<compile_context>
chip_gen: v7x
topology: tpu7x:2x2x1
jax: 0.10.0
libtpu: 0.0.40
codegen_flags: <defaults>
</compile_context>

<pallas_src>
import math

import jax
import jax.numpy as jnp
from jax.experimental import pallas as pl
from jax.experimental.pallas import tpu as pltpu

# hyperparams consistent with the module (embedding_dim=384), small batch/seq
D = 384            # embedding_dim
FF = 4 * D         # feed-forward hidden dim = 1536
B = 2              # small batch
S = 128            # small seq len  -> B*S = 256 tokens = ONE 256-row tile


def ffn_kernel(x_ref, w1_ref, b1_ref, w2_ref, b2_ref, o_ref):
    """Fused Linear -> ReLU -> Linear for one (TM, D) tile of tokens."""
    x = x_ref[...].astype(jnp.bfloat16)                                   # (TM, D)
    h = jnp.dot(x, w1_ref[...], preferred_element_type=jnp.float32)       # (TM, FF) f32 acc
    h = jnp.maximum(h + b1_ref[...], 0.0)                                 # bias + ReLU (f32)
    y = jnp.dot(h.astype(jnp.bfloat16), w2_ref[...],
                preferred_element_type=jnp.float32)                       # (TM, D) f32 acc
    y = y + b2_ref[...]                                                   # broadcast (1, D)
    # TODO(synk): nn.Dropout(p=0.2) is identity in eval mode; training-mode
    # stochastic dropout (pltpu.prng_seed / prng_random_bits + 1/(1-p) scale)
    # intentionally not applied here.
    o_ref[...] = y.astype(o_ref.dtype)


def _round_up(n, m):
    return -(-n // m) * m


def feed_forward(x, params):
    """x: (..., D) -> (..., D), same dtype as x."""
    orig_shape = x.shape
    d = orig_shape[-1]
    n = math.prod(orig_shape[:-1])
    x2 = x.reshape(n, d)

    # Pad rows to a multiple of 8 so stores are sublane-aligned (no masking).
    n_pad = _round_up(n, 8)
    if n_pad <= 512:
        tm = n_pad                     # single grid step: no per-step overhead
    else:
        tm = 512                       # biggest tile that comfortably fits VMEM
        n_pad = _round_up(n_pad, tm)
    if n_pad != n:
        x2 = jnp.pad(x2, ((0, n_pad - n), (0, 0)))

    grid_steps = n_pad // tm

    # Resident weights/biases: constant index map; single-buffer them when the
    # grid actually has multiple steps (saves ~2.25 MiB of VMEM headroom).
    def resident_spec(shape):
        if grid_steps > 1:
            return pl.BlockSpec(shape, lambda i: (0, 0),
                                pipeline_mode=pl.Buffered(1))
        return pl.BlockSpec(shape, lambda i: (0, 0))

    itemsize = jnp.dtype(x.dtype).itemsize
    cost = pl.CostEstimate(
        flops=4 * n_pad * d * FF,                  # 2 matmuls * 2 flops/MAC
        transcendentals=0,
        bytes_accessed=(n_pad * d * itemsize       # x in
                        + n_pad * d * itemsize     # y out
                        + (d * FF + FF * d) * 2    # bf16 weights
                        + (FF + d) * 4),           # f32 biases
    )

    out = pl.pallas_call(
        ffn_kernel,
        out_shape=jax.ShapeDtypeStruct((n_pad, d), x.dtype),
        grid_spec=pltpu.PrefetchScalarGridSpec(
            num_scalar_prefetch=0,
            grid=(grid_steps,),
            in_specs=[
                pl.BlockSpec((tm, d), lambda i: (i, 0)),   # x tile
                resident_spec((d, FF)),                    # W1 (VMEM-resident)
                resident_spec((1, FF)),                    # b1
                resident_spec((FF, d)),                    # W2 (VMEM-resident)
                resident_spec((1, d)),                     # b2
            ],
            out_specs=pl.BlockSpec((tm, d), lambda i: (i, 0)),
        ),
        compiler_params=pltpu.CompilerParams(
            # "parallel" only matters on v7x megacore with >1 step; harmless
            # (measured ~zero delta) on single-TC v5e/v6e.
            dimension_semantics=("parallel",) if grid_steps > 1 else ("arbitrary",),
            vmem_limit_bytes=32 * 1024 * 1024,
        ),
        cost_estimate=cost,
    )(x2, params["w1"], params["b1"], params["w2"], params["b2"])

    if n_pad != n:
        out = out[:n]
    return out.reshape(orig_shape)


def init_params(key):
    """Weights pre-transposed to (in, out); bf16 weights, f32 biases."""
    k1, k2 = jax.random.split(key, 2)
    std = 0.02
    return {
        "w1": (std * jax.random.normal(k1, (D, FF), jnp.float32)).astype(jnp.bfloat16),
        "b1": jnp.zeros((1, FF), jnp.float32) + 0.01,
        "w2": (std * jax.random.normal(k2, (FF, D), jnp.float32)).astype(jnp.bfloat16),
        "b2": jnp.zeros((1, D), jnp.float32) - 0.01,
    }


def feed_forward_ref(x, params):
    """Pure-JAX f32 reference (dropout = identity)."""
    w1 = params["w1"].astype(jnp.float32)
    w2 = params["w2"].astype(jnp.float32)
    h = jnp.maximum(x @ w1 + params["b1"], 0.0)
    return h @ w2 + params["b2"]


if __name__ == "__main__":
    key = jax.random.PRNGKey(0)
    pkey, xkey, xkey2 = jax.random.split(key, 3)
    params = init_params(pkey)

    # Main shape: B*S = 256 tokens -> single grid step, (256, 384) tile.
    x = jax.random.normal(xkey, (B, S, D), jnp.float32)
    y = jax.block_until_ready(feed_forward(x, params))
    assert y.shape == (B, S, D) and y.dtype == jnp.float32
    assert bool(jnp.all(jnp.isfinite(y)))
    y_ref = feed_forward_ref(x, params)
    max_err = float(jnp.max(jnp.abs(y - y_ref)))
    assert max_err < 5e-2, f"max abs error too large: {max_err}"

    # Ragged shape: 50 tokens -> padded to 56 rows (multiple of 8), sliced back.
    x_odd = jax.random.normal(xkey2, (1, 50, D), jnp.float32)
    y_odd = jax.block_until_ready(feed_forward(x_odd, params))
    assert y_odd.shape == (1, 50, D)
    max_err_odd = float(jnp.max(jnp.abs(y_odd - feed_forward_ref(x_odd, params))))
    assert max_err_odd < 5e-2, f"max abs error too large (ragged): {max_err_odd}"

    print("KERNEL_OK")
</pallas_src>

<mosaic_0001>
module attributes {stable_mosaic.version = 11 : i64} {
  func.func @ffn_kernel(%arg0: i32, %arg1: memref<256x384xf32, #tpu.memory_space<vmem>>, %arg2: memref<384x1536xbf16, #tpu.memory_space<vmem>>, %arg3: memref<1x1536xf32, #tpu.memory_space<vmem>>, %arg4: memref<1536x384xbf16, #tpu.memory_space<vmem>>, %arg5: memref<1x384xf32, #tpu.memory_space<vmem>>, %arg6: memref<256x384xf32, #tpu.memory_space<vmem>>) attributes {dimension_semantics = [#tpu.dimension_semantics<arbitrary>], iteration_bounds = array<i64: 1>, scalar_prefetch = 0 : i64, scratch_operands = 0 : i64, tpu.core_type = #tpu.core_type<tc>, window_params = [{transform_indices = @transform_0, window_bounds = array<i64: 256, 384>}, {pipeline_mode = #tpu.pipeline_mode<synchronous>, transform_indices = @transform_1, window_bounds = array<i64: 384, 1536>}, {pipeline_mode = #tpu.pipeline_mode<synchronous>, transform_indices = @transform_2, window_bounds = array<i64: 1, 1536>}, {pipeline_mode = #tpu.pipeline_mode<synchronous>, transform_indices = @transform_3, window_bounds = array<i64: 1536, 384>}, {pipeline_mode = #tpu.pipeline_mode<synchronous>, transform_indices = @transform_4, window_bounds = array<i64: 1, 384>}, {transform_indices = @transform_5, window_bounds = array<i64: 256, 384>}]} {
    %c0 = arith.constant 0 : index
    %c0_0 = arith.constant 0 : index
    %0 = vector.load %arg1[%c0, %c0_0] : memref<256x384xf32, #tpu.memory_space<vmem>>, vector<256x384xf32>
    %1 = arith.truncf %0 : vector<256x384xf32> to vector<256x384xbf16>
    %c0_1 = arith.constant 0 : index
    %c0_2 = arith.constant 0 : index
    %2 = vector.load %arg2[%c0_1, %c0_2] : memref<384x1536xbf16, #tpu.memory_space<vmem>>, vector<384x1536xbf16>
    %cst = arith.constant dense<0.000000e+00> : vector<256x1536xf32>
    %3 = tpu.matmul %1, %2, %cst {dimension_numbers = #tpu.dot_dimension_numbers<[1], [0], [0], [1], [0, 0, 1, 1], [], []>} : vector<256x384xbf16>, vector<384x1536xbf16>, vector<256x1536xf32> -> vector<256x1536xf32>
    %c0_3 = arith.constant 0 : index
    %c0_4 = arith.constant 0 : index
    %4 = vector.load %arg3[%c0_3, %c0_4] : memref<1x1536xf32, #tpu.memory_space<vmem>>, vector<1x1536xf32>
    %5 = vector.broadcast %4 : vector<1x1536xf32> to vector<256x1536xf32>
    %6 = arith.addf %3, %5 : vector<256x1536xf32>
    %cst_5 = arith.constant 0.000000e+00 : f32
    %7 = vector.broadcast %cst_5 : f32 to vector<256x1536xf32>
    %8 = arith.maximumf %6, %7 : vector<256x1536xf32>
    %9 = arith.truncf %8 : vector<256x1536xf32> to vector<256x1536xbf16>
    %c0_6 = arith.constant 0 : index
    %c0_7 = arith.constant 0 : index
    %10 = vector.load %arg4[%c0_6, %c0_7] : memref<1536x384xbf16, #tpu.memory_space<vmem>>, vector<1536x384xbf16>
    %cst_8 = arith.constant dense<0.000000e+00> : vector<256x384xf32>
    %11 = tpu.matmul %9, %10, %cst_8 {dimension_numbers = #tpu.dot_dimension_numbers<[1], [0], [0], [1], [0, 0, 1, 1], [], []>} : vector<256x1536xbf16>, vector<1536x384xbf16>, vector<256x384xf32> -> vector<256x384xf32>
    %c0_9 = arith.constant 0 : index
    %c0_10 = arith.constant 0 : index
    %12 = vector.load %arg5[%c0_9, %c0_10] : memref<1x384xf32, #tpu.memory_space<vmem>>, vector<1x384xf32>
    %13 = vector.broadcast %12 : vector<1x384xf32> to vector<256x384xf32>
    %14 = arith.addf %11, %13 : vector<256x384xf32>
    %c0_11 = arith.constant 0 : index
    %c0_12 = arith.constant 0 : index
    %15 = vector.load %arg6[%c0_11, %c0_12] : memref<256x384xf32, #tpu.memory_space<vmem>>, vector<256x384xf32>
    tpu.vector_store %arg6[%c0_11, %c0_12], %14 {strides = array<i32>} : memref<256x384xf32, #tpu.memory_space<vmem>>, vector<256x384xf32>,
    return
  }
  func.func @transform_0(%arg0: i32) -> (i32, i32) {
    %c0_i32 = arith.constant 0 : i32
    %c0_i32_0 = arith.constant 0 : i32
    return %arg0, %c0_i32 : i32, i32
  }
  func.func @transform_1(%arg0: i32) -> (i32, i32) {
    %c0_i32 = arith.constant 0 : i32
    %c0_i32_0 = arith.constant 0 : i32
    %c0_i32_1 = arith.constant 0 : i32
    return %c0_i32, %c0_i32_0 : i32, i32
  }
  func.func @transform_2(%arg0: i32) -> (i32, i32) {
    %c0_i32 = arith.constant 0 : i32
    %c0_i32_0 = arith.constant 0 : i32
    %c0_i32_1 = arith.constant 0 : i32
    return %c0_i32, %c0_i32_0 : i32, i32
  }
  func.func @transform_3(%arg0: i32) -> (i32, i32) {
    %c0_i32 = arith.constant 0 : i32
    %c0_i32_0 = arith.constant 0 : i32
    %c0_i32_1 = arith.constant 0 : i32
    return %c0_i32, %c0_i32_0 : i32, i32
  }
  func.func @transform_4(%arg0: i32) -> (i32, i32) {
    %c0_i32 = arith.constant 0 : i32
    %c0_i32_0 = arith.constant 0 : i32
    %c0_i32_1 = arith.constant 0 : i32
    return %c0_i32, %c0_i32_0 : i32, i32
  }
  func.func @transform_5(%arg0: i32) -> (i32, i32) {
    %c0_i32 = arith.constant 0 : i32
    %c0_i32_0 = arith.constant 0 : i32
    return %arg0, %c0_i32 : i32, i32
  }
}

</mosaic_0001>

<bundles_post_ra>
// kernel: tpu_custom_call.1
= control target key start
LH: loop header
LB: loop body
LE: loop exit
PB: predicated region body
PF: predicated region fallthrough
CT: control target
= control target key end

     0   :  { %10 = vsyncpa [#allocation3], 0  ;;  %s14849_s0 = inlined_call_operand.hbm [shape: f32[256,384], index: 0, kind: input, shape index: {}]   ;;  %s14850_s1 = inlined_call_operand.hbm [shape: bf16[384,1536], index: 1, kind: input, shape index: {}]   ;;  %s14851_s2 = inlined_call_operand.hbm [shape: f32[1,1536], index: 2, kind: input, shape index: {}]   ;;  %s14852_s3 = inlined_call_operand.hbm [shape: bf16[1536,384], index: 3, kind: input, shape index: {}]   ;;  %s14853_s4 = inlined_call_operand.hbm [shape: f32[1,384], index: 4, kind: input, shape index: {}]   ;;  %s14854_s5 = inlined_call_operand.hbm [shape: f32[256,384], index: 5, kind: output, shape index: {}]  }
   0x1   :  { %11 = vsyncpa [#allocation6], 0 }
   0x2   :  { %12 = vsyncpa [#allocation9], 0 }
   0x3   :  { %13 = vsyncpa [#allocation4], 0  ;;  %s12461_s18 = smov [#allocation5]   ;;  %s12321_s22 = scalar_lea.hbm %s14850_s1, 36864 }
   0x4   :  { %s31_s19 = sshll.u32 %s12461_s18, 4  ;;  %p12322_p0 = scmp.ne.s32.totalorder %s14850_s1, %s12321_s22  ;;  %s32_s19 = int_to_ptr.vmem [resolvable:$true] %s31_s19 }
   0x5   :  { %p12325_p1 = scmp.lt.u32.totalorder %s12321_s22, %s14850_s1 }
   0x7   :  { %p12327_p2 = pnand %p12325_p1, %p12322_p0 }
   0x9   :  { %12330 = shalt.err (!%p12327_p2)
}
   0xa   :  { %s12331_s27 = scalar_lea.vmem %s32_s19, 36864  ;;  %p12336_p4 = scmp.lt.s32.totalorder %s32_s19, %s32_s19 }
   0xb   :  { %p12332_p3 = scmp.ne.s32.totalorder %s32_s19, %s12331_s27  ;;  %p12337_p5 = scmp.lt.s32.totalorder %s12331_s27, %s12331_s27 }
   0xd   :  { %p12338_p6 = por %p12337_p5, %p12336_p4 }
   0xf   :  { %p12339_p7 = pnand %p12338_p6, %p12332_p3 }
  0x11   :  { %12342 = shalt.err (!%p12339_p7)
}
  0x12   :  { %s12462_s28 = smov 768   ;;  %s12463_s29 = smov 48  }
  0x13   :  { %37 = dma.hbm_to_vmem [thread:$0]  %s14850_s1, 36864, %s32_s19, [#allocation6], %s12462_s28, %s12462_s28, %s12463_s29  }
  0x14   :  { %s12464_s7 = smov [#allocation8]   ;;  %s12343_s11 = scalar_lea.hbm %s14852_s3, 36864 }
  0x15   :  { %s53_s8 = sshll.u32 %s12464_s7, 4  ;;  %p12344_p8 = scmp.ne.s32.totalorder %s14852_s3, %s12343_s11  ;;  %s54_s8 = int_to_ptr.vmem [resolvable:$true] %s53_s8 }
  0x16   :  { %p12347_p9 = scmp.lt.u32.totalorder %s12343_s11, %s14852_s3 }
  0x18   :  { %p12349_p10 = pnand %p12347_p9, %p12344_p8 }
  0x1a   :  { %12352 = shalt.err (!%p12349_p10)
}
  0x1b   :  { %s12353_s16 = scalar_lea.vmem %s54_s8, 36864  ;;  %p12358_p12 = scmp.lt.s32.totalorder %s54_s8, %s54_s8 }
  0x1c   :  { %p12354_p11 = scmp.ne.s32.totalorder %s54_s8, %s12353_s16  ;;  %p12359_p13 = scmp.lt.s32.totalorder %s12353_s16, %s12353_s16 }
  0x1e   :  { %p12360_p0 = por %p12359_p13, %p12358_p12 }
  0x20   :  { %p12361_p1 = pnand %p12360_p0, %p12354_p11 }
  0x22   :  { %12364 = shalt.err (!%p12361_p1)
}
  0x23   :  { %s12465_s1 = smov 192   ;;  %s12466_s17 = smov 12  }
  0x24   :  { %59 = dma.hbm_to_vmem [thread:$0]  %s14852_s3, 36864, %s54_s8, [#allocation9], %s12465_s1, %s12465_s1, %s12466_s17  }
  0x25   :  { %s12467_s20 = smov [#allocation2]   ;;  %s12365_s24 = scalar_lea.hbm %s14849_s0, 12288 }
  0x26   :  { %s19_s21 = sshll.u32 %s12467_s20, 4  ;;  %p12366_p2 = scmp.ne.s32.totalorder %s14849_s0, %s12365_s24  ;;  %s20_s21 = int_to_ptr.vmem [resolvable:$true] %s19_s21 }
  0x27   :  { %p12369_p3 = scmp.lt.u32.totalorder %s12365_s24, %s14849_s0 }
  0x29   :  { %p12371_p4 = pnand %p12369_p3, %p12366_p2 }
  0x2b   :  { %12374 = shalt.err (!%p12371_p4)
}
  0x2c   :  { %s12375_s29 = scalar_lea.vmem %s20_s21, 12288  ;;  %p12380_p6 = scmp.lt.s32.totalorder %s20_s21, %s20_s21 }
  0x2d   :  { %p12376_p5 = scmp.ne.s32.totalorder %s20_s21, %s12375_s29  ;;  %p12381_p7 = scmp.lt.s32.totalorder %s12375_s29, %s12375_s29 }
  0x2f   :  { %p12382_p8 = por %p12381_p7, %p12380_p6 }
  0x31   :  { %p12383_p9 = pnand %p12382_p8, %p12376_p5 }
  0x33   :  { %12386 = shalt.err (!%p12383_p9)
}
  0x34   :  { %s12468_s3 = smov 384   ;;  %s12469_s30 = smov 24  }
  0x35   :  { %25 = dma.hbm_to_vmem [thread:$0]  %s14849_s0, 12288, %s20_s21, [#allocation3], %s12468_s3, %s12468_s3, %s12469_s30  }
  0x36   :  { %s12470_s8 = smov [#allocation7]   ;;  %s12471_s10 = smov [#allocation10]  }
  0x37   :  { %s44_s9 = sshll.u32 %s12470_s8, 4  ;;  %s66_s11 = sshll.u32 %s12471_s10, 4  ;;  %s45_s9 = int_to_ptr.vmem [resolvable:$true] %s44_s9  ;;  %s67_s11 = int_to_ptr.vmem [resolvable:$true] %s66_s11 }
  0x38   :  { %s12387_s14 = scalar_lea.hbm %s14851_s2, 192 }
  0x39   :  { %p12388_p10 = scmp.ne.s32.totalorder %s14851_s2, %s12387_s14  ;;  %p12391_p11 = scmp.lt.u32.totalorder %s12387_s14, %s14851_s2 }
  0x3b   :  { %p12393_p12 = pnand %p12391_p11, %p12388_p10 }
  0x3d   :  { %12396 = shalt.err (!%p12393_p12)
}
  0x3e   :  { %s12397_s0 = scalar_lea.vmem %s45_s9, 192  ;;  %p12402_p0 = scmp.lt.s32.totalorder %s45_s9, %s45_s9 }
  0x3f   :  { %p12398_p13 = scmp.ne.s32.totalorder %s45_s9, %s12397_s0  ;;  %p12403_p1 = scmp.lt.s32.totalorder %s12397_s0, %s12397_s0 }
  0x41   :  { %p12404_p2 = por %p12403_p1, %p12402_p0 }
  0x43   :  { %p12405_p3 = pnand %p12404_p2, %p12398_p13 }
  0x45   :  { %12408 = shalt.err (!%p12405_p3)
}
  0x46   :  { %47 = dma.hbm_to_vmem [thread:$0]  %s14851_s2, 192, %s45_s9, [#allocation6]  }
  0x47   :  { %s12409_s22 = scalar_lea.hbm %s14853_s4, 48 }
  0x48   :  { %p12410_p4 = scmp.ne.s32.totalorder %s14853_s4, %s12409_s22  ;;  %p12413_p5 = scmp.lt.u32.totalorder %s12409_s22, %s14853_s4 }
  0x4a   :  { %p12415_p6 = pnand %p12413_p5, %p12410_p4 }
  0x4c   :  { %12418 = shalt.err (!%p12415_p6)
}
  0x4d   :  { %s12419_s27 = scalar_lea.vmem %s67_s11, 48  ;;  %s12423_s28 = scalar_lea.vmem %s67_s11, 64 }
  0x4e   :  { %p12420_p7 = scmp.ne.s32.totalorder %s67_s11, %s12419_s27  ;;  %p12424_p8 = scmp.lt.s32.totalorder %s67_s11, %s67_s11 }
  0x4f   :  { %p12425_p9 = scmp.lt.s32.totalorder %s12423_s28, %s12419_s27 }
  0x51   :  { %p12426_p10 = por %p12425_p9, %p12424_p8 }
  0x53   :  { %p12427_p11 = pnand %p12426_p10, %p12420_p7 }
  0x55   :  { %12430 = shalt.err (!%p12427_p11)
}
  0x56   :  { %69 = dma.hbm_to_vmem [thread:$0]  %s14853_s4, 48, %s67_s11, [#allocation9]  }
  0x57   :  { %12453 = dma.done.wait [#allocation3], 12288  }
  0x58   :  { %12454 = vsyncadd [#allocation3], 4294955008 }
  0x59   :  { %12455 = dma.done.wait [#allocation6], 37056  }
  0x5a   :  { %12456 = vsyncadd [#allocation6], 4294930240 }
  0x5b   :  { %12457 = dma.done.wait [#allocation9], 36912  }
  0x5c   :  { %12458 = vsyncadd [#allocation9], 4294930384  ;;  %v11503_v0 = vld [vmem:[#allocation5 + $0x4] ss:$48 sps:$4 sm:$0xff]   ;;  %v11505_v1 = vld [vmem:[#allocation5 + $0xc] ss:$48 sps:$4 sm:$0xff]  }
  0x5d   :  { %2022 = vmatprep.subr.bf16.mxu0 %v11503_v0  ;;  %v11507_v2 = vld [vmem:[#allocation5] ss:$48 sps:$4 sm:$0xff]   ;;  %v11508_v3 = vld [vmem:[#allocation5 + $0x8] ss:$48 sps:$4 sm:$0xff]   ;;  %2408 = vmatprep.subr.bf16.mxu1 %v11505_v1  ;;  %v11509_v4 = vld [vmem:[#allocation5 + $0x64] ss:$48 sps:$4 sm:$0xff]  }
  0x5e   :  { %2023 = vmatpush1.bf16.msra.mxu0 %v11507_v2  ;;  %2409 = vmatpush1.bf16.msra.mxu1 %v11508_v3  ;;  %v11511_v5 = vld [vmem:[#allocation5 + $0x6c] ss:$48 sps:$4 sm:$0xff]   ;;  %v11513_v6 = vld [vmem:[#allocation5 + $0x60] ss:$48 sps:$4 sm:$0xff]   ;;  %v11514_v7 = vld [vmem:[#allocation5 + $0x68] ss:$48 sps:$4 sm:$0xff]  }
  0x5f   :  { %2024 = vmatprep.subr.bf16.mxu0 %v11509_v4  ;;  %2410 = vmatprep.subr.bf16.mxu1 %v11511_v5  ;;  %v11515_v8 = vld [vmem:[#allocation5 + $0xc4] ss:$48 sps:$4 sm:$0xff]   ;;  %v11517_v9 = vld [vmem:[#allocation5 + $0xcc] ss:$48 sps:$4 sm:$0xff]   ;;  %v11519_v10 = vld [vmem:[#allocation5 + $0xc0] ss:$48 sps:$4 sm:$0xff]  }
  0x60   :  { %v11520_v11 = vld [vmem:[#allocation5 + $0xc8] ss:$48 sps:$4 sm:$0xff]   ;;  %v11521_v12 = vld [vmem:[#allocation5 + $0x124] ss:$48 sps:$4 sm:$0xff]   ;;  %v11523_v13 = vld [vmem:[#allocation5 + $0x12c] ss:$48 sps:$4 sm:$0xff]  }
  0x61   :  { %v11525_v14 = vld [vmem:[#allocation5 + $0x120] ss:$48 sps:$4 sm:$0xff]   ;;  %v11526_v15 = vld [vmem:[#allocation5 + $0x128] ss:$48 sps:$4 sm:$0xff]   ;;  %v11527_v16 = vld [vmem:[#allocation5 + $0x184] ss:$48 sps:$4 sm:$0xff]  }
  0x62   :  { %2025 = vmatpush1.bf16.msra.mxu0 %v11513_v6  ;;  %2411 = vmatpush1.bf16.msra.mxu1 %v11514_v7  ;;  %v11529_v17 = vld [vmem:[#allocation5 + $0x18c] ss:$48 sps:$4 sm:$0xff]   ;;  %v11531_v18 = vld [vmem:[#allocation5 + $0x180] ss:$48 sps:$4 sm:$0xff]   ;;  %v11532_v19 = vld [vmem:[#allocation5 + $0x188] ss:$48 sps:$4 sm:$0xff]  }
  0x63   :  { %2026 = vmatprep.subr.bf16.mxu0 %v11515_v8  ;;  %2412 = vmatprep.subr.bf16.mxu1 %v11517_v9  ;;  %v11533_v20 = vld [vmem:[#allocation5 + $0x1e4] ss:$48 sps:$4 sm:$0xff]   ;;  %v11535_v21 = vld [vmem:[#allocation5 + $0x1ec] ss:$48 sps:$4 sm:$0xff]   ;;  %v11537_v22 = vld [vmem:[#allocation5 + $0x1e0] ss:$48 sps:$4 sm:$0xff]  }
  0x64   :  { %v11538_v23 = vld [vmem:[#allocation5 + $0x1e8] ss:$48 sps:$4 sm:$0xff]   ;;  %v11539_v24 = vld [vmem:[#allocation5 + $0x244] ss:$48 sps:$4 sm:$0xff]   ;;  %v11541_v25 = vld [vmem:[#allocation5 + $0x24c] ss:$48 sps:$4 sm:$0xff]  }
  0x65   :  { %v11543_v26 = vld [vmem:[#allocation5 + $0x240] ss:$48 sps:$4 sm:$0xff]   ;;  %v11544_v27 = vld [vmem:[#allocation5 + $0x248] ss:$48 sps:$4 sm:$0xff]   ;;  %v11545_v28 = vld [vmem:[#allocation5 + $0x2a4] ss:$48 sps:$4 sm:$0xff]  }
  0x66   :  { %2027 = vmatpush1.bf16.msra.mxu0 %v11519_v10  ;;  %2413 = vmatpush1.bf16.msra.mxu1 %v11520_v11  ;;  %v11547_v29 = vld [vmem:[#allocation5 + $0x2ac] ss:$48 sps:$4 sm:$0xff]   ;;  %v11549_v30 = vld [vmem:[#allocation5 + $0x2a0] ss:$48 sps:$4 sm:$0xff]   ;;  %v11550_v31 = vld [vmem:[#allocation5 + $0x2a8] ss:$48 sps:$4 sm:$0xff]  }
  0x67   :  { %2028 = vmatprep.subr.bf16.mxu0 %v11521_v12  ;;  %2414 = vmatprep.subr.bf16.mxu1 %v11523_v13  ;;  %v11551_v32 = vld [vmem:[#allocation5 + $0x304] ss:$48 sps:$4 sm:$0xff]   ;;  %v11553_v33 = vld [vmem:[#allocation5 + $0x30c] ss:$48 sps:$4 sm:$0xff]   ;;  %v11555_v34 = vld [vmem:[#allocation5 + $0x300] ss:$48 sps:$4 sm:$0xff]  }
  0x68   :  { %v11556_v35 = vld [vmem:[#allocation5 + $0x308] ss:$48 sps:$4 sm:$0xff]   ;;  %v11557_v36 = vld [vmem:[#allocation5 + $0x364] ss:$48 sps:$4 sm:$0xff]   ;;  %v11559_v37 = vld [vmem:[#allocation5 + $0x36c] ss:$48 sps:$4 sm:$0xff]  }
  0x69   :  { %v11561_v38 = vld [vmem:[#allocation5 + $0x360] ss:$48 sps:$4 sm:$0xff]   ;;  %v11562_v39 = vld [vmem:[#allocation5 + $0x368] ss:$48 sps:$4 sm:$0xff]   ;;  %v11563_v40 = vld [vmem:[#allocation5 + $0x3c4] ss:$48 sps:$4 sm:$0xff]  }
  0x6a   :  { %2029 = vmatpush1.bf16.msra.mxu0 %v11525_v14  ;;  %2415 = vmatpush1.bf16.msra.mxu1 %v11526_v15  ;;  %v11565_v41 = vld [vmem:[#allocation5 + $0x3cc] ss:$48 sps:$4 sm:$0xff]   ;;  %v11567_v42 = vld [vmem:[#allocation5 + $0x3c0] ss:$48 sps:$4 sm:$0xff]   ;;  %v11568_v43 = vld [vmem:[#allocation5 + $0x3c8] ss:$48 sps:$4 sm:$0xff]  }
  0x6b   :  { %2030 = vmatprep.subr.bf16.mxu0 %v11527_v16  ;;  %2416 = vmatprep.subr.bf16.mxu1 %v11529_v17  ;;  %v11569_v44 = vld [vmem:[#allocation5 + $0x424] ss:$48 sps:$4 sm:$0xff]   ;;  %v11571_v45 = vld [vmem:[#allocation5 + $0x42c] ss:$48 sps:$4 sm:$0xff]   ;;  %v11573_v47 = vld [vmem:[#allocation5 + $0x420] ss:$48 sps:$4 sm:$0xff]  }
  0x6c   :  { %v87_v46 = vld [vmem:[#allocation2 + $0x8] sm:$0xff]  ;;  %v90_v49 = vld [vmem:[#allocation2 + $0x20] sm:$0xff]  ;;  %v89_v4 = vld [vmem:[#allocation2 + $0x18] sm:$0xff]  ;;  %s12473_s4 = smov [#allocation11]  }
  0x6d   :  { %v11574_v48 = vld [vmem:[#allocation5 + $0x428] ss:$48 sps:$4 sm:$0xff]   ;;  %v11575_v50 = vld [vmem:[#allocation5 + $0x484] ss:$48 sps:$4 sm:$0xff]   ;;  %v12567_v51 = vpack.c.bf16 %v90_v49, %v87_v46  ;;  %v11577_v52 = vld [vmem:[#allocation5 + $0x48c] ss:$48 sps:$4 sm:$0xff]  }
  0x6e   :  { %2031 = vmatpush1.bf16.msra.mxu0 %v11531_v18  ;;  %2417 = vmatpush1.bf16.msra.mxu1 %v11532_v19  ;;  %v11579_v53 = vld [vmem:[#allocation5 + $0x480] ss:$48 sps:$4 sm:$0xff]   ;;  %v11580_v54 = vld [vmem:[#allocation5 + $0x488] ss:$48 sps:$4 sm:$0xff]   ;;  %v11581_v55 = vld [vmem:[#allocation5 + $0x4e4] ss:$48 sps:$4 sm:$0xff]  }
  0x6f   :  { %2032 = vmatprep.subr.bf16.mxu0 %v11533_v20  ;;  %2418 = vmatprep.subr.bf16.mxu1 %v11535_v21  ;;  %v11583_v56 = vld [vmem:[#allocation5 + $0x4ec] ss:$48 sps:$4 sm:$0xff]   ;;  %v11585_v57 = vld [vmem:[#allocation5 + $0x4e0] ss:$48 sps:$4 sm:$0xff]   ;;  %v11586_v58 = vld [vmem:[#allocation5 + $0x4e8] ss:$48 sps:$4 sm:$0xff]  }
  0x70   :  { %2054 = vmatprep.mubr.bf16.mxu0 %v12567_v51  ;;  %2440 = vmatprep.mubr.bf16.mxu1 %v12567_v51  ;;  %v11587_v59 = vld [vmem:[#allocation5 + $0x544] ss:$48 sps:$4 sm:$0xff]   ;;  %v11589_v60 = vld [vmem:[#allocation5 + $0x54c] ss:$48 sps:$4 sm:$0xff]   ;;  %v11591_v61 = vld [vmem:[#allocation5 + $0x540] ss:$48 sps:$4 sm:$0xff]  }
  0x71   :  { %v11592_v62 = vld [vmem:[#allocation5 + $0x548] ss:$48 sps:$4 sm:$0xff]   ;;  %v11593_v63 = vld [vmem:[#allocation5 + $0x5a4] ss:$48 sps:$4 sm:$0xff]   ;;  %v11595_v0 = vld [vmem:[#allocation5 + $0x5ac] ss:$48 sps:$4 sm:$0xff]  }
  0x72   :  { %2033 = vmatpush1.bf16.msra.mxu0 %v11537_v22  ;;  %2419 = vmatpush1.bf16.msra.mxu1 %v11538_v23  ;;  %v11597_v1 = vld [vmem:[#allocation5 + $0x5a0] ss:$48 sps:$4 sm:$0xff]   ;;  %v11598_v2 = vld [vmem:[#allocation5 + $0x5a8] ss:$48 sps:$4 sm:$0xff]   ;;  %v11601_v5 = vld [vmem:[#allocation5 + $0x60c] ss:$48 sps:$4 sm:$0xff]  }
  0x73   :  { %2034 = vmatprep.subr.bf16.mxu0 %v11539_v24  ;;  %2420 = vmatprep.subr.bf16.mxu1 %v11541_v25  ;;  %v86_v3 = vld [vmem:[#allocation2] sm:$0xff]  ;;  %v93_v7 = vld [vmem:[#allocation2 + $0x38] sm:$0xff]  ;;  %v96_v8 = vld [vmem:[#allocation2 + $0x50] sm:$0xff]  ;;  %s9076_s6 = sshll.u32 %s12473_s4, 4  ;;  %s9077_s6 = int_to_ptr.vmem [resolvable:$true] %s9076_s6 }
  0x74   :  { %v11604_v6 = vld [vmem:[#allocation5 + $0x604] ss:$48 sps:$4 sm:$0xff]   ;;  %v12571_v9 = vpack.c.bf16 %v89_v4, %v86_v3  ;;  %v11599_v10 = vld [vmem:[#allocation5 + $0x608] ss:$48 sps:$4 sm:$0xff]   ;;  %v11602_v11 = vld [vmem:[#allocation5 + $0x600] ss:$48 sps:$4 sm:$0xff]   ;;  %v12573_v12 = vpack.c.bf16 %v96_v8, %v93_v7  ;;  %p12436_p13 = scmp.lt.s32.totalorder %s9077_s6, %s9077_s6 }
  0x75   :  { %v11607_v13 = vld [vmem:[#allocation5 + $0x66c] ss:$48 sps:$4 sm:$0xff]   ;;  %v11610_v14 = vld [vmem:[#allocation5 + $0x664] ss:$48 sps:$4 sm:$0xff]   ;;  %v11605_v18 = vld [vmem:[#allocation5 + $0x668] ss:$48 sps:$4 sm:$0xff]  }
  0x76   :  { %2035 = vmatpush1.bf16.msra.mxu0 %v11543_v26  ;;  %2421 = vmatpush1.bf16.msra.mxu1 %v11544_v27  ;;  %v92_v15 = vld [vmem:[#allocation2 + $0x30] sm:$0xff]  ;;  %v95_v16 = vld [vmem:[#allocation2 + $0x48] sm:$0xff]  ;;  %v102_v20 = vld [vmem:[#allocation2 + $0x80] sm:$0xff]  ;;  %s12431_s7 = scalar_lea.vmem %s9077_s6, 12288 }
  0x77   :  { %2036 = vmatprep.subr.bf16.mxu0 %v11545_v28  ;;  %2422 = vmatprep.subr.bf16.mxu1 %v11547_v29  ;;  %v99_v17 = vld [vmem:[#allocation2 + $0x68] sm:$0xff]  ;;  %v11608_v19 = vld [vmem:[#allocation5 + $0x660] ss:$48 sps:$4 sm:$0xff]   ;;  %v11616_v22 = vld [vmem:[#allocation5 + $0x6c4] ss:$48 sps:$4 sm:$0xff]   ;;  %v12579_v23 = vpack.c.bf16 %v95_v16, %v92_v15  ;;  %p12432_p12 = scmp.ne.s32.totalorder %s9077_s6, %s12431_s7  ;;  %p12437_p0 = scmp.lt.s32.totalorder %s12431_s7, %s12431_s7 }
  0x78   :  { %v11613_v21 = vld [vmem:[#allocation5 + $0x6cc] ss:$48 sps:$4 sm:$0xff]   ;;  %v12581_v24 = vpack.c.bf16 %v102_v20, %v99_v17  ;;  %v11611_v25 = vld [vmem:[#allocation5 + $0x6c8] ss:$48 sps:$4 sm:$0xff]   ;;  %v11614_v26 = vld [vmem:[#allocation5 + $0x6c0] ss:$48 sps:$4 sm:$0xff]  }
  0x79   :  { %v98_v27 = vld [vmem:[#allocation2 + $0x60] sm:$0xff]  ;;  %v11619_v28 = vld [vmem:[#allocation5 + $0x72c] ss:$48 sps:$4 sm:$0xff]   ;;  %v116_v4 = vld [vmem:[#allocation2 + $0xf0] sm:$0xff]  ;;  %p12438_p1 = por %p12437_p0, %p12436_p13 }
  0x7a   :  { %2037 = vmatpush1.bf16.msra.mxu0 %v11549_v30  ;;  %2423 = vmatpush1.bf16.msra.mxu1 %v11550_v31  ;;  %v11622_v29 = vld [vmem:[#allocation5 + $0x724] ss:$48 sps:$4 sm:$0xff]   ;;  %v101_v30 = vld [vmem:[#allocation2 + $0x78] sm:$0xff]  ;;  %v135_v20 = vld [vmem:[#allocation2 + $0x188] sm:$0xff] }
  0x7b   :  { %2038 = vmatprep.subr.bf16.mxu0 %v11551_v32  ;;  %2424 = vmatprep.subr.bf16.mxu1 %v11553_v33  ;;  %v105_v31 = vld [vmem:[#allocation2 + $0x98] sm:$0xff]  ;;  %v108_v32 = vld [vmem:[#allocation2 + $0xb0] sm:$0xff]  ;;  %v114_v46 = vld [vmem:[#allocation2 + $0xe0] sm:$0xff]  ;;  %p12439_p2 = pnand %p12438_p1, %p12432_p12 }
  0x7c   :  { %v11617_v33 = vld [vmem:[#allocation5 + $0x728] ss:$48 sps:$4 sm:$0xff]   ;;  %v11637_v49 = vld [vmem:[#allocation5 + $0x84c] ss:$48 sps:$4 sm:$0xff]   ;;  %v126_v7 = vld [vmem:[#allocation2 + $0x140] sm:$0xff] }
  0x7d   :  { %v132_v15 = vld [vmem:[#allocation2 + $0x170] sm:$0xff] }
  0x7e   :  { %2039 = vmatpush1.bf16.msra.mxu0 %v11555_v34  ;;  %2425 = vmatpush1.bf16.msra.mxu1 %v11556_v35  ;;  %v11620_v34 = vld [vmem:[#allocation5 + $0x720] ss:$48 sps:$4 sm:$0xff]   ;;  %v11625_v35 = vld [vmem:[#allocation5 + $0x78c] ss:$48 sps:$4 sm:$0xff]  }
  0x7f   :  { %2040 = vmatprep.subr.bf16.mxu0 %v11557_v36  ;;  %2426 = vmatprep.subr.bf16.mxu1 %v11559_v37  ;;  %v11628_v36 = vld [vmem:[#allocation5 + $0x784] ss:$48 sps:$4 sm:$0xff]   ;;  %v12587_v37 = vpack.c.bf16 %v101_v30, %v98_v27  ;;  %v137_v27 = vld [vmem:[#allocation2 + $0x198] sm:$0xff] }
  0x82   :  { %2041 = vmatpush1.bf16.msra.mxu0 %v11561_v38  ;;  %2427 = vmatpush1.bf16.msra.mxu1 %v11562_v39  ;;  %v12589_v38 = vpack.c.bf16 %v108_v32, %v105_v31  ;;  %v11623_v39 = vld [vmem:[#allocation5 + $0x788] ss:$48 sps:$4 sm:$0xff]   ;;  %v140_v32 = vld [vmem:[#allocation2 + $0x1b0] sm:$0xff] }
  0x83   :  { %2042 = vmatprep.subr.bf16.mxu0 %v11563_v40  ;;  %2428 = vmatprep.subr.bf16.mxu1 %v11565_v41  ;;  %v11626_v40 = vld [vmem:[#allocation5 + $0x780] ss:$48 sps:$4 sm:$0xff]   ;;  %v11631_v41 = vld [vmem:[#allocation5 + $0x7ec] ss:$48 sps:$4 sm:$0xff]  }
  0x86   :  { %2043 = vmatpush1.bf16.msra.mxu0 %v11567_v42  ;;  %2429 = vmatpush1.bf16.msra.mxu1 %v11568_v43  ;;  %v11634_v42 = vld [vmem:[#allocation5 + $0x7e4] ss:$48 sps:$4 sm:$0xff]  }
  0x87   :  { %2044 = vmatprep.subr.bf16.mxu0 %v11569_v44  ;;  %2430 = vmatprep.subr.bf16.mxu1 %v11571_v45  ;;  %v104_v43 = vld [vmem:[#allocation2 + $0x90] sm:$0xff]  ;;  %v107_v44 = vld [vmem:[#allocation2 + $0xa8] sm:$0xff] }
  0x88   :  { %v111_v45 = vld [vmem:[#allocation2 + $0xc8] sm:$0xff] }
  0x8a   :  { %2045 = vmatpush1.bf16.msra.mxu0 %v11573_v47  ;;  %2431 = vmatpush1.bf16.msra.mxu1 %v11574_v48  ;;  %v11629_v47 = vld [vmem:[#allocation5 + $0x7e8] ss:$48 sps:$4 sm:$0xff]   ;;  %v11632_v48 = vld [vmem:[#allocation5 + $0x7e0] ss:$48 sps:$4 sm:$0xff]  }
  0x8b   :  { %2046 = vmatprep.subr.bf16.mxu0 %v11575_v50  ;;  %2432 = vmatprep.subr.bf16.mxu1 %v11577_v52  ;;  %v11640_v50 = vld [vmem:[#allocation5 + $0x844] ss:$48 sps:$4 sm:$0xff]   ;;  %v12595_v52 = vpack.c.bf16 %v107_v44, %v104_v43 }
  0x8c   :  { %v156_v43 = vld [vmem:[#allocation2 + $0x230] sm:$0xff] }
  0x8e   :  { %2047 = vmatpush1.bf16.msra.mxu0 %v11579_v53  ;;  %2433 = vmatpush1.bf16.msra.mxu1 %v11580_v54  ;;  %v12597_v53 = vpack.c.bf16 %v114_v46, %v111_v45  ;;  %v11635_v54 = vld [vmem:[#allocation5 + $0x848] ss:$48 sps:$4 sm:$0xff]   ;;  %v152_v46 = vld [vmem:[#allocation2 + $0x210] sm:$0xff] }
  0x8f   :  { %2048 = vmatprep.subr.bf16.mxu0 %v11581_v55  ;;  %2434 = vmatprep.subr.bf16.mxu1 %v11583_v56  ;;  %v11638_v55 = vld [vmem:[#allocation5 + $0x840] ss:$48 sps:$4 sm:$0xff]  }
  0x90   :  { %v110_v56 = vld [vmem:[#allocation2 + $0xc0] sm:$0xff] }
  0x92   :  { %2049 = vmatpush1.bf16.msra.mxu0 %v11585_v57  ;;  %2435 = vmatpush1.bf16.msra.mxu1 %v11586_v58  ;;  %v11643_v57 = vld [vmem:[#allocation5 + $0x8ac] ss:$48 sps:$4 sm:$0xff]   ;;  %v11646_v58 = vld [vmem:[#allocation5 + $0x8a4] ss:$48 sps:$4 sm:$0xff]  }
  0x93   :  { %2050 = vmatprep.subr.bf16.mxu0 %v11587_v59  ;;  %2436 = vmatprep.subr.bf16.mxu1 %v11589_v60  ;;  %v113_v59 = vld [vmem:[#allocation2 + $0xd8] sm:$0xff] }
  0x94   :  { %v117_v60 = vld [vmem:[#allocation2 + $0xf8] sm:$0xff] }
  0x96   :  { %2051 = vmatpush1.bf16.msra.mxu0 %v11591_v61  ;;  %2437 = vmatpush1.bf16.msra.mxu1 %v11592_v62  ;;  %v120_v61 = vld [vmem:[#allocation2 + $0x110] sm:$0xff]  ;;  %v11641_v62 = vld [vmem:[#allocation5 + $0x8a8] ss:$48 sps:$4 sm:$0xff]  }
  0x97   :  { %2052 = vmatprep.subr.bf16.mxu0 %v11593_v63  ;;  %2438 = vmatprep.subr.bf16.mxu1 %v11595_v0  ;;  %v11644_v63 = vld [vmem:[#allocation5 + $0x8a0] ss:$48 sps:$4 sm:$0xff]   ;;  %v11649_v0 = vld [vmem:[#allocation5 + $0x1c] ss:$48 sps:$4 sm:$0xff]   ;;  %v12605_v3 = vpack.c.bf16 %v120_v61, %v117_v60 }
  0x98   :  { %v164_v61 = vld [vmem:[#allocation2 + $0x270] sm:$0xff] }
  0x9a   :  { %2053 = vmatpush1.bf16.msra.mxu0 %v11597_v1  ;;  %2439 = vmatpush1.bf16.msra.mxu1 %v11598_v2  ;;  %v11652_v1 = vld [vmem:[#allocation5 + $0x14] ss:$48 sps:$4 sm:$0xff]   ;;  %v12603_v2 = vpack.c.bf16 %v113_v59, %v110_v56  ;;  %v161_v56 = vld [vmem:[#allocation2 + $0x258] sm:$0xff] }
  0x9b   :  { %2601 = vmatprep.subr.bf16.mxu1 %v11601_v5  ;;  %2215 = vmatprep.subr.bf16.mxu0 %v11604_v6  ;;  %v119_v5 = vld [vmem:[#allocation2 + $0x108] sm:$0xff] }
  0x9c   :  { %v123_v6 = vld [vmem:[#allocation2 + $0x128] sm:$0xff]  ;;  %v12611_v8 = vpack.c.bf16 %v119_v5, %v116_v4  ;;  %v170_v5 = vld [vmem:[#allocation2 + $0x2a0] sm:$0xff] }
  0x9d   :  { %2055 = vmatmul.mubr.bf16.vlgmr.msra.gmra.mrb[0].mxu0 %v12571_v9  ;;  %2441 = vmatmul.mubr.bf16.vlgmr.msra.gmra.mrb[0].mxu1 %v12571_v9 }
  0x9e   :  { %2602 = vmatpush1.bf16.msra.mxu1 %v11599_v10  ;;  %2216 = vmatpush1.bf16.msra.mxu0 %v11602_v11  ;;  %v12613_v10 = vpack.c.bf16 %v126_v7, %v123_v6  ;;  %v122_v11 = vld [vmem:[#allocation2 + $0x120] sm:$0xff]  ;;  %v173_v6 = vld [vmem:[#allocation2 + $0x2b8] sm:$0xff] }
  0x9f   :  { %2064 = vmatprep.mubr.bf16.mxu0 %v12573_v12  ;;  %2450 = vmatprep.mubr.bf16.mxu1 %v12573_v12  ;;  %v177_v7 = vld [vmem:[#allocation2 + $0x2d8] sm:$0xff] }
  0xa0   :  { %2603 = vmatprep.subr.bf16.mxu1 %v11607_v13  ;;  %2217 = vmatprep.subr.bf16.mxu0 %v11610_v14  ;;  %v125_v13 = vld [vmem:[#allocation2 + $0x138] sm:$0xff] }
  0xa1   :  { %v129_v14 = vld [vmem:[#allocation2 + $0x158] sm:$0xff]  ;;  %v12619_v16 = vpack.c.bf16 %v125_v13, %v122_v11  ;;  %v180_v11 = vld [vmem:[#allocation2 + $0x2f0] sm:$0xff]  ;;  %v12683_v13 = vpack.c.bf16 %v173_v6, %v170_v5 }
  0xa2   :  { %2604 = vmatpush1.bf16.msra.mxu1 %v11605_v18  ;;  %2218 = vmatpush1.bf16.msra.mxu0 %v11608_v19  ;;  %v12621_v17 = vpack.c.bf16 %v132_v15, %v129_v14  ;;  %v128_v18 = vld [vmem:[#allocation2 + $0x150] sm:$0xff]  ;;  %v131_v19 = vld [vmem:[#allocation2 + $0x168] sm:$0xff]  ;;  %v12685_v14 = vpack.c.bf16 %v180_v11, %v177_v7 }
  0xa3   :  { %2605 = vmatprep.subr.bf16.mxu1 %v11613_v21  ;;  %2219 = vmatprep.subr.bf16.mxu0 %v11616_v22  ;;  %v138_v21 = vld [vmem:[#allocation2 + $0x1a0] sm:$0xff]  ;;  %v12627_v22 = vpack.c.bf16 %v131_v19, %v128_v18  ;;  %15048 = vst [vmem:[#allocation26_spill] sm:$0xff] %v12683_v13  ;;  %v176_v15 = vld [vmem:[#allocation2 + $0x2d0] sm:$0xff]  ;;  %v179_v18 = vld [vmem:[#allocation2 + $0x2e8] sm:$0xff] }
  0xa4   :  { %15049 = vst [vmem:[#allocation27_spill] sm:$0xff] %v12685_v14  ;;  %v12691_v19 = vpack.c.bf16 %v179_v18, %v176_v15  ;;  %v11671_v5 = vld [vmem:[#allocation5 + $0x198] ss:$48 sps:$4 sm:$0xff]   ;;  %v11674_v6 = vld [vmem:[#allocation5 + $0x190] ss:$48 sps:$4 sm:$0xff]  }
  0xa5   :  { %2065 = vmatmul.mubr.bf16.gmra.mrb[4].mxu0 %v12579_v23  ;;  %2451 = vmatmul.mubr.bf16.gmra.mrb[4].mxu1 %v12579_v23  ;;  %v11679_v7 = vld [vmem:[#allocation5 + $0x1fc] ss:$48 sps:$4 sm:$0xff]   ;;  %v11682_v11 = vld [vmem:[#allocation5 + $0x1f4] ss:$48 sps:$4 sm:$0xff]  }
  0xa6   :  { %2074 = vmatprep.mubr.bf16.mxu0 %v12581_v24  ;;  %2460 = vmatprep.mubr.bf16.mxu1 %v12581_v24  ;;  %15050 = vst [vmem:[#allocation28_spill] sm:$0xff] %v12691_v19  ;;  %v106_v15 = vld [vmem:[#allocation2 + $0xa0] sm:$0xff]  ;;  %v109_v18 = vld [vmem:[#allocation2 + $0xb8] sm:$0xff] }
  0xa7   :  { %2606 = vmatpush1.bf16.msra.mxu1 %v11611_v25  ;;  %2220 = vmatpush1.bf16.msra.mxu0 %v11614_v26  ;;  %v12629_v25 = vpack.c.bf16 %v138_v21, %v135_v20  ;;  %v134_v26 = vld [vmem:[#allocation2 + $0x180] sm:$0xff]  ;;  %v88_v20 = vld [vmem:[#allocation2 + $0x10] sm:$0xff]  ;;  %v14855_v21 = vmov 0  }
  0xa8   :  { %2607 = vmatprep.subr.bf16.mxu1 %v11619_v28  ;;  %2221 = vmatprep.subr.bf16.mxu0 %v11622_v29  ;;  %v141_v28 = vld [vmem:[#allocation2 + $0x1b8] sm:$0xff]  ;;  %v144_v29 = vld [vmem:[#allocation2 + $0x1d0] sm:$0xff]  ;;  %v12635_v30 = vpack.c.bf16 %v137_v27, %v134_v26  ;;  %v91_v26 = vld [vmem:[#allocation2 + $0x28] sm:$0xff] }
  0xa9   :  { %15038 = vst [vmem:[#allocation16_spill] sm:$0xff] %v12629_v25  ;;  %v12637_v31 = vpack.c.bf16 %v144_v29, %v141_v28  ;;  %v11647_v27 = vld [vmem:[#allocation5 + $0x18] ss:$48 sps:$4 sm:$0xff]   ;;  %v11650_v28 = vld [vmem:[#allocation5 + $0x10] ss:$48 sps:$4 sm:$0xff]   ;;  %v12697_v29 = vpack.c.bf16 %v91_v26, %v88_v20 }
  0xaa   :  { %15039 = vst [vmem:[#allocation17_spill] sm:$0xff] %v12635_v30  ;;  %v11677_v20 = vld [vmem:[#allocation5 + $0x1f8] ss:$48 sps:$4 sm:$0xff]   ;;  %v11680_v26 = vld [vmem:[#allocation5 + $0x1f0] ss:$48 sps:$4 sm:$0xff]  }
  0xab   :  { %2608 = vmatpush1.bf16.msra.mxu1 %v11617_v33  ;;  %2222 = vmatpush1.bf16.msra.mxu0 %v11620_v34  ;;  %15040 = vst [vmem:[#allocation18_spill] sm:$0xff] %v12637_v31  ;;  %v143_v33 = vld [vmem:[#allocation2 + $0x1c8] sm:$0xff] }
  0xac   :  { %2609 = vmatprep.subr.bf16.mxu1 %v11625_v35  ;;  %2223 = vmatprep.subr.bf16.mxu0 %v11628_v36  ;;  %v147_v34 = vld [vmem:[#allocation2 + $0x1e8] sm:$0xff]  ;;  %v150_v35 = vld [vmem:[#allocation2 + $0x200] sm:$0xff]  ;;  %v12643_v36 = vpack.c.bf16 %v143_v33, %v140_v32 }
  0xad   :  { %2075 = vmatmul.mubr.bf16.gmra.mrb[8].mxu0 %v12587_v37  ;;  %2461 = vmatmul.mubr.bf16.gmra.mrb[8].mxu1 %v12587_v37  ;;  %v11655_v32 = vld [vmem:[#allocation5 + $0x7c] ss:$48 sps:$4 sm:$0xff]   ;;  %v11658_v33 = vld [vmem:[#allocation5 + $0x74] ss:$48 sps:$4 sm:$0xff]  }
  0xae   :  { %2084 = vmatprep.mubr.bf16.mxu0 %v12589_v38  ;;  %2470 = vmatprep.mubr.bf16.mxu1 %v12589_v38  ;;  %15041 = vst [vmem:[#allocation19_spill] sm:$0xff] %v12643_v36 }
  0xaf   :  { %2610 = vmatpush1.bf16.msra.mxu1 %v11623_v39  ;;  %2224 = vmatpush1.bf16.msra.mxu0 %v11626_v40  ;;  %v12645_v39 = vpack.c.bf16 %v150_v35, %v147_v34  ;;  %v146_v40 = vld [vmem:[#allocation2 + $0x1e0] sm:$0xff]  ;;  %v97_v35 = vld [vmem:[#allocation2 + $0x58] sm:$0xff] }
  0xb0   :  { %2611 = vmatprep.subr.bf16.mxu1 %v11631_v41  ;;  %2225 = vmatprep.subr.bf16.mxu0 %v11634_v42  ;;  %v149_v41 = vld [vmem:[#allocation2 + $0x1f8] sm:$0xff]  ;;  %v94_v34 = vld [vmem:[#allocation2 + $0x40] sm:$0xff] }
  0xb1   :  { %15042 = vst [vmem:[#allocation20_spill] sm:$0xff] %v12645_v39  ;;  %v153_v42 = vld [vmem:[#allocation2 + $0x218] sm:$0xff]  ;;  %v12651_v44 = vpack.c.bf16 %v149_v41, %v146_v40  ;;  %v11656_v41 = vld [vmem:[#allocation5 + $0x70] ss:$48 sps:$4 sm:$0xff]  }
  0xb2   :  { %v12653_v45 = vpack.c.bf16 %v156_v43, %v153_v42  ;;  %v11653_v40 = vld [vmem:[#allocation5 + $0x78] ss:$48 sps:$4 sm:$0xff]   ;;  %v11661_v42 = vld [vmem:[#allocation5 + $0xdc] ss:$48 sps:$4 sm:$0xff]   ;;  %v11664_v43 = vld [vmem:[#allocation5 + $0xd4] ss:$48 sps:$4 sm:$0xff]  }
  0xb3   :  { %2612 = vmatpush1.bf16.msra.mxu1 %v11629_v47  ;;  %2226 = vmatpush1.bf16.msra.mxu0 %v11632_v48  ;;  %15043 = vst [vmem:[#allocation21_spill] sm:$0xff] %v12651_v44  ;;  %v155_v47 = vld [vmem:[#allocation2 + $0x228] sm:$0xff] }
  0xb4   :  { %2613 = vmatprep.subr.bf16.mxu1 %v11637_v49  ;;  %2227 = vmatprep.subr.bf16.mxu0 %v11640_v50  ;;  %15044 = vst [vmem:[#allocation22_spill] sm:$0xff] %v12653_v45  ;;  %v159_v48 = vld [vmem:[#allocation2 + $0x248] sm:$0xff]  ;;  %v162_v49 = vld [vmem:[#allocation2 + $0x260] sm:$0xff]  ;;  %v12659_v50 = vpack.c.bf16 %v155_v47, %v152_v46  ;;  %v12703_v46 = vpack.c.bf16 %v97_v35, %v94_v34 }
  0xb5   :  { %2085 = vmatmul.mubr.bf16.gmra.mrb[12].mxu0 %v12595_v52  ;;  %2471 = vmatmul.mubr.bf16.gmra.mrb[12].mxu1 %v12595_v52  ;;  %v11659_v47 = vld [vmem:[#allocation5 + $0xd8] ss:$48 sps:$4 sm:$0xff]   ;;  %v11686_v34 = vld [vmem:[#allocation5 + $0x250] ss:$48 sps:$4 sm:$0xff]   ;;  %v11691_v35 = vld [vmem:[#allocation5 + $0x2bc] ss:$48 sps:$4 sm:$0xff]  }
  0xb6   :  { %2094 = vmatprep.mubr.bf16.mxu0 %v12597_v53  ;;  %2480 = vmatprep.mubr.bf16.mxu1 %v12597_v53 }
  0xb7   :  { %2614 = vmatpush1.bf16.msra.mxu1 %v11635_v54  ;;  %2228 = vmatpush1.bf16.msra.mxu0 %v11638_v55  ;;  %v12661_v54 = vpack.c.bf16 %v162_v49, %v159_v48  ;;  %v158_v55 = vld [vmem:[#allocation2 + $0x240] sm:$0xff]  ;;  %v11667_v49 = vld [vmem:[#allocation5 + $0x13c] ss:$48 sps:$4 sm:$0xff]  }
  0xb8   :  { %2615 = vmatprep.subr.bf16.mxu1 %v11643_v57  ;;  %2229 = vmatprep.subr.bf16.mxu0 %v11646_v58  ;;  %v165_v57 = vld [vmem:[#allocation2 + $0x278] sm:$0xff]  ;;  %v168_v58 = vld [vmem:[#allocation2 + $0x290] sm:$0xff]  ;;  %v12667_v59 = vpack.c.bf16 %v161_v56, %v158_v55 }
  0xb9   :  { %15045 = vst [vmem:[#allocation23_spill] sm:$0xff] %v12661_v54  ;;  %v12669_v60 = vpack.c.bf16 %v168_v58, %v165_v57  ;;  %v11662_v48 = vld [vmem:[#allocation5 + $0xd0] ss:$48 sps:$4 sm:$0xff]   ;;  %v11670_v55 = vld [vmem:[#allocation5 + $0x134] ss:$48 sps:$4 sm:$0xff]   ;;  %v103_v57 = vld [vmem:[#allocation2 + $0x88] sm:$0xff] }
  0xba   :  { %v100_v56 = vld [vmem:[#allocation2 + $0x70] sm:$0xff]  ;;  %v11665_v58 = vld [vmem:[#allocation5 + $0x138] ss:$48 sps:$4 sm:$0xff]  }
  0xbb   :  { %2616 = vmatpush1.bf16.msra.mxu1 %v11641_v62  ;;  %2230 = vmatpush1.bf16.msra.mxu0 %v11644_v63  ;;  %v167_v62 = vld [vmem:[#allocation2 + $0x288] sm:$0xff] }
  0xbc   :  { %3180 = vmatprep.subr.bf16.mxu1 %v11649_v0  ;;  %2794 = vmatprep.subr.bf16.mxu0 %v11652_v1  ;;  %v171_v63 = vld [vmem:[#allocation2 + $0x2a8] sm:$0xff]  ;;  %v174_v0 = vld [vmem:[#allocation2 + $0x2c0] sm:$0xff]  ;;  %v12675_v1 = vpack.c.bf16 %v167_v62, %v164_v61 }
  0xbd   :  { %2095 = vmatmul.mubr.bf16.gmra.mrb[16].mxu0 %v12603_v2  ;;  %2481 = vmatmul.mubr.bf16.gmra.mrb[16].mxu1 %v12603_v2  ;;  %v12677_v4 = vpack.c.bf16 %v174_v0, %v171_v63  ;;  %v11668_v61 = vld [vmem:[#allocation5 + $0x130] ss:$48 sps:$4 sm:$0xff]   ;;  %v11673_v62 = vld [vmem:[#allocation5 + $0x19c] ss:$48 sps:$4 sm:$0xff]   ;;  %v11676_v63 = vld [vmem:[#allocation5 + $0x194] ss:$48 sps:$4 sm:$0xff]   ;;  %v12709_v0 = vpack.c.bf16 %v103_v57, %v100_v56 }
  0xbe   :  { %2104 = vmatprep.mubr.bf16.mxu0 %v12605_v3  ;;  %2490 = vmatprep.mubr.bf16.mxu1 %v12605_v3  ;;  %15046 = vst [vmem:[#allocation24_spill] sm:$0xff] %v12675_v1  ;;  %v11695_v56 = vld [vmem:[#allocation5 + $0x318] ss:$48 sps:$4 sm:$0xff]   ;;  %v11698_v57 = vld [vmem:[#allocation5 + $0x310] ss:$48 sps:$4 sm:$0xff]  }
  0xbf   :  { %15047 = vst [vmem:[#allocation25_spill] sm:$0xff] %v12677_v4 }
  0xc5   :  { %2105 = vmatmul.mubr.bf16.gmra.mrb[20].mxu0 %v12611_v8  ;;  %2491 = vmatmul.mubr.bf16.gmra.mrb[20].mxu1 %v12611_v8 }
  0xc6   :  { %2114 = vmatprep.mubr.bf16.mxu0 %v12613_v10  ;;  %2500 = vmatprep.mubr.bf16.mxu1 %v12613_v10 }
  0xcd   :  { %2115 = vmatmul.mubr.bf16.gmra.mrb[24].mxu0 %v12619_v16  ;;  %2501 = vmatmul.mubr.bf16.gmra.mrb[24].mxu1 %v12619_v16 }
  0xce   :  { %2124 = vmatprep.mubr.bf16.mxu0 %v12621_v17  ;;  %2510 = vmatprep.mubr.bf16.mxu1 %v12621_v17 }
  0xd5   :  { %2125 = vmatmul.mubr.bf16.gmra.mrb[28].mxu0 %v12627_v22  ;;  %2511 = vmatmul.mubr.bf16.gmra.mrb[28].mxu1 %v12627_v22 }
  0xd6   :  { %2134 = vmatprep.mubr.bf16.mxu0 %v12629_v25  ;;  %2520 = vmatprep.mubr.bf16.mxu1 %v12629_v25 }
  0xdd   :  { %2135 = vmatmul.mubr.bf16.gmra.mrb[32].mxu0 %v12635_v30  ;;  %2521 = vmatmul.mubr.bf16.gmra.mrb[32].mxu1 %v12635_v30 }
  0xde   :  { %2144 = vmatprep.mubr.bf16.mxu0 %v12637_v31  ;;  %2530 = vmatprep.mubr.bf16.mxu1 %v12637_v31 }
  0xe5   :  { %2145 = vmatmul.mubr.bf16.gmra.mrb[36].mxu0 %v12643_v36  ;;  %2531 = vmatmul.mubr.bf16.gmra.mrb[36].mxu1 %v12643_v36 }
  0xe6   :  { %2154 = vmatprep.mubr.bf16.mxu0 %v12645_v39  ;;  %2540 = vmatprep.mubr.bf16.mxu1 %v12645_v39 }
  0xed   :  { %2155 = vmatmul.mubr.bf16.gmra.mrb[40].mxu0 %v12651_v44  ;;  %2541 = vmatmul.mubr.bf16.gmra.mrb[40].mxu1 %v12651_v44 }
  0xee   :  { %2164 = vmatprep.mubr.bf16.mxu0 %v12653_v45  ;;  %2550 = vmatprep.mubr.bf16.mxu1 %v12653_v45 }
  0xf5   :  { %2165 = vmatmul.mubr.bf16.gmra.mrb[44].mxu0 %v12659_v50  ;;  %2551 = vmatmul.mubr.bf16.gmra.mrb[44].mxu1 %v12659_v50 }
  0xf6   :  { %2174 = vmatprep.mubr.bf16.mxu0 %v12661_v54  ;;  %2560 = vmatprep.mubr.bf16.mxu1 %v12661_v54 }
  0xfd   :  { %2175 = vmatmul.mubr.bf16.gmra.mrb[48].mxu0 %v12667_v59  ;;  %2561 = vmatmul.mubr.bf16.gmra.mrb[48].mxu1 %v12667_v59 }
  0xfe   :  { %2184 = vmatprep.mubr.bf16.mxu0 %v12669_v60  ;;  %2570 = vmatprep.mubr.bf16.mxu1 %v12669_v60 }
 0x105   :  { %2185 = vmatmul.mubr.bf16.gmra.mrb[52].mxu0 %v12675_v1  ;;  %2571 = vmatmul.mubr.bf16.gmra.mrb[52].mxu1 %v12675_v1 }
 0x106   :  { %2194 = vmatprep.mubr.bf16.mxu0 %v12677_v4  ;;  %2580 = vmatprep.mubr.bf16.mxu1 %v12677_v4 }
 0x10d   :  { %2195 = vmatmul.mubr.bf16.gmra.mrb[56].mxu0 %v12683_v13  ;;  %2581 = vmatmul.mubr.bf16.gmra.mrb[56].mxu1 %v12683_v13 }
 0x10e   :  { %2204 = vmatprep.mubr.bf16.mxu0 %v12685_v14  ;;  %2590 = vmatprep.mubr.bf16.mxu1 %v12685_v14 }
 0x115   :  { %2205 = vmatmul.mubr.bf16.gmra.mrb[60].mxu0 %v12691_v19  ;;  %2591 = vmatmul.mubr.bf16.gmra.mrb[60].mxu1 %v12691_v19 }
 0x116   :  { %2247 = vmatprep.mubr.bf16.mxu0 %v14855_v21  ;;  %2633 = vmatprep.mubr.bf16.mxu1 %v14855_v21 }
 0x11d   :  { %2248 = vmatmul.mubr.bf16.vlgmr.msra.gmra.mrb[0].mxu0 %v12697_v29  ;;  %2634 = vmatmul.mubr.bf16.vlgmr.msra.gmra.mrb[0].mxu1 %v12697_v29 }
 0x11e   :  { %3181 = vmatpush1.bf16.msra.mxu1 %v11647_v27  ;;  %2795 = vmatpush1.bf16.msra.mxu0 %v11650_v28  ;;  %v11685_v27 = vld [vmem:[#allocation5 + $0x25c] ss:$48 sps:$4 sm:$0xff]   ;;  %v11688_v28 = vld [vmem:[#allocation5 + $0x254] ss:$48 sps:$4 sm:$0xff]  }
 0x11f   :  { %2257 = vmatprep.mubr.bf16.mxu0 %v14855_v21  ;;  %2643 = vmatprep.mubr.bf16.mxu1 %v14855_v21 }
 0x120   :  { %3182 = vmatprep.subr.bf16.mxu1 %v11655_v32  ;;  %2796 = vmatprep.subr.bf16.mxu0 %v11658_v33  ;;  %v12715_v32 = vpack.c.bf16 %v109_v18, %v106_v15  ;;  %v11683_v33 = vld [vmem:[#allocation5 + $0x258] ss:$48 sps:$4 sm:$0xff]  }
 0x121   :  { %v11707_v18 = vld [vmem:[#allocation5 + $0x3d8] ss:$48 sps:$4 sm:$0xff]  }
 0x122   :  { %3183 = vmatpush1.bf16.msra.mxu1 %v11653_v40  ;;  %2797 = vmatpush1.bf16.msra.mxu0 %v11656_v41  ;;  %v11694_v40 = vld [vmem:[#allocation5 + $0x2b4] ss:$48 sps:$4 sm:$0xff]  }
 0x123   :  { %3184 = vmatprep.subr.bf16.mxu1 %v11661_v42  ;;  %2798 = vmatprep.subr.bf16.mxu0 %v11664_v43  ;;  %v112_v41 = vld [vmem:[#allocation2 + $0xd0] sm:$0xff]  ;;  %v115_v42 = vld [vmem:[#allocation2 + $0xe8] sm:$0xff] }
 0x124   :  { %v11689_v43 = vld [vmem:[#allocation5 + $0x2b8] ss:$48 sps:$4 sm:$0xff]  }
 0x125   :  { %2258 = vmatmul.mubr.bf16.gmra.mrb[4].mxu0 %v12703_v46  ;;  %2644 = vmatmul.mubr.bf16.gmra.mrb[4].mxu1 %v12703_v46 }
 0x126   :  { %2267 = vmatprep.mubr.bf16.mxu0 %v14855_v21  ;;  %2653 = vmatprep.mubr.bf16.mxu1 %v14855_v21 }
 0x127   :  { %3185 = vmatpush1.bf16.msra.mxu1 %v11659_v47  ;;  %2799 = vmatpush1.bf16.msra.mxu0 %v11662_v48  ;;  %v11692_v47 = vld [vmem:[#allocation5 + $0x2b0] ss:$48 sps:$4 sm:$0xff]   ;;  %v11697_v48 = vld [vmem:[#allocation5 + $0x31c] ss:$48 sps:$4 sm:$0xff]  }
 0x128   :  { %3186 = vmatprep.subr.bf16.mxu1 %v11667_v49  ;;  %2800 = vmatprep.subr.bf16.mxu0 %v11670_v55  ;;  %v11700_v49 = vld [vmem:[#allocation5 + $0x314] ss:$48 sps:$4 sm:$0xff]   ;;  %v12721_v55 = vpack.c.bf16 %v115_v42, %v112_v41 }
 0x129   :  { %v11724_v41 = vld [vmem:[#allocation5 + $0x494] ss:$48 sps:$4 sm:$0xff]  }
 0x12b   :  { %3187 = vmatpush1.bf16.msra.mxu1 %v11665_v58  ;;  %2801 = vmatpush1.bf16.msra.mxu0 %v11668_v61  ;;  %v11703_v58 = vld [vmem:[#allocation5 + $0x37c] ss:$48 sps:$4 sm:$0xff]   ;;  %v11706_v61 = vld [vmem:[#allocation5 + $0x374] ss:$48 sps:$4 sm:$0xff]  }
 0x12c   :  { %3188 = vmatprep.subr.bf16.mxu1 %v11673_v62  ;;  %2802 = vmatprep.subr.bf16.mxu0 %v11676_v63  ;;  %v118_v62 = vld [vmem:[#allocation2 + $0x100] sm:$0xff]  ;;  %v121_v63 = vld [vmem:[#allocation2 + $0x118] sm:$0xff] }
 0x12d   :  { %2268 = vmatmul.mubr.bf16.gmra.mrb[8].mxu0 %v12709_v0  ;;  %2654 = vmatmul.mubr.bf16.gmra.mrb[8].mxu1 %v12709_v0  ;;  %v12727_v15 = vpack.c.bf16 %v121_v63, %v118_v62  ;;  %v11733_v62 = vld [vmem:[#allocation5 + $0x55c] ss:$48 sps:$4 sm:$0xff]   ;;  %v11736_v63 = vld [vmem:[#allocation5 + $0x554] ss:$48 sps:$4 sm:$0xff]  }
 0x12e   :  { %2277 = vmatprep.mubr.bf16.mxu0 %v14855_v21  ;;  %2663 = vmatprep.mubr.bf16.mxu1 %v14855_v21 }
 0x12f   :  { %3189 = vmatpush1.bf16.msra.mxu1 %v11671_v5  ;;  %2803 = vmatpush1.bf16.msra.mxu0 %v11674_v6  ;;  %v11701_v5 = vld [vmem:[#allocation5 + $0x378] ss:$48 sps:$4 sm:$0xff]   ;;  %v11704_v6 = vld [vmem:[#allocation5 + $0x370] ss:$48 sps:$4 sm:$0xff]  }
 0x130   :  { %3190 = vmatprep.subr.bf16.mxu1 %v11679_v7  ;;  %2804 = vmatprep.subr.bf16.mxu0 %v11682_v11  ;;  %v11709_v7 = vld [vmem:[#allocation5 + $0x3dc] ss:$48 sps:$4 sm:$0xff]   ;;  %v11712_v11 = vld [vmem:[#allocation5 + $0x3d4] ss:$48 sps:$4 sm:$0xff]  }
 0x133   :  { %3191 = vmatpush1.bf16.msra.mxu1 %v11677_v20  ;;  %2805 = vmatpush1.bf16.msra.mxu0 %v11680_v26  ;;  %v11710_v20 = vld [vmem:[#allocation5 + $0x3d0] ss:$48 sps:$4 sm:$0xff]   ;;  %v11715_v26 = vld [vmem:[#allocation5 + $0x43c] ss:$48 sps:$4 sm:$0xff]  }
 0x134   :  { %3192 = vmatprep.subr.bf16.mxu1 %v11685_v27  ;;  %2806 = vmatprep.subr.bf16.mxu0 %v11688_v28  ;;  %v11718_v27 = vld [vmem:[#allocation5 + $0x434] ss:$48 sps:$4 sm:$0xff]  }
 0x135   :  { %2278 = vmatmul.mubr.bf16.gmra.mrb[12].mxu0 %v12715_v32  ;;  %2664 = vmatmul.mubr.bf16.gmra.mrb[12].mxu1 %v12715_v32  ;;  %v124_v28 = vld [vmem:[#allocation2 + $0x130] sm:$0xff] }
 0x136   :  { %2287 = vmatprep.mubr.bf16.mxu0 %v14855_v21  ;;  %2673 = vmatprep.mubr.bf16.mxu1 %v14855_v21 }
 0x137   :  { %3193 = vmatpush1.bf16.msra.mxu1 %v11683_v33  ;;  %2807 = vmatpush1.bf16.msra.mxu0 %v11686_v34  ;;  %v127_v33 = vld [vmem:[#allocation2 + $0x148] sm:$0xff] }
 0x138   :  { %3194 = vmatprep.subr.bf16.mxu1 %v11691_v35  ;;  %2808 = vmatprep.subr.bf16.mxu0 %v11694_v40  ;;  %v11713_v34 = vld [vmem:[#allocation5 + $0x438] ss:$48 sps:$4 sm:$0xff]   ;;  %v11716_v35 = vld [vmem:[#allocation5 + $0x430] ss:$48 sps:$4 sm:$0xff]   ;;  %v11721_v40 = vld [vmem:[#allocation5 + $0x49c] ss:$48 sps:$4 sm:$0xff]   ;;  %v12733_v42 = vpack.c.bf16 %v127_v33, %v124_v28 }
 0x139   :  { %v11740_v28 = vld [vmem:[#allocation5 + $0x5b0] ss:$48 sps:$4 sm:$0xff]   ;;  %v11745_v33 = vld [vmem:[#allocation5 + $0x61c] ss:$48 sps:$4 sm:$0xff]  }
 0x13b   :  { %3195 = vmatpush1.bf16.msra.mxu1 %v11689_v43  ;;  %2809 = vmatpush1.bf16.msra.mxu0 %v11692_v47  ;;  %v11719_v43 = vld [vmem:[#allocation5 + $0x498] ss:$48 sps:$4 sm:$0xff]   ;;  %v11722_v47 = vld [vmem:[#allocation5 + $0x490] ss:$48 sps:$4 sm:$0xff]  }
 0x13c   :  { %3196 = vmatprep.subr.bf16.mxu1 %v11697_v48  ;;  %2810 = vmatprep.subr.bf16.mxu0 %v11700_v49  ;;  %v11727_v48 = vld [vmem:[#allocation5 + $0x4fc] ss:$48 sps:$4 sm:$0xff]   ;;  %v11730_v49 = vld [vmem:[#allocation5 + $0x4f4] ss:$48 sps:$4 sm:$0xff]  }
 0x13d   :  { %2288 = vmatmul.mubr.bf16.gmra.mrb[16].mxu0 %v12721_v55  ;;  %2674 = vmatmul.mubr.bf16.gmra.mrb[16].mxu1 %v12721_v55 }
 0x13e   :  { %2297 = vmatprep.mubr.bf16.mxu0 %v14855_v21  ;;  %2683 = vmatprep.mubr.bf16.mxu1 %v14855_v21 }
 0x13f   :  { %3197 = vmatpush1.bf16.msra.mxu1 %v11695_v56  ;;  %2811 = vmatpush1.bf16.msra.mxu0 %v11698_v57  ;;  %v130_v56 = vld [vmem:[#allocation2 + $0x160] sm:$0xff]  ;;  %v133_v57 = vld [vmem:[#allocation2 + $0x178] sm:$0xff] }
 0x140   :  { %3198 = vmatprep.subr.bf16.mxu1 %v11703_v58  ;;  %2812 = vmatprep.subr.bf16.mxu0 %v11706_v61  ;;  %v11725_v58 = vld [vmem:[#allocation5 + $0x4f8] ss:$48 sps:$4 sm:$0xff]   ;;  %v11728_v61 = vld [vmem:[#allocation5 + $0x4f0] ss:$48 sps:$4 sm:$0xff]  }
 0x143   :  { %3199 = vmatpush1.bf16.msra.mxu1 %v11701_v5  ;;  %2813 = vmatpush1.bf16.msra.mxu0 %v11704_v6  ;;  %v12739_v5 = vpack.c.bf16 %v133_v57, %v130_v56  ;;  %v11731_v6 = vld [vmem:[#allocation5 + $0x558] ss:$48 sps:$4 sm:$0xff]   ;;  %v154_v56 = vld [vmem:[#allocation2 + $0x220] sm:$0xff] }
 0x144   :  { %3200 = vmatprep.subr.bf16.mxu1 %v11709_v7  ;;  %2814 = vmatprep.subr.bf16.mxu0 %v11712_v11  ;;  %v11734_v7 = vld [vmem:[#allocation5 + $0x550] ss:$48 sps:$4 sm:$0xff]   ;;  %v11739_v11 = vld [vmem:[#allocation5 + $0x5bc] ss:$48 sps:$4 sm:$0xff]  }
 0x145   :  { %2298 = vmatmul.mubr.bf16.gmra.mrb[20].mxu0 %v12727_v15  ;;  %2684 = vmatmul.mubr.bf16.gmra.mrb[20].mxu1 %v12727_v15  ;;  %v157_v57 = vld [vmem:[#allocation2 + $0x238] sm:$0xff] }
 0x146   :  { %2307 = vmatprep.mubr.bf16.mxu0 %v14855_v21  ;;  %2693 = vmatprep.mubr.bf16.mxu1 %v14855_v21 }
 0x147   :  { %3201 = vmatpush1.bf16.msra.mxu1 %v11707_v18  ;;  %2815 = vmatpush1.bf16.msra.mxu0 %v11710_v20  ;;  %v11742_v18 = vld [vmem:[#allocation5 + $0x5b4] ss:$48 sps:$4 sm:$0xff]  }
 0x148   :  { %3202 = vmatprep.subr.bf16.mxu1 %v11715_v26  ;;  %2816 = vmatprep.subr.bf16.mxu0 %v11718_v27  ;;  %v136_v20 = vld [vmem:[#allocation2 + $0x190] sm:$0xff]  ;;  %v139_v26 = vld [vmem:[#allocation2 + $0x1a8] sm:$0xff] }
 0x149   :  { %v11737_v27 = vld [vmem:[#allocation5 + $0x5b8] ss:$48 sps:$4 sm:$0xff]  }
 0x14b   :  { %3203 = vmatpush1.bf16.msra.mxu1 %v11713_v34  ;;  %2817 = vmatpush1.bf16.msra.mxu0 %v11716_v35  ;;  %v11748_v34 = vld [vmem:[#allocation5 + $0x614] ss:$48 sps:$4 sm:$0xff]   ;;  %v12745_v35 = vpack.c.bf16 %v139_v26, %v136_v20  ;;  %v175_v20 = vld [vmem:[#allocation2 + $0x2c8] sm:$0xff] }
 0x14c   :  { %3204 = vmatprep.subr.bf16.mxu1 %v11721_v40  ;;  %2818 = vmatprep.subr.bf16.mxu0 %v11724_v41  ;;  %v142_v40 = vld [vmem:[#allocation2 + $0x1c0] sm:$0xff]  ;;  %v145_v41 = vld [vmem:[#allocation2 + $0x1d8] sm:$0xff] }
 0x14d   :  { %2308 = vmatmul.mubr.bf16.gmra.mrb[24].mxu0 %v12733_v42  ;;  %2694 = vmatmul.mubr.bf16.gmra.mrb[24].mxu1 %v12733_v42 }
 0x14e   :  { %2317 = vmatprep.mubr.bf16.mxu0 %v14855_v21  ;;  %2703 = vmatprep.mubr.bf16.mxu1 %v14855_v21 }
 0x14f   :  { %3205 = vmatpush1.bf16.msra.mxu1 %v11719_v43  ;;  %2819 = vmatpush1.bf16.msra.mxu0 %v11722_v47  ;;  %v12751_v43 = vpack.c.bf16 %v145_v41, %v142_v40  ;;  %v148_v47 = vld [vmem:[#allocation2 + $0x1f0] sm:$0xff]  ;;  %v11751_v41 = vld [vmem:[#allocation5 + $0x67c] ss:$48 sps:$4 sm:$0xff]  }
 0x150   :  { %3206 = vmatprep.subr.bf16.mxu1 %v11727_v48  ;;  %2820 = vmatprep.subr.bf16.mxu0 %v11730_v49  ;;  %v151_v48 = vld [vmem:[#allocation2 + $0x208] sm:$0xff]  ;;  %v11746_v40 = vld [vmem:[#allocation5 + $0x610] ss:$48 sps:$4 sm:$0xff]  }
 0x151   :  { %v12757_v49 = vpack.c.bf16 %v151_v48, %v148_v47  ;;  %v11754_v47 = vld [vmem:[#allocation5 + $0x674] ss:$48 sps:$4 sm:$0xff]   ;;  %v11749_v48 = vld [vmem:[#allocation5 + $0x678] ss:$48 sps:$4 sm:$0xff]  }
 0x153   :  { %3207 = vmatpush1.bf16.msra.mxu1 %v11725_v58  ;;  %2821 = vmatpush1.bf16.msra.mxu0 %v11728_v61  ;;  %v12763_v58 = vpack.c.bf16 %v157_v57, %v154_v56  ;;  %v160_v61 = vld [vmem:[#allocation2 + $0x250] sm:$0xff]  ;;  %v11757_v57 = vld [vmem:[#allocation5 + $0x6dc] ss:$48 sps:$4 sm:$0xff]  }
 0x154   :  { %3208 = vmatprep.subr.bf16.mxu1 %v11733_v62  ;;  %2822 = vmatprep.subr.bf16.mxu0 %v11736_v63  ;;  %v163_v62 = vld [vmem:[#allocation2 + $0x268] sm:$0xff]  ;;  %v11752_v56 = vld [vmem:[#allocation5 + $0x670] ss:$48 sps:$4 sm:$0xff]  }
 0x155   :  { %2318 = vmatmul.mubr.bf16.gmra.mrb[28].mxu0 %v12739_v5  ;;  %2704 = vmatmul.mubr.bf16.gmra.mrb[28].mxu1 %v12739_v5  ;;  %v12769_v63 = vpack.c.bf16 %v163_v62, %v160_v61  ;;  %v11760_v61 = vld [vmem:[#allocation5 + $0x6d4] ss:$48 sps:$4 sm:$0xff]   ;;  %v11755_v62 = vld [vmem:[#allocation5 + $0x6d8] ss:$48 sps:$4 sm:$0xff]  }
 0x156   :  { %2327 = vmatprep.mubr.bf16.mxu0 %v14855_v21  ;;  %2713 = vmatprep.mubr.bf16.mxu1 %v14855_v21 }
 0x157   :  { %3209 = vmatpush1.bf16.msra.mxu1 %v11731_v6  ;;  %2823 = vmatpush1.bf16.msra.mxu0 %v11734_v7  ;;  %v166_v6 = vld [vmem:[#allocation2 + $0x280] sm:$0xff]  ;;  %v169_v7 = vld [vmem:[#allocation2 + $0x298] sm:$0xff] }
 0x158   :  { %3210 = vmatprep.subr.bf16.mxu1 %v11739_v11  ;;  %2824 = vmatprep.subr.bf16.mxu0 %v11742_v18  ;;  %v12775_v11 = vpack.c.bf16 %v169_v7, %v166_v6  ;;  %v172_v18 = vld [vmem:[#allocation2 + $0x2b0] sm:$0xff]  ;;  %v11763_v7 = vld [vmem:[#allocation5 + $0x73c] ss:$48 sps:$4 sm:$0xff]  }
 0x159   :  { %v12781_v26 = vpack.c.bf16 %v175_v20, %v172_v18  ;;  %v11758_v6 = vld [vmem:[#allocation5 + $0x6d0] ss:$48 sps:$4 sm:$0xff]   ;;  %v11766_v18 = vld [vmem:[#allocation5 + $0x734] ss:$48 sps:$4 sm:$0xff]   ;;  %v11761_v20 = vld [vmem:[#allocation5 + $0x738] ss:$48 sps:$4 sm:$0xff]  }
 0x15b   :  { %3211 = vmatpush1.bf16.msra.mxu1 %v11737_v27  ;;  %2825 = vmatpush1.bf16.msra.mxu0 %v11740_v28  ;;  %v178_v27 = vld [vmem:[#allocation2 + $0x2e0] sm:$0xff]  ;;  %v181_v28 = vld [vmem:[#allocation2 + $0x2f8] sm:$0xff] }
 0x15c   :  { %3373 = vmatprep.subr.bf16.mxu1 %v11745_v33  ;;  %2987 = vmatprep.subr.bf16.mxu0 %v11748_v34  ;;  %v12787_v33 = vpack.c.bf16 %v181_v28, %v178_v27  ;;  %v11743_v34 = vld [vmem:[#allocation5 + $0x618] ss:$48 sps:$4 sm:$0xff]   ;;  %v11764_v27 = vld [vmem:[#allocation5 + $0x730] ss:$48 sps:$4 sm:$0xff]   ;;  %v11769_v28 = vld [vmem:[#allocation5 + $0x79c] ss:$48 sps:$4 sm:$0xff]  }
 0x15d   :  { %2328 = vmatmul.mubr.bf16.gmra.mrb[32].mxu0 %v12745_v35  ;;  %2714 = vmatmul.mubr.bf16.gmra.mrb[32].mxu1 %v12745_v35 }
 0x15e   :  { %2337 = vmatprep.mubr.bf16.mxu0 %v14855_v21  ;;  %2723 = vmatprep.mubr.bf16.mxu1 %v14855_v21 }
 0x165   :  { %2338 = vmatmul.mubr.bf16.gmra.mrb[36].mxu0 %v12751_v43  ;;  %2724 = vmatmul.mubr.bf16.gmra.mrb[36].mxu1 %v12751_v43 }
 0x166   :  { %2347 = vmatprep.mubr.bf16.mxu0 %v14855_v21  ;;  %2733 = vmatprep.mubr.bf16.mxu1 %v14855_v21 }
 0x16d   :  { %2348 = vmatmul.mubr.bf16.gmra.mrb[40].mxu0 %v12757_v49  ;;  %2734 = vmatmul.mubr.bf16.gmra.mrb[40].mxu1 %v12757_v49 }
 0x16e   :  { %2357 = vmatprep.mubr.bf16.mxu0 %v14855_v21  ;;  %2743 = vmatprep.mubr.bf16.mxu1 %v14855_v21 }
 0x175   :  { %2358 = vmatmul.mubr.bf16.gmra.mrb[44].mxu0 %v12763_v58  ;;  %2744 = vmatmul.mubr.bf16.gmra.mrb[44].mxu1 %v12763_v58 }
 0x176   :  { %2367 = vmatprep.mubr.bf16.mxu0 %v14855_v21  ;;  %2753 = vmatprep.mubr.bf16.mxu1 %v14855_v21 }
 0x17d   :  { %2368 = vmatmul.mubr.bf16.gmra.mrb[48].mxu0 %v12769_v63  ;;  %2754 = vmatmul.mubr.bf16.gmra.mrb[48].mxu1 %v12769_v63 }
 0x17e   :  { %2377 = vmatprep.mubr.bf16.mxu0 %v14855_v21  ;;  %2763 = vmatprep.mubr.bf16.mxu1 %v14855_v21 }
 0x185   :  { %2378 = vmatmul.mubr.bf16.gmra.mrb[52].mxu0 %v12775_v11  ;;  %2764 = vmatmul.mubr.bf16.gmra.mrb[52].mxu1 %v12775_v11 }
 0x186   :  { %2387 = vmatprep.mubr.bf16.mxu0 %v14855_v21  ;;  %2773 = vmatprep.mubr.bf16.mxu1 %v14855_v21 }
 0x18d   :  { %2388 = vmatmul.mubr.bf16.gmra.mrb[56].mxu0 %v12781_v26  ;;  %2774 = vmatmul.mubr.bf16.gmra.mrb[56].mxu1 %v12781_v26 }
 0x18e   :  { %2397 = vmatprep.mubr.bf16.mxu0 %v14855_v21  ;;  %2783 = vmatprep.mubr.bf16.mxu1 %v14855_v21 }
 0x195   :  { %2398 = vmatmul.mubr.bf16.gmra.mrb[60].mxu0 %v12787_v33  ;;  %2784 = vmatmul.mubr.bf16.gmra.mrb[60].mxu1 %v12787_v33 }
 0x196   :  { %2826 = vmatprep.mubr.bf16.mxu0 %v12567_v51  ;;  %3212 = vmatprep.mubr.bf16.mxu1 %v12567_v51 }
 0x19d   :  { %2827 = vmatmul.mubr.bf16.vlgmr.msra.gmra.mrb[64].mxu0 %v12571_v9  ;;  %3213 = vmatmul.mubr.bf16.vlgmr.msra.gmra.mrb[64].mxu1 %v12571_v9 }
 0x19e   :  { %3374 = vmatpush1.bf16.msra.mxu1 %v11743_v34  ;;  %2988 = vmatpush1.bf16.msra.mxu0 %v11746_v40  ;;  %v11772_v34 = vld [vmem:[#allocation5 + $0x794] ss:$48 sps:$4 sm:$0xff]   ;;  %v11767_v40 = vld [vmem:[#allocation5 + $0x798] ss:$48 sps:$4 sm:$0xff]  }
 0x19f   :  { %2836 = vmatprep.mubr.bf16.mxu0 %v12573_v12  ;;  %3222 = vmatprep.mubr.bf16.mxu1 %v12573_v12 }
 0x1a0   :  { %3375 = vmatprep.subr.bf16.mxu1 %v11751_v41  ;;  %2989 = vmatprep.subr.bf16.mxu0 %v11754_v47  ;;  %v11770_v41 = vld [vmem:[#allocation5 + $0x790] ss:$48 sps:$4 sm:$0xff]   ;;  %v11775_v47 = vld [vmem:[#allocation5 + $0x7fc] ss:$48 sps:$4 sm:$0xff]  }
 0x1a2   :  { %3376 = vmatpush1.bf16.msra.mxu1 %v11749_v48  ;;  %2990 = vmatpush1.bf16.msra.mxu0 %v11752_v56  ;;  %v11778_v48 = vld [vmem:[#allocation5 + $0x7f4] ss:$48 sps:$4 sm:$0xff]   ;;  %v11773_v56 = vld [vmem:[#allocation5 + $0x7f8] ss:$48 sps:$4 sm:$0xff]  }
 0x1a3   :  { %3377 = vmatprep.subr.bf16.mxu1 %v11757_v57  ;;  %2991 = vmatprep.subr.bf16.mxu0 %v11760_v61  ;;  %v11776_v57 = vld [vmem:[#allocation5 + $0x7f0] ss:$48 sps:$4 sm:$0xff]   ;;  %v11781_v61 = vld [vmem:[#allocation5 + $0x85c] ss:$48 sps:$4 sm:$0xff]  }
 0x1a5   :  { %2837 = vmatmul.mubr.bf16.gmra.mrb[68].mxu0 %v12579_v23  ;;  %3223 = vmatmul.mubr.bf16.gmra.mrb[68].mxu1 %v12579_v23 }
 0x1a6   :  { %2846 = vmatprep.mubr.bf16.mxu0 %v12581_v24  ;;  %3232 = vmatprep.mubr.bf16.mxu1 %v12581_v24 }
 0x1a7   :  { %3378 = vmatpush1.bf16.msra.mxu1 %v11755_v62  ;;  %2992 = vmatpush1.bf16.msra.mxu0 %v11758_v6  ;;  %v11784_v62 = vld [vmem:[#allocation5 + $0x854] ss:$48 sps:$4 sm:$0xff]   ;;  %v11779_v6 = vld [vmem:[#allocation5 + $0x858] ss:$48 sps:$4 sm:$0xff]  }
 0x1a8   :  { %3379 = vmatprep.subr.bf16.mxu1 %v11763_v7  ;;  %2993 = vmatprep.subr.bf16.mxu0 %v11766_v18  ;;  %v11782_v7 = vld [vmem:[#allocation5 + $0x850] ss:$48 sps:$4 sm:$0xff]   ;;  %v11787_v18 = vld [vmem:[#allocation5 + $0x8bc] ss:$48 sps:$4 sm:$0xff]  }
 0x1ab   :  { %3380 = vmatpush1.bf16.msra.mxu1 %v11761_v20  ;;  %2994 = vmatpush1.bf16.msra.mxu0 %v11764_v27  ;;  %v11790_v20 = vld [vmem:[#allocation5 + $0x8b4] ss:$48 sps:$4 sm:$0xff]   ;;  %v11785_v27 = vld [vmem:[#allocation5 + $0x8b8] ss:$48 sps:$4 sm:$0xff]  }
 0x1ac   :  { %3381 = vmatprep.subr.bf16.mxu1 %v11769_v28  ;;  %2995 = vmatprep.subr.bf16.mxu0 %v11772_v34  ;;  %v11788_v28 = vld [vmem:[#allocation5 + $0x8b0] ss:$48 sps:$4 sm:$0xff]   ;;  %v11793_v34 = vld [vmem:[#allocation5 + $0x2c] ss:$48 sps:$4 sm:$0xff]  }
 0x1ad   :  { %2847 = vmatmul.mubr.bf16.gmra.mrb[72].mxu0 %v12587_v37  ;;  %3233 = vmatmul.mubr.bf16.gmra.mrb[72].mxu1 %v12587_v37 }
 0x1ae   :  { %2856 = vmatprep.mubr.bf16.mxu0 %v12589_v38  ;;  %3242 = vmatprep.mubr.bf16.mxu1 %v12589_v38 }
 0x1af   :  { %3382 = vmatpush1.bf16.msra.mxu1 %v11767_v40  ;;  %2996 = vmatpush1.bf16.msra.mxu0 %v11770_v41  ;;  %v11796_v40 = vld [vmem:[#allocation5 + $0x24] ss:$48 sps:$4 sm:$0xff]   ;;  %v522_v41 = vlaneseq }
 0x1b0   :  { %3383 = vmatprep.subr.bf16.mxu1 %v11775_v47  ;;  %2997 = vmatprep.subr.bf16.mxu0 %v11778_v48 }
 0x1b1   :  { %v12831_v47 = vshrl.u32 %v522_v41, 7 }
 0x1b3   :  { %3384 = vmatpush1.bf16.msra.mxu1 %v11773_v56  ;;  %2998 = vmatpush1.bf16.msra.mxu0 %v11776_v57  ;;  %15051 = vst [vmem:[#allocation29_spill] sm:$0xff] %v12831_v47  ;;  %v12836_v48 = vsub.s32 0, %v12831_v47  ;;  %v12839_v56 = vsub.s32 2, %v12831_v47  ;;  %v518_v57 = vld [vmem:[#allocation7] sm:$0xff] }
 0x1b4   :  { %3385 = vmatprep.subr.bf16.mxu1 %v11781_v61  ;;  %2999 = vmatprep.subr.bf16.mxu0 %v11784_v62  ;;  %v12842_v61 = vsub.s32 1, %v12831_v47  ;;  %v14865_v62 = vsub.s32 3, %v12831_v47 }
 0x1b5   :  { %2857 = vmatmul.mubr.bf16.gmra.mrb[76].mxu0 %v12595_v52  ;;  %3243 = vmatmul.mubr.bf16.gmra.mrb[76].mxu1 %v12595_v52  ;;  %15052 = vst [vmem:[#allocation30_spill] sm:$0xff] %v12836_v48  ;;  %15053 = vst [vmem:[#allocation31_spill] sm:$0xff] %v12839_v56 }
 0x1b6   :  { %2866 = vmatprep.mubr.bf16.mxu0 %v12597_v53  ;;  %3252 = vmatprep.mubr.bf16.mxu1 %v12597_v53  ;;  %15054 = vst [vmem:[#allocation32_spill] sm:$0xff] %v12842_v61 }
 0x1b7   :  { %3386 = vmatpush1.bf16.msra.mxu1 %v11779_v6  ;;  %3000 = vmatpush1.bf16.msra.mxu0 %v11782_v7  ;;  %v12848_v6 = vrot.slane %v518_v57, %v12836_v48  ;;  %v12851_v7 = vrot.slane %v518_v57, %v12839_v56 }
 0x1b8   :  { %3387 = vmatprep.subr.bf16.mxu1 %v11787_v18  ;;  %3001 = vmatprep.subr.bf16.mxu0 %v11790_v20  ;;  %v12854_v18 = vrot.slane %v518_v57, %v12842_v61  ;;  %v12858_v20 = vrot.slane %v518_v57, %v14865_v62 }
 0x1bb   :  { %3388 = vmatpush1.bf16.msra.mxu1 %v11785_v27  ;;  %3002 = vmatpush1.bf16.msra.mxu0 %v11788_v28 }
 0x1bc   :  { %3952 = vmatprep.subr.bf16.mxu1 %v11793_v34  ;;  %3566 = vmatprep.subr.bf16.mxu0 %v11796_v40 }
 0x1bd   :  { %2867 = vmatmul.mubr.bf16.gmra.mrb[80].mxu0 %v12603_v2  ;;  %3253 = vmatmul.mubr.bf16.gmra.mrb[80].mxu1 %v12603_v2 }
 0x1be   :  { %2876 = vmatprep.mubr.bf16.mxu0 %v12605_v3  ;;  %3262 = vmatprep.mubr.bf16.mxu1 %v12605_v3 }
 0x1c5   :  { %2877 = vmatmul.mubr.bf16.gmra.mrb[84].mxu0 %v12611_v8  ;;  %3263 = vmatmul.mubr.bf16.gmra.mrb[84].mxu1 %v12611_v8 }
 0x1c6   :  { %2886 = vmatprep.mubr.bf16.mxu0 %v12613_v10  ;;  %3272 = vmatprep.mubr.bf16.mxu1 %v12613_v10 }
 0x1cd   :  { %2887 = vmatmul.mubr.bf16.gmra.mrb[88].mxu0 %v12619_v16  ;;  %3273 = vmatmul.mubr.bf16.gmra.mrb[88].mxu1 %v12619_v16 }
 0x1ce   :  { %2896 = vmatprep.mubr.bf16.mxu0 %v12621_v17  ;;  %3282 = vmatprep.mubr.bf16.mxu1 %v12621_v17 }
 0x1d5   :  { %2897 = vmatmul.mubr.bf16.gmra.mrb[92].mxu0 %v12627_v22  ;;  %3283 = vmatmul.mubr.bf16.gmra.mrb[92].mxu1 %v12627_v22 }
 0x1d6   :  { %2906 = vmatprep.mubr.bf16.mxu0 %v12629_v25  ;;  %3292 = vmatprep.mubr.bf16.mxu1 %v12629_v25 }
 0x1dd   :  { %2907 = vmatmul.mubr.bf16.gmra.mrb[96].mxu0 %v12635_v30  ;;  %3293 = vmatmul.mubr.bf16.gmra.mrb[96].mxu1 %v12635_v30 }
 0x1de   :  { %2916 = vmatprep.mubr.bf16.mxu0 %v12637_v31  ;;  %3302 = vmatprep.mubr.bf16.mxu1 %v12637_v31 }
 0x1e5   :  { %2917 = vmatmul.mubr.bf16.gmra.mrb[100].mxu0 %v12643_v36  ;;  %3303 = vmatmul.mubr.bf16.gmra.mrb[100].mxu1 %v12643_v36 }
 0x1e6   :  { %2926 = vmatprep.mubr.bf16.mxu0 %v12645_v39  ;;  %3312 = vmatprep.mubr.bf16.mxu1 %v12645_v39 }
 0x1ed   :  { %2927 = vmatmul.mubr.bf16.gmra.mrb[104].mxu0 %v12651_v44  ;;  %3313 = vmatmul.mubr.bf16.gmra.mrb[104].mxu1 %v12651_v44 }
 0x1ee   :  { %2936 = vmatprep.mubr.bf16.mxu0 %v12653_v45  ;;  %3322 = vmatprep.mubr.bf16.mxu1 %v12653_v45 }
 0x1f0   :  { %v2249_v27 = vpop.f32.mrb[0].mxu0  ;;  %v2635_v28 = vpop.f32.mrb[0].mxu1 }
 0x1f1   :  { %v10338_v34 = vadd.f32 %v2249_v27, %v12848_v6  ;;  %v10402_v40 = vadd.f32 %v2635_v28, %v12851_v7  ;;  %v2251_v41 = vpop.f32.mrb[1].mxu0  ;;  %v2637_v21 = vpop.f32.mrb[1].mxu1 }
 0x1f2   :  { %v10339_v56 = vadd.f32 %v2251_v41, %v12854_v18  ;;  %v10403_v61 = vadd.f32 %v2637_v21, %v12858_v20  ;;  %v2253_v48 = vpop.f32.mrb[2].mxu0  ;;  %v2639_v44 = vpop.f32.mrb[2].mxu1 }
 0x1f3   :  { %v10340_v57 = vadd.f32 %v2253_v48, %v12848_v6  ;;  %v10404_v62 = vadd.f32 %v2639_v44, %v12851_v7  ;;  %v2255_v47 = vpop.f32.mrb[3].mxu0  ;;  %v2641_v45 = vpop.f32.mrb[3].mxu1  ;;  %v4338_v36 = vmax.f32 %v10338_v34, 0.0  ;;  %v4340_v28 = vmax.f32 %v10402_v40, 0.0 }
 0x1f4   :  { %v10341_v39 = vadd.f32 %v2255_v47, %v12854_v18  ;;  %v10405_v27 = vadd.f32 %v2641_v45, %v12858_v20  ;;  %v4339_v21 = vmax.f32 %v10339_v56, 0.0  ;;  %v4341_v41 = vmax.f32 %v10403_v61, 0.0 }
 0x1f5   :  { %v4350_v31 = vmax.f32 %v10340_v57, 0.0  ;;  %v4352_v30 = vmax.f32 %v10404_v62, 0.0  ;;  %2937 = vmatmul.mubr.bf16.gmra.mrb[108].mxu0 %v12659_v50  ;;  %3323 = vmatmul.mubr.bf16.gmra.mrb[108].mxu1 %v12659_v50 }
 0x1f6   :  { %v4351_v25 = vmax.f32 %v10341_v39, 0.0  ;;  %v4353_v48 = vmax.f32 %v10405_v27, 0.0  ;;  %2946 = vmatprep.mubr.bf16.mxu0 %v12661_v54  ;;  %3332 = vmatprep.mubr.bf16.mxu1 %v12661_v54 }
 0x1f7   :  { %v12874_v44 = vpack.c.bf16 %v4350_v31, %v4338_v36  ;;  %v12876_v47 = vpack.c.bf16 %v4352_v30, %v4340_v28 }
 0x1f8   :  { %v12878_v45 = vpack.c.bf16 %v4351_v25, %v4339_v21  ;;  %v2259_v34 = vpop.f32.mrb[4].mxu0  ;;  %v2645_v62 = vpop.f32.mrb[4].mxu1  ;;  %v12880_v40 = vpack.c.bf16 %v4353_v48, %v4341_v41 }
 0x1f9   :  { %15055 = vst [vmem:[#allocation33_spill] sm:$0xff] %v12874_v44  ;;  %15056 = vst [vmem:[#allocation34_spill] sm:$0xff] %v12876_v47  ;;  %v10342_v57 = vadd.f32 %v2259_v34, %v12848_v6  ;;  %v10406_v56 = vadd.f32 %v2645_v62, %v12851_v7  ;;  %v2261_v39 = vpop.f32.mrb[5].mxu0  ;;  %v2647_v61 = vpop.f32.mrb[5].mxu1 }
 0x1fa   :  { %15057 = vst [vmem:[#allocation35_spill] sm:$0xff] %v12878_v45  ;;  %15058 = vst [vmem:[#allocation36_spill] sm:$0xff] %v12880_v40  ;;  %v10343_v27 = vadd.f32 %v2261_v39, %v12854_v18  ;;  %v10407_v54 = vadd.f32 %v2647_v61, %v12858_v20  ;;  %v2263_v31 = vpop.f32.mrb[6].mxu0  ;;  %v2649_v36 = vpop.f32.mrb[6].mxu1 }
 0x1fb   :  { %v10344_v30 = vadd.f32 %v2263_v31, %v12848_v6  ;;  %v10408_v25 = vadd.f32 %v2649_v36, %v12851_v7  ;;  %v2265_v28 = vpop.f32.mrb[7].mxu0  ;;  %v2651_v21 = vpop.f32.mrb[7].mxu1  ;;  %v4362_v34 = vmax.f32 %v10342_v57, 0.0  ;;  %v4364_v62 = vmax.f32 %v10406_v56, 0.0 }
 0x1fc   :  { %v10345_v41 = vadd.f32 %v2265_v28, %v12854_v18  ;;  %v10409_v48 = vadd.f32 %v2651_v21, %v12858_v20  ;;  %v4363_v39 = vmax.f32 %v10343_v27, 0.0  ;;  %v4365_v61 = vmax.f32 %v10407_v54, 0.0 }
 0x1fd   :  { %v4374_v47 = vmax.f32 %v10344_v30, 0.0  ;;  %v4376_v40 = vmax.f32 %v10408_v25, 0.0  ;;  %2947 = vmatmul.mubr.bf16.gmra.mrb[112].mxu0 %v12667_v59  ;;  %3333 = vmatmul.mubr.bf16.gmra.mrb[112].mxu1 %v12667_v59 }
 0x1fe   :  { %v4375_v44 = vmax.f32 %v10345_v41, 0.0  ;;  %v4377_v31 = vmax.f32 %v10409_v48, 0.0  ;;  %2956 = vmatprep.mubr.bf16.mxu0 %v12669_v60  ;;  %3342 = vmatprep.mubr.bf16.mxu1 %v12669_v60 }
 0x1ff   :  { %v12894_v36 = vpack.c.bf16 %v4374_v47, %v4362_v34  ;;  %v12896_v28 = vpack.c.bf16 %v4376_v40, %v4364_v62 }
 0x200   :  { %v12898_v57 = vpack.c.bf16 %v4375_v44, %v4363_v39  ;;  %v2269_v56 = vpop.f32.mrb[8].mxu0  ;;  %v2655_v30 = vpop.f32.mrb[8].mxu1  ;;  %v12900_v25 = vpack.c.bf16 %v4377_v31, %v4365_v61 }
 0x201   :  { %15059 = vst [vmem:[#allocation37_spill] sm:$0xff] %v12894_v36  ;;  %15060 = vst [vmem:[#allocation38_spill] sm:$0xff] %v12896_v28  ;;  %v10346_v21 = vadd.f32 %v2269_v56, %v12848_v6  ;;  %v10410_v54 = vadd.f32 %v2655_v30, %v12851_v7  ;;  %v2271_v27 = vpop.f32.mrb[9].mxu0  ;;  %v2657_v41 = vpop.f32.mrb[9].mxu1 }
 0x202   :  { %15061 = vst [vmem:[#allocation39_spill] sm:$0xff] %v12898_v57  ;;  %15062 = vst [vmem:[#allocation40_spill] sm:$0xff] %v12900_v25  ;;  %v10347_v48 = vadd.f32 %v2271_v27, %v12854_v18  ;;  %v10411_v45 = vadd.f32 %v2657_v41, %v12858_v20  ;;  %v2273_v47 = vpop.f32.mrb[10].mxu0  ;;  %v2659_v34 = vpop.f32.mrb[10].mxu1 }
 0x203   :  { %v10348_v40 = vadd.f32 %v2273_v47, %v12848_v6  ;;  %v10412_v44 = vadd.f32 %v2659_v34, %v12851_v7  ;;  %v2275_v62 = vpop.f32.mrb[11].mxu0  ;;  %v2661_v39 = vpop.f32.mrb[11].mxu1  ;;  %v4386_v56 = vmax.f32 %v10346_v21, 0.0  ;;  %v4388_v30 = vmax.f32 %v10410_v54, 0.0 }
 0x204   :  { %v10349_v61 = vadd.f32 %v2275_v62, %v12854_v18  ;;  %v10413_v31 = vadd.f32 %v2661_v39, %v12858_v20  ;;  %v4387_v27 = vmax.f32 %v10347_v48, 0.0  ;;  %v4389_v41 = vmax.f32 %v10411_v45, 0.0 }
 0x205   :  { %v4398_v28 = vmax.f32 %v10348_v40, 0.0  ;;  %v4400_v25 = vmax.f32 %v10412_v44, 0.0  ;;  %2957 = vmatmul.mubr.bf16.gmra.mrb[116].mxu0 %v12675_v1  ;;  %3343 = vmatmul.mubr.bf16.gmra.mrb[116].mxu1 %v12675_v1 }
 0x206   :  { %v4399_v36 = vmax.f32 %v10349_v61, 0.0  ;;  %v4401_v47 = vmax.f32 %v10413_v31, 0.0  ;;  %2966 = vmatprep.mubr.bf16.mxu0 %v12677_v4  ;;  %3352 = vmatprep.mubr.bf16.mxu1 %v12677_v4 }
 0x207   :  { %v12914_v34 = vpack.c.bf16 %v4398_v28, %v4386_v56  ;;  %v12916_v62 = vpack.c.bf16 %v4400_v25, %v4388_v30 }
 0x208   :  { %v12918_v21 = vpack.c.bf16 %v4399_v36, %v4387_v27  ;;  %v2279_v54 = vpop.f32.mrb[12].mxu0  ;;  %v2665_v40 = vpop.f32.mrb[12].mxu1  ;;  %v12920_v44 = vpack.c.bf16 %v4401_v47, %v4389_v41 }
 0x209   :  { %15063 = vst [vmem:[#allocation41_spill] sm:$0xff] %v12914_v34  ;;  %15064 = vst [vmem:[#allocation42_spill] sm:$0xff] %v12916_v62  ;;  %v10350_v39 = vadd.f32 %v2279_v54, %v12848_v6  ;;  %v10414_v45 = vadd.f32 %v2665_v40, %v12851_v7  ;;  %v2281_v48 = vpop.f32.mrb[13].mxu0  ;;  %v2667_v61 = vpop.f32.mrb[13].mxu1 }
 0x20a   :  { %15065 = vst [vmem:[#allocation43_spill] sm:$0xff] %v12918_v21  ;;  %15066 = vst [vmem:[#allocation44_spill] sm:$0xff] %v12920_v44  ;;  %v10351_v31 = vadd.f32 %v2281_v48, %v12854_v18  ;;  %v10415_v57 = vadd.f32 %v2667_v61, %v12858_v20  ;;  %v2283_v28 = vpop.f32.mrb[14].mxu0  ;;  %v2669_v56 = vpop.f32.mrb[14].mxu1 }
 0x20b   :  { %v10352_v25 = vadd.f32 %v2283_v28, %v12848_v6  ;;  %v10416_v36 = vadd.f32 %v2669_v56, %v12851_v7  ;;  %v2285_v30 = vpop.f32.mrb[15].mxu0  ;;  %v2671_v27 = vpop.f32.mrb[15].mxu1  ;;  %v4410_v54 = vmax.f32 %v10350_v39, 0.0  ;;  %v4412_v40 = vmax.f32 %v10414_v45, 0.0 }
 0x20c   :  { %v10353_v41 = vadd.f32 %v2285_v30, %v12854_v18  ;;  %v10417_v47 = vadd.f32 %v2671_v27, %v12858_v20  ;;  %v4411_v48 = vmax.f32 %v10351_v31, 0.0  ;;  %v4413_v61 = vmax.f32 %v10415_v57, 0.0 }
 0x20d   :  { %v4422_v62 = vmax.f32 %v10352_v25, 0.0  ;;  %v4424_v44 = vmax.f32 %v10416_v36, 0.0  ;;  %2967 = vmatmul.mubr.bf16.gmra.mrb[120].mxu0 %v12683_v13  ;;  %3353 = vmatmul.mubr.bf16.gmra.mrb[120].mxu1 %v12683_v13 }
 0x20e   :  { %v4423_v34 = vmax.f32 %v10353_v41, 0.0  ;;  %v4425_v28 = vmax.f32 %v10417_v47, 0.0  ;;  %2976 = vmatprep.mubr.bf16.mxu0 %v12685_v14  ;;  %3362 = vmatprep.mubr.bf16.mxu1 %v12685_v14  ;;  %v11797_v14 = vld [vmem:[#allocation5 + $0x88] ss:$48 sps:$4 sm:$0xff]  }
 0x20f   :  { %v12934_v56 = vpack.c.bf16 %v4422_v62, %v4410_v54  ;;  %v12936_v30 = vpack.c.bf16 %v4424_v44, %v4412_v40 }
 0x210   :  { %v12938_v39 = vpack.c.bf16 %v4423_v34, %v4411_v48  ;;  %v2289_v45 = vpop.f32.mrb[16].mxu0  ;;  %v2675_v25 = vpop.f32.mrb[16].mxu1  ;;  %v12940_v36 = vpack.c.bf16 %v4425_v28, %v4413_v61 }
 0x211   :  { %15067 = vst [vmem:[#allocation45_spill] sm:$0xff] %v12934_v56  ;;  %15068 = vst [vmem:[#allocation46_spill] sm:$0xff] %v12936_v30  ;;  %v10354_v27 = vadd.f32 %v2289_v45, %v12848_v6  ;;  %v10418_v57 = vadd.f32 %v2675_v25, %v12851_v7  ;;  %v2291_v31 = vpop.f32.mrb[17].mxu0  ;;  %v2677_v41 = vpop.f32.mrb[17].mxu1 }
 0x212   :  { %15069 = vst [vmem:[#allocation47_spill] sm:$0xff] %v12938_v39  ;;  %15070 = vst [vmem:[#allocation48_spill] sm:$0xff] %v12940_v36  ;;  %v10355_v47 = vadd.f32 %v2291_v31, %v12854_v18  ;;  %v10419_v21 = vadd.f32 %v2677_v41, %v12858_v20  ;;  %v2293_v62 = vpop.f32.mrb[18].mxu0  ;;  %v2679_v54 = vpop.f32.mrb[18].mxu1  ;;  %v15071_v39 = vmov 0  }
 0x213   :  { %v10356_v44 = vadd.f32 %v2293_v62, %v12848_v6  ;;  %v10420_v34 = vadd.f32 %v2679_v54, %v12851_v7  ;;  %v2295_v40 = vpop.f32.mrb[19].mxu0  ;;  %v2681_v48 = vpop.f32.mrb[19].mxu1  ;;  %v4434_v45 = vmax.f32 %v10354_v27, 0.0  ;;  %v4436_v25 = vmax.f32 %v10418_v57, 0.0 }
 0x214   :  { %v10357_v61 = vadd.f32 %v2295_v40, %v12854_v18  ;;  %v10421_v28 = vadd.f32 %v2681_v48, %v12858_v20  ;;  %v4435_v31 = vmax.f32 %v10355_v47, 0.0  ;;  %v4437_v41 = vmax.f32 %v10419_v21, 0.0 }
 0x215   :  { %v4446_v30 = vmax.f32 %v10356_v44, 0.0  ;;  %v4448_v36 = vmax.f32 %v10420_v34, 0.0  ;;  %2977 = vmatmul.mubr.bf16.gmra.mrb[124].mxu0 %v12691_v19  ;;  %3363 = vmatmul.mubr.bf16.gmra.mrb[124].mxu1 %v12691_v19 }
 0x216   :  { %v4447_v56 = vmax.f32 %v10357_v61, 0.0  ;;  %v4449_v62 = vmax.f32 %v10421_v28, 0.0  ;;  %3019 = vmatprep.mubr.bf16.mxu0 %v15071_v39  ;;  %3405 = vmatprep.mubr.bf16.mxu1 %v15071_v39 }
 0x217   :  { %v12954_v54 = vpack.c.bf16 %v4446_v30, %v4434_v45  ;;  %v12956_v40 = vpack.c.bf16 %v4448_v36, %v4436_v25  ;;  %v11791_v36 = vld [vmem:[#allocation5 + $0x28] ss:$48 sps:$4 sm:$0xff]   ;;  %v11794_v25 = vld [vmem:[#allocation5 + $0x20] ss:$48 sps:$4 sm:$0xff]  }
 0x218   :  { %v12958_v27 = vpack.c.bf16 %v4447_v56, %v4435_v31  ;;  %v2299_v57 = vpop.f32.mrb[20].mxu0  ;;  %v2685_v44 = vpop.f32.mrb[20].mxu1  ;;  %v12960_v34 = vpack.c.bf16 %v4449_v62, %v4437_v41 }
 0x219   :  { %15072 = vst [vmem:[#allocation49_spill] sm:$0xff] %v12954_v54  ;;  %15073 = vst [vmem:[#allocation50_spill] sm:$0xff] %v12956_v40  ;;  %v10358_v48 = vadd.f32 %v2299_v57, %v12848_v6  ;;  %v10422_v21 = vadd.f32 %v2685_v44, %v12851_v7  ;;  %v2301_v47 = vpop.f32.mrb[21].mxu0  ;;  %v2687_v61 = vpop.f32.mrb[21].mxu1  ;;  %v11799_v40 = vld [vmem:[#allocation5 + $0x8c] ss:$48 sps:$4 sm:$0xff]  }
 0x21a   :  { %15074 = vst [vmem:[#allocation51_spill] sm:$0xff] %v12958_v27  ;;  %15075 = vst [vmem:[#allocation52_spill] sm:$0xff] %v12960_v34  ;;  %v10359_v28 = vadd.f32 %v2301_v47, %v12854_v18  ;;  %v10423_v19 = vadd.f32 %v2687_v61, %v12858_v20  ;;  %v2303_v30 = vpop.f32.mrb[22].mxu0  ;;  %v2689_v45 = vpop.f32.mrb[22].mxu1  ;;  %v11802_v34 = vld [vmem:[#allocation5 + $0x84] ss:$48 sps:$4 sm:$0xff]  }
 0x21b   :  { %v10360_v56 = vadd.f32 %v2303_v30, %v12848_v6  ;;  %v10424_v31 = vadd.f32 %v2689_v45, %v12851_v7  ;;  %v2305_v41 = vpop.f32.mrb[23].mxu0  ;;  %v2691_v62 = vpop.f32.mrb[23].mxu1  ;;  %v4458_v54 = vmax.f32 %v10358_v48, 0.0  ;;  %v4460_v47 = vmax.f32 %v10422_v21, 0.0  ;;  %v11805_v48 = vld [vmem:[#allocation5 + $0xec] ss:$48 sps:$4 sm:$0xff]  }
 0x21c   :  { %v10361_v57 = vadd.f32 %v2305_v41, %v12854_v18  ;;  %v10425_v44 = vadd.f32 %v2691_v62, %v12858_v20  ;;  %v4459_v30 = vmax.f32 %v10359_v28, 0.0  ;;  %v4461_v13 = vmax.f32 %v10423_v19, 0.0  ;;  %v11800_v41 = vld [vmem:[#allocation5 + $0x80] ss:$48 sps:$4 sm:$0xff]   ;;  %v11808_v21 = vld [vmem:[#allocation5 + $0xe4] ss:$48 sps:$4 sm:$0xff]  }
 0x21d   :  { %v4470_v27 = vmax.f32 %v10360_v56, 0.0  ;;  %v4472_v61 = vmax.f32 %v10424_v31, 0.0  ;;  %3020 = vmatmul.mubr.bf16.vlgmr.msra.gmra.mrb[64].mxu0 %v12697_v29  ;;  %3406 = vmatmul.mubr.bf16.vlgmr.msra.gmra.mrb[64].mxu1 %v12697_v29 }
 0x21e   :  { %v4471_v45 = vmax.f32 %v10361_v57, 0.0  ;;  %v4473_v4 = vmax.f32 %v10425_v44, 0.0  ;;  %3953 = vmatpush1.bf16.msra.mxu1 %v11791_v36  ;;  %3567 = vmatpush1.bf16.msra.mxu0 %v11794_v25 }
 0x21f   :  { %v12972_v1 = vpack.c.bf16 %v4470_v27, %v4458_v54  ;;  %3029 = vmatprep.mubr.bf16.mxu0 %v15071_v39  ;;  %3415 = vmatprep.mubr.bf16.mxu1 %v15071_v39  ;;  %v12976_v56 = vpack.c.bf16 %v4472_v61, %v4460_v47 }
 0x220   :  { %v12978_v31 = vpack.c.bf16 %v4471_v45, %v4459_v30  ;;  %v2309_v62 = vpop.f32.mrb[24].mxu0  ;;  %v2695_v28 = vpop.f32.mrb[24].mxu1  ;;  %3954 = vmatprep.subr.bf16.mxu1 %v11799_v40  ;;  %3568 = vmatprep.subr.bf16.mxu0 %v11802_v34  ;;  %v12980_v19 = vpack.c.bf16 %v4473_v4, %v4461_v13  ;;  %v11803_v34 = vld [vmem:[#allocation5 + $0xe8] ss:$48 sps:$4 sm:$0xff]   ;;  %v11806_v45 = vld [vmem:[#allocation5 + $0xe0] ss:$48 sps:$4 sm:$0xff]  }
 0x221   :  { %15076 = vst [vmem:[#allocation53_spill] sm:$0xff] %v12972_v1  ;;  %15077 = vst [vmem:[#allocation54_spill] sm:$0xff] %v12976_v56  ;;  %v10362_v36 = vadd.f32 %v2309_v62, %v12848_v6  ;;  %v10426_v54 = vadd.f32 %v2695_v28, %v12851_v7  ;;  %v2311_v27 = vpop.f32.mrb[25].mxu0  ;;  %v2697_v25 = vpop.f32.mrb[25].mxu1 }
 0x222   :  { %15078 = vst [vmem:[#allocation55_spill] sm:$0xff] %v12978_v31  ;;  %15079 = vst [vmem:[#allocation56_spill] sm:$0xff] %v12980_v19  ;;  %v10363_v57 = vadd.f32 %v2311_v27, %v12854_v18  ;;  %v10427_v44 = vadd.f32 %v2697_v25, %v12858_v20  ;;  %v2313_v47 = vpop.f32.mrb[26].mxu0  ;;  %v2699_v61 = vpop.f32.mrb[26].mxu1  ;;  %3955 = vmatpush1.bf16.msra.mxu1 %v11797_v14  ;;  %3569 = vmatpush1.bf16.msra.mxu0 %v11800_v41  ;;  %v11811_v27 = vld [vmem:[#allocation5 + $0x14c] ss:$48 sps:$4 sm:$0xff]  }
 0x223   :  { %v10364_v30 = vadd.f32 %v2313_v47, %v12848_v6  ;;  %v10428_v40 = vadd.f32 %v2699_v61, %v12851_v7  ;;  %v2315_v4 = vpop.f32.mrb[27].mxu0  ;;  %v2701_v13 = vpop.f32.mrb[27].mxu1  ;;  %3956 = vmatprep.subr.bf16.mxu1 %v11805_v48  ;;  %3570 = vmatprep.subr.bf16.mxu0 %v11808_v21  ;;  %v11814_v25 = vld [vmem:[#allocation5 + $0x144] ss:$48 sps:$4 sm:$0xff]   ;;  %v4482_v56 = vmax.f32 %v10362_v36, 0.0  ;;  %v4484_v19 = vmax.f32 %v10426_v54, 0.0 }
 0x224   :  { %v10365_v62 = vadd.f32 %v2315_v4, %v12854_v18  ;;  %v10429_v28 = vadd.f32 %v2701_v13, %v12858_v20  ;;  %v4483_v47 = vmax.f32 %v10363_v57, 0.0  ;;  %v4485_v61 = vmax.f32 %v10427_v44, 0.0  ;;  %v11809_v36 = vld [vmem:[#allocation5 + $0x148] ss:$48 sps:$4 sm:$0xff]   ;;  %v11812_v54 = vld [vmem:[#allocation5 + $0x140] ss:$48 sps:$4 sm:$0xff]  }
 0x225   :  { %v4494_v14 = vmax.f32 %v10364_v30, 0.0  ;;  %v4496_v41 = vmax.f32 %v10428_v40, 0.0  ;;  %3030 = vmatmul.mubr.bf16.gmra.mrb[68].mxu0 %v12703_v46  ;;  %3416 = vmatmul.mubr.bf16.gmra.mrb[68].mxu1 %v12703_v46  ;;  %v11817_v57 = vld [vmem:[#allocation5 + $0x1ac] ss:$48 sps:$4 sm:$0xff]   ;;  %v11820_v44 = vld [vmem:[#allocation5 + $0x1a4] ss:$48 sps:$4 sm:$0xff]  }
 0x226   :  { %v4495_v1 = vmax.f32 %v10365_v62, 0.0  ;;  %v4497_v48 = vmax.f32 %v10429_v28, 0.0  ;;  %3039 = vmatprep.mubr.bf16.mxu0 %v15071_v39  ;;  %3425 = vmatprep.mubr.bf16.mxu1 %v15071_v39 }
 0x227   :  { %v12994_v21 = vpack.c.bf16 %v4494_v14, %v4482_v56  ;;  %3957 = vmatpush1.bf16.msra.mxu1 %v11803_v34  ;;  %3571 = vmatpush1.bf16.msra.mxu0 %v11806_v45  ;;  %v12996_v30 = vpack.c.bf16 %v4496_v41, %v4484_v19 }
 0x228   :  { %v12998_v40 = vpack.c.bf16 %v4495_v1, %v4483_v47  ;;  %v2319_v4 = vpop.f32.mrb[28].mxu0  ;;  %v2705_v13 = vpop.f32.mrb[28].mxu1  ;;  %3958 = vmatprep.subr.bf16.mxu1 %v11811_v27  ;;  %3572 = vmatprep.subr.bf16.mxu0 %v11814_v25  ;;  %v13000_v62 = vpack.c.bf16 %v4497_v48, %v4485_v61  ;;  %v11815_v61 = vld [vmem:[#allocation5 + $0x1a8] ss:$48 sps:$4 sm:$0xff]   ;;  %v11818_v48 = vld [vmem:[#allocation5 + $0x1a0] ss:$48 sps:$4 sm:$0xff]  }
 0x229   :  { %15080 = vst [vmem:[#allocation57_spill] sm:$0xff] %v12994_v21  ;;  %15081 = vst [vmem:[#allocation58_spill] sm:$0xff] %v12996_v30  ;;  %v10366_v28 = vadd.f32 %v2319_v4, %v12848_v6  ;;  %v10430_v56 = vadd.f32 %v2705_v13, %v12851_v7  ;;  %v2321_v34 = vpop.f32.mrb[29].mxu0  ;;  %v2707_v45 = vpop.f32.mrb[29].mxu1 }
 0x22a   :  { %15082 = vst [vmem:[#allocation59_spill] sm:$0xff] %v12998_v40  ;;  %15083 = vst [vmem:[#allocation60_spill] sm:$0xff] %v13000_v62  ;;  %v10367_v14 = vadd.f32 %v2321_v34, %v12854_v18  ;;  %v10431_v19 = vadd.f32 %v2707_v45, %v12858_v20  ;;  %v2323_v1 = vpop.f32.mrb[30].mxu0  ;;  %v2709_v41 = vpop.f32.mrb[30].mxu1  ;;  %v11823_v34 = vld [vmem:[#allocation5 + $0x20c] ss:$48 sps:$4 sm:$0xff]  }
 0x22b   :  { %v10368_v47 = vadd.f32 %v2323_v1, %v12848_v6  ;;  %v10432_v27 = vadd.f32 %v2709_v41, %v12851_v7  ;;  %v2325_v25 = vpop.f32.mrb[31].mxu0  ;;  %v2711_v30 = vpop.f32.mrb[31].mxu1  ;;  %3959 = vmatpush1.bf16.msra.mxu1 %v11809_v36  ;;  %3573 = vmatpush1.bf16.msra.mxu0 %v11812_v54  ;;  %v11826_v45 = vld [vmem:[#allocation5 + $0x204] ss:$48 sps:$4 sm:$0xff]   ;;  %v4506_v62 = vmax.f32 %v10366_v28, 0.0  ;;  %v4508_v21 = vmax.f32 %v10430_v56, 0.0 }
 0x22c   :  { %v10369_v4 = vadd.f32 %v2325_v25, %v12854_v18  ;;  %v10433_v13 = vadd.f32 %v2711_v30, %v12858_v20  ;;  %3960 = vmatprep.subr.bf16.mxu1 %v11817_v57  ;;  %3574 = vmatprep.subr.bf16.mxu0 %v11820_v44  ;;  %v4507_v36 = vmax.f32 %v10367_v14, 0.0  ;;  %v4509_v54 = vmax.f32 %v10431_v19, 0.0  ;;  %v11821_v57 = vld [vmem:[#allocation5 + $0x208] ss:$48 sps:$4 sm:$0xff]   ;;  %v11824_v44 = vld [vmem:[#allocation5 + $0x200] ss:$48 sps:$4 sm:$0xff]  }
 0x22d   :  { %v4518_v40 = vmax.f32 %v10368_v47, 0.0  ;;  %v4520_v1 = vmax.f32 %v10432_v27, 0.0  ;;  %3040 = vmatmul.mubr.bf16.gmra.mrb[72].mxu0 %v12709_v0  ;;  %3426 = vmatmul.mubr.bf16.gmra.mrb[72].mxu1 %v12709_v0  ;;  %v11829_v14 = vld [vmem:[#allocation5 + $0x26c] ss:$48 sps:$4 sm:$0xff]   ;;  %v11832_v19 = vld [vmem:[#allocation5 + $0x264] ss:$48 sps:$4 sm:$0xff]  }
 0x22e   :  { %v4519_v41 = vmax.f32 %v10369_v4, 0.0  ;;  %v4521_v31 = vmax.f32 %v10433_v13, 0.0  ;;  %3049 = vmatprep.mubr.bf16.mxu0 %v15071_v39  ;;  %3435 = vmatprep.mubr.bf16.mxu1 %v15071_v39 }
 0x22f   :  { %v13014_v30 = vpack.c.bf16 %v4518_v40, %v4506_v62  ;;  %3961 = vmatpush1.bf16.msra.mxu1 %v11815_v61  ;;  %3575 = vmatpush1.bf16.msra.mxu0 %v11818_v48  ;;  %v13016_v28 = vpack.c.bf16 %v4520_v1, %v4508_v21 }
 0x230   :  { %v13018_v56 = vpack.c.bf16 %v4519_v41, %v4507_v36  ;;  %v2329_v47 = vpop.f32.mrb[32].mxu0  ;;  %v2715_v27 = vpop.f32.mrb[32].mxu1  ;;  %3962 = vmatprep.subr.bf16.mxu1 %v11823_v34  ;;  %3576 = vmatprep.subr.bf16.mxu0 %v11826_v45  ;;  %v13020_v25 = vpack.c.bf16 %v4521_v31, %v4509_v54  ;;  %v11827_v31 = vld [vmem:[#allocation5 + $0x268] ss:$48 sps:$4 sm:$0xff]   ;;  %v11830_v54 = vld [vmem:[#allocation5 + $0x260] ss:$48 sps:$4 sm:$0xff]  }
 0x231   :  { %15084 = vst [vmem:[#allocation61_spill] sm:$0xff] %v13014_v30  ;;  %15085 = vst [vmem:[#allocation62_spill] sm:$0xff] %v13016_v28  ;;  %v10370_v4 = vadd.f32 %v2329_v47, %v12848_v6  ;;  %v10434_v40 = vadd.f32 %v2715_v27, %v12851_v7  ;;  %v2331_v62 = vpop.f32.mrb[33].mxu0  ;;  %v2717_v61 = vpop.f32.mrb[33].mxu1 }
 0x232   :  { %15086 = vst [vmem:[#allocation63_spill] sm:$0xff] %v13018_v56  ;;  %15087 = vst [vmem:[#allocation64_spill] sm:$0xff] %v13020_v25  ;;  %v10371_v48 = vadd.f32 %v2331_v62, %v12854_v18  ;;  %v10435_v21 = vadd.f32 %v2717_v61, %v12858_v20  ;;  %v2333_v13 = vpop.f32.mrb[34].mxu0  ;;  %v2719_v1 = vpop.f32.mrb[34].mxu1  ;;  %v11835_v62 = vld [vmem:[#allocation5 + $0x2cc] ss:$48 sps:$4 sm:$0xff]  }
 0x233   :  { %v10372_v36 = vadd.f32 %v2333_v13, %v12848_v6  ;;  %v10436_v34 = vadd.f32 %v2719_v1, %v12851_v7  ;;  %v2335_v45 = vpop.f32.mrb[35].mxu0  ;;  %v2721_v41 = vpop.f32.mrb[35].mxu1  ;;  %3963 = vmatpush1.bf16.msra.mxu1 %v11821_v57  ;;  %3577 = vmatpush1.bf16.msra.mxu0 %v11824_v44  ;;  %v11838_v61 = vld [vmem:[#allocation5 + $0x2c4] ss:$48 sps:$4 sm:$0xff]   ;;  %v4530_v28 = vmax.f32 %v10370_v4, 0.0  ;;  %v4532_v25 = vmax.f32 %v10434_v40, 0.0 }
 0x234   :  { %v10373_v47 = vadd.f32 %v2335_v45, %v12854_v18  ;;  %v10437_v27 = vadd.f32 %v2721_v41, %v12858_v20  ;;  %3964 = vmatprep.subr.bf16.mxu1 %v11829_v14  ;;  %3578 = vmatprep.subr.bf16.mxu0 %v11832_v19  ;;  %v4531_v57 = vmax.f32 %v10371_v48, 0.0  ;;  %v4533_v44 = vmax.f32 %v10435_v21, 0.0  ;;  %v11833_v19 = vld [vmem:[#allocation5 + $0x2c8] ss:$48 sps:$4 sm:$0xff]   ;;  %v11836_v4 = vld [vmem:[#allocation5 + $0x2c0] ss:$48 sps:$4 sm:$0xff]  }
 0x235   :  { %v4542_v30 = vmax.f32 %v10372_v36, 0.0  ;;  %v4544_v13 = vmax.f32 %v10436_v34, 0.0  ;;  %3050 = vmatmul.mubr.bf16.gmra.mrb[76].mxu0 %v12715_v32  ;;  %3436 = vmatmul.mubr.bf16.gmra.mrb[76].mxu1 %v12715_v32  ;;  %v11841_v48 = vld [vmem:[#allocation5 + $0x32c] ss:$48 sps:$4 sm:$0xff]   ;;  %v11844_v21 = vld [vmem:[#allocation5 + $0x324] ss:$48 sps:$4 sm:$0xff]  }
 0x236   :  { %v4543_v1 = vmax.f32 %v10373_v47, 0.0  ;;  %v4545_v56 = vmax.f32 %v10437_v27, 0.0  ;;  %3059 = vmatprep.mubr.bf16.mxu0 %v15071_v39  ;;  %3445 = vmatprep.mubr.bf16.mxu1 %v15071_v39 }
 0x237   :  { %v13034_v14 = vpack.c.bf16 %v4542_v30, %v4530_v28  ;;  %3965 = vmatpush1.bf16.msra.mxu1 %v11827_v31  ;;  %3579 = vmatpush1.bf16.msra.mxu0 %v11830_v54  ;;  %v13036_v40 = vpack.c.bf16 %v4544_v13, %v4532_v25 }
 0x238   :  { %v13038_v36 = vpack.c.bf16 %v4543_v1, %v4531_v57  ;;  %v2339_v34 = vpop.f32.mrb[36].mxu0  ;;  %v2725_v45 = vpop.f32.mrb[36].mxu1  ;;  %3966 = vmatprep.subr.bf16.mxu1 %v11835_v62  ;;  %3580 = vmatprep.subr.bf16.mxu0 %v11838_v61  ;;  %v13040_v41 = vpack.c.bf16 %v4545_v56, %v4533_v44  ;;  %v11839_v56 = vld [vmem:[#allocation5 + $0x328] ss:$48 sps:$4 sm:$0xff]   ;;  %v11842_v44 = vld [vmem:[#allocation5 + $0x320] ss:$48 sps:$4 sm:$0xff]  }
 0x239   :  { %15088 = vst [vmem:[#allocation65_spill] sm:$0xff] %v13034_v14  ;;  %15089 = vst [vmem:[#allocation66_spill] sm:$0xff] %v13036_v40  ;;  %v10374_v47 = vadd.f32 %v2339_v34, %v12848_v6  ;;  %v10438_v30 = vadd.f32 %v2725_v45, %v12851_v7  ;;  %v2341_v28 = vpop.f32.mrb[37].mxu0  ;;  %v2727_v31 = vpop.f32.mrb[37].mxu1 }
 0x23a   :  { %15090 = vst [vmem:[#allocation67_spill] sm:$0xff] %v13038_v36  ;;  %15091 = vst [vmem:[#allocation68_spill] sm:$0xff] %v13040_v41  ;;  %v10375_v54 = vadd.f32 %v2341_v28, %v12854_v18  ;;  %v10439_v25 = vadd.f32 %v2727_v31, %v12858_v20  ;;  %v2343_v27 = vpop.f32.mrb[38].mxu0  ;;  %v2729_v13 = vpop.f32.mrb[38].mxu1  ;;  %v11847_v28 = vld [vmem:[#allocation5 + $0x38c] ss:$48 sps:$4 sm:$0xff]  }
 0x23b   :  { %v10376_v57 = vadd.f32 %v2343_v27, %v12848_v6  ;;  %v10440_v62 = vadd.f32 %v2729_v13, %v12851_v7  ;;  %v2345_v61 = vpop.f32.mrb[39].mxu0  ;;  %v2731_v1 = vpop.f32.mrb[39].mxu1  ;;  %3967 = vmatpush1.bf16.msra.mxu1 %v11833_v19  ;;  %3581 = vmatpush1.bf16.msra.mxu0 %v11836_v4  ;;  %v11850_v31 = vld [vmem:[#allocation5 + $0x384] ss:$48 sps:$4 sm:$0xff]   ;;  %v4554_v40 = vmax.f32 %v10374_v47, 0.0  ;;  %v4556_v41 = vmax.f32 %v10438_v30, 0.0 }
 0x23c   :  { %v10377_v34 = vadd.f32 %v2345_v61, %v12854_v18  ;;  %v10441_v45 = vadd.f32 %v2731_v1, %v12858_v20  ;;  %3968 = vmatprep.subr.bf16.mxu1 %v11841_v48  ;;  %3582 = vmatprep.subr.bf16.mxu0 %v11844_v21  ;;  %v4555_v19 = vmax.f32 %v10375_v54, 0.0  ;;  %v4557_v4 = vmax.f32 %v10439_v25, 0.0  ;;  %v11845_v21 = vld [vmem:[#allocation5 + $0x388] ss:$48 sps:$4 sm:$0xff]   ;;  %v11848_v47 = vld [vmem:[#allocation5 + $0x380] ss:$48 sps:$4 sm:$0xff]  }
 0x23d   :  { %v4566_v14 = vmax.f32 %v10376_v57, 0.0  ;;  %v4568_v27 = vmax.f32 %v10440_v62, 0.0  ;;  %3060 = vmatmul.mubr.bf16.gmra.mrb[80].mxu0 %v12721_v55  ;;  %3446 = vmatmul.mubr.bf16.gmra.mrb[80].mxu1 %v12721_v55  ;;  %v11853_v54 = vld [vmem:[#allocation5 + $0x3ec] ss:$48 sps:$4 sm:$0xff]   ;;  %v11856_v25 = vld [vmem:[#allocation5 + $0x3e4] ss:$48 sps:$4 sm:$0xff]  }
 0x23e   :  { %v4567_v13 = vmax.f32 %v10377_v34, 0.0  ;;  %v4569_v36 = vmax.f32 %v10441_v45, 0.0  ;;  %3069 = vmatprep.mubr.bf16.mxu0 %v15071_v39  ;;  %3455 = vmatprep.mubr.bf16.mxu1 %v15071_v39 }
 0x23f   :  { %v13054_v48 = vpack.c.bf16 %v4566_v14, %v4554_v40  ;;  %3969 = vmatpush1.bf16.msra.mxu1 %v11839_v56  ;;  %3583 = vmatpush1.bf16.msra.mxu0 %v11842_v44  ;;  %v13056_v30 = vpack.c.bf16 %v4568_v27, %v4556_v41 }
 0x240   :  { %v13058_v57 = vpack.c.bf16 %v4567_v13, %v4555_v19  ;;  %v2349_v62 = vpop.f32.mrb[40].mxu0  ;;  %v2735_v61 = vpop.f32.mrb[40].mxu1  ;;  %3970 = vmatprep.subr.bf16.mxu1 %v11847_v28  ;;  %3584 = vmatprep.subr.bf16.mxu0 %v11850_v31  ;;  %v13060_v1 = vpack.c.bf16 %v4569_v36, %v4557_v4  ;;  %v11851_v36 = vld [vmem:[#allocation5 + $0x3e8] ss:$48 sps:$4 sm:$0xff]   ;;  %v11854_v4 = vld [vmem:[#allocation5 + $0x3e0] ss:$48 sps:$4 sm:$0xff]  }
 0x241   :  { %15092 = vst [vmem:[#allocation69_spill] sm:$0xff] %v13054_v48  ;;  %15093 = vst [vmem:[#allocation70_spill] sm:$0xff] %v13056_v30  ;;  %v10378_v34 = vadd.f32 %v2349_v62, %v12848_v6  ;;  %v10442_v14 = vadd.f32 %v2735_v61, %v12851_v7  ;;  %v2351_v40 = vpop.f32.mrb[41].mxu0  ;;  %v2737_v56 = vpop.f32.mrb[41].mxu1 }
 0x242   :  { %15094 = vst [vmem:[#allocation71_spill] sm:$0xff] %v13058_v57  ;;  %15095 = vst [vmem:[#allocation72_spill] sm:$0xff] %v13060_v1  ;;  %v10379_v44 = vadd.f32 %v2351_v40, %v12854_v18  ;;  %v10443_v41 = vadd.f32 %v2737_v56, %v12858_v20  ;;  %v2353_v45 = vpop.f32.mrb[42].mxu0  ;;  %v2739_v27 = vpop.f32.mrb[42].mxu1  ;;  %v11859_v40 = vld [vmem:[#allocation5 + $0x44c] ss:$48 sps:$4 sm:$0xff]  }
 0x243   :  { %v10380_v19 = vadd.f32 %v2353_v45, %v12848_v6  ;;  %v10444_v28 = vadd.f32 %v2739_v27, %v12851_v7  ;;  %v2355_v31 = vpop.f32.mrb[43].mxu0  ;;  %v2741_v13 = vpop.f32.mrb[43].mxu1  ;;  %3971 = vmatpush1.bf16.msra.mxu1 %v11845_v21  ;;  %3585 = vmatpush1.bf16.msra.mxu0 %v11848_v47  ;;  %v11862_v56 = vld [vmem:[#allocation5 + $0x444] ss:$48 sps:$4 sm:$0xff]   ;;  %v4578_v30 = vmax.f32 %v10378_v34, 0.0  ;;  %v4580_v1 = vmax.f32 %v10442_v14, 0.0 }
 0x244   :  { %v10381_v62 = vadd.f32 %v2355_v31, %v12854_v18  ;;  %v10445_v61 = vadd.f32 %v2741_v13, %v12858_v20  ;;  %3972 = vmatprep.subr.bf16.mxu1 %v11853_v54  ;;  %3586 = vmatprep.subr.bf16.mxu0 %v11856_v25  ;;  %v4579_v21 = vmax.f32 %v10379_v44, 0.0  ;;  %v4581_v47 = vmax.f32 %v10443_v41, 0.0  ;;  %v11857_v25 = vld [vmem:[#allocation5 + $0x448] ss:$48 sps:$4 sm:$0xff]   ;;  %v11860_v34 = vld [vmem:[#allocation5 + $0x440] ss:$48 sps:$4 sm:$0xff]  }
 0x245   :  { %v4590_v48 = vmax.f32 %v10380_v19, 0.0  ;;  %v4592_v45 = vmax.f32 %v10444_v28, 0.0  ;;  %3070 = vmatmul.mubr.bf16.gmra.mrb[84].mxu0 %v12727_v15  ;;  %3456 = vmatmul.mubr.bf16.gmra.mrb[84].mxu1 %v12727_v15  ;;  %v11865_v44 = vld [vmem:[#allocation5 + $0x4ac] ss:$48 sps:$4 sm:$0xff]   ;;  %v11868_v41 = vld [vmem:[#allocation5 + $0x4a4] ss:$48 sps:$4 sm:$0xff]  }
 0x246   :  { %v4591_v27 = vmax.f32 %v10381_v62, 0.0  ;;  %v4593_v57 = vmax.f32 %v10445_v61, 0.0  ;;  %3079 = vmatprep.mubr.bf16.mxu0 %v15071_v39  ;;  %3465 = vmatprep.mubr.bf16.mxu1 %v15071_v39 }
 0x247   :  { %v13074_v54 = vpack.c.bf16 %v4590_v48, %v4578_v30  ;;  %3973 = vmatpush1.bf16.msra.mxu1 %v11851_v36  ;;  %3587 = vmatpush1.bf16.msra.mxu0 %v11854_v4  ;;  %v13076_v14 = vpack.c.bf16 %v4592_v45, %v4580_v1 }
 0x248   :  { %v13078_v19 = vpack.c.bf16 %v4591_v27, %v4579_v21  ;;  %v2359_v28 = vpop.f32.mrb[44].mxu0  ;;  %v2745_v31 = vpop.f32.mrb[44].mxu1  ;;  %3974 = vmatprep.subr.bf16.mxu1 %v11859_v40  ;;  %3588 = vmatprep.subr.bf16.mxu0 %v11862_v56  ;;  %v13080_v13 = vpack.c.bf16 %v4593_v57, %v4581_v47  ;;  %v11863_v57 = vld [vmem:[#allocation5 + $0x4a8] ss:$48 sps:$4 sm:$0xff]   ;;  %v11866_v47 = vld [vmem:[#allocation5 + $0x4a0] ss:$48 sps:$4 sm:$0xff]  }
 0x249   :  { %15096 = vst [vmem:[#allocation73_spill] sm:$0xff] %v13074_v54  ;;  %15097 = vst [vmem:[#allocation74_spill] sm:$0xff] %v13076_v14  ;;  %v10382_v62 = vadd.f32 %v2359_v28, %v12848_v6  ;;  %v10446_v48 = vadd.f32 %v2745_v31, %v12851_v7  ;;  %v2361_v30 = vpop.f32.mrb[45].mxu0  ;;  %v2747_v36 = vpop.f32.mrb[45].mxu1 }
 0x24a   :  { %15098 = vst [vmem:[#allocation75_spill] sm:$0xff] %v13078_v19  ;;  %15099 = vst [vmem:[#allocation76_spill] sm:$0xff] %v13080_v13  ;;  %v10383_v4 = vadd.f32 %v2361_v30, %v12854_v18  ;;  %v10447_v1 = vadd.f32 %v2747_v36, %v12858_v20  ;;  %v2363_v61 = vpop.f32.mrb[46].mxu0  ;;  %v2749_v45 = vpop.f32.mrb[46].mxu1  ;;  %v11871_v30 = vld [vmem:[#allocation5 + $0x50c] ss:$48 sps:$4 sm:$0xff]  }
 0x24b   :  { %v10384_v21 = vadd.f32 %v2363_v61, %v12848_v6  ;;  %v10448_v40 = vadd.f32 %v2749_v45, %v12851_v7  ;;  %v2365_v56 = vpop.f32.mrb[47].mxu0  ;;  %v2751_v27 = vpop.f32.mrb[47].mxu1  ;;  %3975 = vmatpush1.bf16.msra.mxu1 %v11857_v25  ;;  %3589 = vmatpush1.bf16.msra.mxu0 %v11860_v34  ;;  %v11874_v36 = vld [vmem:[#allocation5 + $0x504] ss:$48 sps:$4 sm:$0xff]   ;;  %v4602_v14 = vmax.f32 %v10382_v62, 0.0  ;;  %v4604_v13 = vmax.f32 %v10446_v48, 0.0 }
 0x24c   :  { %v10385_v28 = vadd.f32 %v2365_v56, %v12854_v18  ;;  %v10449_v31 = vadd.f32 %v2751_v27, %v12858_v20  ;;  %3976 = vmatprep.subr.bf16.mxu1 %v11865_v44  ;;  %3590 = vmatprep.subr.bf16.mxu0 %v11868_v41  ;;  %v4603_v25 = vmax.f32 %v10383_v4, 0.0  ;;  %v4605_v34 = vmax.f32 %v10447_v1, 0.0  ;;  %v11869_v41 = vld [vmem:[#allocation5 + $0x508] ss:$48 sps:$4 sm:$0xff]   ;;  %v11872_v62 = vld [vmem:[#allocation5 + $0x500] ss:$48 sps:$4 sm:$0xff]  }
 0x24d   :  { %v4614_v54 = vmax.f32 %v10384_v21, 0.0  ;;  %v4616_v61 = vmax.f32 %v10448_v40, 0.0  ;;  %3080 = vmatmul.mubr.bf16.gmra.mrb[88].mxu0 %v12733_v42  ;;  %3466 = vmatmul.mubr.bf16.gmra.mrb[88].mxu1 %v12733_v42  ;;  %v11877_v4 = vld [vmem:[#allocation5 + $0x56c] ss:$48 sps:$4 sm:$0xff]   ;;  %v11880_v1 = vld [vmem:[#allocation5 + $0x564] ss:$48 sps:$4 sm:$0xff]  }
 0x24e   :  { %v4615_v45 = vmax.f32 %v10385_v28, 0.0  ;;  %v4617_v19 = vmax.f32 %v10449_v31, 0.0  ;;  %3089 = vmatprep.mubr.bf16.mxu0 %v15071_v39  ;;  %3475 = vmatprep.mubr.bf16.mxu1 %v15071_v39 }
 0x24f   :  { %v13094_v44 = vpack.c.bf16 %v4614_v54, %v4602_v14  ;;  %3977 = vmatpush1.bf16.msra.mxu1 %v11863_v57  ;;  %3591 = vmatpush1.bf16.msra.mxu0 %v11866_v47  ;;  %v13096_v48 = vpack.c.bf16 %v4616_v61, %v4604_v13 }
 0x250   :  { %v13098_v21 = vpack.c.bf16 %v4615_v45, %v4603_v25  ;;  %v2369_v40 = vpop.f32.mrb[48].mxu0  ;;  %v2755_v56 = vpop.f32.mrb[48].mxu1  ;;  %3978 = vmatprep.subr.bf16.mxu1 %v11871_v30  ;;  %3592 = vmatprep.subr.bf16.mxu0 %v11874_v36  ;;  %v13100_v27 = vpack.c.bf16 %v4617_v19, %v4605_v34  ;;  %v11875_v19 = vld [vmem:[#allocation5 + $0x568] ss:$48 sps:$4 sm:$0xff]   ;;  %v11878_v34 = vld [vmem:[#allocation5 + $0x560] ss:$48 sps:$4 sm:$0xff]  }
 0x251   :  { %15100 = vst [vmem:[#allocation77_spill] sm:$0xff] %v13094_v44  ;;  %15101 = vst [vmem:[#allocation78_spill] sm:$0xff] %v13096_v48  ;;  %v10386_v28 = vadd.f32 %v2369_v40, %v12848_v6  ;;  %v10450_v54 = vadd.f32 %v2755_v56, %v12851_v7  ;;  %v2371_v14 = vpop.f32.mrb[49].mxu0  ;;  %v2757_v57 = vpop.f32.mrb[49].mxu1 }
 0x252   :  { %15102 = vst [vmem:[#allocation79_spill] sm:$0xff] %v13098_v21  ;;  %15103 = vst [vmem:[#allocation80_spill] sm:$0xff] %v13100_v27  ;;  %v10387_v47 = vadd.f32 %v2371_v14, %v12854_v18  ;;  %v10451_v13 = vadd.f32 %v2757_v57, %v12858_v20  ;;  %v2373_v31 = vpop.f32.mrb[50].mxu0  ;;  %v2759_v61 = vpop.f32.mrb[50].mxu1  ;;  %v11883_v14 = vld [vmem:[#allocation5 + $0x5cc] ss:$48 sps:$4 sm:$0xff]  }
 0x253   :  { %v10388_v25 = vadd.f32 %v2373_v31, %v12848_v6  ;;  %v10452_v30 = vadd.f32 %v2759_v61, %v12851_v7  ;;  %v2375_v36 = vpop.f32.mrb[51].mxu0  ;;  %v2761_v45 = vpop.f32.mrb[51].mxu1  ;;  %3979 = vmatpush1.bf16.msra.mxu1 %v11869_v41  ;;  %3593 = vmatpush1.bf16.msra.mxu0 %v11872_v62  ;;  %v11886_v57 = vld [vmem:[#allocation5 + $0x5c4] ss:$48 sps:$4 sm:$0xff]   ;;  %v4626_v48 = vmax.f32 %v10386_v28, 0.0  ;;  %v4628_v27 = vmax.f32 %v10450_v54, 0.0 }
 0x254   :  { %v10389_v40 = vadd.f32 %v2375_v36, %v12854_v18  ;;  %v10453_v56 = vadd.f32 %v2761_v45, %v12858_v20  ;;  %3980 = vmatprep.subr.bf16.mxu1 %v11877_v4  ;;  %3594 = vmatprep.subr.bf16.mxu0 %v11880_v1  ;;  %v4627_v41 = vmax.f32 %v10387_v47, 0.0  ;;  %v4629_v62 = vmax.f32 %v10451_v13, 0.0  ;;  %v11881_v1 = vld [vmem:[#allocation5 + $0x5c8] ss:$48 sps:$4 sm:$0xff]   ;;  %v11884_v28 = vld [vmem:[#allocation5 + $0x5c0] ss:$48 sps:$4 sm:$0xff]  }
 0x255   :  { %v4638_v44 = vmax.f32 %v10388_v25, 0.0  ;;  %v4640_v31 = vmax.f32 %v10452_v30, 0.0  ;;  %3090 = vmatmul.mubr.bf16.gmra.mrb[92].mxu0 %v12739_v5  ;;  %3476 = vmatmul.mubr.bf16.gmra.mrb[92].mxu1 %v12739_v5  ;;  %v11889_v47 = vld [vmem:[#allocation5 + $0x62c] ss:$48 sps:$4 sm:$0xff]   ;;  %v11892_v13 = vld [vmem:[#allocation5 + $0x624] ss:$48 sps:$4 sm:$0xff]  }
 0x256   :  { %v4639_v61 = vmax.f32 %v10389_v40, 0.0  ;;  %v4641_v21 = vmax.f32 %v10453_v56, 0.0  ;;  %3099 = vmatprep.mubr.bf16.mxu0 %v15071_v39  ;;  %3485 = vmatprep.mubr.bf16.mxu1 %v15071_v39 }
 0x257   :  { %v13114_v4 = vpack.c.bf16 %v4638_v44, %v4626_v48  ;;  %3981 = vmatpush1.bf16.msra.mxu1 %v11875_v19  ;;  %3595 = vmatpush1.bf16.msra.mxu0 %v11878_v34  ;;  %v13116_v54 = vpack.c.bf16 %v4640_v31, %v4628_v27 }
 0x258   :  { %v13118_v25 = vpack.c.bf16 %v4639_v61, %v4627_v41  ;;  %v2379_v30 = vpop.f32.mrb[52].mxu0  ;;  %v2765_v36 = vpop.f32.mrb[52].mxu1  ;;  %3982 = vmatprep.subr.bf16.mxu1 %v11883_v14  ;;  %3596 = vmatprep.subr.bf16.mxu0 %v11886_v57  ;;  %v13120_v45 = vpack.c.bf16 %v4641_v21, %v4629_v62 }
 0x259   :  { %15104 = vst [vmem:[#allocation81_spill] sm:$0xff] %v13116_v54  ;;  %v10390_v40 = vadd.f32 %v2379_v30, %v12848_v6  ;;  %v10454_v44 = vadd.f32 %v2765_v36, %v12851_v7  ;;  %v2381_v48 = vpop.f32.mrb[53].mxu0  ;;  %v2767_v19 = vpop.f32.mrb[53].mxu1 }
 0x25a   :  { %15105 = vst [vmem:[#allocation82_spill] sm:$0xff] %v13120_v45  ;;  %v10391_v34 = vadd.f32 %v2381_v48, %v12854_v18  ;;  %v10455_v27 = vadd.f32 %v2767_v19, %v12858_v20  ;;  %v2383_v56 = vpop.f32.mrb[54].mxu0  ;;  %v2769_v31 = vpop.f32.mrb[54].mxu1 }
 0x25b   :  { %v10392_v41 = vadd.f32 %v2383_v56, %v12848_v6  ;;  %v10456_v14 = vadd.f32 %v2769_v31, %v12851_v7  ;;  %v2385_v57 = vpop.f32.mrb[55].mxu0  ;;  %v2771_v61 = vpop.f32.mrb[55].mxu1  ;;  %3983 = vmatpush1.bf16.msra.mxu1 %v11881_v1  ;;  %3597 = vmatpush1.bf16.msra.mxu0 %v11884_v28  ;;  %v4650_v30 = vmax.f32 %v10390_v40, 0.0  ;;  %v4652_v36 = vmax.f32 %v10454_v44, 0.0 }
 0x25c   :  { %v10393_v21 = vadd.f32 %v2385_v57, %v12854_v18  ;;  %v10457_v62 = vadd.f32 %v2771_v61, %v12858_v20  ;;  %4145 = vmatprep.subr.bf16.mxu1 %v11889_v47  ;;  %3759 = vmatprep.subr.bf16.mxu0 %v11892_v13  ;;  %v4651_v56 = vmax.f32 %v10391_v34, 0.0  ;;  %v4653_v31 = vmax.f32 %v10455_v27, 0.0 }
 0x25d   :  { %v4662_v48 = vmax.f32 %v10392_v41, 0.0  ;;  %v4664_v19 = vmax.f32 %v10456_v14, 0.0  ;;  %3100 = vmatmul.mubr.bf16.gmra.mrb[96].mxu0 %v12745_v35  ;;  %3486 = vmatmul.mubr.bf16.gmra.mrb[96].mxu1 %v12745_v35 }
 0x25e   :  { %v4663_v54 = vmax.f32 %v10393_v21, 0.0  ;;  %v4665_v45 = vmax.f32 %v10457_v62, 0.0  ;;  %3109 = vmatprep.mubr.bf16.mxu0 %v15071_v39  ;;  %3495 = vmatprep.mubr.bf16.mxu1 %v15071_v39 }
 0x25f   :  { %v13134_v1 = vpack.c.bf16 %v4662_v48, %v4650_v30  ;;  %v13136_v28 = vpack.c.bf16 %v4664_v19, %v4652_v36 }
 0x260   :  { %v13138_v47 = vpack.c.bf16 %v4663_v54, %v4651_v56  ;;  %v2389_v13 = vpop.f32.mrb[56].mxu0  ;;  %v2775_v40 = vpop.f32.mrb[56].mxu1  ;;  %v13140_v44 = vpack.c.bf16 %v4665_v45, %v4653_v31 }
 0x261   :  { %15106 = vst [vmem:[#allocation83_spill] sm:$0xff] %v13136_v28  ;;  %v10394_v41 = vadd.f32 %v2389_v13, %v12848_v6  ;;  %v10458_v34 = vadd.f32 %v2775_v40, %v12851_v7  ;;  %v2391_v27 = vpop.f32.mrb[57].mxu0  ;;  %v2777_v14 = vpop.f32.mrb[57].mxu1 }
 0x262   :  { %15107 = vst [vmem:[#allocation84_spill] sm:$0xff] %v13140_v44  ;;  %v10395_v57 = vadd.f32 %v2391_v27, %v12854_v18  ;;  %v10459_v61 = vadd.f32 %v2777_v14, %v12858_v20  ;;  %v2393_v21 = vpop.f32.mrb[58].mxu0  ;;  %v2779_v62 = vpop.f32.mrb[58].mxu1 }
 0x263   :  { %v10396_v30 = vadd.f32 %v2393_v21, %v12848_v6  ;;  %v10460_v54 = vadd.f32 %v2779_v62, %v12851_v7  ;;  %v2395_v36 = vpop.f32.mrb[59].mxu0  ;;  %v2781_v48 = vpop.f32.mrb[59].mxu1  ;;  %v4674_v56 = vmax.f32 %v10394_v41, 0.0  ;;  %v4676_v31 = vmax.f32 %v10458_v34, 0.0 }
 0x264   :  { %v10397_v45 = vadd.f32 %v2395_v36, %v12854_v18  ;;  %v10461_v19 = vadd.f32 %v2781_v48, %v12858_v20  ;;  %v4675_v27 = vmax.f32 %v10395_v57, 0.0  ;;  %v4677_v14 = vmax.f32 %v10459_v61, 0.0 }
 0x265   :  { %v4686_v13 = vmax.f32 %v10396_v30, 0.0  ;;  %v4688_v40 = vmax.f32 %v10460_v54, 0.0  ;;  %3110 = vmatmul.mubr.bf16.gmra.mrb[100].mxu0 %v12751_v43  ;;  %3496 = vmatmul.mubr.bf16.gmra.mrb[100].mxu1 %v12751_v43 }
 0x266   :  { %v4687_v28 = vmax.f32 %v10397_v45, 0.0  ;;  %v4689_v21 = vmax.f32 %v10461_v19, 0.0  ;;  %3119 = vmatprep.mubr.bf16.mxu0 %v15071_v39  ;;  %3505 = vmatprep.mubr.bf16.mxu1 %v15071_v39 }
 0x267   :  { %v13154_v62 = vpack.c.bf16 %v4686_v13, %v4674_v56  ;;  %v13156_v36 = vpack.c.bf16 %v4688_v40, %v4676_v31 }
 0x268   :  { %v13158_v41 = vpack.c.bf16 %v4687_v28, %v4675_v27  ;;  %v2399_v34 = vpop.f32.mrb[60].mxu0  ;;  %v2785_v30 = vpop.f32.mrb[60].mxu1  ;;  %v13160_v54 = vpack.c.bf16 %v4689_v21, %v4677_v14 }
 0x269   :  { %15108 = vst [vmem:[#allocation85_spill] sm:$0xff] %v13154_v62  ;;  %15109 = vst [vmem:[#allocation86_spill] sm:$0xff] %v13156_v36  ;;  %v10398_v48 = vadd.f32 %v2399_v34, %v12848_v6  ;;  %v10462_v57 = vadd.f32 %v2785_v30, %v12851_v7  ;;  %v2401_v61 = vpop.f32.mrb[61].mxu0  ;;  %v2787_v45 = vpop.f32.mrb[61].mxu1 }
 0x26a   :  { %15110 = vst [vmem:[#allocation87_spill] sm:$0xff] %v13160_v54  ;;  %v10399_v19 = vadd.f32 %v2401_v61, %v12854_v18  ;;  %v10463_v44 = vadd.f32 %v2787_v45, %v12858_v20  ;;  %v2403_v56 = vpop.f32.mrb[62].mxu0  ;;  %v2789_v13 = vpop.f32.mrb[62].mxu1 }
 0x26b   :  { %v10400_v31 = vadd.f32 %v2403_v56, %v12848_v6  ;;  %v10464_v28 = vadd.f32 %v2789_v13, %v12851_v7  ;;  %v2405_v40 = vpop.f32.mrb[63].mxu0  ;;  %v2791_v27 = vpop.f32.mrb[63].mxu1  ;;  %v4698_v34 = vmax.f32 %v10398_v48, 0.0  ;;  %v4700_v30 = vmax.f32 %v10462_v57, 0.0  ;;  %v11893_v57 = vld [vmem:[#allocation5 + $0x688] ss:$48 sps:$4 sm:$0xff]  }
 0x26c   :  { %v10401_v14 = vadd.f32 %v2405_v40, %v12854_v18  ;;  %v10465_v21 = vadd.f32 %v2791_v27, %v12858_v20  ;;  %v4699_v61 = vmax.f32 %v10399_v19, 0.0  ;;  %v4701_v45 = vmax.f32 %v10463_v44, 0.0  ;;  %v11887_v44 = vld [vmem:[#allocation5 + $0x628] ss:$48 sps:$4 sm:$0xff]   ;;  %v11896_v19 = vld [vmem:[#allocation5 + $0x680] ss:$48 sps:$4 sm:$0xff]  }
 0x26d   :  { %v4710_v36 = vmax.f32 %v10400_v31, 0.0  ;;  %v4712_v54 = vmax.f32 %v10464_v28, 0.0  ;;  %3120 = vmatmul.mubr.bf16.gmra.mrb[104].mxu0 %v12757_v49  ;;  %3506 = vmatmul.mubr.bf16.gmra.mrb[104].mxu1 %v12757_v49  ;;  %v11901_v56 = vld [vmem:[#allocation5 + $0x6ec] ss:$48 sps:$4 sm:$0xff]   ;;  %v11904_v13 = vld [vmem:[#allocation5 + $0x6e4] ss:$48 sps:$4 sm:$0xff]  }
 0x26e   :  { %v4711_v62 = vmax.f32 %v10401_v14, 0.0  ;;  %v4713_v6 = vmax.f32 %v10465_v21, 0.0  ;;  %3129 = vmatprep.mubr.bf16.mxu0 %v15071_v39  ;;  %3515 = vmatprep.mubr.bf16.mxu1 %v15071_v39  ;;  %v11902_v31 = vld [vmem:[#allocation5 + $0x6e0] ss:$48 sps:$4 sm:$0xff]   ;;  %v11907_v28 = vld [vmem:[#allocation5 + $0x74c] ss:$48 sps:$4 sm:$0xff]  }
 0x26f   :  { %v13174_v7 = vpack.c.bf16 %v4710_v36, %v4698_v34  ;;  %v13180_v48 = vpack.c.bf16 %v4712_v54, %v4700_v30  ;;  %v11895_v36 = vld [vmem:[#allocation5 + $0x68c] ss:$48 sps:$4 sm:$0xff]   ;;  %v11898_v54 = vld [vmem:[#allocation5 + $0x684] ss:$48 sps:$4 sm:$0xff]   ;;  %v11908_v40 = vld [vmem:[#allocation5 + $0x740] ss:$48 sps:$4 sm:$0xff]  }
 0x270   :  { %v13176_v18 = vpack.c.bf16 %v4711_v62, %v4699_v61  ;;  %v13178_v20 = vpack.c.bf16 %v4713_v6, %v4701_v45  ;;  %v11890_v62 = vld [vmem:[#allocation5 + $0x620] ss:$48 sps:$4 sm:$0xff]   ;;  %v11913_v27 = vld [vmem:[#allocation5 + $0x7ac] ss:$48 sps:$4 sm:$0xff]   ;;  %v11916_v14 = vld [vmem:[#allocation5 + $0x7a4] ss:$48 sps:$4 sm:$0xff]  }
 0x271   :  { %v11911_v21 = vld [vmem:[#allocation5 + $0x7a8] ss:$48 sps:$4 sm:$0xff]   ;;  %v11914_v34 = vld [vmem:[#allocation5 + $0x7a0] ss:$48 sps:$4 sm:$0xff]   ;;  %v11919_v30 = vld [vmem:[#allocation5 + $0x80c] ss:$48 sps:$4 sm:$0xff]  }
 0x272   :  { %v11920_v61 = vld [vmem:[#allocation5 + $0x800] ss:$48 sps:$4 sm:$0xff]   ;;  %v11925_v45 = vld [vmem:[#allocation5 + $0x86c] ss:$48 sps:$4 sm:$0xff]   ;;  %v11928_v6 = vld [vmem:[#allocation5 + $0x864] ss:$48 sps:$4 sm:$0xff]  }
 0x275   :  { %3130 = vmatmul.mubr.bf16.gmra.mrb[108].mxu0 %v12763_v58  ;;  %3516 = vmatmul.mubr.bf16.gmra.mrb[108].mxu1 %v12763_v58 }
 0x276   :  { %3139 = vmatprep.mubr.bf16.mxu0 %v15071_v39  ;;  %3525 = vmatprep.mubr.bf16.mxu1 %v15071_v39 }
 0x27d   :  { %3140 = vmatmul.mubr.bf16.gmra.mrb[112].mxu0 %v12769_v63  ;;  %3526 = vmatmul.mubr.bf16.gmra.mrb[112].mxu1 %v12769_v63 }
 0x27e   :  { %3149 = vmatprep.mubr.bf16.mxu0 %v15071_v39  ;;  %3535 = vmatprep.mubr.bf16.mxu1 %v15071_v39 }
 0x285   :  { %3150 = vmatmul.mubr.bf16.gmra.mrb[116].mxu0 %v12775_v11  ;;  %3536 = vmatmul.mubr.bf16.gmra.mrb[116].mxu1 %v12775_v11 }
 0x286   :  { %3159 = vmatprep.mubr.bf16.mxu0 %v15071_v39  ;;  %3545 = vmatprep.mubr.bf16.mxu1 %v15071_v39 }
 0x28d   :  { %3160 = vmatmul.mubr.bf16.gmra.mrb[120].mxu0 %v12781_v26  ;;  %3546 = vmatmul.mubr.bf16.gmra.mrb[120].mxu1 %v12781_v26 }
 0x28e   :  { %3169 = vmatprep.mubr.bf16.mxu0 %v15071_v39  ;;  %3555 = vmatprep.mubr.bf16.mxu1 %v15071_v39 }
 0x295   :  { %3170 = vmatmul.mubr.bf16.gmra.mrb[124].mxu0 %v12787_v33  ;;  %3556 = vmatmul.mubr.bf16.gmra.mrb[124].mxu1 %v12787_v33 }
 0x296   :  { %3598 = vmatprep.mubr.bf16.mxu0 %v12567_v51  ;;  %3984 = vmatprep.mubr.bf16.mxu1 %v12567_v51  ;;  %v11899_v51 = vld [vmem:[#allocation5 + $0x6e8] ss:$48 sps:$4 sm:$0xff]  }
 0x29d   :  { %3599 = vmatmul.mubr.bf16.vlgmr.msra.gmra.mrb[128].mxu0 %v12571_v9  ;;  %3985 = vmatmul.mubr.bf16.vlgmr.msra.gmra.mrb[128].mxu1 %v12571_v9  ;;  %v11910_v9 = vld [vmem:[#allocation5 + $0x744] ss:$48 sps:$4 sm:$0xff]  }
 0x29e   :  { %4146 = vmatpush1.bf16.msra.mxu1 %v11887_v44  ;;  %3760 = vmatpush1.bf16.msra.mxu0 %v11890_v62  ;;  %v11923_v44 = vld [vmem:[#allocation5 + $0x868] ss:$48 sps:$4 sm:$0xff]   ;;  %v11926_v62 = vld [vmem:[#allocation5 + $0x860] ss:$48 sps:$4 sm:$0xff]  }
 0x29f   :  { %3608 = vmatprep.mubr.bf16.mxu0 %v12573_v12  ;;  %3994 = vmatprep.mubr.bf16.mxu1 %v12573_v12  ;;  %v11905_v12 = vld [vmem:[#allocation5 + $0x748] ss:$48 sps:$4 sm:$0xff]  }
 0x2a0   :  { %4147 = vmatprep.subr.bf16.mxu1 %v11895_v36  ;;  %3761 = vmatprep.subr.bf16.mxu0 %v11898_v54  ;;  %v11931_v36 = vld [vmem:[#allocation5 + $0x8cc] ss:$48 sps:$4 sm:$0xff]   ;;  %v11932_v54 = vld [vmem:[#allocation5 + $0x8c0] ss:$48 sps:$4 sm:$0xff]  }
 0x2a2   :  { %4148 = vmatpush1.bf16.msra.mxu1 %v11893_v57  ;;  %3762 = vmatpush1.bf16.msra.mxu0 %v11896_v19  ;;  %v11935_v57 = vld [vmem:[#allocation8 + $0xc8] ss:$12 sps:$4 sm:$0xff]   ;;  %v11939_v19 = vld [vmem:[#allocation8 + $0x4] ss:$12 sps:$4 sm:$0xff]  }
 0x2a3   :  { %4149 = vmatprep.subr.bf16.mxu1 %v11901_v56  ;;  %3763 = vmatprep.subr.bf16.mxu0 %v11904_v13  ;;  %v15117_v13 = vld [vmem:[#allocation21_spill] sm:$0xff] }
 0x2a5   :  { %3609 = vmatmul.mubr.bf16.gmra.mrb[132].mxu0 %v12579_v23  ;;  %3995 = vmatmul.mubr.bf16.gmra.mrb[132].mxu1 %v12579_v23  ;;  %v11922_v23 = vld [vmem:[#allocation5 + $0x804] ss:$48 sps:$4 sm:$0xff]  }
 0x2a6   :  { %3618 = vmatprep.mubr.bf16.mxu0 %v12581_v24  ;;  %4004 = vmatprep.mubr.bf16.mxu1 %v12581_v24  ;;  %v11917_v24 = vld [vmem:[#allocation5 + $0x808] ss:$48 sps:$4 sm:$0xff]  }
 0x2a7   :  { %4150 = vmatpush1.bf16.msra.mxu1 %v11899_v51  ;;  %3764 = vmatpush1.bf16.msra.mxu0 %v11902_v31  ;;  %v12319_v51 = vld [vmem:[#allocation7] sm:$0xff] }
 0x2a8   :  { %4151 = vmatprep.subr.bf16.mxu1 %v11907_v28  ;;  %3765 = vmatprep.subr.bf16.mxu0 %v11910_v9 }
 0x2ab   :  { %4152 = vmatpush1.bf16.msra.mxu1 %v11905_v12  ;;  %3766 = vmatpush1.bf16.msra.mxu0 %v11908_v40  ;;  %v15118_v40 = vld [vmem:[#allocation22_spill] sm:$0xff] }
 0x2ac   :  { %4153 = vmatprep.subr.bf16.mxu1 %v11913_v27  ;;  %3767 = vmatprep.subr.bf16.mxu0 %v11916_v14 }
 0x2ad   :  { %3619 = vmatmul.mubr.bf16.gmra.mrb[136].mxu0 %v12587_v37  ;;  %4005 = vmatmul.mubr.bf16.gmra.mrb[136].mxu1 %v12587_v37  ;;  %v11934_v37 = vld [vmem:[#allocation5 + $0x8c4] ss:$48 sps:$4 sm:$0xff]  }
 0x2ae   :  { %3628 = vmatprep.mubr.bf16.mxu0 %v12589_v38  ;;  %4014 = vmatprep.mubr.bf16.mxu1 %v12589_v38  ;;  %v11929_v38 = vld [vmem:[#allocation5 + $0x8c8] ss:$48 sps:$4 sm:$0xff]  }
 0x2af   :  { %4154 = vmatpush1.bf16.msra.mxu1 %v11911_v21  ;;  %3768 = vmatpush1.bf16.msra.mxu0 %v11914_v34 }
 0x2b0   :  { %4155 = vmatprep.subr.bf16.mxu1 %v11919_v30  ;;  %3769 = vmatprep.subr.bf16.mxu0 %v11922_v23 }
 0x2b3   :  { %4156 = vmatpush1.bf16.msra.mxu1 %v11917_v24  ;;  %3770 = vmatpush1.bf16.msra.mxu0 %v11920_v61 }
 0x2b4   :  { %4157 = vmatprep.subr.bf16.mxu1 %v11925_v45  ;;  %3771 = vmatprep.subr.bf16.mxu0 %v11928_v6 }
 0x2b5   :  { %3629 = vmatmul.mubr.bf16.gmra.mrb[140].mxu0 %v12595_v52  ;;  %4015 = vmatmul.mubr.bf16.gmra.mrb[140].mxu1 %v12595_v52  ;;  %v15111_v52 = vld [vmem:[#allocation16_spill] sm:$0xff] }
 0x2b6   :  { %3638 = vmatprep.mubr.bf16.mxu0 %v12597_v53  ;;  %4024 = vmatprep.mubr.bf16.mxu1 %v12597_v53  ;;  %v15112_v53 = vld [vmem:[#allocation17_spill] sm:$0xff] }
 0x2b7   :  { %4158 = vmatpush1.bf16.msra.mxu1 %v11923_v44  ;;  %3772 = vmatpush1.bf16.msra.mxu0 %v11926_v62 }
 0x2b8   :  { %4159 = vmatprep.subr.bf16.mxu1 %v11931_v36  ;;  %3773 = vmatprep.subr.bf16.mxu0 %v11934_v37 }
 0x2bb   :  { %4160 = vmatpush1.bf16.msra.mxu1 %v11929_v38  ;;  %3774 = vmatpush1.bf16.msra.mxu0 %v11932_v54 }
 0x2bc   :  { %9666 = vmatprep.subr.bf16.mxu1 %v11935_v57  ;;  %6851 = vmatprep.subr.bf16.mxu0 %v11939_v19 }
 0x2bd   :  { %3639 = vmatmul.mubr.bf16.gmra.mrb[144].mxu0 %v12603_v2  ;;  %4025 = vmatmul.mubr.bf16.gmra.mrb[144].mxu1 %v12603_v2  ;;  %v15113_v2 = vld [vmem:[#allocation18_spill] sm:$0xff] }
 0x2be   :  { %3648 = vmatprep.mubr.bf16.mxu0 %v12605_v3  ;;  %4034 = vmatprep.mubr.bf16.mxu1 %v12605_v3  ;;  %v15114_v3 = vld [vmem:[#allocation19_spill] sm:$0xff] }
 0x2c5   :  { %3649 = vmatmul.mubr.bf16.gmra.mrb[148].mxu0 %v12611_v8  ;;  %4035 = vmatmul.mubr.bf16.gmra.mrb[148].mxu1 %v12611_v8  ;;  %v15115_v8 = vld [vmem:[#allocation20_spill] sm:$0xff] }
 0x2c6   :  { %3658 = vmatprep.mubr.bf16.mxu0 %v12613_v10  ;;  %4044 = vmatprep.mubr.bf16.mxu1 %v12613_v10  ;;  %v15116_v10 = vld [vmem:[#allocation29_spill] sm:$0xff] }
 0x2c7   :  { %v552_v56 = vsub.s32 7, %v15116_v10 }
 0x2c9   :  { %v13254_v12 = vrot.slane %v12319_v51, %v552_v56 }
 0x2cd   :  { %3659 = vmatmul.mubr.bf16.gmra.mrb[152].mxu0 %v12619_v16  ;;  %4045 = vmatmul.mubr.bf16.gmra.mrb[152].mxu1 %v12619_v16  ;;  %v540_v16 = vsub.s32 4, %v15116_v10 }
 0x2ce   :  { %3668 = vmatprep.mubr.bf16.mxu0 %v12621_v17  ;;  %4054 = vmatprep.mubr.bf16.mxu1 %v12621_v17  ;;  %v548_v17 = vsub.s32 6, %v15116_v10 }
 0x2cf   :  { %v13248_v31 = vrot.slane %v12319_v51, %v540_v16 }
 0x2d0   :  { %v13250_v28 = vrot.slane %v12319_v51, %v548_v17  ;;  %v15119_v17 = vld [vmem:[#allocation23_spill] sm:$0xff] }
 0x2d5   :  { %3669 = vmatmul.mubr.bf16.gmra.mrb[156].mxu0 %v12627_v22  ;;  %4055 = vmatmul.mubr.bf16.gmra.mrb[156].mxu1 %v12627_v22  ;;  %v544_v22 = vsub.s32 5, %v15116_v10 }
 0x2d6   :  { %3678 = vmatprep.mubr.bf16.mxu0 %v15111_v52  ;;  %4064 = vmatprep.mubr.bf16.mxu1 %v15111_v52 }
 0x2d7   :  { %v13252_v9 = vrot.slane %v12319_v51, %v544_v22 }
 0x2dd   :  { %3679 = vmatmul.mubr.bf16.gmra.mrb[160].mxu0 %v15112_v53  ;;  %4065 = vmatmul.mubr.bf16.gmra.mrb[160].mxu1 %v15112_v53 }
 0x2de   :  { %3688 = vmatprep.mubr.bf16.mxu0 %v15113_v2  ;;  %4074 = vmatprep.mubr.bf16.mxu1 %v15113_v2 }
 0x2e5   :  { %3689 = vmatmul.mubr.bf16.gmra.mrb[164].mxu0 %v15114_v3  ;;  %4075 = vmatmul.mubr.bf16.gmra.mrb[164].mxu1 %v15114_v3 }
 0x2e6   :  { %3698 = vmatprep.mubr.bf16.mxu0 %v15115_v8  ;;  %4084 = vmatprep.mubr.bf16.mxu1 %v15115_v8 }
 0x2ed   :  { %3699 = vmatmul.mubr.bf16.gmra.mrb[168].mxu0 %v15117_v13  ;;  %4085 = vmatmul.mubr.bf16.gmra.mrb[168].mxu1 %v15117_v13 }
 0x2ee   :  { %3708 = vmatprep.mubr.bf16.mxu0 %v15118_v40  ;;  %4094 = vmatprep.mubr.bf16.mxu1 %v15118_v40 }
 0x2f0   :  { %v3021_v27 = vpop.f32.mrb[64].mxu0  ;;  %v3407_v14 = vpop.f32.mrb[64].mxu1 }
 0x2f1   :  { %v10466_v21 = vadd.f32 %v3021_v27, %v13248_v31  ;;  %v10530_v34 = vadd.f32 %v3407_v14, %v13250_v28  ;;  %v3023_v30 = vpop.f32.mrb[65].mxu0  ;;  %v3409_v23 = vpop.f32.mrb[65].mxu1 }
 0x2f2   :  { %v10467_v24 = vadd.f32 %v3023_v30, %v13252_v9  ;;  %v10531_v61 = vadd.f32 %v3409_v23, %v13254_v12  ;;  %v3025_v45 = vpop.f32.mrb[66].mxu0  ;;  %v3411_v6 = vpop.f32.mrb[66].mxu1 }
 0x2f3   :  { %v10468_v44 = vadd.f32 %v3025_v45, %v13248_v31  ;;  %v10532_v62 = vadd.f32 %v3411_v6, %v13250_v28  ;;  %v3027_v36 = vpop.f32.mrb[67].mxu0  ;;  %v3413_v37 = vpop.f32.mrb[67].mxu1  ;;  %v4342_v57 = vmax.f32 %v10466_v21, 0.0  ;;  %v4344_v19 = vmax.f32 %v10530_v34, 0.0 }
 0x2f4   :  { %v10469_v38 = vadd.f32 %v3027_v36, %v13252_v9  ;;  %v10533_v54 = vadd.f32 %v3413_v37, %v13254_v12  ;;  %v4343_v2 = vmax.f32 %v10467_v24, 0.0  ;;  %v4345_v3 = vmax.f32 %v10531_v61, 0.0 }
 0x2f5   :  { %v4354_v52 = vmax.f32 %v10468_v44, 0.0  ;;  %v4356_v53 = vmax.f32 %v10532_v62, 0.0  ;;  %3709 = vmatmul.mubr.bf16.gmra.mrb[172].mxu0 %v12659_v50  ;;  %4095 = vmatmul.mubr.bf16.gmra.mrb[172].mxu1 %v12659_v50 }
 0x2f6   :  { %v4355_v8 = vmax.f32 %v10469_v38, 0.0  ;;  %v4357_v16 = vmax.f32 %v10533_v54, 0.0  ;;  %3718 = vmatprep.mubr.bf16.mxu0 %v15119_v17  ;;  %4104 = vmatprep.mubr.bf16.mxu1 %v15119_v17 }
 0x2f7   :  { %v13270_v22 = vpack.c.bf16 %v4354_v52, %v4342_v57  ;;  %v13272_v56 = vpack.c.bf16 %v4356_v53, %v4344_v19 }
 0x2f8   :  { %v13274_v13 = vpack.c.bf16 %v4355_v8, %v4343_v2  ;;  %v3031_v51 = vpop.f32.mrb[68].mxu0  ;;  %v3417_v40 = vpop.f32.mrb[68].mxu1  ;;  %v13276_v27 = vpack.c.bf16 %v4357_v16, %v4345_v3 }
 0x2f9   :  { %15120 = vst [vmem:[#allocation16_spill] sm:$0xff] %v13272_v56  ;;  %v10470_v50 = vadd.f32 %v3031_v51, %v13248_v31  ;;  %v10534_v14 = vadd.f32 %v3417_v40, %v13250_v28  ;;  %v3033_v21 = vpop.f32.mrb[69].mxu0  ;;  %v3419_v34 = vpop.f32.mrb[69].mxu1 }
 0x2fa   :  { %15121 = vst [vmem:[#allocation17_spill] sm:$0xff] %v13276_v27  ;;  %v10471_v30 = vadd.f32 %v3033_v21, %v13252_v9  ;;  %v10535_v23 = vadd.f32 %v3419_v34, %v13254_v12  ;;  %v3035_v24 = vpop.f32.mrb[70].mxu0  ;;  %v3421_v61 = vpop.f32.mrb[70].mxu1 }
 0x2fb   :  { %v10472_v45 = vadd.f32 %v3035_v24, %v13248_v31  ;;  %v10536_v6 = vadd.f32 %v3421_v61, %v13250_v28  ;;  %v3037_v44 = vpop.f32.mrb[71].mxu0  ;;  %v3423_v62 = vpop.f32.mrb[71].mxu1  ;;  %v4366_v38 = vmax.f32 %v10470_v50, 0.0  ;;  %v4368_v54 = vmax.f32 %v10534_v14, 0.0 }
 0x2fc   :  { %v10473_v36 = vadd.f32 %v3037_v44, %v13252_v9  ;;  %v10537_v37 = vadd.f32 %v3423_v62, %v13254_v12  ;;  %v4367_v52 = vmax.f32 %v10471_v30, 0.0  ;;  %v4369_v53 = vmax.f32 %v10535_v23, 0.0 }
 0x2fd   :  { %v4378_v57 = vmax.f32 %v10472_v45, 0.0  ;;  %v4380_v19 = vmax.f32 %v10536_v6, 0.0  ;;  %3719 = vmatmul.mubr.bf16.gmra.mrb[176].mxu0 %v12667_v59  ;;  %4105 = vmatmul.mubr.bf16.gmra.mrb[176].mxu1 %v12667_v59 }
 0x2fe   :  { %v4379_v2 = vmax.f32 %v10473_v36, 0.0  ;;  %v4381_v3 = vmax.f32 %v10537_v37, 0.0  ;;  %3728 = vmatprep.mubr.bf16.mxu0 %v12669_v60  ;;  %4114 = vmatprep.mubr.bf16.mxu1 %v12669_v60 }
 0x2ff   :  { %v13290_v8 = vpack.c.bf16 %v4378_v57, %v4366_v38  ;;  %v13292_v16 = vpack.c.bf16 %v4380_v19, %v4368_v54  ;;  %v15124_v19 = vld [vmem:[#allocation24_spill] sm:$0xff] }
 0x300   :  { %v13294_v17 = vpack.c.bf16 %v4379_v2, %v4367_v52  ;;  %v3041_v51 = vpop.f32.mrb[72].mxu0  ;;  %v3427_v40 = vpop.f32.mrb[72].mxu1  ;;  %v13296_v50 = vpack.c.bf16 %v4381_v3, %v4369_v53 }
 0x301   :  { %15122 = vst [vmem:[#allocation18_spill] sm:$0xff] %v13292_v16  ;;  %v10474_v59 = vadd.f32 %v3041_v51, %v13248_v31  ;;  %v10538_v14 = vadd.f32 %v3427_v40, %v13250_v28  ;;  %v3043_v21 = vpop.f32.mrb[73].mxu0  ;;  %v3429_v34 = vpop.f32.mrb[73].mxu1  ;;  %v15125_v51 = vld [vmem:[#allocation25_spill] sm:$0xff] }
 0x302   :  { %15123 = vst [vmem:[#allocation19_spill] sm:$0xff] %v13296_v50  ;;  %v10475_v30 = vadd.f32 %v3043_v21, %v13252_v9  ;;  %v10539_v60 = vadd.f32 %v3429_v34, %v13254_v12  ;;  %v3045_v23 = vpop.f32.mrb[74].mxu0  ;;  %v3431_v24 = vpop.f32.mrb[74].mxu1  ;;  %v11940_v50 = vld [vmem:[#allocation8 + $0x18] ss:$12 sps:$4 sm:$0xff]  }
 0x303   :  { %v10476_v61 = vadd.f32 %v3045_v23, %v13248_v31  ;;  %v10540_v45 = vadd.f32 %v3431_v24, %v13250_v28  ;;  %v3047_v6 = vpop.f32.mrb[75].mxu0  ;;  %v3433_v44 = vpop.f32.mrb[75].mxu1  ;;  %v4390_v37 = vmax.f32 %v10474_v59, 0.0  ;;  %v4392_v38 = vmax.f32 %v10538_v14, 0.0 }
 0x304   :  { %v10477_v62 = vadd.f32 %v3047_v6, %v13252_v9  ;;  %v10541_v36 = vadd.f32 %v3433_v44, %v13254_v12  ;;  %v4391_v52 = vmax.f32 %v10475_v30, 0.0  ;;  %v4393_v53 = vmax.f32 %v10539_v60, 0.0 }
 0x305   :  { %v4402_v54 = vmax.f32 %v10476_v61, 0.0  ;;  %v4404_v57 = vmax.f32 %v10540_v45, 0.0  ;;  %3729 = vmatmul.mubr.bf16.gmra.mrb[180].mxu0 %v15124_v19  ;;  %4115 = vmatmul.mubr.bf16.gmra.mrb[180].mxu1 %v15124_v19 }
 0x306   :  { %v4403_v2 = vmax.f32 %v10477_v62, 0.0  ;;  %v4405_v3 = vmax.f32 %v10541_v36, 0.0  ;;  %3738 = vmatprep.mubr.bf16.mxu0 %v15125_v51  ;;  %4124 = vmatprep.mubr.bf16.mxu1 %v15125_v51  ;;  %v15128_v51 = vld [vmem:[#allocation26_spill] sm:$0xff] }
 0x307   :  { %v13310_v40 = vpack.c.bf16 %v4402_v54, %v4390_v37  ;;  %v13312_v21 = vpack.c.bf16 %v4404_v57, %v4392_v38 }
 0x308   :  { %v13314_v59 = vpack.c.bf16 %v4403_v2, %v4391_v52  ;;  %v3051_v14 = vpop.f32.mrb[76].mxu0  ;;  %v3437_v34 = vpop.f32.mrb[76].mxu1  ;;  %v13316_v23 = vpack.c.bf16 %v4405_v3, %v4393_v53 }
 0x309   :  { %15126 = vst [vmem:[#allocation20_spill] sm:$0xff] %v13312_v21  ;;  %v10478_v24 = vadd.f32 %v3051_v14, %v13248_v31  ;;  %v10542_v30 = vadd.f32 %v3437_v34, %v13250_v28  ;;  %v3053_v60 = vpop.f32.mrb[77].mxu0  ;;  %v3439_v61 = vpop.f32.mrb[77].mxu1 }
 0x30a   :  { %15127 = vst [vmem:[#allocation29_spill] sm:$0xff] %v13316_v23  ;;  %v10479_v45 = vadd.f32 %v3053_v60, %v13252_v9  ;;  %v10543_v6 = vadd.f32 %v3439_v61, %v13254_v12  ;;  %v3055_v44 = vpop.f32.mrb[78].mxu0  ;;  %v3441_v62 = vpop.f32.mrb[78].mxu1 }
 0x30b   :  { %v10480_v36 = vadd.f32 %v3055_v44, %v13248_v31  ;;  %v10544_v37 = vadd.f32 %v3441_v62, %v13250_v28  ;;  %v3057_v38 = vpop.f32.mrb[79].mxu0  ;;  %v3443_v54 = vpop.f32.mrb[79].mxu1  ;;  %v4414_v52 = vmax.f32 %v10478_v24, 0.0  ;;  %v4416_v53 = vmax.f32 %v10542_v30, 0.0  ;;  %v15129_v44 = vld [vmem:[#allocation27_spill] sm:$0xff] }
 0x30c   :  { %v10481_v57 = vadd.f32 %v3057_v38, %v13252_v9  ;;  %v10545_v19 = vadd.f32 %v3443_v54, %v13254_v12  ;;  %v4415_v14 = vmax.f32 %v10479_v45, 0.0  ;;  %v4417_v34 = vmax.f32 %v10543_v6, 0.0 }
 0x30d   :  { %v4426_v2 = vmax.f32 %v10480_v36, 0.0  ;;  %v4428_v3 = vmax.f32 %v10544_v37, 0.0  ;;  %3739 = vmatmul.mubr.bf16.gmra.mrb[184].mxu0 %v15128_v51  ;;  %4125 = vmatmul.mubr.bf16.gmra.mrb[184].mxu1 %v15128_v51 }
 0x30e   :  { %v4427_v60 = vmax.f32 %v10481_v57, 0.0  ;;  %v4429_v61 = vmax.f32 %v10545_v19, 0.0  ;;  %3748 = vmatprep.mubr.bf16.mxu0 %v15129_v44  ;;  %4134 = vmatprep.mubr.bf16.mxu1 %v15129_v44 }
 0x30f   :  { %v13330_v62 = vpack.c.bf16 %v4426_v2, %v4414_v52  ;;  %v13332_v38 = vpack.c.bf16 %v4428_v3, %v4416_v53 }
 0x310   :  { %v13334_v24 = vpack.c.bf16 %v4427_v60, %v4415_v14  ;;  %v3061_v30 = vpop.f32.mrb[80].mxu0  ;;  %v3447_v36 = vpop.f32.mrb[80].mxu1  ;;  %v13336_v37 = vpack.c.bf16 %v4429_v61, %v4417_v34 }
 0x311   :  { %15130 = vst [vmem:[#allocation21_spill] sm:$0xff] %v13332_v38  ;;  %v10482_v54 = vadd.f32 %v3061_v30, %v13248_v31  ;;  %v10546_v45 = vadd.f32 %v3447_v36, %v13250_v28  ;;  %v3063_v6 = vpop.f32.mrb[81].mxu0  ;;  %v3449_v57 = vpop.f32.mrb[81].mxu1 }
 0x312   :  { %15131 = vst [vmem:[#allocation22_spill] sm:$0xff] %v13336_v37  ;;  %v10483_v19 = vadd.f32 %v3063_v6, %v13252_v9  ;;  %v10547_v51 = vadd.f32 %v3449_v57, %v13254_v12  ;;  %v3065_v52 = vpop.f32.mrb[82].mxu0  ;;  %v3451_v2 = vpop.f32.mrb[82].mxu1  ;;  %v15132_v37 = vld [vmem:[#allocation28_spill] sm:$0xff] }
 0x313   :  { %v10484_v53 = vadd.f32 %v3065_v52, %v13248_v31  ;;  %v10548_v3 = vadd.f32 %v3451_v2, %v13250_v28  ;;  %v3067_v14 = vpop.f32.mrb[83].mxu0  ;;  %v3453_v60 = vpop.f32.mrb[83].mxu1  ;;  %v4438_v44 = vmax.f32 %v10482_v54, 0.0  ;;  %v4440_v30 = vmax.f32 %v10546_v45, 0.0 }
 0x314   :  { %v10485_v34 = vadd.f32 %v3067_v14, %v13252_v9  ;;  %v10549_v61 = vadd.f32 %v3453_v60, %v13254_v12  ;;  %v4439_v6 = vmax.f32 %v10483_v19, 0.0  ;;  %v4441_v57 = vmax.f32 %v10547_v51, 0.0 }
 0x315   :  { %v4450_v36 = vmax.f32 %v10484_v53, 0.0  ;;  %v4452_v38 = vmax.f32 %v10548_v3, 0.0  ;;  %3749 = vmatmul.mubr.bf16.gmra.mrb[188].mxu0 %v15132_v37  ;;  %4135 = vmatmul.mubr.bf16.gmra.mrb[188].mxu1 %v15132_v37 }
 0x316   :  { %v4451_v21 = vmax.f32 %v10485_v34, 0.0  ;;  %v4453_v52 = vmax.f32 %v10549_v61, 0.0  ;;  %3791 = vmatprep.mubr.bf16.mxu0 %v15071_v39  ;;  %4177 = vmatprep.mubr.bf16.mxu1 %v15071_v39 }
 0x317   :  { %v13350_v2 = vpack.c.bf16 %v4450_v36, %v4438_v44  ;;  %v13352_v14 = vpack.c.bf16 %v4452_v38, %v4440_v30  ;;  %v11936_v38 = vld [vmem:[#allocation8 + $0x8] ss:$12 sps:$4 sm:$0xff]   ;;  %v11937_v30 = vld [vmem:[#allocation8] ss:$12 sps:$4 sm:$0xff]  }
 0x318   :  { %v13354_v54 = vpack.c.bf16 %v4451_v21, %v4439_v6  ;;  %v3071_v45 = vpop.f32.mrb[84].mxu0  ;;  %v3457_v53 = vpop.f32.mrb[84].mxu1  ;;  %v13356_v3 = vpack.c.bf16 %v4453_v52, %v4441_v57 }
 0x319   :  { %15133 = vst [vmem:[#allocation23_spill] sm:$0xff] %v13350_v2  ;;  %15134 = vst [vmem:[#allocation24_spill] sm:$0xff] %v13352_v14  ;;  %v10486_v37 = vadd.f32 %v3071_v45, %v13248_v31  ;;  %v10550_v19 = vadd.f32 %v3457_v53, %v13250_v28  ;;  %v3073_v51 = vpop.f32.mrb[85].mxu0  ;;  %v3459_v60 = vpop.f32.mrb[85].mxu1  ;;  %v11942_v14 = vld [vmem:[#allocation8 + $0x1c] ss:$12 sps:$4 sm:$0xff]  }
 0x31a   :  { %15135 = vst [vmem:[#allocation25_spill] sm:$0xff] %v13356_v3  ;;  %v10487_v34 = vadd.f32 %v3073_v51, %v13252_v9  ;;  %v10551_v61 = vadd.f32 %v3459_v60, %v13254_v12  ;;  %v3075_v44 = vpop.f32.mrb[86].mxu0  ;;  %v3461_v36 = vpop.f32.mrb[86].mxu1  ;;  %v11943_v3 = vld [vmem:[#allocation8 + $0xe0] ss:$12 sps:$4 sm:$0xff]  }
 0x31b   :  { %v10488_v21 = vadd.f32 %v3075_v44, %v13248_v31  ;;  %v10552_v6 = vadd.f32 %v3461_v36, %v13250_v28  ;;  %v3077_v57 = vpop.f32.mrb[87].mxu0  ;;  %v3463_v52 = vpop.f32.mrb[87].mxu1  ;;  %v4462_v23 = vmax.f32 %v10486_v37, 0.0  ;;  %v4464_v51 = vmax.f32 %v10550_v19, 0.0  ;;  %v11947_v37 = vld [vmem:[#allocation8 + $0x34] ss:$12 sps:$4 sm:$0xff]  }
 0x31c   :  { %v10489_v45 = vadd.f32 %v3077_v57, %v13252_v9  ;;  %v10553_v53 = vadd.f32 %v3463_v52, %v13254_v12  ;;  %v4463_v44 = vmax.f32 %v10487_v34, 0.0  ;;  %v4465_v56 = vmax.f32 %v10551_v61, 0.0  ;;  %v11944_v57 = vld [vmem:[#allocation8 + $0x20] ss:$12 sps:$4 sm:$0xff]   ;;  %v11951_v19 = vld [vmem:[#allocation8 + $0xf8] ss:$12 sps:$4 sm:$0xff]  }
 0x31d   :  { %v4474_v16 = vmax.f32 %v10488_v21, 0.0  ;;  %v4476_v60 = vmax.f32 %v10552_v6, 0.0  ;;  %3792 = vmatmul.mubr.bf16.vlgmr.msra.gmra.mrb[128].mxu0 %v12697_v29  ;;  %4178 = vmatmul.mubr.bf16.vlgmr.msra.gmra.mrb[128].mxu1 %v12697_v29 }
 0x31e   :  { %v4475_v36 = vmax.f32 %v10489_v45, 0.0  ;;  %v4477_v27 = vmax.f32 %v10553_v53, 0.0  ;;  %9667 = vmatpush3.bf16.msra.mxu1 %v11936_v38  ;;  %6852 = vmatpush1.bf16.msra.mxu0 %v11937_v30 }
 0x31f   :  { %v13368_v2 = vpack.c.bf16 %v4474_v16, %v4462_v23  ;;  %3801 = vmatprep.mubr.bf16.mxu0 %v15071_v39  ;;  %4187 = vmatprep.mubr.bf16.mxu1 %v15071_v39  ;;  %v13372_v21 = vpack.c.bf16 %v4476_v60, %v4464_v51 }
 0x320   :  { %v13374_v6 = vpack.c.bf16 %v4475_v36, %v4463_v44  ;;  %v3081_v29 = vpop.f32.mrb[88].mxu0  ;;  %v3467_v34 = vpop.f32.mrb[88].mxu1  ;;  %6853 = vmatprep.subr.bf16.mxu0 %v11942_v14  ;;  %9668 = vmatprep.subr.bf16.mxu1 %v11943_v3  ;;  %v13376_v61 = vpack.c.bf16 %v4477_v27, %v4465_v56  ;;  %v11945_v3 = vld [vmem:[#allocation8 + $0x30] ss:$12 sps:$4 sm:$0xff]   ;;  %v11952_v44 = vld [vmem:[#allocation8 + $0x38] ss:$12 sps:$4 sm:$0xff]  }
 0x321   :  { %15136 = vst [vmem:[#allocation26_spill] sm:$0xff] %v13372_v21  ;;  %v10490_v38 = vadd.f32 %v3081_v29, %v13248_v31  ;;  %v10554_v16 = vadd.f32 %v3467_v34, %v13250_v28  ;;  %v3083_v23 = vpop.f32.mrb[89].mxu0  ;;  %v3469_v30 = vpop.f32.mrb[89].mxu1  ;;  %v11950_v34 = vld [vmem:[#allocation8 + $0x4c] ss:$12 sps:$4 sm:$0xff]  }
 0x322   :  { %15137 = vst [vmem:[#allocation27_spill] sm:$0xff] %v13376_v61  ;;  %v10491_v52 = vadd.f32 %v3083_v23, %v13252_v9  ;;  %v10555_v45 = vadd.f32 %v3469_v30, %v13254_v12  ;;  %v3085_v53 = vpop.f32.mrb[90].mxu0  ;;  %v3471_v51 = vpop.f32.mrb[90].mxu1  ;;  %6854 = vmatpush1.bf16.msra.mxu0 %v11940_v50  ;;  %9669 = vmatpush3.bf16.msra.mxu1 %v11944_v57  ;;  %v11959_v23 = vld [vmem:[#allocation8 + $0x110] ss:$12 sps:$4 sm:$0xff]  }
 0x323   :  { %v10492_v60 = vadd.f32 %v3085_v53, %v13248_v31  ;;  %v10556_v14 = vadd.f32 %v3471_v51, %v13250_v28  ;;  %v3087_v56 = vpop.f32.mrb[91].mxu0  ;;  %v3473_v27 = vpop.f32.mrb[91].mxu1  ;;  %6855 = vmatprep.subr.bf16.mxu0 %v11947_v37  ;;  %9670 = vmatprep.subr.bf16.mxu1 %v11951_v19  ;;  %v4486_v30 = vmax.f32 %v10490_v38, 0.0  ;;  %v4488_v21 = vmax.f32 %v10554_v16, 0.0  ;;  %v11960_v38 = vld [vmem:[#allocation8 + $0x50] ss:$12 sps:$4 sm:$0xff]  }
 0x324   :  { %v10493_v36 = vadd.f32 %v3087_v56, %v13252_v9  ;;  %v10557_v29 = vadd.f32 %v3473_v27, %v13254_v12  ;;  %v4487_v53 = vmax.f32 %v10491_v52, 0.0  ;;  %v4489_v51 = vmax.f32 %v10555_v45, 0.0  ;;  %v11948_v56 = vld [vmem:[#allocation8 + $0x48] ss:$12 sps:$4 sm:$0xff]   ;;  %v11955_v52 = vld [vmem:[#allocation8 + $0x64] ss:$12 sps:$4 sm:$0xff]  }
 0x325   :  { %v4498_v50 = vmax.f32 %v10492_v60, 0.0  ;;  %v4500_v57 = vmax.f32 %v10556_v14, 0.0  ;;  %3802 = vmatmul.mubr.bf16.gmra.mrb[132].mxu0 %v12703_v46  ;;  %4188 = vmatmul.mubr.bf16.gmra.mrb[132].mxu1 %v12703_v46  ;;  %v11967_v45 = vld [vmem:[#allocation8 + $0x128] ss:$12 sps:$4 sm:$0xff]  }
 0x326   :  { %v4499_v61 = vmax.f32 %v10493_v36, 0.0  ;;  %v4501_v37 = vmax.f32 %v10557_v29, 0.0  ;;  %3811 = vmatprep.mubr.bf16.mxu0 %v15071_v39  ;;  %4197 = vmatprep.mubr.bf16.mxu1 %v15071_v39 }
 0x327   :  { %v13390_v19 = vpack.c.bf16 %v4498_v50, %v4486_v30  ;;  %6856 = vmatpush1.bf16.msra.mxu0 %v11945_v3  ;;  %9671 = vmatpush3.bf16.msra.mxu1 %v11952_v44  ;;  %v13392_v16 = vpack.c.bf16 %v4500_v57, %v4488_v21 }
 0x328   :  { %v13394_v60 = vpack.c.bf16 %v4499_v61, %v4487_v53  ;;  %v3091_v14 = vpop.f32.mrb[92].mxu0  ;;  %v3477_v46 = vpop.f32.mrb[92].mxu1  ;;  %6857 = vmatprep.subr.bf16.mxu0 %v11950_v34  ;;  %9672 = vmatprep.subr.bf16.mxu1 %v11959_v23  ;;  %v13396_v27 = vpack.c.bf16 %v4501_v37, %v4489_v51  ;;  %v11953_v51 = vld [vmem:[#allocation8 + $0x60] ss:$12 sps:$4 sm:$0xff]   ;;  %v11968_v37 = vld [vmem:[#allocation8 + $0x68] ss:$12 sps:$4 sm:$0xff]  }
 0x329   :  { %15138 = vst [vmem:[#allocation28_spill] sm:$0xff] %v13390_v19  ;;  %15139 = vst [vmem:[#allocation88_spill] sm:$0xff] %v13392_v16  ;;  %v10494_v36 = vadd.f32 %v3091_v14, %v13248_v31  ;;  %v10558_v29 = vadd.f32 %v3477_v46, %v13250_v28  ;;  %v3093_v3 = vpop.f32.mrb[93].mxu0  ;;  %v3479_v30 = vpop.f32.mrb[93].mxu1 }
 0x32a   :  { %15140 = vst [vmem:[#allocation89_spill] sm:$0xff] %v13394_v60  ;;  %15141 = vst [vmem:[#allocation90_spill] sm:$0xff] %v13396_v27  ;;  %v10495_v44 = vadd.f32 %v3093_v3, %v13252_v9  ;;  %v10559_v21 = vadd.f32 %v3479_v30, %v13254_v12  ;;  %v3095_v61 = vpop.f32.mrb[94].mxu0  ;;  %v3481_v50 = vpop.f32.mrb[94].mxu1  ;;  %v11958_v3 = vld [vmem:[#allocation8 + $0x7c] ss:$12 sps:$4 sm:$0xff]  }
 0x32b   :  { %v10496_v57 = vadd.f32 %v3095_v61, %v13248_v31  ;;  %v10560_v34 = vadd.f32 %v3481_v50, %v13250_v28  ;;  %v3097_v23 = vpop.f32.mrb[95].mxu0  ;;  %v3483_v53 = vpop.f32.mrb[95].mxu1  ;;  %6858 = vmatpush1.bf16.msra.mxu0 %v11948_v56  ;;  %9673 = vmatpush3.bf16.msra.mxu1 %v11960_v38  ;;  %v11975_v30 = vld [vmem:[#allocation8 + $0x140] ss:$12 sps:$4 sm:$0xff]   ;;  %v4510_v16 = vmax.f32 %v10494_v36, 0.0  ;;  %v4512_v27 = vmax.f32 %v10558_v29, 0.0 }
 0x32c   :  { %v10497_v14 = vadd.f32 %v3097_v23, %v13252_v9  ;;  %v10561_v46 = vadd.f32 %v3483_v53, %v13254_v12  ;;  %6859 = vmatprep.subr.bf16.mxu0 %v11955_v52  ;;  %9674 = vmatprep.subr.bf16.mxu1 %v11967_v45  ;;  %v4511_v56 = vmax.f32 %v10495_v44, 0.0  ;;  %v4513_v50 = vmax.f32 %v10559_v21, 0.0  ;;  %v11956_v45 = vld [vmem:[#allocation8 + $0x78] ss:$12 sps:$4 sm:$0xff]   ;;  %v11976_v36 = vld [vmem:[#allocation8 + $0x80] ss:$12 sps:$4 sm:$0xff]  }
 0x32d   :  { %v4522_v19 = vmax.f32 %v10496_v57, 0.0  ;;  %v4524_v61 = vmax.f32 %v10560_v34, 0.0  ;;  %3812 = vmatmul.mubr.bf16.gmra.mrb[136].mxu0 %v12709_v0  ;;  %4198 = vmatmul.mubr.bf16.gmra.mrb[136].mxu1 %v12709_v0  ;;  %v11963_v44 = vld [vmem:[#allocation8 + $0x94] ss:$12 sps:$4 sm:$0xff]   ;;  %v11983_v21 = vld [vmem:[#allocation8 + $0x158] ss:$12 sps:$4 sm:$0xff]  }
 0x32e   :  { %v4523_v38 = vmax.f32 %v10497_v14, 0.0  ;;  %v4525_v60 = vmax.f32 %v10561_v46, 0.0  ;;  %3821 = vmatprep.mubr.bf16.mxu0 %v15071_v39  ;;  %4207 = vmatprep.mubr.bf16.mxu1 %v15071_v39 }
 0x32f   :  { %v13410_v52 = vpack.c.bf16 %v4522_v19, %v4510_v16  ;;  %6860 = vmatpush1.bf16.msra.mxu0 %v11953_v51  ;;  %9675 = vmatpush3.bf16.msra.mxu1 %v11968_v37  ;;  %v13412_v29 = vpack.c.bf16 %v4524_v61, %v4512_v27 }
 0x330   :  { %v13414_v57 = vpack.c.bf16 %v4523_v38, %v4511_v56  ;;  %v3101_v34 = vpop.f32.mrb[96].mxu0  ;;  %v3487_v0 = vpop.f32.mrb[96].mxu1  ;;  %6861 = vmatprep.subr.bf16.mxu0 %v11958_v3  ;;  %9676 = vmatprep.subr.bf16.mxu1 %v11975_v30  ;;  %v13416_v23 = vpack.c.bf16 %v4525_v60, %v4513_v50  ;;  %v11961_v60 = vld [vmem:[#allocation8 + $0x90] ss:$12 sps:$4 sm:$0xff]   ;;  %v11984_v50 = vld [vmem:[#allocation8 + $0x98] ss:$12 sps:$4 sm:$0xff]  }
 0x331   :  { %15142 = vst [vmem:[#allocation91_spill] sm:$0xff] %v13410_v52  ;;  %15143 = vst [vmem:[#allocation92_spill] sm:$0xff] %v13412_v29  ;;  %v10498_v53 = vadd.f32 %v3101_v34, %v13248_v31  ;;  %v10562_v19 = vadd.f32 %v3487_v0, %v13250_v28  ;;  %v3103_v16 = vpop.f32.mrb[97].mxu0  ;;  %v3489_v51 = vpop.f32.mrb[97].mxu1  ;;  %v11966_v0 = vld [vmem:[#allocation8 + $0xac] ss:$12 sps:$4 sm:$0xff]  }
 0x332   :  { %15144 = vst [vmem:[#allocation93_spill] sm:$0xff] %v13416_v23  ;;  %v10499_v37 = vadd.f32 %v3103_v16, %v13252_v9  ;;  %v10563_v27 = vadd.f32 %v3489_v51, %v13254_v12  ;;  %v3105_v14 = vpop.f32.mrb[98].mxu0  ;;  %v3491_v46 = vpop.f32.mrb[98].mxu1  ;;  %v11991_v16 = vld [vmem:[#allocation8 + $0x170] ss:$12 sps:$4 sm:$0xff]  }
 0x333   :  { %v10500_v61 = vadd.f32 %v3105_v14, %v13248_v31  ;;  %v10564_v3 = vadd.f32 %v3491_v46, %v13250_v28  ;;  %v3107_v30 = vpop.f32.mrb[99].mxu0  ;;  %v3493_v56 = vpop.f32.mrb[99].mxu1  ;;  %6862 = vmatpush1.bf16.msra.mxu0 %v11956_v45  ;;  %9677 = vmatpush3.bf16.msra.mxu1 %v11976_v36  ;;  %v4534_v51 = vmax.f32 %v10498_v53, 0.0  ;;  %v4536_v29 = vmax.f32 %v10562_v19, 0.0  ;;  %v11992_v53 = vld [vmem:[#allocation8 + $0xb0] ss:$12 sps:$4 sm:$0xff]  }
 0x334   :  { %v10501_v38 = vadd.f32 %v3107_v30, %v13252_v9  ;;  %v10565_v34 = vadd.f32 %v3493_v56, %v13254_v12  ;;  %6863 = vmatprep.subr.bf16.mxu0 %v11963_v44  ;;  %9678 = vmatprep.subr.bf16.mxu1 %v11983_v21  ;;  %v4535_v45 = vmax.f32 %v10499_v37, 0.0  ;;  %v4537_v46 = vmax.f32 %v10563_v27, 0.0  ;;  %v11964_v21 = vld [vmem:[#allocation8 + $0xa8] ss:$12 sps:$4 sm:$0xff]   ;;  %v11971_v37 = vld [vmem:[#allocation8 + $0xc4] ss:$12 sps:$4 sm:$0xff]  }
 0x335   :  { %v4546_v23 = vmax.f32 %v10500_v61, 0.0  ;;  %v4548_v14 = vmax.f32 %v10564_v3, 0.0  ;;  %3822 = vmatmul.mubr.bf16.gmra.mrb[140].mxu0 %v12715_v32  ;;  %4208 = vmatmul.mubr.bf16.gmra.mrb[140].mxu1 %v12715_v32  ;;  %v11999_v27 = vld [vmem:[#allocation8 + $0x248] ss:$12 sps:$4 sm:$0xff]  }
 0x336   :  { %v4547_v36 = vmax.f32 %v10501_v38, 0.0  ;;  %v4549_v52 = vmax.f32 %v10565_v34, 0.0  ;;  %3831 = vmatprep.mubr.bf16.mxu0 %v15071_v39  ;;  %4217 = vmatprep.mubr.bf16.mxu1 %v15071_v39 }
 0x337   :  { %v13430_v44 = vpack.c.bf16 %v4546_v23, %v4534_v51  ;;  %6864 = vmatpush1.bf16.msra.mxu0 %v11961_v60  ;;  %9679 = vmatpush3.bf16.msra.mxu1 %v11984_v50  ;;  %v13432_v19 = vpack.c.bf16 %v4548_v14, %v4536_v29 }
 0x338   :  { %v13434_v61 = vpack.c.bf16 %v4547_v36, %v4535_v45  ;;  %v3111_v3 = vpop.f32.mrb[100].mxu0  ;;  %v3497_v32 = vpop.f32.mrb[100].mxu1  ;;  %6865 = vmatprep.subr.bf16.mxu0 %v11966_v0  ;;  %9680 = vmatprep.subr.bf16.mxu1 %v11991_v16  ;;  %v13436_v30 = vpack.c.bf16 %v4549_v52, %v4537_v46  ;;  %v11969_v52 = vld [vmem:[#allocation8 + $0xc0] ss:$12 sps:$4 sm:$0xff]  }
 0x339   :  { %15145 = vst [vmem:[#allocation94_spill] sm:$0xff] %v13432_v19  ;;  %v10502_v56 = vadd.f32 %v3111_v3, %v13248_v31  ;;  %v10566_v23 = vadd.f32 %v3497_v32, %v13250_v28  ;;  %v3113_v60 = vpop.f32.mrb[101].mxu0  ;;  %v3499_v38 = vpop.f32.mrb[101].mxu1  ;;  %v11974_v3 = vld [vmem:[#allocation8 + $0xdc] ss:$12 sps:$4 sm:$0xff]  }
 0x33a   :  { %15146 = vst [vmem:[#allocation95_spill] sm:$0xff] %v13436_v30  ;;  %v10503_v50 = vadd.f32 %v3113_v60, %v13252_v9  ;;  %v10567_v29 = vadd.f32 %v3499_v38, %v13254_v12  ;;  %v3115_v34 = vpop.f32.mrb[102].mxu0  ;;  %v3501_v51 = vpop.f32.mrb[102].mxu1 }
 0x33b   :  { %v10504_v14 = vadd.f32 %v3115_v34, %v13248_v31  ;;  %v10568_v0 = vadd.f32 %v3501_v51, %v13250_v28  ;;  %v3117_v16 = vpop.f32.mrb[103].mxu0  ;;  %v3503_v45 = vpop.f32.mrb[103].mxu1  ;;  %6866 = vmatpush1.bf16.msra.mxu0 %v11964_v21  ;;  %9681 = vmatpush3.bf16.msra.mxu1 %v11992_v53  ;;  %v4558_v32 = vmax.f32 %v10502_v56, 0.0  ;;  %v4560_v60 = vmax.f32 %v10566_v23, 0.0 }
 0x33c   :  { %v10505_v46 = vadd.f32 %v3117_v16, %v13252_v9  ;;  %v10569_v36 = vadd.f32 %v3503_v45, %v13254_v12  ;;  %6867 = vmatprep.subr.bf16.mxu0 %v11971_v37  ;;  %9778 = vmatprep.subr.bf16.mxu1 %v11999_v27  ;;  %v4559_v34 = vmax.f32 %v10503_v50, 0.0  ;;  %v4561_v51 = vmax.f32 %v10567_v29, 0.0  ;;  %v11972_v37 = vld [vmem:[#allocation8 + $0xd8] ss:$12 sps:$4 sm:$0xff]  }
 0x33d   :  { %v4570_v38 = vmax.f32 %v10504_v14, 0.0  ;;  %v4572_v19 = vmax.f32 %v10568_v0, 0.0  ;;  %3832 = vmatmul.mubr.bf16.gmra.mrb[144].mxu0 %v12721_v55  ;;  %4218 = vmatmul.mubr.bf16.gmra.mrb[144].mxu1 %v12721_v55  ;;  %v11979_v55 = vld [vmem:[#allocation8 + $0xf4] ss:$12 sps:$4 sm:$0xff]  }
 0x33e   :  { %v4571_v21 = vmax.f32 %v10505_v46, 0.0  ;;  %v4573_v30 = vmax.f32 %v10569_v36, 0.0  ;;  %3841 = vmatprep.mubr.bf16.mxu0 %v15071_v39  ;;  %4227 = vmatprep.mubr.bf16.mxu1 %v15071_v39 }
 0x33f   :  { %v13450_v53 = vpack.c.bf16 %v4570_v38, %v4558_v32  ;;  %6868 = vmatpush1.bf16.msra.mxu0 %v11969_v52  ;;  %v13452_v27 = vpack.c.bf16 %v4572_v19, %v4560_v60 }
 0x340   :  { %v13454_v56 = vpack.c.bf16 %v4571_v21, %v4559_v34  ;;  %v3121_v23 = vpop.f32.mrb[104].mxu0  ;;  %v3507_v14 = vpop.f32.mrb[104].mxu1  ;;  %6869 = vmatprep.subr.bf16.mxu0 %v11974_v3  ;;  %v13456_v50 = vpack.c.bf16 %v4573_v30, %v4561_v51  ;;  %v11977_v30 = vld [vmem:[#allocation8 + $0xf0] ss:$12 sps:$4 sm:$0xff]   ;;  %v11982_v21 = vld [vmem:[#allocation8 + $0x10c] ss:$12 sps:$4 sm:$0xff]  }
 0x341   :  { %15147 = vst [vmem:[#allocation96_spill] sm:$0xff] %v13452_v27  ;;  %v10506_v29 = vadd.f32 %v3121_v23, %v13248_v31  ;;  %v10570_v0 = vadd.f32 %v3507_v14, %v13250_v28  ;;  %v3123_v16 = vpop.f32.mrb[105].mxu0  ;;  %v3509_v45 = vpop.f32.mrb[105].mxu1 }
 0x342   :  { %15148 = vst [vmem:[#allocation97_spill] sm:$0xff] %v13456_v50  ;;  %v10507_v46 = vadd.f32 %v3123_v16, %v13252_v9  ;;  %v10571_v52 = vadd.f32 %v3509_v45, %v13254_v12  ;;  %v3125_v19 = vpop.f32.mrb[106].mxu0  ;;  %v3511_v36 = vpop.f32.mrb[106].mxu1 }
 0x343   :  { %v10508_v32 = vadd.f32 %v3125_v19, %v13248_v31  ;;  %v10572_v60 = vadd.f32 %v3511_v36, %v13250_v28  ;;  %v3127_v3 = vpop.f32.mrb[107].mxu0  ;;  %v3513_v38 = vpop.f32.mrb[107].mxu1  ;;  %6870 = vmatpush1.bf16.msra.mxu0 %v11972_v37  ;;  %v4582_v23 = vmax.f32 %v10506_v29, 0.0  ;;  %v4584_v14 = vmax.f32 %v10570_v0, 0.0 }
 0x344   :  { %v10509_v34 = vadd.f32 %v3127_v3, %v13252_v9  ;;  %v10573_v51 = vadd.f32 %v3513_v38, %v13254_v12  ;;  %6871 = vmatprep.subr.bf16.mxu0 %v11979_v55  ;;  %v4583_v19 = vmax.f32 %v10507_v46, 0.0  ;;  %v4585_v36 = vmax.f32 %v10571_v52, 0.0  ;;  %v11980_v55 = vld [vmem:[#allocation8 + $0x108] ss:$12 sps:$4 sm:$0xff]  }
 0x345   :  { %v4594_v16 = vmax.f32 %v10508_v32, 0.0  ;;  %v4596_v45 = vmax.f32 %v10572_v60, 0.0  ;;  %3842 = vmatmul.mubr.bf16.gmra.mrb[148].mxu0 %v12727_v15  ;;  %4228 = vmatmul.mubr.bf16.gmra.mrb[148].mxu1 %v12727_v15  ;;  %v11987_v15 = vld [vmem:[#allocation8 + $0x124] ss:$12 sps:$4 sm:$0xff]  }
 0x346   :  { %v4595_v27 = vmax.f32 %v10509_v34, 0.0  ;;  %v4597_v50 = vmax.f32 %v10573_v51, 0.0  ;;  %3851 = vmatprep.mubr.bf16.mxu0 %v15071_v39  ;;  %4237 = vmatprep.mubr.bf16.mxu1 %v15071_v39 }
 0x347   :  { %v13470_v37 = vpack.c.bf16 %v4594_v16, %v4582_v23  ;;  %6872 = vmatpush1.bf16.msra.mxu0 %v11977_v30  ;;  %v13472_v29 = vpack.c.bf16 %v4596_v45, %v4584_v14 }
 0x348   :  { %v13474_v0 = vpack.c.bf16 %v4595_v27, %v4583_v19  ;;  %v3131_v32 = vpop.f32.mrb[108].mxu0  ;;  %v3517_v60 = vpop.f32.mrb[108].mxu1  ;;  %6873 = vmatprep.subr.bf16.mxu0 %v11982_v21  ;;  %v13476_v46 = vpack.c.bf16 %v4597_v50, %v4585_v36  ;;  %v11985_v50 = vld [vmem:[#allocation8 + $0x120] ss:$12 sps:$4 sm:$0xff]  }
 0x349   :  { %15149 = vst [vmem:[#allocation98_spill] sm:$0xff] %v13470_v37  ;;  %15150 = vst [vmem:[#allocation99_spill] sm:$0xff] %v13472_v29  ;;  %v10510_v52 = vadd.f32 %v3131_v32, %v13248_v31  ;;  %v10574_v3 = vadd.f32 %v3517_v60, %v13250_v28  ;;  %v3133_v38 = vpop.f32.mrb[109].mxu0  ;;  %v3519_v34 = vpop.f32.mrb[109].mxu1  ;;  %v11990_v32 = vld [vmem:[#allocation8 + $0x13c] ss:$12 sps:$4 sm:$0xff]  }
 0x34a   :  { %15151 = vst [vmem:[#allocation100_spill] sm:$0xff] %v13476_v46  ;;  %v10511_v51 = vadd.f32 %v3133_v38, %v13252_v9  ;;  %v10575_v30 = vadd.f32 %v3519_v34, %v13254_v12  ;;  %v3135_v23 = vpop.f32.mrb[110].mxu0  ;;  %v3521_v14 = vpop.f32.mrb[110].mxu1 }
 0x34b   :  { %v10512_v27 = vadd.f32 %v3135_v23, %v13248_v31  ;;  %v10576_v16 = vadd.f32 %v3521_v14, %v13250_v28  ;;  %v3137_v21 = vpop.f32.mrb[111].mxu0  ;;  %v3523_v45 = vpop.f32.mrb[111].mxu1  ;;  %6874 = vmatpush1.bf16.msra.mxu0 %v11980_v55  ;;  %v4606_v60 = vmax.f32 %v10510_v52, 0.0  ;;  %v4608_v38 = vmax.f32 %v10574_v3, 0.0 }
 0x34c   :  { %v10513_v19 = vadd.f32 %v3137_v21, %v13252_v9  ;;  %v10577_v36 = vadd.f32 %v3523_v45, %v13254_v12  ;;  %6875 = vmatprep.subr.bf16.mxu0 %v11987_v15  ;;  %v4607_v23 = vmax.f32 %v10511_v51, 0.0  ;;  %v4609_v14 = vmax.f32 %v10575_v30, 0.0  ;;  %v11988_v15 = vld [vmem:[#allocation8 + $0x138] ss:$12 sps:$4 sm:$0xff]  }
 0x34d   :  { %v4618_v29 = vmax.f32 %v10512_v27, 0.0  ;;  %v4620_v34 = vmax.f32 %v10576_v16, 0.0  ;;  %3852 = vmatmul.mubr.bf16.gmra.mrb[152].mxu0 %v12733_v42  ;;  %4238 = vmatmul.mubr.bf16.gmra.mrb[152].mxu1 %v12733_v42  ;;  %v11995_v42 = vld [vmem:[#allocation8 + $0x154] ss:$12 sps:$4 sm:$0xff]  }
 0x34e   :  { %v4619_v46 = vmax.f32 %v10513_v19, 0.0  ;;  %v4621_v37 = vmax.f32 %v10577_v36, 0.0  ;;  %3861 = vmatprep.mubr.bf16.mxu0 %v15071_v39  ;;  %4247 = vmatprep.mubr.bf16.mxu1 %v15071_v39 }
 0x34f   :  { %v13490_v55 = vpack.c.bf16 %v4618_v29, %v4606_v60  ;;  %6876 = vmatpush1.bf16.msra.mxu0 %v11985_v50  ;;  %v13492_v52 = vpack.c.bf16 %v4620_v34, %v4608_v38 }
 0x350   :  { %v13494_v3 = vpack.c.bf16 %v4619_v46, %v4607_v23  ;;  %v3141_v27 = vpop.f32.mrb[112].mxu0  ;;  %v3527_v16 = vpop.f32.mrb[112].mxu1  ;;  %6877 = vmatprep.subr.bf16.mxu0 %v11990_v32  ;;  %v13496_v51 = vpack.c.bf16 %v4621_v37, %v4609_v14  ;;  %v11993_v37 = vld [vmem:[#allocation8 + $0x150] ss:$12 sps:$4 sm:$0xff]  }
 0x351   :  { %15152 = vst [vmem:[#allocation101_spill] sm:$0xff] %v13490_v55  ;;  %15153 = vst [vmem:[#allocation102_spill] sm:$0xff] %v13492_v52  ;;  %v10514_v30 = vadd.f32 %v3141_v27, %v13248_v31  ;;  %v10578_v21 = vadd.f32 %v3527_v16, %v13250_v28  ;;  %v3143_v45 = vpop.f32.mrb[113].mxu0  ;;  %v3529_v19 = vpop.f32.mrb[113].mxu1  ;;  %v11998_v27 = vld [vmem:[#allocation8 + $0x16c] ss:$12 sps:$4 sm:$0xff]  }
 0x352   :  { %15154 = vst [vmem:[#allocation103_spill] sm:$0xff] %v13496_v51  ;;  %v10515_v29 = vadd.f32 %v3143_v45, %v13252_v9  ;;  %v10579_v50 = vadd.f32 %v3529_v19, %v13254_v12  ;;  %v3145_v36 = vpop.f32.mrb[114].mxu0  ;;  %v3531_v60 = vpop.f32.mrb[114].mxu1 }
 0x353   :  { %v10516_v46 = vadd.f32 %v3145_v36, %v13248_v31  ;;  %v10580_v38 = vadd.f32 %v3531_v60, %v13250_v28  ;;  %v3147_v32 = vpop.f32.mrb[115].mxu0  ;;  %v3533_v34 = vpop.f32.mrb[115].mxu1  ;;  %6878 = vmatpush1.bf16.msra.mxu0 %v11988_v15  ;;  %v4630_v16 = vmax.f32 %v10514_v30, 0.0  ;;  %v4632_v45 = vmax.f32 %v10578_v21, 0.0 }
 0x354   :  { %v10517_v23 = vadd.f32 %v3147_v32, %v13252_v9  ;;  %v10581_v14 = vadd.f32 %v3533_v34, %v13254_v12  ;;  %6879 = vmatprep.subr.bf16.mxu0 %v11995_v42  ;;  %v4631_v36 = vmax.f32 %v10515_v29, 0.0  ;;  %v4633_v60 = vmax.f32 %v10579_v50, 0.0  ;;  %v11996_v42 = vld [vmem:[#allocation8 + $0x168] ss:$12 sps:$4 sm:$0xff]  }
 0x355   :  { %v4642_v52 = vmax.f32 %v10516_v46, 0.0  ;;  %v4644_v19 = vmax.f32 %v10580_v38, 0.0  ;;  %3862 = vmatmul.mubr.bf16.gmra.mrb[156].mxu0 %v12739_v5  ;;  %4248 = vmatmul.mubr.bf16.gmra.mrb[156].mxu1 %v12739_v5  ;;  %v12003_v5 = vld [vmem:[#allocation8 + $0x184] ss:$12 sps:$4 sm:$0xff]  }
 0x356   :  { %v4643_v51 = vmax.f32 %v10517_v23, 0.0  ;;  %v4645_v55 = vmax.f32 %v10581_v14, 0.0  ;;  %3871 = vmatprep.mubr.bf16.mxu0 %v15071_v39  ;;  %4257 = vmatprep.mubr.bf16.mxu1 %v15071_v39 }
 0x357   :  { %v13510_v15 = vpack.c.bf16 %v4642_v52, %v4630_v16  ;;  %6880 = vmatpush1.bf16.msra.mxu0 %v11993_v37  ;;  %v13512_v30 = vpack.c.bf16 %v4644_v19, %v4632_v45 }
 0x358   :  { %v13514_v21 = vpack.c.bf16 %v4643_v51, %v4631_v36  ;;  %v3151_v46 = vpop.f32.mrb[116].mxu0  ;;  %v3537_v38 = vpop.f32.mrb[116].mxu1  ;;  %6881 = vmatprep.subr.bf16.mxu0 %v11998_v27  ;;  %v13516_v29 = vpack.c.bf16 %v4645_v55, %v4633_v60 }
 0x359   :  { %15155 = vst [vmem:[#allocation104_spill] sm:$0xff] %v13512_v30  ;;  %v10518_v50 = vadd.f32 %v3151_v46, %v13248_v31  ;;  %v10582_v32 = vadd.f32 %v3537_v38, %v13250_v28  ;;  %v3153_v34 = vpop.f32.mrb[117].mxu0  ;;  %v3539_v23 = vpop.f32.mrb[117].mxu1 }
 0x35a   :  { %15156 = vst [vmem:[#allocation105_spill] sm:$0xff] %v13516_v29  ;;  %v10519_v52 = vadd.f32 %v3153_v34, %v13252_v9  ;;  %v10583_v37 = vadd.f32 %v3539_v23, %v13254_v12  ;;  %v3155_v14 = vpop.f32.mrb[118].mxu0  ;;  %v3541_v16 = vpop.f32.mrb[118].mxu1 }
 0x35b   :  { %v10520_v51 = vadd.f32 %v3155_v14, %v13248_v31  ;;  %v10584_v45 = vadd.f32 %v3541_v16, %v13250_v28  ;;  %v3157_v27 = vpop.f32.mrb[119].mxu0  ;;  %v3543_v19 = vpop.f32.mrb[119].mxu1  ;;  %6882 = vmatpush1.bf16.msra.mxu0 %v11996_v42  ;;  %v4654_v60 = vmax.f32 %v10518_v50, 0.0  ;;  %v4656_v46 = vmax.f32 %v10582_v32, 0.0 }
 0x35c   :  { %v10521_v55 = vadd.f32 %v3157_v27, %v13252_v9  ;;  %v10585_v36 = vadd.f32 %v3543_v19, %v13254_v12  ;;  %7044 = vmatprep.subr.bf16.mxu0 %v12003_v5  ;;  %v4655_v23 = vmax.f32 %v10519_v52, 0.0  ;;  %v4657_v14 = vmax.f32 %v10583_v37, 0.0 }
 0x35d   :  { %v4666_v38 = vmax.f32 %v10520_v51, 0.0  ;;  %v4668_v34 = vmax.f32 %v10584_v45, 0.0  ;;  %3872 = vmatmul.mubr.bf16.gmra.mrb[160].mxu0 %v12745_v35  ;;  %4258 = vmatmul.mubr.bf16.gmra.mrb[160].mxu1 %v12745_v35 }
 0x35e   :  { %v4667_v30 = vmax.f32 %v10521_v55, 0.0  ;;  %v4669_v16 = vmax.f32 %v10585_v36, 0.0  ;;  %3881 = vmatprep.mubr.bf16.mxu0 %v15071_v39  ;;  %4267 = vmatprep.mubr.bf16.mxu1 %v15071_v39 }
 0x35f   :  { %v13530_v42 = vpack.c.bf16 %v4666_v38, %v4654_v60  ;;  %v13532_v27 = vpack.c.bf16 %v4668_v34, %v4656_v46 }
 0x360   :  { %v13534_v5 = vpack.c.bf16 %v4667_v30, %v4655_v23  ;;  %v3161_v50 = vpop.f32.mrb[120].mxu0  ;;  %v3547_v32 = vpop.f32.mrb[120].mxu1  ;;  %v13536_v51 = vpack.c.bf16 %v4669_v16, %v4657_v14 }
 0x361   :  { %15157 = vst [vmem:[#allocation106_spill] sm:$0xff] %v13532_v27  ;;  %v10522_v35 = vadd.f32 %v3161_v50, %v13248_v31  ;;  %v10586_v52 = vadd.f32 %v3547_v32, %v13250_v28  ;;  %v3163_v37 = vpop.f32.mrb[121].mxu0  ;;  %v3549_v45 = vpop.f32.mrb[121].mxu1 }
 0x362   :  { %15158 = vst [vmem:[#allocation107_spill] sm:$0xff] %v13536_v51  ;;  %v10523_v19 = vadd.f32 %v3163_v37, %v13252_v9  ;;  %v10587_v55 = vadd.f32 %v3549_v45, %v13254_v12  ;;  %v3165_v36 = vpop.f32.mrb[122].mxu0  ;;  %v3551_v60 = vpop.f32.mrb[122].mxu1 }
 0x363   :  { %v10524_v46 = vadd.f32 %v3165_v36, %v13248_v31  ;;  %v10588_v30 = vadd.f32 %v3551_v60, %v13250_v28  ;;  %v3167_v38 = vpop.f32.mrb[123].mxu0  ;;  %v3553_v34 = vpop.f32.mrb[123].mxu1  ;;  %v4678_v16 = vmax.f32 %v10522_v35, 0.0  ;;  %v4680_v50 = vmax.f32 %v10586_v52, 0.0 }
 0x364   :  { %v10525_v23 = vadd.f32 %v3167_v38, %v13252_v9  ;;  %v10589_v14 = vadd.f32 %v3553_v34, %v13254_v12  ;;  %v4679_v37 = vmax.f32 %v10523_v19, 0.0  ;;  %v4681_v45 = vmax.f32 %v10587_v55, 0.0 }
 0x365   :  { %v4690_v32 = vmax.f32 %v10524_v46, 0.0  ;;  %v4692_v27 = vmax.f32 %v10588_v30, 0.0  ;;  %3882 = vmatmul.mubr.bf16.gmra.mrb[164].mxu0 %v12751_v43  ;;  %4268 = vmatmul.mubr.bf16.gmra.mrb[164].mxu1 %v12751_v43 }
 0x366   :  { %v4691_v51 = vmax.f32 %v10525_v23, 0.0  ;;  %v4693_v36 = vmax.f32 %v10589_v14, 0.0  ;;  %3891 = vmatprep.mubr.bf16.mxu0 %v15071_v39  ;;  %4277 = vmatprep.mubr.bf16.mxu1 %v15071_v39 }
 0x367   :  { %v13550_v60 = vpack.c.bf16 %v4690_v32, %v4678_v16  ;;  %v13552_v38 = vpack.c.bf16 %v4692_v27, %v4680_v50 }
 0x368   :  { %v13554_v35 = vpack.c.bf16 %v4691_v51, %v4679_v37  ;;  %v3171_v52 = vpop.f32.mrb[124].mxu0  ;;  %v3557_v46 = vpop.f32.mrb[124].mxu1  ;;  %v13556_v30 = vpack.c.bf16 %v4693_v36, %v4681_v45 }
 0x369   :  { %15159 = vst [vmem:[#allocation108_spill] sm:$0xff] %v13552_v38  ;;  %v10526_v43 = vadd.f32 %v3171_v52, %v13248_v31  ;;  %v10590_v19 = vadd.f32 %v3557_v46, %v13250_v28  ;;  %v3173_v55 = vpop.f32.mrb[125].mxu0  ;;  %v3559_v34 = vpop.f32.mrb[125].mxu1 }
 0x36a   :  { %15160 = vst [vmem:[#allocation109_spill] sm:$0xff] %v13556_v30  ;;  %v10527_v23 = vadd.f32 %v3173_v55, %v13252_v9  ;;  %v3175_v14 = vpop.f32.mrb[126].mxu0  ;;  %v3561_v29 = vpop.f32.mrb[126].mxu1  ;;  %v10591_v16 = vadd.f32 %v3559_v34, %v13254_v12 }
 0x36b   :  { %v10528_v27 = vadd.f32 %v3175_v14, %v13248_v31  ;;  %v10592_v51 = vadd.f32 %v3561_v29, %v13250_v28  ;;  %v3177_v50 = vpop.f32.mrb[127].mxu0  ;;  %v3563_v32 = vpop.f32.mrb[127].mxu1  ;;  %v4702_v36 = vmax.f32 %v10526_v43, 0.0  ;;  %v4704_v52 = vmax.f32 %v10590_v19, 0.0  ;;  %v12011_v43 = vld [vmem:[#allocation8 + $0x1b4] ss:$12 sps:$4 sm:$0xff]  }
 0x36c   :  { %v10529_v37 = vadd.f32 %v3177_v50, %v13252_v9  ;;  %v10593_v45 = vadd.f32 %v3563_v32, %v13254_v12  ;;  %v4703_v55 = vmax.f32 %v10527_v23, 0.0  ;;  %v4705_v31 = vmax.f32 %v10591_v16, 0.0  ;;  %v12015_v19 = vld [vmem:[#allocation8 + $0x278] ss:$12 sps:$4 sm:$0xff]   ;;  %v12009_v23 = vld [vmem:[#allocation8 + $0x1b0] ss:$12 sps:$4 sm:$0xff]  }
 0x36d   :  { %v4714_v46 = vmax.f32 %v10528_v27, 0.0  ;;  %v4716_v38 = vmax.f32 %v10592_v51, 0.0  ;;  %3892 = vmatmul.mubr.bf16.gmra.mrb[168].mxu0 %v12757_v49  ;;  %4278 = vmatmul.mubr.bf16.gmra.mrb[168].mxu1 %v12757_v49  ;;  %v15161_v49 = vld [vmem:[#allocation35_spill] sm:$0xff]  ;;  %v12016_v14 = vld [vmem:[#allocation8 + $0x1b8] ss:$12 sps:$4 sm:$0xff]   ;;  %v15164_v51 = vld [vmem:[#allocation37_spill] sm:$0xff] }
 0x36e   :  { %v4715_v34 = vmax.f32 %v10529_v37, 0.0  ;;  %v4717_v30 = vmax.f32 %v10593_v45, 0.0  ;;  %3901 = vmatprep.mubr.bf16.mxu0 %v15071_v39  ;;  %4287 = vmatprep.mubr.bf16.mxu1 %v15071_v39  ;;  %v12014_v16 = vld [vmem:[#allocation8 + $0x1cc] ss:$12 sps:$4 sm:$0xff]   ;;  %v12023_v27 = vld [vmem:[#allocation8 + $0x290] ss:$12 sps:$4 sm:$0xff]  }
 0x36f   :  { %v13570_v28 = vpack.c.bf16 %v4714_v46, %v4702_v36  ;;  %v13572_v9 = vpack.c.bf16 %v4716_v38, %v4704_v52  ;;  %v12007_v38 = vld [vmem:[#allocation8 + $0x260] ss:$12 sps:$4 sm:$0xff]   ;;  %v12012_v32 = vld [vmem:[#allocation8 + $0x1c8] ss:$12 sps:$4 sm:$0xff]   ;;  %v12024_v37 = vld [vmem:[#allocation8 + $0x1d0] ss:$12 sps:$4 sm:$0xff]  }
 0x370   :  { %v13574_v12 = vpack.c.bf16 %v4715_v34, %v4703_v55  ;;  %v13576_v29 = vpack.c.bf16 %v4717_v30, %v4705_v31  ;;  %v15162_v30 = vld [vmem:[#allocation33_spill] sm:$0xff]  ;;  %v15165_v50 = vld [vmem:[#allocation43_spill] sm:$0xff]  ;;  %v12031_v36 = vld [vmem:[#allocation8 + $0x2a8] ss:$12 sps:$4 sm:$0xff]  }
 0x371   :  { %v12019_v45 = vld [vmem:[#allocation8 + $0x1e4] ss:$12 sps:$4 sm:$0xff]   ;;  %v12017_v52 = vld [vmem:[#allocation8 + $0x1e0] ss:$12 sps:$4 sm:$0xff]   ;;  %v12032_v46 = vld [vmem:[#allocation8 + $0x1e8] ss:$12 sps:$4 sm:$0xff]  }
 0x372   :  { %v12022_v55 = vld [vmem:[#allocation8 + $0x1fc] ss:$12 sps:$4 sm:$0xff]   ;;  %v12039_v34 = vld [vmem:[#allocation8 + $0x2c0] ss:$12 sps:$4 sm:$0xff]  }
 0x373   :  { %v15166_v31 = vld [vmem:[#allocation41_spill] sm:$0xff] }
 0x375   :  { %3902 = vmatmul.mubr.bf16.gmra.mrb[172].mxu0 %v12763_v58  ;;  %4288 = vmatmul.mubr.bf16.gmra.mrb[172].mxu1 %v12763_v58  ;;  %v12000_v58 = vld [vmem:[#allocation8 + $0x188] ss:$12 sps:$4 sm:$0xff]  }
 0x376   :  { %3911 = vmatprep.mubr.bf16.mxu0 %v15071_v39  ;;  %4297 = vmatprep.mubr.bf16.mxu1 %v15071_v39 }
 0x37d   :  { %3912 = vmatmul.mubr.bf16.gmra.mrb[176].mxu0 %v12769_v63  ;;  %4298 = vmatmul.mubr.bf16.gmra.mrb[176].mxu1 %v12769_v63  ;;  %v12001_v63 = vld [vmem:[#allocation8 + $0x180] ss:$12 sps:$4 sm:$0xff]  }
 0x37e   :  { %3921 = vmatprep.mubr.bf16.mxu0 %v15071_v39  ;;  %4307 = vmatprep.mubr.bf16.mxu1 %v15071_v39 }
 0x385   :  { %3922 = vmatmul.mubr.bf16.gmra.mrb[180].mxu0 %v12775_v11  ;;  %4308 = vmatmul.mubr.bf16.gmra.mrb[180].mxu1 %v12775_v11  ;;  %v12006_v11 = vld [vmem:[#allocation8 + $0x19c] ss:$12 sps:$4 sm:$0xff]  }
 0x386   :  { %3931 = vmatprep.mubr.bf16.mxu0 %v15071_v39  ;;  %4317 = vmatprep.mubr.bf16.mxu1 %v15071_v39 }
 0x38d   :  { %3932 = vmatmul.mubr.bf16.gmra.mrb[184].mxu0 %v12781_v26  ;;  %4318 = vmatmul.mubr.bf16.gmra.mrb[184].mxu1 %v12781_v26  ;;  %v15163_v26 = vld [vmem:[#allocation39_spill] sm:$0xff] }
 0x38e   :  { %3941 = vmatprep.mubr.bf16.mxu0 %v15071_v39  ;;  %4327 = vmatprep.mubr.bf16.mxu1 %v15071_v39  ;;  %v12004_v39 = vld [vmem:[#allocation8 + $0x198] ss:$12 sps:$4 sm:$0xff]  }
 0x395   :  { %3942 = vmatmul.mubr.bf16.gmra.mrb[188].mxu0 %v12787_v33  ;;  %4328 = vmatmul.mubr.bf16.gmra.mrb[188].mxu1 %v12787_v33  ;;  %v12008_v33 = vld [vmem:[#allocation8 + $0x1a0] ss:$12 sps:$4 sm:$0xff]  }
 0x396   :  { %6883 = vmatprep.mubr.bf16.mxu0 %v15161_v49  ;;  %8041 = vmatprep.mubr.bf16.mxu1 %v15161_v49  ;;  %v15167_v49 = vld [vmem:[#allocation47_spill] sm:$0xff] }
 0x39d   :  { %6884 = vmatmul.mubr.bf16.vlgmr.msra.gmra.mrb[192].mxu0 %v15162_v30  ;;  %8042 = vmatmul.mubr.bf16.vlgmr.msra.gmra.mrb[192].mxu1 %v15162_v30  ;;  %v12025_v30 = vld [vmem:[#allocation8 + $0x210] ss:$12 sps:$4 sm:$0xff]  }
 0x39e   :  { %6893 = vmatprep.mubr.bf16.mxu0 %v15163_v26  ;;  %8049 = vmatprep.mubr.bf16.mxu1 %v15163_v26  ;;  %v12048_v26 = vld [vmem:[#allocation8 + $0x218] ss:$12 sps:$4 sm:$0xff]  }
 0x39f   :  { %9779 = vmatpush3.bf16.msra.mxu1 %v12000_v58  ;;  %7045 = vmatpush1.bf16.msra.mxu0 %v12001_v63  ;;  %v12020_v58 = vld [vmem:[#allocation8 + $0x1f8] ss:$12 sps:$4 sm:$0xff]   ;;  %v12040_v63 = vld [vmem:[#allocation8 + $0x200] ss:$12 sps:$4 sm:$0xff]  }
 0x3a0   :  { %7046 = vmatprep.subr.bf16.mxu0 %v12006_v11  ;;  %9780 = vmatprep.subr.bf16.mxu1 %v12007_v38  ;;  %v12027_v11 = vld [vmem:[#allocation8 + $0x214] ss:$12 sps:$4 sm:$0xff]   ;;  %v12047_v38 = vld [vmem:[#allocation8 + $0x2d8] ss:$12 sps:$4 sm:$0xff]  }
 0x3a3   :  { %7047 = vmatpush1.bf16.msra.mxu0 %v12004_v39  ;;  %9781 = vmatpush3.bf16.msra.mxu1 %v12008_v33  ;;  %v12030_v39 = vld [vmem:[#allocation8 + $0x22c] ss:$12 sps:$4 sm:$0xff]   ;;  %v12055_v33 = vld [vmem:[#allocation8 + $0x2f0] ss:$12 sps:$4 sm:$0xff]  }
 0x3a4   :  { %7048 = vmatprep.subr.bf16.mxu0 %v12011_v43  ;;  %9782 = vmatprep.subr.bf16.mxu1 %v12015_v19  ;;  %v15168_v43 = vld [vmem:[#allocation45_spill] sm:$0xff]  ;;  %v15169_v19 = vld [vmem:[#allocation51_spill] sm:$0xff] }
 0x3a5   :  { %6894 = vmatmul.mubr.bf16.gmra.mrb[196].mxu0 %v15164_v51  ;;  %8050 = vmatmul.mubr.bf16.gmra.mrb[196].mxu1 %v15164_v51  ;;  %v12033_v51 = vld [vmem:[#allocation8 + $0x240] ss:$12 sps:$4 sm:$0xff]  }
 0x3a6   :  { %6903 = vmatprep.mubr.bf16.mxu0 %v15165_v50  ;;  %8057 = vmatprep.mubr.bf16.mxu1 %v15165_v50  ;;  %v12038_v50 = vld [vmem:[#allocation8 + $0x25c] ss:$12 sps:$4 sm:$0xff]  }
 0x3a7   :  { %7049 = vmatpush1.bf16.msra.mxu0 %v12009_v23  ;;  %9783 = vmatpush3.bf16.msra.mxu1 %v12016_v14  ;;  %v12028_v23 = vld [vmem:[#allocation8 + $0x228] ss:$12 sps:$4 sm:$0xff]   ;;  %v12056_v14 = vld [vmem:[#allocation8 + $0x230] ss:$12 sps:$4 sm:$0xff]  }
 0x3a8   :  { %7050 = vmatprep.subr.bf16.mxu0 %v12014_v16  ;;  %9784 = vmatprep.subr.bf16.mxu1 %v12023_v27  ;;  %v12035_v16 = vld [vmem:[#allocation8 + $0x244] ss:$12 sps:$4 sm:$0xff]   ;;  %v12063_v27 = vld [vmem:[#allocation8 + $0x3c8] ss:$12 sps:$4 sm:$0xff]  }
 0x3ab   :  { %7051 = vmatpush1.bf16.msra.mxu0 %v12012_v32  ;;  %9785 = vmatpush3.bf16.msra.mxu1 %v12024_v37  ;;  %v15170_v32 = vld [vmem:[#allocation49_spill] sm:$0xff]  ;;  %v15171_v37 = vld [vmem:[#allocation55_spill] sm:$0xff] }
 0x3ac   :  { %7052 = vmatprep.subr.bf16.mxu0 %v12019_v45  ;;  %9786 = vmatprep.subr.bf16.mxu1 %v12031_v36  ;;  %v12036_v45 = vld [vmem:[#allocation8 + $0x258] ss:$12 sps:$4 sm:$0xff]   ;;  %v12043_v36 = vld [vmem:[#allocation8 + $0x274] ss:$12 sps:$4 sm:$0xff]  }
 0x3ad   :  { %6904 = vmatmul.mubr.bf16.gmra.mrb[200].mxu0 %v15166_v31  ;;  %8058 = vmatmul.mubr.bf16.gmra.mrb[200].mxu1 %v15166_v31  ;;  %v12044_v31 = vld [vmem:[#allocation8 + $0x288] ss:$12 sps:$4 sm:$0xff]  }
 0x3ae   :  { %6913 = vmatprep.mubr.bf16.mxu0 %v15167_v49  ;;  %8065 = vmatprep.mubr.bf16.mxu1 %v15167_v49  ;;  %v12051_v49 = vld [vmem:[#allocation8 + $0x2a4] ss:$12 sps:$4 sm:$0xff]  }
 0x3af   :  { %7053 = vmatpush1.bf16.msra.mxu0 %v12017_v52  ;;  %9787 = vmatpush3.bf16.msra.mxu1 %v12032_v46  ;;  %v12041_v52 = vld [vmem:[#allocation8 + $0x270] ss:$12 sps:$4 sm:$0xff]   ;;  %v12046_v46 = vld [vmem:[#allocation8 + $0x28c] ss:$12 sps:$4 sm:$0xff]  }
 0x3b0   :  { %7054 = vmatprep.subr.bf16.mxu0 %v12022_v55  ;;  %9788 = vmatprep.subr.bf16.mxu1 %v12039_v34  ;;  %v15172_v55 = vld [vmem:[#allocation53_spill] sm:$0xff]  ;;  %v15173_v34 = vld [vmem:[#allocation59_spill] sm:$0xff] }
 0x3b3   :  { %7055 = vmatpush1.bf16.msra.mxu0 %v12020_v58  ;;  %9789 = vmatpush3.bf16.msra.mxu1 %v12040_v63  ;;  %v12049_v58 = vld [vmem:[#allocation8 + $0x2a0] ss:$12 sps:$4 sm:$0xff]   ;;  %v12054_v63 = vld [vmem:[#allocation8 + $0x2bc] ss:$12 sps:$4 sm:$0xff]  }
 0x3b4   :  { %7056 = vmatprep.subr.bf16.mxu0 %v12027_v11  ;;  %9790 = vmatprep.subr.bf16.mxu1 %v12047_v38  ;;  %v15174_v11 = vld [vmem:[#allocation57_spill] sm:$0xff]  ;;  %v15175_v38 = vld [vmem:[#allocation63_spill] sm:$0xff] }
 0x3b5   :  { %6914 = vmatmul.mubr.bf16.gmra.mrb[204].mxu0 %v15168_v43  ;;  %8066 = vmatmul.mubr.bf16.gmra.mrb[204].mxu1 %v15168_v43  ;;  %v15176_v43 = vld [vmem:[#allocation61_spill] sm:$0xff] }
 0x3b6   :  { %6923 = vmatprep.mubr.bf16.mxu0 %v15169_v19  ;;  %8073 = vmatprep.mubr.bf16.mxu1 %v15169_v19  ;;  %v15177_v19 = vld [vmem:[#allocation67_spill] sm:$0xff] }
 0x3b7   :  { %7057 = vmatpush1.bf16.msra.mxu0 %v12025_v30  ;;  %9791 = vmatpush3.bf16.msra.mxu1 %v12048_v26  ;;  %v12052_v30 = vld [vmem:[#allocation8 + $0x2b8] ss:$12 sps:$4 sm:$0xff]   ;;  %v12059_v26 = vld [vmem:[#allocation8 + $0x2d4] ss:$12 sps:$4 sm:$0xff]  }
 0x3b8   :  { %7058 = vmatprep.subr.bf16.mxu0 %v12030_v39  ;;  %9792 = vmatprep.subr.bf16.mxu1 %v12055_v33  ;;  %v12057_v39 = vld [vmem:[#allocation8 + $0x2d0] ss:$12 sps:$4 sm:$0xff]   ;;  %v12062_v33 = vld [vmem:[#allocation8 + $0x2ec] ss:$12 sps:$4 sm:$0xff]  }
 0x3bb   :  { %7059 = vmatpush1.bf16.msra.mxu0 %v12028_v23  ;;  %9793 = vmatpush3.bf16.msra.mxu1 %v12056_v14  ;;  %v12060_v23 = vld [vmem:[#allocation8 + $0x2e8] ss:$12 sps:$4 sm:$0xff]   ;;  %v12067_v14 = vld [vmem:[#allocation8 + $0x304] ss:$12 sps:$4 sm:$0xff]  }
 0x3bc   :  { %7060 = vmatprep.subr.bf16.mxu0 %v12035_v16  ;;  %9890 = vmatprep.subr.bf16.mxu1 %v12063_v27  ;;  %v15178_v16 = vld [vmem:[#allocation65_spill] sm:$0xff]  ;;  %v15179_v27 = vld [vmem:[#allocation71_spill] sm:$0xff] }
 0x3bd   :  { %6924 = vmatmul.mubr.bf16.gmra.mrb[208].mxu0 %v15170_v32  ;;  %8074 = vmatmul.mubr.bf16.gmra.mrb[208].mxu1 %v15170_v32  ;;  %v519_v32 = vld [vmem:[#allocation7 + $0x8] sm:$0xf] }
 0x3be   :  { %6933 = vmatprep.mubr.bf16.mxu0 %v15171_v37  ;;  %8081 = vmatprep.mubr.bf16.mxu1 %v15171_v37  ;;  %v15182_v37 = vld [vmem:[#allocation73_spill] sm:$0xff] }
 0x3bf   :  { %7061 = vmatpush1.bf16.msra.mxu0 %v12033_v51  ;;  %v15180_v51 = vld [vmem:[#allocation69_spill] sm:$0xff] }
 0x3c0   :  { %7062 = vmatprep.subr.bf16.mxu0 %v12038_v50  ;;  %v15181_v50 = vld [vmem:[#allocation75_spill] sm:$0xff] }
 0x3c3   :  { %7063 = vmatpush1.bf16.msra.mxu0 %v12036_v45  ;;  %v15183_v45 = vld [vmem:[#allocation30_spill] sm:$0xff] }
 0x3c4   :  { %7064 = vmatprep.subr.bf16.mxu0 %v12043_v36  ;;  %v13641_v36 = vrot.slane %v519_v32, %v15183_v45 }
 0x3c5   :  { %6934 = vmatmul.mubr.bf16.gmra.mrb[212].mxu0 %v15172_v55  ;;  %8082 = vmatmul.mubr.bf16.gmra.mrb[212].mxu1 %v15172_v55  ;;  %v15185_v55 = vld [vmem:[#allocation79_spill] sm:$0xff] }
 0x3c6   :  { %6943 = vmatprep.mubr.bf16.mxu0 %v15173_v34  ;;  %8089 = vmatprep.mubr.bf16.mxu1 %v15173_v34  ;;  %v15186_v34 = vld [vmem:[#allocation32_spill] sm:$0xff] }
 0x3c7   :  { %7065 = vmatpush1.bf16.msra.mxu0 %v12041_v52  ;;  %v15184_v52 = vld [vmem:[#allocation31_spill] sm:$0xff] }
 0x3c8   :  { %7066 = vmatprep.subr.bf16.mxu0 %v12046_v46  ;;  %v13644_v46 = vrot.slane %v519_v32, %v15184_v52 }
 0x3cb   :  { %7067 = vmatpush1.bf16.msra.mxu0 %v12044_v31  ;;  %v13649_v31 = vrot.slane %v519_v32, %v15186_v34 }
 0x3cc   :  { %7068 = vmatprep.subr.bf16.mxu0 %v12051_v49  ;;  %v15187_v49 = vsub.s32 3, %v15116_v10 }
 0x3cd   :  { %6944 = vmatmul.mubr.bf16.gmra.mrb[216].mxu0 %v15174_v11  ;;  %8090 = vmatmul.mubr.bf16.gmra.mrb[216].mxu1 %v15174_v11 }
 0x3ce   :  { %6953 = vmatprep.mubr.bf16.mxu0 %v15175_v38  ;;  %8097 = vmatprep.mubr.bf16.mxu1 %v15175_v38 }
 0x3cf   :  { %7069 = vmatpush1.bf16.msra.mxu0 %v12049_v58  ;;  %v13653_v58 = vrot.slane %v519_v32, %v15187_v49 }
 0x3d0   :  { %7070 = vmatprep.subr.bf16.mxu0 %v12054_v63 }
 0x3d3   :  { %7071 = vmatpush1.bf16.msra.mxu0 %v12052_v30 }
 0x3d4   :  { %7072 = vmatprep.subr.bf16.mxu0 %v12059_v26 }
 0x3d5   :  { %6954 = vmatmul.mubr.bf16.gmra.mrb[220].mxu0 %v15176_v43  ;;  %8098 = vmatmul.mubr.bf16.gmra.mrb[220].mxu1 %v15176_v43 }
 0x3d6   :  { %6963 = vmatprep.mubr.bf16.mxu0 %v15177_v19  ;;  %8105 = vmatprep.mubr.bf16.mxu1 %v15177_v19 }
 0x3d7   :  { %7073 = vmatpush1.bf16.msra.mxu0 %v12057_v39 }
 0x3d8   :  { %7074 = vmatprep.subr.bf16.mxu0 %v12062_v33 }
 0x3db   :  { %7075 = vmatpush1.bf16.msra.mxu0 %v12060_v23 }
 0x3dc   :  { %7237 = vmatprep.subr.bf16.mxu0 %v12067_v14 }
 0x3dd   :  { %6964 = vmatmul.mubr.bf16.gmra.mrb[224].mxu0 %v15178_v16  ;;  %8106 = vmatmul.mubr.bf16.gmra.mrb[224].mxu1 %v15178_v16 }
 0x3de   :  { %6973 = vmatprep.mubr.bf16.mxu0 %v15179_v27  ;;  %8113 = vmatprep.mubr.bf16.mxu1 %v15179_v27 }
 0x3e5   :  { %6974 = vmatmul.mubr.bf16.gmra.mrb[228].mxu0 %v15180_v51  ;;  %8114 = vmatmul.mubr.bf16.gmra.mrb[228].mxu1 %v15180_v51 }
 0x3e6   :  { %6983 = vmatprep.mubr.bf16.mxu0 %v15181_v50  ;;  %8121 = vmatprep.mubr.bf16.mxu1 %v15181_v50 }
 0x3ed   :  { %6984 = vmatmul.mubr.bf16.gmra.mrb[232].mxu0 %v15182_v37  ;;  %8122 = vmatmul.mubr.bf16.gmra.mrb[232].mxu1 %v15182_v37 }
 0x3ee   :  { %6993 = vmatprep.mubr.bf16.mxu0 %v15185_v55  ;;  %8129 = vmatprep.mubr.bf16.mxu1 %v15185_v55 }
 0x3f0   :  { %v3793_v63 = vpop.f32.mrb[128].mxu0  ;;  %v4179_v11 = vpop.f32.mrb[128].mxu1 }
 0x3f1   :  { %v10594_v38 = vadd.f32 %v3793_v63, %v13641_v36  ;;  %v10658_v30 = vadd.f32 %v4179_v11, %v13644_v46  ;;  %v3795_v26 = vpop.f32.mrb[129].mxu0  ;;  %v4181_v39 = vpop.f32.mrb[129].mxu1  ;;  %v15188_v63 = vld [vmem:[#allocation77_spill] sm:$0xff] }
 0x3f2   :  { %v10595_v33 = vadd.f32 %v3795_v26, %v13649_v31  ;;  %v10659_v43 = vadd.f32 %v4181_v39, %v13653_v58  ;;  %v3797_v19 = vpop.f32.mrb[130].mxu0  ;;  %v4183_v23 = vpop.f32.mrb[130].mxu1 }
 0x3f3   :  { %v10596_v14 = vadd.f32 %v3797_v19, %v13641_v36  ;;  %v10660_v10 = vadd.f32 %v4183_v23, %v13644_v46  ;;  %v3799_v16 = vpop.f32.mrb[131].mxu0  ;;  %v4185_v27 = vpop.f32.mrb[131].mxu1  ;;  %v4346_v32 = vmax.f32 %v10594_v38, 0.0  ;;  %v4348_v37 = vmax.f32 %v10658_v30, 0.0 }
 0x3f4   :  { %v10597_v51 = vadd.f32 %v3799_v16, %v13649_v31  ;;  %v10661_v50 = vadd.f32 %v4185_v27, %v13653_v58  ;;  %v4347_v11 = vmax.f32 %v10595_v33, 0.0  ;;  %v4349_v26 = vmax.f32 %v10659_v43, 0.0 }
 0x3f5   :  { %v4358_v55 = vmax.f32 %v10596_v14, 0.0  ;;  %v4360_v49 = vmax.f32 %v10660_v10, 0.0  ;;  %6994 = vmatmul.mubr.bf16.gmra.mrb[236].mxu0 %v15188_v63  ;;  %8130 = vmatmul.mubr.bf16.gmra.mrb[236].mxu1 %v15188_v63 }
 0x3f6   :  { %v4359_v39 = vmax.f32 %v10597_v51, 0.0  ;;  %v4361_v19 = vmax.f32 %v10661_v50, 0.0  ;;  %7003 = vmatprep.mubr.bf16.mxu0 %v13118_v25  ;;  %8137 = vmatprep.mubr.bf16.mxu1 %v13118_v25 }
 0x3f7   :  { %v13667_v23 = vpack.c.bf16 %v4358_v55, %v4346_v32  ;;  %v13669_v16 = vpack.c.bf16 %v4360_v49, %v4348_v37 }
 0x3f8   :  { %v13671_v38 = vpack.c.bf16 %v4359_v39, %v4347_v11  ;;  %v3803_v30 = vpop.f32.mrb[132].mxu0  ;;  %v4189_v14 = vpop.f32.mrb[132].mxu1  ;;  %v13673_v10 = vpack.c.bf16 %v4361_v19, %v4349_v26 }
 0x3f9   :  { %15189 = vst [vmem:[#allocation35_spill] sm:$0xff] %v13669_v16  ;;  %v10598_v27 = vadd.f32 %v3803_v30, %v13641_v36  ;;  %v10662_v33 = vadd.f32 %v4189_v14, %v13644_v46  ;;  %v3805_v43 = vpop.f32.mrb[133].mxu0  ;;  %v4191_v51 = vpop.f32.mrb[133].mxu1 }
 0x3fa   :  { %15190 = vst [vmem:[#allocation33_spill] sm:$0xff] %v13673_v10  ;;  %v10599_v50 = vadd.f32 %v3805_v43, %v13649_v31  ;;  %v10663_v25 = vadd.f32 %v4191_v51, %v13653_v58  ;;  %v3807_v32 = vpop.f32.mrb[134].mxu0  ;;  %v4193_v55 = vpop.f32.mrb[134].mxu1  ;;  %v15203_v10 = vld [vmem:[#allocation36_spill] sm:$0xff] }
 0x3fb   :  { %v10600_v37 = vadd.f32 %v3807_v32, %v13641_v36  ;;  %v10664_v49 = vadd.f32 %v4193_v55, %v13644_v46  ;;  %v3809_v63 = vpop.f32.mrb[135].mxu0  ;;  %v4195_v11 = vpop.f32.mrb[135].mxu1  ;;  %v4370_v19 = vmax.f32 %v10598_v27, 0.0  ;;  %v4372_v30 = vmax.f32 %v10662_v33, 0.0 }
 0x3fc   :  { %v10601_v26 = vadd.f32 %v3809_v63, %v13649_v31  ;;  %v10665_v39 = vadd.f32 %v4195_v11, %v13653_v58  ;;  %v4371_v43 = vmax.f32 %v10599_v50, 0.0  ;;  %v4373_v51 = vmax.f32 %v10663_v25, 0.0 }
 0x3fd   :  { %v4382_v14 = vmax.f32 %v10600_v37, 0.0  ;;  %v4384_v34 = vmax.f32 %v10664_v49, 0.0  ;;  %7004 = vmatmul.mubr.bf16.gmra.mrb[240].mxu0 %v13114_v4  ;;  %8138 = vmatmul.mubr.bf16.gmra.mrb[240].mxu1 %v13114_v4 }
 0x3fe   :  { %v4383_v45 = vmax.f32 %v10601_v26, 0.0  ;;  %v4385_v32 = vmax.f32 %v10665_v39, 0.0  ;;  %7013 = vmatprep.mubr.bf16.mxu0 %v13138_v47  ;;  %8145 = vmatprep.mubr.bf16.mxu1 %v13138_v47 }
 0x3ff   :  { %v13687_v55 = vpack.c.bf16 %v4382_v14, %v4370_v19  ;;  %v13689_v63 = vpack.c.bf16 %v4384_v34, %v4372_v30 }
 0x400   :  { %v13691_v27 = vpack.c.bf16 %v4383_v45, %v4371_v43  ;;  %v3813_v33 = vpop.f32.mrb[136].mxu0  ;;  %v4199_v37 = vpop.f32.mrb[136].mxu1  ;;  %v13693_v49 = vpack.c.bf16 %v4385_v32, %v4373_v51 }
 0x401   :  { %15191 = vst [vmem:[#allocation39_spill] sm:$0xff] %v13687_v55  ;;  %15192 = vst [vmem:[#allocation37_spill] sm:$0xff] %v13689_v63  ;;  %v10602_v4 = vadd.f32 %v3813_v33, %v13641_v36  ;;  %v10666_v50 = vadd.f32 %v4199_v37, %v13644_v46  ;;  %v3815_v25 = vpop.f32.mrb[137].mxu0  ;;  %v4201_v11 = vpop.f32.mrb[137].mxu1  ;;  %v15215_v55 = vld [vmem:[#allocation44_spill] sm:$0xff] }
 0x402   :  { %15193 = vst [vmem:[#allocation43_spill] sm:$0xff] %v13693_v49  ;;  %v10603_v26 = vadd.f32 %v3815_v25, %v13649_v31  ;;  %v10667_v47 = vadd.f32 %v4201_v11, %v13653_v58  ;;  %v3817_v39 = vpop.f32.mrb[138].mxu0  ;;  %v4203_v19 = vpop.f32.mrb[138].mxu1 }
 0x403   :  { %v10604_v34 = vadd.f32 %v3817_v39, %v13641_v36  ;;  %v10668_v45 = vadd.f32 %v4203_v19, %v13644_v46  ;;  %v3819_v30 = vpop.f32.mrb[139].mxu0  ;;  %v4205_v14 = vpop.f32.mrb[139].mxu1  ;;  %v4394_v32 = vmax.f32 %v10602_v4, 0.0  ;;  %v4396_v33 = vmax.f32 %v10666_v50, 0.0 }
 0x404   :  { %v10605_v43 = vadd.f32 %v3819_v30, %v13649_v31  ;;  %v10669_v51 = vadd.f32 %v4205_v14, %v13653_v58  ;;  %v4395_v25 = vmax.f32 %v10603_v26, 0.0  ;;  %v4397_v11 = vmax.f32 %v10667_v47, 0.0 }
 0x405   :  { %v4406_v37 = vmax.f32 %v10604_v34, 0.0  ;;  %v4408_v63 = vmax.f32 %v10668_v45, 0.0  ;;  %7014 = vmatmul.mubr.bf16.gmra.mrb[244].mxu0 %v13134_v1  ;;  %8146 = vmatmul.mubr.bf16.gmra.mrb[244].mxu1 %v13134_v1 }
 0x406   :  { %v4407_v49 = vmax.f32 %v10605_v43, 0.0  ;;  %v4409_v39 = vmax.f32 %v10669_v51, 0.0  ;;  %7023 = vmatprep.mubr.bf16.mxu0 %v13158_v41  ;;  %8153 = vmatprep.mubr.bf16.mxu1 %v13158_v41 }
 0x407   :  { %v13707_v19 = vpack.c.bf16 %v4406_v37, %v4394_v32  ;;  %v13709_v30 = vpack.c.bf16 %v4408_v63, %v4396_v33 }
 0x408   :  { %v13711_v4 = vpack.c.bf16 %v4407_v49, %v4395_v25  ;;  %v3823_v50 = vpop.f32.mrb[140].mxu0  ;;  %v4209_v34 = vpop.f32.mrb[140].mxu1  ;;  %v13713_v45 = vpack.c.bf16 %v4409_v39, %v4397_v11 }
 0x409   :  { %15194 = vst [vmem:[#allocation41_spill] sm:$0xff] %v13707_v19  ;;  %15195 = vst [vmem:[#allocation47_spill] sm:$0xff] %v13709_v30  ;;  %v10606_v1 = vadd.f32 %v3823_v50, %v13641_v36  ;;  %v10670_v26 = vadd.f32 %v4209_v34, %v13644_v46  ;;  %v3825_v47 = vpop.f32.mrb[141].mxu0  ;;  %v4211_v14 = vpop.f32.mrb[141].mxu1  ;;  %v15209_v19 = vld [vmem:[#allocation40_spill] sm:$0xff] }
 0x40a   :  { %15196 = vst [vmem:[#allocation45_spill] sm:$0xff] %v13711_v4  ;;  %15197 = vst [vmem:[#allocation51_spill] sm:$0xff] %v13713_v45  ;;  %v10607_v43 = vadd.f32 %v3825_v47, %v13649_v31  ;;  %v10671_v41 = vadd.f32 %v4211_v14, %v13653_v58  ;;  %v3827_v51 = vpop.f32.mrb[142].mxu0  ;;  %v4213_v32 = vpop.f32.mrb[142].mxu1  ;;  %v15198_v45 = vld [vmem:[#allocation85_spill] sm:$0xff] }
 0x40b   :  { %v10608_v63 = vadd.f32 %v3827_v51, %v13641_v36  ;;  %v10672_v49 = vadd.f32 %v4213_v32, %v13644_v46  ;;  %v3829_v33 = vpop.f32.mrb[143].mxu0  ;;  %v4215_v37 = vpop.f32.mrb[143].mxu1  ;;  %v4418_v39 = vmax.f32 %v10606_v1, 0.0  ;;  %v4420_v50 = vmax.f32 %v10670_v26, 0.0 }
 0x40c   :  { %v10609_v25 = vadd.f32 %v3829_v33, %v13649_v31  ;;  %v10673_v11 = vadd.f32 %v4215_v37, %v13653_v58  ;;  %v4419_v47 = vmax.f32 %v10607_v43, 0.0  ;;  %v4421_v14 = vmax.f32 %v10671_v41, 0.0 }
 0x40d   :  { %v4430_v34 = vmax.f32 %v10608_v63, 0.0  ;;  %v4432_v30 = vmax.f32 %v10672_v49, 0.0  ;;  %7024 = vmatmul.mubr.bf16.gmra.mrb[248].mxu0 %v15198_v45  ;;  %8154 = vmatmul.mubr.bf16.gmra.mrb[248].mxu1 %v15198_v45 }
 0x40e   :  { %v4431_v16 = vmax.f32 %v10609_v25, 0.0  ;;  %v4433_v51 = vmax.f32 %v10673_v11, 0.0  ;;  %7033 = vmatprep.mubr.bf16.mxu0 %v13176_v18  ;;  %8161 = vmatprep.mubr.bf16.mxu1 %v13176_v18 }
 0x40f   :  { %v13727_v32 = vpack.c.bf16 %v4430_v34, %v4418_v39  ;;  %v13729_v33 = vpack.c.bf16 %v4432_v30, %v4420_v50 }
 0x410   :  { %v13731_v1 = vpack.c.bf16 %v4431_v16, %v4419_v47  ;;  %v3833_v26 = vpop.f32.mrb[144].mxu0  ;;  %v4219_v63 = vpop.f32.mrb[144].mxu1  ;;  %v13733_v49 = vpack.c.bf16 %v4433_v51, %v4421_v14 }
 0x411   :  { %15199 = vst [vmem:[#allocation49_spill] sm:$0xff] %v13727_v32  ;;  %15200 = vst [vmem:[#allocation55_spill] sm:$0xff] %v13729_v33  ;;  %v10610_v45 = vadd.f32 %v3833_v26, %v13641_v36  ;;  %v10674_v43 = vadd.f32 %v4219_v63, %v13644_v46  ;;  %v3835_v41 = vpop.f32.mrb[145].mxu0  ;;  %v4221_v37 = vpop.f32.mrb[145].mxu1 }
 0x412   :  { %15201 = vst [vmem:[#allocation53_spill] sm:$0xff] %v13731_v1  ;;  %15202 = vst [vmem:[#allocation59_spill] sm:$0xff] %v13733_v49  ;;  %v10611_v25 = vadd.f32 %v3835_v41, %v13649_v31  ;;  %v10675_v18 = vadd.f32 %v4221_v37, %v13653_v58  ;;  %v3837_v11 = vpop.f32.mrb[146].mxu0  ;;  %v4223_v39 = vpop.f32.mrb[146].mxu1 }
 0x413   :  { %v10612_v30 = vadd.f32 %v3837_v11, %v13641_v36  ;;  %v10676_v16 = vadd.f32 %v4223_v39, %v13644_v46  ;;  %v3839_v50 = vpop.f32.mrb[147].mxu0  ;;  %v4225_v34 = vpop.f32.mrb[147].mxu1  ;;  %v4442_v51 = vmax.f32 %v10610_v45, 0.0  ;;  %v4444_v26 = vmax.f32 %v10674_v43, 0.0 }
 0x414   :  { %v10613_v47 = vadd.f32 %v3839_v50, %v13649_v31  ;;  %v10677_v14 = vadd.f32 %v4225_v34, %v13653_v58  ;;  %v4443_v41 = vmax.f32 %v10611_v25, 0.0  ;;  %v4445_v37 = vmax.f32 %v10675_v18, 0.0 }
 0x415   :  { %v4454_v63 = vmax.f32 %v10612_v30, 0.0  ;;  %v4456_v33 = vmax.f32 %v10676_v16, 0.0  ;;  %7034 = vmatmul.mubr.bf16.gmra.mrb[252].mxu0 %v13174_v7  ;;  %8162 = vmatmul.mubr.bf16.gmra.mrb[252].mxu1 %v13174_v7 }
 0x416   :  { %v4455_v49 = vmax.f32 %v10613_v47, 0.0  ;;  %v4457_v11 = vmax.f32 %v10677_v14, 0.0  ;;  %7076 = vmatprep.mubr.bf16.mxu0 %v15203_v10  ;;  %8202 = vmatprep.mubr.bf16.mxu1 %v15203_v10 }
 0x417   :  { %v13747_v39 = vpack.c.bf16 %v4454_v63, %v4442_v51  ;;  %v13749_v50 = vpack.c.bf16 %v4456_v33, %v4444_v26 }
 0x418   :  { %v13751_v45 = vpack.c.bf16 %v4455_v49, %v4443_v41  ;;  %v3843_v43 = vpop.f32.mrb[148].mxu0  ;;  %v4229_v30 = vpop.f32.mrb[148].mxu1  ;;  %v13753_v16 = vpack.c.bf16 %v4457_v11, %v4445_v37  ;;  %v12064_v41 = vld [vmem:[#allocation8 + $0x308] ss:$12 sps:$4 sm:$0xff]   ;;  %v12065_v37 = vld [vmem:[#allocation8 + $0x300] ss:$12 sps:$4 sm:$0xff]  }
 0x419   :  { %15204 = vst [vmem:[#allocation57_spill] sm:$0xff] %v13747_v39  ;;  %15205 = vst [vmem:[#allocation63_spill] sm:$0xff] %v13749_v50  ;;  %v10614_v7 = vadd.f32 %v3843_v43, %v13641_v36  ;;  %v10678_v25 = vadd.f32 %v4229_v30, %v13644_v46  ;;  %v3845_v18 = vpop.f32.mrb[149].mxu0  ;;  %v4231_v34 = vpop.f32.mrb[149].mxu1  ;;  %v12070_v30 = vld [vmem:[#allocation8 + $0x31c] ss:$12 sps:$4 sm:$0xff]  }
 0x41a   :  { %15206 = vst [vmem:[#allocation61_spill] sm:$0xff] %v13751_v45  ;;  %15207 = vst [vmem:[#allocation67_spill] sm:$0xff] %v13753_v16  ;;  %v10615_v47 = vadd.f32 %v3845_v18, %v13649_v31  ;;  %v10679_v10 = vadd.f32 %v4231_v34, %v13653_v58  ;;  %v3847_v14 = vpop.f32.mrb[150].mxu0  ;;  %v4233_v51 = vpop.f32.mrb[150].mxu1  ;;  %v12071_v50 = vld [vmem:[#allocation8 + $0x3e0] ss:$12 sps:$4 sm:$0xff]  }
 0x41b   :  { %v10616_v33 = vadd.f32 %v3847_v14, %v13641_v36  ;;  %v10680_v49 = vadd.f32 %v4233_v51, %v13644_v46  ;;  %v3849_v26 = vpop.f32.mrb[151].mxu0  ;;  %v4235_v63 = vpop.f32.mrb[151].mxu1  ;;  %v4466_v16 = vmax.f32 %v10614_v7, 0.0  ;;  %v4468_v18 = vmax.f32 %v10678_v25, 0.0  ;;  %v15208_v45 = vld [vmem:[#allocation34_spill] sm:$0xff] }
 0x41c   :  { %v10617_v11 = vadd.f32 %v3849_v26, %v13649_v31  ;;  %v10681_v43 = vadd.f32 %v4235_v63, %v13653_v58  ;;  %v4467_v14 = vmax.f32 %v10615_v47, 0.0  ;;  %v4469_v51 = vmax.f32 %v10679_v10, 0.0  ;;  %v12068_v7 = vld [vmem:[#allocation8 + $0x318] ss:$12 sps:$4 sm:$0xff]   ;;  %v12072_v25 = vld [vmem:[#allocation8 + $0x320] ss:$12 sps:$4 sm:$0xff]  }
 0x41d   :  { %v4478_v39 = vmax.f32 %v10616_v33, 0.0  ;;  %v4480_v34 = vmax.f32 %v10680_v49, 0.0  ;;  %7077 = vmatmul.mubr.bf16.vlgmr.msra.gmra.mrb[192].mxu0 %v15208_v45  ;;  %8203 = vmatmul.mubr.bf16.vlgmr.msra.gmra.mrb[0].mxu1 %v15208_v45  ;;  %v12075_v47 = vld [vmem:[#allocation8 + $0x334] ss:$12 sps:$4 sm:$0xff]   ;;  %v12079_v10 = vld [vmem:[#allocation8 + $0x3f8] ss:$12 sps:$4 sm:$0xff]  }
 0x41e   :  { %v4479_v32 = vmax.f32 %v10617_v11, 0.0  ;;  %v4481_v1 = vmax.f32 %v10681_v43, 0.0  ;;  %7086 = vmatprep.mubr.bf16.mxu0 %v15209_v19  ;;  %8210 = vmatprep.mubr.bf16.mxu1 %v15209_v19 }
 0x41f   :  { %v13767_v26 = vpack.c.bf16 %v4478_v39, %v4466_v16  ;;  %9891 = vmatpush3.bf16.msra.mxu1 %v12064_v41  ;;  %7238 = vmatpush1.bf16.msra.mxu0 %v12065_v37  ;;  %v13769_v33 = vpack.c.bf16 %v4480_v34, %v4468_v18 }
 0x420   :  { %v13771_v49 = vpack.c.bf16 %v4479_v32, %v4467_v14  ;;  %v3853_v63 = vpop.f32.mrb[152].mxu0  ;;  %v4239_v45 = vpop.f32.mrb[152].mxu1  ;;  %7239 = vmatprep.subr.bf16.mxu0 %v12070_v30  ;;  %9892 = vmatprep.subr.bf16.mxu1 %v12071_v50  ;;  %v13773_v11 = vpack.c.bf16 %v4481_v1, %v4469_v51  ;;  %v12073_v1 = vld [vmem:[#allocation8 + $0x330] ss:$12 sps:$4 sm:$0xff]   ;;  %v12080_v51 = vld [vmem:[#allocation8 + $0x338] ss:$12 sps:$4 sm:$0xff]  }
 0x421   :  { %15210 = vst [vmem:[#allocation65_spill] sm:$0xff] %v13767_v26  ;;  %15211 = vst [vmem:[#allocation71_spill] sm:$0xff] %v13769_v33  ;;  %v10618_v19 = vadd.f32 %v3853_v63, %v13641_v36  ;;  %v10682_v39 = vadd.f32 %v4239_v45, %v13644_v46  ;;  %v3855_v16 = vpop.f32.mrb[153].mxu0  ;;  %v4241_v41 = vpop.f32.mrb[153].mxu1 }
 0x422   :  { %15212 = vst [vmem:[#allocation69_spill] sm:$0xff] %v13771_v49  ;;  %15213 = vst [vmem:[#allocation75_spill] sm:$0xff] %v13773_v11  ;;  %v10619_v37 = vadd.f32 %v3855_v16, %v13649_v31  ;;  %v10683_v43 = vadd.f32 %v4241_v41, %v13653_v58  ;;  %v3857_v32 = vpop.f32.mrb[154].mxu0  ;;  %v4243_v18 = vpop.f32.mrb[154].mxu1  ;;  %v12078_v16 = vld [vmem:[#allocation8 + $0x34c] ss:$12 sps:$4 sm:$0xff]  }
 0x423   :  { %v10620_v34 = vadd.f32 %v3857_v32, %v13641_v36  ;;  %v10684_v50 = vadd.f32 %v4243_v18, %v13644_v46  ;;  %v3859_v30 = vpop.f32.mrb[155].mxu0  ;;  %v4245_v14 = vpop.f32.mrb[155].mxu1  ;;  %7240 = vmatpush1.bf16.msra.mxu0 %v12068_v7  ;;  %9893 = vmatpush3.bf16.msra.mxu1 %v12072_v25  ;;  %v12087_v41 = vld [vmem:[#allocation8 + $0x410] ss:$12 sps:$4 sm:$0xff]   ;;  %v4490_v33 = vmax.f32 %v10618_v19, 0.0  ;;  %v4492_v11 = vmax.f32 %v10682_v39, 0.0 }
 0x424   :  { %v10621_v63 = vadd.f32 %v3859_v30, %v13649_v31  ;;  %v10685_v45 = vadd.f32 %v4245_v14, %v13653_v58  ;;  %7241 = vmatprep.subr.bf16.mxu0 %v12075_v47  ;;  %9894 = vmatprep.subr.bf16.mxu1 %v12079_v10  ;;  %v15214_v49 = vld [vmem:[#allocation38_spill] sm:$0xff]  ;;  %v4491_v7 = vmax.f32 %v10619_v37, 0.0  ;;  %v4493_v25 = vmax.f32 %v10683_v43, 0.0  ;;  %v12088_v19 = vld [vmem:[#allocation8 + $0x350] ss:$12 sps:$4 sm:$0xff]  }
 0x425   :  { %v4502_v26 = vmax.f32 %v10620_v34, 0.0  ;;  %v4504_v32 = vmax.f32 %v10684_v50, 0.0  ;;  %7087 = vmatmul.mubr.bf16.gmra.mrb[196].mxu0 %v15214_v49  ;;  %8211 = vmatmul.mubr.bf16.gmra.mrb[4].mxu1 %v15214_v49  ;;  %v12076_v10 = vld [vmem:[#allocation8 + $0x348] ss:$12 sps:$4 sm:$0xff]   ;;  %v12083_v37 = vld [vmem:[#allocation8 + $0x364] ss:$12 sps:$4 sm:$0xff]  }
 0x426   :  { %v4503_v18 = vmax.f32 %v10621_v63, 0.0  ;;  %v4505_v4 = vmax.f32 %v10685_v45, 0.0  ;;  %7096 = vmatprep.mubr.bf16.mxu0 %v15215_v55  ;;  %8218 = vmatprep.mubr.bf16.mxu1 %v15215_v55  ;;  %v12095_v43 = vld [vmem:[#allocation8 + $0x428] ss:$12 sps:$4 sm:$0xff]  }
 0x427   :  { %v13787_v47 = vpack.c.bf16 %v4502_v26, %v4490_v33  ;;  %7242 = vmatpush1.bf16.msra.mxu0 %v12073_v1  ;;  %9895 = vmatpush3.bf16.msra.mxu1 %v12080_v51  ;;  %v13789_v39 = vpack.c.bf16 %v4504_v32, %v4492_v11 }
 0x428   :  { %v13791_v34 = vpack.c.bf16 %v4503_v18, %v4491_v7  ;;  %v3863_v50 = vpop.f32.mrb[156].mxu0  ;;  %v4249_v49 = vpop.f32.mrb[156].mxu1  ;;  %7243 = vmatprep.subr.bf16.mxu0 %v12078_v16  ;;  %9896 = vmatprep.subr.bf16.mxu1 %v12087_v41  ;;  %v13793_v30 = vpack.c.bf16 %v4505_v4, %v4493_v25  ;;  %v12081_v4 = vld [vmem:[#allocation8 + $0x360] ss:$12 sps:$4 sm:$0xff]   ;;  %v12096_v7 = vld [vmem:[#allocation8 + $0x368] ss:$12 sps:$4 sm:$0xff]  }
 0x429   :  { %15216 = vst [vmem:[#allocation73_spill] sm:$0xff] %v13787_v47  ;;  %15217 = vst [vmem:[#allocation31_spill] sm:$0xff] %v13789_v39  ;;  %v10622_v55 = vadd.f32 %v3863_v50, %v13641_v36  ;;  %v10686_v26 = vadd.f32 %v4249_v49, %v13644_v46  ;;  %v3865_v33 = vpop.f32.mrb[157].mxu0  ;;  %v4251_v14 = vpop.f32.mrb[157].mxu1  ;;  %v12086_v50 = vld [vmem:[#allocation8 + $0x37c] ss:$12 sps:$4 sm:$0xff]  }
 0x42a   :  { %15218 = vst [vmem:[#allocation79_spill] sm:$0xff] %v13791_v34  ;;  %15219 = vst [vmem:[#allocation77_spill] sm:$0xff] %v13793_v30  ;;  %v10623_v1 = vadd.f32 %v3865_v33, %v13649_v31  ;;  %v10687_v11 = vadd.f32 %v4251_v14, %v13653_v58  ;;  %v3867_v51 = vpop.f32.mrb[158].mxu0  ;;  %v4253_v63 = vpop.f32.mrb[158].mxu1  ;;  %v12103_v49 = vld [vmem:[#allocation8 + $0x440] ss:$12 sps:$4 sm:$0xff]  }
 0x42b   :  { %v10624_v45 = vadd.f32 %v3867_v51, %v13641_v36  ;;  %v10688_v16 = vadd.f32 %v4253_v63, %v13644_v46  ;;  %v3869_v41 = vpop.f32.mrb[159].mxu0  ;;  %v4255_v32 = vpop.f32.mrb[159].mxu1  ;;  %7244 = vmatpush1.bf16.msra.mxu0 %v12076_v10  ;;  %9897 = vmatpush3.bf16.msra.mxu1 %v12088_v19  ;;  %v4514_v33 = vmax.f32 %v10622_v55, 0.0  ;;  %v4516_v14 = vmax.f32 %v10686_v26, 0.0  ;;  %v15220_v30 = vld [vmem:[#allocation42_spill] sm:$0xff]  ;;  %v15221_v34 = vld [vmem:[#allocation48_spill] sm:$0xff] }
 0x42c   :  { %v10625_v25 = vadd.f32 %v3869_v41, %v13649_v31  ;;  %v10689_v18 = vadd.f32 %v4255_v32, %v13653_v58  ;;  %7245 = vmatprep.subr.bf16.mxu0 %v12083_v37  ;;  %9898 = vmatprep.subr.bf16.mxu1 %v12095_v43  ;;  %v4515_v10 = vmax.f32 %v10623_v1, 0.0  ;;  %v4517_v63 = vmax.f32 %v10687_v11, 0.0  ;;  %v12084_v43 = vld [vmem:[#allocation8 + $0x378] ss:$12 sps:$4 sm:$0xff]   ;;  %v12104_v55 = vld [vmem:[#allocation8 + $0x380] ss:$12 sps:$4 sm:$0xff]  }
 0x42d   :  { %v4526_v39 = vmax.f32 %v10624_v45, 0.0  ;;  %v4528_v51 = vmax.f32 %v10688_v16, 0.0  ;;  %7097 = vmatmul.mubr.bf16.gmra.mrb[200].mxu0 %v15220_v30  ;;  %8219 = vmatmul.mubr.bf16.gmra.mrb[8].mxu1 %v15220_v30  ;;  %v12091_v1 = vld [vmem:[#allocation8 + $0x394] ss:$12 sps:$4 sm:$0xff]   ;;  %v12111_v11 = vld [vmem:[#allocation8 + $0x458] ss:$12 sps:$4 sm:$0xff]  }
 0x42e   :  { %v4527_v19 = vmax.f32 %v10625_v25, 0.0  ;;  %v4529_v47 = vmax.f32 %v10689_v18, 0.0  ;;  %7106 = vmatprep.mubr.bf16.mxu0 %v15221_v34  ;;  %8226 = vmatprep.mubr.bf16.mxu1 %v15221_v34 }
 0x42f   :  { %v13807_v37 = vpack.c.bf16 %v4526_v39, %v4514_v33  ;;  %7246 = vmatpush1.bf16.msra.mxu0 %v12081_v4  ;;  %9899 = vmatpush3.bf16.msra.mxu1 %v12096_v7  ;;  %v13809_v26 = vpack.c.bf16 %v4528_v51, %v4516_v14 }
 0x430   :  { %v13811_v45 = vpack.c.bf16 %v4527_v19, %v4515_v10  ;;  %v3873_v16 = vpop.f32.mrb[160].mxu0  ;;  %v4259_v30 = vpop.f32.mrb[160].mxu1  ;;  %7247 = vmatprep.subr.bf16.mxu0 %v12086_v50  ;;  %9900 = vmatprep.subr.bf16.mxu1 %v12103_v49  ;;  %v13813_v41 = vpack.c.bf16 %v4529_v47, %v4517_v63  ;;  %v12089_v47 = vld [vmem:[#allocation8 + $0x390] ss:$12 sps:$4 sm:$0xff]   ;;  %v12112_v10 = vld [vmem:[#allocation8 + $0x398] ss:$12 sps:$4 sm:$0xff]  }
 0x431   :  { %15222 = vst [vmem:[#allocation85_spill] sm:$0xff] %v13807_v37  ;;  %15223 = vst [vmem:[#allocation36_spill] sm:$0xff] %v13809_v26  ;;  %v10626_v34 = vadd.f32 %v3873_v16, %v13641_v36  ;;  %v10690_v39 = vadd.f32 %v4259_v30, %v13644_v46  ;;  %v3875_v32 = vpop.f32.mrb[161].mxu0  ;;  %v4261_v4 = vpop.f32.mrb[161].mxu1  ;;  %v12094_v16 = vld [vmem:[#allocation8 + $0x3ac] ss:$12 sps:$4 sm:$0xff]  }
 0x432   :  { %15224 = vst [vmem:[#allocation34_spill] sm:$0xff] %v13811_v45  ;;  %15225 = vst [vmem:[#allocation40_spill] sm:$0xff] %v13813_v41  ;;  %v10627_v7 = vadd.f32 %v3875_v32, %v13649_v31  ;;  %v10691_v25 = vadd.f32 %v4261_v4, %v13653_v58  ;;  %v3877_v18 = vpop.f32.mrb[162].mxu0  ;;  %v4263_v33 = vpop.f32.mrb[162].mxu1  ;;  %v12119_v30 = vld [vmem:[#allocation8 + $0x470] ss:$12 sps:$4 sm:$0xff]  }
 0x433   :  { %v10628_v14 = vadd.f32 %v3877_v18, %v13641_v36  ;;  %v10692_v50 = vadd.f32 %v4263_v33, %v13644_v46  ;;  %v3879_v49 = vpop.f32.mrb[163].mxu0  ;;  %v4265_v51 = vpop.f32.mrb[163].mxu1  ;;  %7248 = vmatpush1.bf16.msra.mxu0 %v12084_v43  ;;  %9901 = vmatpush3.bf16.msra.mxu1 %v12104_v55  ;;  %v4538_v32 = vmax.f32 %v10626_v34, 0.0  ;;  %v4540_v4 = vmax.f32 %v10690_v39, 0.0  ;;  %v15226_v41 = vld [vmem:[#allocation46_spill] sm:$0xff]  ;;  %v15227_v45 = vld [vmem:[#allocation52_spill] sm:$0xff] }
 0x434   :  { %v10629_v63 = vadd.f32 %v3879_v49, %v13649_v31  ;;  %v10693_v19 = vadd.f32 %v4265_v51, %v13653_v58  ;;  %7249 = vmatprep.subr.bf16.mxu0 %v12091_v1  ;;  %9902 = vmatprep.subr.bf16.mxu1 %v12111_v11  ;;  %v4539_v43 = vmax.f32 %v10627_v7, 0.0  ;;  %v4541_v33 = vmax.f32 %v10691_v25, 0.0  ;;  %v12092_v11 = vld [vmem:[#allocation8 + $0x3a8] ss:$12 sps:$4 sm:$0xff]   ;;  %v12120_v34 = vld [vmem:[#allocation8 + $0x3b0] ss:$12 sps:$4 sm:$0xff]  }
 0x435   :  { %v4550_v26 = vmax.f32 %v10628_v14, 0.0  ;;  %v4552_v18 = vmax.f32 %v10692_v50, 0.0  ;;  %7107 = vmatmul.mubr.bf16.gmra.mrb[204].mxu0 %v15226_v41  ;;  %8227 = vmatmul.mubr.bf16.gmra.mrb[12].mxu1 %v15226_v41  ;;  %v12099_v7 = vld [vmem:[#allocation8 + $0x3c4] ss:$12 sps:$4 sm:$0xff]   ;;  %v12127_v25 = vld [vmem:[#allocation8 + $0x548] ss:$12 sps:$4 sm:$0xff]  }
 0x436   :  { %v4551_v55 = vmax.f32 %v10629_v63, 0.0  ;;  %v4553_v37 = vmax.f32 %v10693_v19, 0.0  ;;  %7116 = vmatprep.mubr.bf16.mxu0 %v15227_v45  ;;  %8234 = vmatprep.mubr.bf16.mxu1 %v15227_v45 }
 0x437   :  { %v13827_v1 = vpack.c.bf16 %v4550_v26, %v4538_v32  ;;  %7250 = vmatpush1.bf16.msra.mxu0 %v12089_v47  ;;  %9903 = vmatpush3.bf16.msra.mxu1 %v12112_v10  ;;  %v13829_v39 = vpack.c.bf16 %v4552_v18, %v4540_v4 }
 0x438   :  { %v13831_v14 = vpack.c.bf16 %v4551_v55, %v4539_v43  ;;  %v3883_v50 = vpop.f32.mrb[164].mxu0  ;;  %v4269_v41 = vpop.f32.mrb[164].mxu1  ;;  %7251 = vmatprep.subr.bf16.mxu0 %v12094_v16  ;;  %9904 = vmatprep.subr.bf16.mxu1 %v12119_v30  ;;  %v13833_v49 = vpack.c.bf16 %v4553_v37, %v4541_v33  ;;  %v12097_v37 = vld [vmem:[#allocation8 + $0x3c0] ss:$12 sps:$4 sm:$0xff]   ;;  %v12102_v55 = vld [vmem:[#allocation8 + $0x3dc] ss:$12 sps:$4 sm:$0xff]  }
 0x439   :  { %15228 = vst [vmem:[#allocation38_spill] sm:$0xff] %v13829_v39  ;;  %v10630_v45 = vadd.f32 %v3883_v50, %v13641_v36  ;;  %v10694_v26 = vadd.f32 %v4269_v41, %v13644_v46  ;;  %v3885_v51 = vpop.f32.mrb[165].mxu0  ;;  %v4271_v47 = vpop.f32.mrb[165].mxu1  ;;  %v15230_v39 = vld [vmem:[#allocation50_spill] sm:$0xff] }
 0x43a   :  { %15229 = vst [vmem:[#allocation44_spill] sm:$0xff] %v13833_v49  ;;  %v10631_v10 = vadd.f32 %v3885_v51, %v13649_v31  ;;  %v10695_v63 = vadd.f32 %v4271_v47, %v13653_v58  ;;  %v3887_v19 = vpop.f32.mrb[166].mxu0  ;;  %v4273_v32 = vpop.f32.mrb[166].mxu1 }
 0x43b   :  { %v10632_v4 = vadd.f32 %v3887_v19, %v13641_v36  ;;  %v10696_v16 = vadd.f32 %v4273_v32, %v13644_v46  ;;  %v3889_v30 = vpop.f32.mrb[167].mxu0  ;;  %v4275_v18 = vpop.f32.mrb[167].mxu1  ;;  %7252 = vmatpush1.bf16.msra.mxu0 %v12092_v11  ;;  %9905 = vmatpush3.bf16.msra.mxu1 %v12120_v34  ;;  %v4562_v50 = vmax.f32 %v10630_v45, 0.0  ;;  %v4564_v41 = vmax.f32 %v10694_v26, 0.0  ;;  %v15231_v34 = vld [vmem:[#allocation56_spill] sm:$0xff] }
 0x43c   :  { %v10633_v43 = vadd.f32 %v3889_v30, %v13649_v31  ;;  %v10697_v33 = vadd.f32 %v4275_v18, %v13653_v58  ;;  %7253 = vmatprep.subr.bf16.mxu0 %v12099_v7  ;;  %10002 = vmatprep.subr.bf16.mxu1 %v12127_v25  ;;  %v4563_v19 = vmax.f32 %v10631_v10, 0.0  ;;  %v4565_v32 = vmax.f32 %v10695_v63, 0.0  ;;  %v12100_v7 = vld [vmem:[#allocation8 + $0x3d8] ss:$12 sps:$4 sm:$0xff]  }
 0x43d   :  { %v4574_v51 = vmax.f32 %v10632_v4, 0.0  ;;  %v4576_v47 = vmax.f32 %v10696_v16, 0.0  ;;  %7117 = vmatmul.mubr.bf16.gmra.mrb[208].mxu0 %v15230_v39  ;;  %8235 = vmatmul.mubr.bf16.gmra.mrb[16].mxu1 %v15230_v39  ;;  %v12107_v39 = vld [vmem:[#allocation8 + $0x3f4] ss:$12 sps:$4 sm:$0xff]  }
 0x43e   :  { %v4575_v11 = vmax.f32 %v10633_v43, 0.0  ;;  %v4577_v49 = vmax.f32 %v10697_v33, 0.0  ;;  %7126 = vmatprep.mubr.bf16.mxu0 %v15231_v34  ;;  %8242 = vmatprep.mubr.bf16.mxu1 %v15231_v34  ;;  %v12110_v34 = vld [vmem:[#allocation8 + $0x40c] ss:$12 sps:$4 sm:$0xff]  }
 0x43f   :  { %v13847_v30 = vpack.c.bf16 %v4574_v51, %v4562_v50  ;;  %7254 = vmatpush1.bf16.msra.mxu0 %v12097_v37  ;;  %v13849_v25 = vpack.c.bf16 %v4576_v47, %v4564_v41 }
 0x440   :  { %v13851_v45 = vpack.c.bf16 %v4575_v11, %v4563_v19  ;;  %v3893_v26 = vpop.f32.mrb[168].mxu0  ;;  %v4279_v4 = vpop.f32.mrb[168].mxu1  ;;  %7255 = vmatprep.subr.bf16.mxu0 %v12102_v55  ;;  %v13853_v10 = vpack.c.bf16 %v4577_v49, %v4565_v32  ;;  %v12105_v49 = vld [vmem:[#allocation8 + $0x3f0] ss:$12 sps:$4 sm:$0xff]  }
 0x441   :  { %15232 = vst [vmem:[#allocation42_spill] sm:$0xff] %v13847_v30  ;;  %15233 = vst [vmem:[#allocation48_spill] sm:$0xff] %v13849_v25  ;;  %v10634_v63 = vadd.f32 %v3893_v26, %v13641_v36  ;;  %v10698_v16 = vadd.f32 %v4279_v4, %v13644_v46  ;;  %v3895_v18 = vpop.f32.mrb[169].mxu0  ;;  %v4281_v43 = vpop.f32.mrb[169].mxu1  ;;  %v15235_v25 = vld [vmem:[#allocation54_spill] sm:$0xff] }
 0x442   :  { %15234 = vst [vmem:[#allocation46_spill] sm:$0xff] %v13853_v10  ;;  %v10635_v33 = vadd.f32 %v3895_v18, %v13649_v31  ;;  %v10699_v37 = vadd.f32 %v4281_v43, %v13653_v58  ;;  %v3897_v50 = vpop.f32.mrb[170].mxu0  ;;  %v4283_v41 = vpop.f32.mrb[170].mxu1 }
 0x443   :  { %v10636_v51 = vadd.f32 %v3897_v50, %v13641_v36  ;;  %v10700_v47 = vadd.f32 %v4283_v41, %v13644_v46  ;;  %v3899_v55 = vpop.f32.mrb[171].mxu0  ;;  %v4285_v19 = vpop.f32.mrb[171].mxu1  ;;  %7256 = vmatpush1.bf16.msra.mxu0 %v12100_v7  ;;  %v4586_v26 = vmax.f32 %v10634_v63, 0.0  ;;  %v4588_v4 = vmax.f32 %v10698_v16, 0.0  ;;  %v15236_v7 = vld [vmem:[#allocation60_spill] sm:$0xff] }
 0x444   :  { %v10637_v32 = vadd.f32 %v3899_v55, %v13649_v31  ;;  %v10701_v11 = vadd.f32 %v4285_v19, %v13653_v58  ;;  %7257 = vmatprep.subr.bf16.mxu0 %v12107_v39  ;;  %v4587_v50 = vmax.f32 %v10635_v33, 0.0  ;;  %v4589_v41 = vmax.f32 %v10699_v37, 0.0  ;;  %v12108_v39 = vld [vmem:[#allocation8 + $0x408] ss:$12 sps:$4 sm:$0xff]  }
 0x445   :  { %v4598_v18 = vmax.f32 %v10636_v51, 0.0  ;;  %v4600_v43 = vmax.f32 %v10700_v47, 0.0  ;;  %7127 = vmatmul.mubr.bf16.gmra.mrb[212].mxu0 %v15235_v25  ;;  %8243 = vmatmul.mubr.bf16.gmra.mrb[20].mxu1 %v15235_v25  ;;  %v12115_v25 = vld [vmem:[#allocation8 + $0x424] ss:$12 sps:$4 sm:$0xff]  }
 0x446   :  { %v4599_v10 = vmax.f32 %v10637_v32, 0.0  ;;  %v4601_v30 = vmax.f32 %v10701_v11, 0.0  ;;  %7136 = vmatprep.mubr.bf16.mxu0 %v15236_v7  ;;  %8250 = vmatprep.mubr.bf16.mxu1 %v15236_v7 }
 0x447   :  { %v13867_v55 = vpack.c.bf16 %v4598_v18, %v4586_v26  ;;  %7258 = vmatpush1.bf16.msra.mxu0 %v12105_v49  ;;  %v13869_v63 = vpack.c.bf16 %v4600_v43, %v4588_v4 }
 0x448   :  { %v13871_v16 = vpack.c.bf16 %v4599_v10, %v4587_v50  ;;  %v3903_v51 = vpop.f32.mrb[172].mxu0  ;;  %v4289_v47 = vpop.f32.mrb[172].mxu1  ;;  %7259 = vmatprep.subr.bf16.mxu0 %v12110_v34  ;;  %v13873_v33 = vpack.c.bf16 %v4601_v30, %v4589_v41  ;;  %v12113_v30 = vld [vmem:[#allocation8 + $0x420] ss:$12 sps:$4 sm:$0xff]  }
 0x449   :  { %15237 = vst [vmem:[#allocation52_spill] sm:$0xff] %v13867_v55  ;;  %15238 = vst [vmem:[#allocation50_spill] sm:$0xff] %v13869_v63  ;;  %v10638_v37 = vadd.f32 %v3903_v51, %v13641_v36  ;;  %v10702_v19 = vadd.f32 %v4289_v47, %v13644_v46  ;;  %v3905_v32 = vpop.f32.mrb[173].mxu0  ;;  %v4291_v11 = vpop.f32.mrb[173].mxu1  ;;  %v12118_v51 = vld [vmem:[#allocation8 + $0x43c] ss:$12 sps:$4 sm:$0xff]  }
 0x44a   :  { %15239 = vst [vmem:[#allocation56_spill] sm:$0xff] %v13871_v16  ;;  %15240 = vst [vmem:[#allocation54_spill] sm:$0xff] %v13873_v33  ;;  %v10639_v26 = vadd.f32 %v3905_v32, %v13649_v31  ;;  %v10703_v49 = vadd.f32 %v4291_v11, %v13653_v58  ;;  %v3907_v4 = vpop.f32.mrb[174].mxu0  ;;  %v4293_v18 = vpop.f32.mrb[174].mxu1  ;;  %v15241_v33 = vld [vmem:[#allocation58_spill] sm:$0xff] }
 0x44b   :  { %v10640_v10 = vadd.f32 %v3907_v4, %v13641_v36  ;;  %v10704_v43 = vadd.f32 %v4293_v18, %v13644_v46  ;;  %v3909_v34 = vpop.f32.mrb[175].mxu0  ;;  %v4295_v50 = vpop.f32.mrb[175].mxu1  ;;  %7260 = vmatpush1.bf16.msra.mxu0 %v12108_v39  ;;  %v4610_v47 = vmax.f32 %v10638_v37, 0.0  ;;  %v4612_v32 = vmax.f32 %v10702_v19, 0.0  ;;  %v15242_v39 = vld [vmem:[#allocation64_spill] sm:$0xff] }
 0x44c   :  { %v10641_v41 = vadd.f32 %v3909_v34, %v13649_v31  ;;  %v10705_v7 = vadd.f32 %v4295_v50, %v13653_v58  ;;  %7261 = vmatprep.subr.bf16.mxu0 %v12115_v25  ;;  %v4611_v4 = vmax.f32 %v10639_v26, 0.0  ;;  %v4613_v18 = vmax.f32 %v10703_v49, 0.0  ;;  %v12116_v25 = vld [vmem:[#allocation8 + $0x438] ss:$12 sps:$4 sm:$0xff]  }
 0x44d   :  { %v4622_v63 = vmax.f32 %v10640_v10, 0.0  ;;  %v4624_v11 = vmax.f32 %v10704_v43, 0.0  ;;  %7137 = vmatmul.mubr.bf16.gmra.mrb[216].mxu0 %v15241_v33  ;;  %8251 = vmatmul.mubr.bf16.gmra.mrb[24].mxu1 %v15241_v33  ;;  %v12123_v33 = vld [vmem:[#allocation8 + $0x454] ss:$12 sps:$4 sm:$0xff]  }
 0x44e   :  { %v4623_v55 = vmax.f32 %v10641_v41, 0.0  ;;  %v4625_v16 = vmax.f32 %v10705_v7, 0.0  ;;  %7146 = vmatprep.mubr.bf16.mxu0 %v15242_v39  ;;  %8258 = vmatprep.mubr.bf16.mxu1 %v15242_v39 }
 0x44f   :  { %v13887_v34 = vpack.c.bf16 %v4622_v63, %v4610_v47  ;;  %7262 = vmatpush1.bf16.msra.mxu0 %v12113_v30  ;;  %v13889_v37 = vpack.c.bf16 %v4624_v11, %v4612_v32 }
 0x450   :  { %v13891_v19 = vpack.c.bf16 %v4623_v55, %v4611_v4  ;;  %v3913_v10 = vpop.f32.mrb[176].mxu0  ;;  %v4299_v43 = vpop.f32.mrb[176].mxu1  ;;  %7263 = vmatprep.subr.bf16.mxu0 %v12118_v51  ;;  %v13893_v26 = vpack.c.bf16 %v4625_v16, %v4613_v18  ;;  %v12121_v16 = vld [vmem:[#allocation8 + $0x450] ss:$12 sps:$4 sm:$0xff]  }
 0x451   :  { %15243 = vst [vmem:[#allocation60_spill] sm:$0xff] %v13887_v34  ;;  %15244 = vst [vmem:[#allocation58_spill] sm:$0xff] %v13889_v37  ;;  %v10642_v49 = vadd.f32 %v3913_v10, %v13641_v36  ;;  %v10706_v50 = vadd.f32 %v4299_v43, %v13644_v46  ;;  %v3915_v41 = vpop.f32.mrb[177].mxu0  ;;  %v4301_v7 = vpop.f32.mrb[177].mxu1  ;;  %v12126_v10 = vld [vmem:[#allocation8 + $0x46c] ss:$12 sps:$4 sm:$0xff]  }
 0x452   :  { %15245 = vst [vmem:[#allocation64_spill] sm:$0xff] %v13891_v19  ;;  %15246 = vst [vmem:[#allocation110_spill] sm:$0xff] %v13893_v26  ;;  %v10643_v63 = vadd.f32 %v3915_v41, %v13649_v31  ;;  %v10707_v30 = vadd.f32 %v4301_v7, %v13653_v58  ;;  %v3917_v47 = vpop.f32.mrb[178].mxu0  ;;  %v4303_v32 = vpop.f32.mrb[178].mxu1  ;;  %v15247_v26 = vld [vmem:[#allocation62_spill] sm:$0xff] }
 0x453   :  { %v10644_v55 = vadd.f32 %v3917_v47, %v13641_v36  ;;  %v10708_v11 = vadd.f32 %v4303_v32, %v13644_v46  ;;  %v3919_v51 = vpop.f32.mrb[179].mxu0  ;;  %v4305_v4 = vpop.f32.mrb[179].mxu1  ;;  %7264 = vmatpush1.bf16.msra.mxu0 %v12116_v25  ;;  %v4634_v43 = vmax.f32 %v10642_v49, 0.0  ;;  %v4636_v41 = vmax.f32 %v10706_v50, 0.0  ;;  %v15248_v25 = vld [vmem:[#allocation68_spill] sm:$0xff] }
 0x454   :  { %v10645_v18 = vadd.f32 %v3919_v51, %v13649_v31  ;;  %v10709_v39 = vadd.f32 %v4305_v4, %v13653_v58  ;;  %7265 = vmatprep.subr.bf16.mxu0 %v12123_v33  ;;  %v4635_v47 = vmax.f32 %v10643_v63, 0.0  ;;  %v4637_v32 = vmax.f32 %v10707_v30, 0.0  ;;  %v12124_v33 = vld [vmem:[#allocation8 + $0x468] ss:$12 sps:$4 sm:$0xff]  }
 0x455   :  { %v4646_v37 = vmax.f32 %v10644_v55, 0.0  ;;  %v4648_v7 = vmax.f32 %v10708_v11, 0.0  ;;  %7147 = vmatmul.mubr.bf16.gmra.mrb[220].mxu0 %v15247_v26  ;;  %8259 = vmatmul.mubr.bf16.gmra.mrb[28].mxu1 %v15247_v26  ;;  %v12131_v26 = vld [vmem:[#allocation8 + $0x484] ss:$12 sps:$4 sm:$0xff]  }
 0x456   :  { %v4647_v34 = vmax.f32 %v10645_v18, 0.0  ;;  %v4649_v19 = vmax.f32 %v10709_v39, 0.0  ;;  %7156 = vmatprep.mubr.bf16.mxu0 %v15248_v25  ;;  %8266 = vmatprep.mubr.bf16.mxu1 %v15248_v25 }
 0x457   :  { %v13907_v51 = vpack.c.bf16 %v4646_v37, %v4634_v43  ;;  %7266 = vmatpush1.bf16.msra.mxu0 %v12121_v16  ;;  %v13909_v49 = vpack.c.bf16 %v4648_v7, %v4636_v41 }
 0x458   :  { %v13911_v50 = vpack.c.bf16 %v4647_v34, %v4635_v47  ;;  %v3923_v55 = vpop.f32.mrb[180].mxu0  ;;  %v4309_v11 = vpop.f32.mrb[180].mxu1  ;;  %7267 = vmatprep.subr.bf16.mxu0 %v12126_v10  ;;  %v13913_v63 = vpack.c.bf16 %v4649_v19, %v4637_v32 }
 0x459   :  { %15249 = vst [vmem:[#allocation62_spill] sm:$0xff] %v13907_v51  ;;  %15250 = vst [vmem:[#allocation68_spill] sm:$0xff] %v13909_v49  ;;  %v10646_v30 = vadd.f32 %v3923_v55, %v13641_v36  ;;  %v10710_v4 = vadd.f32 %v4309_v11, %v13644_v46  ;;  %v3925_v18 = vpop.f32.mrb[181].mxu0  ;;  %v4311_v39 = vpop.f32.mrb[181].mxu1  ;;  %v15252_v49 = vld [vmem:[#allocation66_spill] sm:$0xff]  ;;  %v15253_v51 = vld [vmem:[#allocation72_spill] sm:$0xff] }
 0x45a   :  { %15251 = vst [vmem:[#allocation111_spill] sm:$0xff] %v13913_v63  ;;  %v10647_v37 = vadd.f32 %v3925_v18, %v13649_v31  ;;  %v10711_v16 = vadd.f32 %v4311_v39, %v13653_v58  ;;  %v3927_v43 = vpop.f32.mrb[182].mxu0  ;;  %v4313_v41 = vpop.f32.mrb[182].mxu1 }
 0x45b   :  { %v10648_v34 = vadd.f32 %v3927_v43, %v13641_v36  ;;  %v10712_v7 = vadd.f32 %v4313_v41, %v13644_v46  ;;  %v3929_v10 = vpop.f32.mrb[183].mxu0  ;;  %v4315_v47 = vpop.f32.mrb[183].mxu1  ;;  %7268 = vmatpush1.bf16.msra.mxu0 %v12124_v33  ;;  %v4658_v25 = vmax.f32 %v10646_v30, 0.0  ;;  %v4660_v55 = vmax.f32 %v10710_v4, 0.0 }
 0x45c   :  { %v10649_v19 = vadd.f32 %v3929_v10, %v13649_v31  ;;  %v10713_v32 = vadd.f32 %v4315_v47, %v13653_v58  ;;  %7430 = vmatprep.subr.bf16.mxu0 %v12131_v26  ;;  %v4659_v39 = vmax.f32 %v10647_v37, 0.0  ;;  %v4661_v43 = vmax.f32 %v10711_v16, 0.0 }
 0x45d   :  { %v4670_v11 = vmax.f32 %v10648_v34, 0.0  ;;  %v4672_v18 = vmax.f32 %v10712_v7, 0.0  ;;  %7157 = vmatmul.mubr.bf16.gmra.mrb[224].mxu0 %v15252_v49  ;;  %8267 = vmatmul.mubr.bf16.gmra.mrb[32].mxu1 %v15252_v49 }
 0x45e   :  { %v4671_v63 = vmax.f32 %v10649_v19, 0.0  ;;  %v4673_v41 = vmax.f32 %v10713_v32, 0.0  ;;  %7166 = vmatprep.mubr.bf16.mxu0 %v15253_v51  ;;  %8274 = vmatprep.mubr.bf16.mxu1 %v15253_v51 }
 0x45f   :  { %v13927_v33 = vpack.c.bf16 %v4670_v11, %v4658_v25  ;;  %v13929_v10 = vpack.c.bf16 %v4672_v18, %v4660_v55 }
 0x460   :  { %v13931_v26 = vpack.c.bf16 %v4671_v63, %v4659_v39  ;;  %v3933_v30 = vpop.f32.mrb[184].mxu0  ;;  %v4319_v4 = vpop.f32.mrb[184].mxu1  ;;  %v13933_v34 = vpack.c.bf16 %v4673_v41, %v4661_v43 }
 0x461   :  { %15254 = vst [vmem:[#allocation66_spill] sm:$0xff] %v13927_v33  ;;  %15255 = vst [vmem:[#allocation72_spill] sm:$0xff] %v13929_v10  ;;  %v10650_v49 = vadd.f32 %v3933_v30, %v13641_v36  ;;  %v10714_v37 = vadd.f32 %v4319_v4, %v13644_v46  ;;  %v3935_v16 = vpop.f32.mrb[185].mxu0  ;;  %v4321_v7 = vpop.f32.mrb[185].mxu1  ;;  %v15257_v10 = vld [vmem:[#allocation70_spill] sm:$0xff]  ;;  %v15258_v33 = vld [vmem:[#allocation76_spill] sm:$0xff] }
 0x462   :  { %15256 = vst [vmem:[#allocation112_spill] sm:$0xff] %v13933_v34  ;;  %v10651_v47 = vadd.f32 %v3935_v16, %v13649_v31  ;;  %v10715_v51 = vadd.f32 %v4321_v7, %v13653_v58  ;;  %v3937_v19 = vpop.f32.mrb[186].mxu0  ;;  %v4323_v32 = vpop.f32.mrb[186].mxu1 }
 0x463   :  { %v10652_v25 = vadd.f32 %v3937_v19, %v13641_v36  ;;  %v10716_v63 = vadd.f32 %v4323_v32, %v13644_v46  ;;  %v3939_v55 = vpop.f32.mrb[187].mxu0  ;;  %v4325_v11 = vpop.f32.mrb[187].mxu1  ;;  %v4682_v43 = vmax.f32 %v10650_v49, 0.0  ;;  %v4684_v41 = vmax.f32 %v10714_v37, 0.0 }
 0x464   :  { %v10653_v18 = vadd.f32 %v3939_v55, %v13649_v31  ;;  %v10717_v39 = vadd.f32 %v4325_v11, %v13653_v58  ;;  %v4683_v16 = vmax.f32 %v10651_v47, 0.0  ;;  %v4685_v7 = vmax.f32 %v10715_v51, 0.0 }
 0x465   :  { %v4694_v30 = vmax.f32 %v10652_v25, 0.0  ;;  %v4696_v4 = vmax.f32 %v10716_v63, 0.0  ;;  %7167 = vmatmul.mubr.bf16.gmra.mrb[228].mxu0 %v15257_v10  ;;  %8275 = vmatmul.mubr.bf16.gmra.mrb[36].mxu1 %v15257_v10 }
 0x466   :  { %v4695_v34 = vmax.f32 %v10653_v18, 0.0  ;;  %v4697_v19 = vmax.f32 %v10717_v39, 0.0  ;;  %7176 = vmatprep.mubr.bf16.mxu0 %v15258_v33  ;;  %8282 = vmatprep.mubr.bf16.mxu1 %v15258_v33 }
 0x467   :  { %v13947_v32 = vpack.c.bf16 %v4694_v30, %v4682_v43  ;;  %v13949_v55 = vpack.c.bf16 %v4696_v4, %v4684_v41 }
 0x468   :  { %v13951_v49 = vpack.c.bf16 %v4695_v34, %v4683_v16  ;;  %v3943_v37 = vpop.f32.mrb[188].mxu0  ;;  %v4329_v25 = vpop.f32.mrb[188].mxu1  ;;  %v13953_v63 = vpack.c.bf16 %v4697_v19, %v4685_v7 }
 0x469   :  { %15259 = vst [vmem:[#allocation70_spill] sm:$0xff] %v13947_v32  ;;  %15260 = vst [vmem:[#allocation76_spill] sm:$0xff] %v13949_v55  ;;  %v10654_v10 = vadd.f32 %v3943_v37, %v13641_v36  ;;  %v10718_v47 = vadd.f32 %v4329_v25, %v13644_v46  ;;  %v3945_v51 = vpop.f32.mrb[189].mxu0  ;;  %v4331_v11 = vpop.f32.mrb[189].mxu1 }
 0x46a   :  { %15261 = vst [vmem:[#allocation113_spill] sm:$0xff] %v13953_v63  ;;  %v10655_v18 = vadd.f32 %v3945_v51, %v13649_v31  ;;  %v10719_v33 = vadd.f32 %v4331_v11, %v13653_v58  ;;  %v3947_v39 = vpop.f32.mrb[190].mxu0  ;;  %v4333_v43 = vpop.f32.mrb[190].mxu1  ;;  %v15262_v63 = vld [vmem:[#allocation74_spill] sm:$0xff] }
 0x46b   :  { %v10656_v41 = vadd.f32 %v3947_v39, %v13641_v36  ;;  %v10720_v34 = vadd.f32 %v4333_v43, %v13644_v46  ;;  %v3949_v30 = vpop.f32.mrb[191].mxu0  ;;  %v4335_v4 = vpop.f32.mrb[191].mxu1  ;;  %v4706_v19 = vmax.f32 %v10654_v10, 0.0  ;;  %v4708_v37 = vmax.f32 %v10718_v47, 0.0  ;;  %v15263_v39 = vld [vmem:[#allocation80_spill] sm:$0xff] }
 0x46c   :  { %v10657_v16 = vadd.f32 %v3949_v30, %v13649_v31  ;;  %v10721_v7 = vadd.f32 %v4335_v4, %v13653_v58  ;;  %v4707_v51 = vmax.f32 %v10655_v18, 0.0  ;;  %v4709_v11 = vmax.f32 %v10719_v33, 0.0  ;;  %v15269_v30 = vld [vmem:[#allocation82_spill] sm:$0xff] }
 0x46d   :  { %v4718_v25 = vmax.f32 %v10656_v41, 0.0  ;;  %v4720_v55 = vmax.f32 %v10720_v34, 0.0  ;;  %7177 = vmatmul.mubr.bf16.gmra.mrb[232].mxu0 %v15262_v63  ;;  %8283 = vmatmul.mubr.bf16.gmra.mrb[40].mxu1 %v15262_v63  ;;  %v15268_v34 = vld [vmem:[#allocation78_spill] sm:$0xff] }
 0x46e   :  { %v4719_v32 = vmax.f32 %v10657_v16, 0.0  ;;  %v4721_v36 = vmax.f32 %v10721_v7, 0.0  ;;  %7186 = vmatprep.mubr.bf16.mxu0 %v15263_v39  ;;  %8290 = vmatprep.mubr.bf16.mxu1 %v15263_v39 }
 0x46f   :  { %v13967_v46 = vpack.c.bf16 %v4718_v25, %v4706_v19  ;;  %v13969_v31 = vpack.c.bf16 %v4720_v55, %v4708_v37  ;;  %v15270_v37 = vld [vmem:[#allocation81_spill] sm:$0xff]  ;;  %v15271_v25 = vld [vmem:[#allocation84_spill] sm:$0xff] }
 0x470   :  { %v13971_v58 = vpack.c.bf16 %v4719_v32, %v4707_v51  ;;  %v9682_v10 = vpop.f32.mrb[192].mxu1  ;;  %v13973_v47 = vpack.c.bf16 %v4721_v36, %v4709_v11 }
 0x471   :  { %15264 = vst [vmem:[#allocation74_spill] sm:$0xff] %v13967_v46  ;;  %15265 = vst [vmem:[#allocation80_spill] sm:$0xff] %v13969_v31  ;;  %v9683_v43 = vpop.f32.mrb[193].mxu1  ;;  %v12144_v46 = vld [vmem:[#allocation8 + $0x4b8] ss:$12 sps:$4 sm:$0xff]  }
 0x472   :  { %15266 = vst [vmem:[#allocation114_spill] sm:$0xff] %v13971_v58  ;;  %15267 = vst [vmem:[#allocation115_spill] sm:$0xff] %v13973_v47  ;;  %v13975_v41 = vadd.f32 %v9683_v43, %v9682_v10  ;;  %v9685_v63 = vpop.f32.mrb[194].mxu1 }
 0x473   :  { %v9686_v18 = vpop.f32.mrb[195].mxu1 }
 0x474   :  { %v13977_v33 = vadd.f32 %v9686_v18, %v9685_v63  ;;  %v15272_v63 = vld [vmem:[#allocation83_spill] sm:$0xff] }
 0x475   :  { %7187 = vmatmul.mubr.bf16.gmra.mrb[236].mxu0 %v15268_v34  ;;  %8291 = vmatmul.mubr.bf16.gmra.mrb[44].mxu1 %v15268_v34  ;;  %v15273_v18 = vld [vmem:[#allocation87_spill] sm:$0xff] }
 0x476   :  { %7196 = vmatprep.mubr.bf16.mxu0 %v15269_v30  ;;  %8298 = vmatprep.mubr.bf16.mxu1 %v15269_v30 }
 0x478   :  { %v9688_v32 = vpop.f32.mrb[196].mxu1 }
 0x479   :  { %v9689_v55 = vpop.f32.mrb[197].mxu1 }
 0x47a   :  { %v13983_v4 = vadd.f32 %v9689_v55, %v9688_v32  ;;  %v9691_v16 = vpop.f32.mrb[198].mxu1 }
 0x47b   :  { %v9692_v7 = vpop.f32.mrb[199].mxu1 }
 0x47c   :  { %v13985_v19 = vadd.f32 %v9692_v7, %v9691_v16 }
 0x47d   :  { %7197 = vmatmul.mubr.bf16.gmra.mrb[240].mxu0 %v15270_v37  ;;  %8299 = vmatmul.mubr.bf16.gmra.mrb[48].mxu1 %v15270_v37  ;;  %v15274_v37 = vld [vmem:[#allocation86_spill] sm:$0xff] }
 0x47e   :  { %7206 = vmatprep.mubr.bf16.mxu0 %v15271_v25  ;;  %8306 = vmatprep.mubr.bf16.mxu1 %v15271_v25 }
 0x480   :  { %v9694_v51 = vpop.f32.mrb[200].mxu1 }
 0x481   :  { %v9695_v11 = vpop.f32.mrb[201].mxu1 }
 0x482   :  { %v13991_v36 = vadd.f32 %v9695_v11, %v9694_v51  ;;  %v9697_v39 = vpop.f32.mrb[202].mxu1 }
 0x483   :  { %v9698_v10 = vpop.f32.mrb[203].mxu1 }
 0x484   :  { %v13993_v43 = vadd.f32 %v9698_v10, %v9697_v39 }
 0x485   :  { %7207 = vmatmul.mubr.bf16.gmra.mrb[244].mxu0 %v15272_v63  ;;  %8307 = vmatmul.mubr.bf16.gmra.mrb[52].mxu1 %v15272_v63 }
 0x486   :  { %7216 = vmatprep.mubr.bf16.mxu0 %v15273_v18  ;;  %8314 = vmatprep.mubr.bf16.mxu1 %v15273_v18 }
 0x488   :  { %v9700_v34 = vpop.f32.mrb[204].mxu1 }
 0x489   :  { %v9701_v30 = vpop.f32.mrb[205].mxu1 }
 0x48a   :  { %v13999_v32 = vadd.f32 %v9701_v30, %v9700_v34  ;;  %v9703_v55 = vpop.f32.mrb[206].mxu1 }
 0x48b   :  { %v9704_v16 = vpop.f32.mrb[207].mxu1 }
 0x48c   :  { %v14001_v7 = vadd.f32 %v9704_v16, %v9703_v55  ;;  %v12128_v16 = vld [vmem:[#allocation8 + $0x488] ss:$12 sps:$4 sm:$0xff]  }
 0x48d   :  { %7217 = vmatmul.mubr.bf16.gmra.mrb[248].mxu0 %v15274_v37  ;;  %8315 = vmatmul.mubr.bf16.gmra.mrb[56].mxu1 %v15274_v37  ;;  %v12129_v37 = vld [vmem:[#allocation8 + $0x480] ss:$12 sps:$4 sm:$0xff]  }
 0x48e   :  { %7226 = vmatprep.mubr.bf16.mxu0 %v13178_v20  ;;  %8322 = vmatprep.mubr.bf16.mxu1 %v13178_v20 }
 0x490   :  { %v9706_v25 = vpop.f32.mrb[208].mxu1 }
 0x491   :  { %v9707_v51 = vpop.f32.mrb[209].mxu1 }
 0x492   :  { %v14007_v11 = vadd.f32 %v9707_v51, %v9706_v25  ;;  %v9709_v39 = vpop.f32.mrb[210].mxu1  ;;  %v12134_v51 = vld [vmem:[#allocation8 + $0x49c] ss:$12 sps:$4 sm:$0xff]  }
 0x493   :  { %v9710_v10 = vpop.f32.mrb[211].mxu1 }
 0x494   :  { %v14009_v63 = vadd.f32 %v9710_v10, %v9709_v39  ;;  %v12135_v39 = vld [vmem:[#allocation8 + $0x560] ss:$12 sps:$4 sm:$0xff]  }
 0x495   :  { %7227 = vmatmul.mubr.bf16.gmra.mrb[252].mxu0 %v13180_v48  ;;  %8323 = vmatmul.mubr.bf16.gmra.mrb[60].mxu1 %v13180_v48  ;;  %v12132_v48 = vld [vmem:[#allocation8 + $0x498] ss:$12 sps:$4 sm:$0xff]  }
 0x496   :  { %7269 = vmatprep.mubr.bf16.mxu0 %v13274_v13  ;;  %8363 = vmatprep.mubr.bf16.mxu1 %v13274_v13  ;;  %v12136_v13 = vld [vmem:[#allocation8 + $0x4a0] ss:$12 sps:$4 sm:$0xff]  }
 0x498   :  { %v9712_v18 = vpop.f32.mrb[212].mxu1 }
 0x499   :  { %v9713_v34 = vpop.f32.mrb[213].mxu1 }
 0x49a   :  { %v14015_v30 = vadd.f32 %v9713_v34, %v9712_v18  ;;  %v9715_v20 = vpop.f32.mrb[214].mxu1  ;;  %v12139_v18 = vld [vmem:[#allocation8 + $0x4b4] ss:$12 sps:$4 sm:$0xff]   ;;  %v12143_v34 = vld [vmem:[#allocation8 + $0x578] ss:$12 sps:$4 sm:$0xff]  }
 0x49b   :  { %v9716_v55 = vpop.f32.mrb[215].mxu1 }
 0x49c   :  { %v14017_v25 = vadd.f32 %v9716_v55, %v9715_v20 }
 0x49d   :  { %7270 = vmatmul.mubr.bf16.vlgmr.msra.gmra.mrb[192].mxu0 %v13270_v22  ;;  %8364 = vmatmul.mubr.bf16.vlgmr.msra.gmra.mrb[64].mxu1 %v13270_v22  ;;  %v12137_v22 = vld [vmem:[#allocation8 + $0x4b0] ss:$12 sps:$4 sm:$0xff]  }
 0x49e   :  { %7279 = vmatprep.mubr.bf16.mxu0 %v13294_v17  ;;  %8371 = vmatprep.mubr.bf16.mxu1 %v13294_v17  ;;  %v12142_v17 = vld [vmem:[#allocation8 + $0x4cc] ss:$12 sps:$4 sm:$0xff]  }
 0x49f   :  { %10003 = vmatpush3.bf16.msra.mxu1 %v12128_v16  ;;  %7431 = vmatpush1.bf16.msra.mxu0 %v12129_v37  ;;  %v12151_v16 = vld [vmem:[#allocation8 + $0x590] ss:$12 sps:$4 sm:$0xff]   ;;  %v12140_v37 = vld [vmem:[#allocation8 + $0x4c8] ss:$12 sps:$4 sm:$0xff]  }
 0x4a0   :  { %v9718_v10 = vpop.f32.mrb[216].mxu1  ;;  %7432 = vmatprep.subr.bf16.mxu0 %v12134_v51  ;;  %10004 = vmatprep.subr.bf16.mxu1 %v12135_v39  ;;  %v12152_v51 = vld [vmem:[#allocation8 + $0x4d0] ss:$12 sps:$4 sm:$0xff]  }
 0x4a1   :  { %v9719_v20 = vpop.f32.mrb[217].mxu1 }
 0x4a2   :  { %v14023_v55 = vadd.f32 %v9719_v20, %v9718_v10  ;;  %v9721_v31 = vpop.f32.mrb[218].mxu1 }
 0x4a3   :  { %v9722_v47 = vpop.f32.mrb[219].mxu1  ;;  %7433 = vmatpush1.bf16.msra.mxu0 %v12132_v48  ;;  %10005 = vmatpush3.bf16.msra.mxu1 %v12136_v13 }
 0x4a4   :  { %v14025_v58 = vadd.f32 %v9722_v47, %v9721_v31  ;;  %7434 = vmatprep.subr.bf16.mxu0 %v12139_v18  ;;  %10006 = vmatprep.subr.bf16.mxu1 %v12143_v34  ;;  %v12147_v31 = vld [vmem:[#allocation8 + $0x4e4] ss:$12 sps:$4 sm:$0xff]   ;;  %v12159_v47 = vld [vmem:[#allocation8 + $0x5a8] ss:$12 sps:$4 sm:$0xff]  }
 0x4a5   :  { %7280 = vmatmul.mubr.bf16.gmra.mrb[196].mxu0 %v13290_v8  ;;  %8372 = vmatmul.mubr.bf16.gmra.mrb[68].mxu1 %v13290_v8  ;;  %v12145_v8 = vld [vmem:[#allocation8 + $0x4e0] ss:$12 sps:$4 sm:$0xff]   ;;  %v12160_v34 = vld [vmem:[#allocation8 + $0x4e8] ss:$12 sps:$4 sm:$0xff]  }
 0x4a6   :  { %7289 = vmatprep.mubr.bf16.mxu0 %v13314_v59  ;;  %8379 = vmatprep.mubr.bf16.mxu1 %v13314_v59  ;;  %v12150_v59 = vld [vmem:[#allocation8 + $0x4fc] ss:$12 sps:$4 sm:$0xff]  }
 0x4a7   :  { %7435 = vmatpush1.bf16.msra.mxu0 %v12137_v22  ;;  %10007 = vmatpush3.bf16.msra.mxu1 %v12144_v46  ;;  %v12167_v46 = vld [vmem:[#allocation8 + $0x5c0] ss:$12 sps:$4 sm:$0xff]   ;;  %v12148_v22 = vld [vmem:[#allocation8 + $0x4f8] ss:$12 sps:$4 sm:$0xff]  }
 0x4a8   :  { %v9724_v39 = vpop.f32.mrb[220].mxu1  ;;  %7436 = vmatprep.subr.bf16.mxu0 %v12142_v17  ;;  %10008 = vmatprep.subr.bf16.mxu1 %v12151_v16  ;;  %v12168_v17 = vld [vmem:[#allocation8 + $0x500] ss:$12 sps:$4 sm:$0xff]  }
 0x4a9   :  { %v9725_v48 = vpop.f32.mrb[221].mxu1 }
 0x4aa   :  { %v14031_v13 = vadd.f32 %v9725_v48, %v9724_v39  ;;  %v9727_v10 = vpop.f32.mrb[222].mxu1 }
 0x4ab   :  { %v9728_v18 = vpop.f32.mrb[223].mxu1  ;;  %7437 = vmatpush1.bf16.msra.mxu0 %v12140_v37  ;;  %10009 = vmatpush3.bf16.msra.mxu1 %v12152_v51  ;;  %v12155_v37 = vld [vmem:[#allocation8 + $0x514] ss:$12 sps:$4 sm:$0xff]   ;;  %v12175_v51 = vld [vmem:[#allocation8 + $0x5d8] ss:$12 sps:$4 sm:$0xff]  }
 0x4ac   :  { %v14033_v20 = vadd.f32 %v9728_v18, %v9727_v10  ;;  %7438 = vmatprep.subr.bf16.mxu0 %v12147_v31  ;;  %10010 = vmatprep.subr.bf16.mxu1 %v12159_v47  ;;  %v12176_v10 = vld [vmem:[#allocation8 + $0x518] ss:$12 sps:$4 sm:$0xff]  }
 0x4ad   :  { %7290 = vmatmul.mubr.bf16.gmra.mrb[200].mxu0 %v13310_v40  ;;  %8380 = vmatmul.mubr.bf16.gmra.mrb[72].mxu1 %v13310_v40  ;;  %v12153_v40 = vld [vmem:[#allocation8 + $0x510] ss:$12 sps:$4 sm:$0xff]  }
 0x4ae   :  { %7299 = vmatprep.mubr.bf16.mxu0 %v13334_v24  ;;  %8387 = vmatprep.mubr.bf16.mxu1 %v13334_v24  ;;  %v12158_v24 = vld [vmem:[#allocation8 + $0x52c] ss:$12 sps:$4 sm:$0xff]  }
 0x4af   :  { %7439 = vmatpush1.bf16.msra.mxu0 %v12145_v8  ;;  %10011 = vmatpush3.bf16.msra.mxu1 %v12160_v34  ;;  %v12183_v8 = vld [vmem:[#allocation8 + $0x5f0] ss:$12 sps:$4 sm:$0xff]   ;;  %v12156_v34 = vld [vmem:[#allocation8 + $0x528] ss:$12 sps:$4 sm:$0xff]  }
 0x4b0   :  { %v9730_v16 = vpop.f32.mrb[224].mxu1  ;;  %7440 = vmatprep.subr.bf16.mxu0 %v12150_v59  ;;  %10012 = vmatprep.subr.bf16.mxu1 %v12167_v46  ;;  %v12184_v59 = vld [vmem:[#allocation8 + $0x530] ss:$12 sps:$4 sm:$0xff]  }
 0x4b1   :  { %v9731_v39 = vpop.f32.mrb[225].mxu1 }
 0x4b2   :  { %v14039_v31 = vadd.f32 %v9731_v39, %v9730_v16  ;;  %v9733_v47 = vpop.f32.mrb[226].mxu1 }
 0x4b3   :  { %v9734_v48 = vpop.f32.mrb[227].mxu1  ;;  %7441 = vmatpush1.bf16.msra.mxu0 %v12148_v22  ;;  %10013 = vmatpush3.bf16.msra.mxu1 %v12168_v17  ;;  %v12163_v22 = vld [vmem:[#allocation8 + $0x544] ss:$12 sps:$4 sm:$0xff]   ;;  %v12191_v17 = vld [vmem:[#allocation8 + $0x6c8] ss:$12 sps:$4 sm:$0xff]  }
 0x4b4   :  { %v14041_v18 = vadd.f32 %v9734_v48, %v9733_v47  ;;  %7442 = vmatprep.subr.bf16.mxu0 %v12155_v37  ;;  %10014 = vmatprep.subr.bf16.mxu1 %v12175_v51  ;;  %v15275_v48 = vld [vmem:[#allocation23_spill] sm:$0xff] }
 0x4b5   :  { %7300 = vmatmul.mubr.bf16.gmra.mrb[204].mxu0 %v13330_v62  ;;  %8388 = vmatmul.mubr.bf16.gmra.mrb[76].mxu1 %v13330_v62  ;;  %v12161_v62 = vld [vmem:[#allocation8 + $0x540] ss:$12 sps:$4 sm:$0xff]  }
 0x4b6   :  { %7309 = vmatprep.mubr.bf16.mxu0 %v13354_v54  ;;  %8395 = vmatprep.mubr.bf16.mxu1 %v13354_v54  ;;  %v12166_v54 = vld [vmem:[#allocation8 + $0x55c] ss:$12 sps:$4 sm:$0xff]  }
 0x4b7   :  { %7443 = vmatpush1.bf16.msra.mxu0 %v12153_v40  ;;  %10015 = vmatpush3.bf16.msra.mxu1 %v12176_v10  ;;  %v12164_v40 = vld [vmem:[#allocation8 + $0x558] ss:$12 sps:$4 sm:$0xff]  }
 0x4b8   :  { %v9736_v46 = vpop.f32.mrb[228].mxu1  ;;  %7444 = vmatprep.subr.bf16.mxu0 %v12158_v24  ;;  %10016 = vmatprep.subr.bf16.mxu1 %v12183_v8  ;;  %v12171_v24 = vld [vmem:[#allocation8 + $0x574] ss:$12 sps:$4 sm:$0xff]  }
 0x4b9   :  { %v9737_v16 = vpop.f32.mrb[229].mxu1 }
 0x4ba   :  { %v14047_v37 = vadd.f32 %v9737_v16, %v9736_v46  ;;  %v9739_v51 = vpop.f32.mrb[230].mxu1  ;;  %v12174_v16 = vld [vmem:[#allocation8 + $0x58c] ss:$12 sps:$4 sm:$0xff]  }
 0x4bb   :  { %v9740_v39 = vpop.f32.mrb[231].mxu1  ;;  %7445 = vmatpush1.bf16.msra.mxu0 %v12156_v34  ;;  %10017 = vmatpush3.bf16.msra.mxu1 %v12184_v59 }
 0x4bc   :  { %v14049_v47 = vadd.f32 %v9740_v39, %v9739_v51  ;;  %7446 = vmatprep.subr.bf16.mxu0 %v12163_v22  ;;  %10114 = vmatprep.subr.bf16.mxu1 %v12191_v17  ;;  %v12169_v22 = vld [vmem:[#allocation8 + $0x570] ss:$12 sps:$4 sm:$0xff]   ;;  %v12172_v51 = vld [vmem:[#allocation8 + $0x588] ss:$12 sps:$4 sm:$0xff]  }
 0x4bd   :  { %7310 = vmatmul.mubr.bf16.gmra.mrb[208].mxu0 %v15275_v48  ;;  %8396 = vmatmul.mubr.bf16.gmra.mrb[80].mxu1 %v15275_v48 }
 0x4be   :  { %7319 = vmatprep.mubr.bf16.mxu0 %v13374_v6  ;;  %8403 = vmatprep.mubr.bf16.mxu1 %v13374_v6  ;;  %v15276_v6 = vld [vmem:[#allocation89_spill] sm:$0xff] }
 0x4bf   :  { %7447 = vmatpush1.bf16.msra.mxu0 %v12161_v62  ;;  %v12179_v62 = vld [vmem:[#allocation8 + $0x5a4] ss:$12 sps:$4 sm:$0xff]  }
 0x4c0   :  { %v9742_v10 = vpop.f32.mrb[232].mxu1  ;;  %7448 = vmatprep.subr.bf16.mxu0 %v12166_v54 }
 0x4c1   :  { %v9743_v8 = vpop.f32.mrb[233].mxu1 }
 0x4c2   :  { %v14055_v34 = vadd.f32 %v9743_v8, %v9742_v10  ;;  %v9745_v59 = vpop.f32.mrb[234].mxu1 }
 0x4c3   :  { %v9746_v46 = vpop.f32.mrb[235].mxu1  ;;  %7449 = vmatpush1.bf16.msra.mxu0 %v12164_v40 }
 0x4c4   :  { %v14057_v17 = vadd.f32 %v9746_v46, %v9745_v59  ;;  %7450 = vmatprep.subr.bf16.mxu0 %v12171_v24  ;;  %v12177_v24 = vld [vmem:[#allocation8 + $0x5a0] ss:$12 sps:$4 sm:$0xff]   ;;  %v15277_v59 = vld [vmem:[#allocation28_spill] sm:$0xff] }
 0x4c5   :  { %7320 = vmatmul.mubr.bf16.gmra.mrb[212].mxu0 %v13368_v2  ;;  %8404 = vmatmul.mubr.bf16.gmra.mrb[84].mxu1 %v13368_v2  ;;  %v12182_v2 = vld [vmem:[#allocation8 + $0x5bc] ss:$12 sps:$4 sm:$0xff]   ;;  %v12180_v46 = vld [vmem:[#allocation8 + $0x5b8] ss:$12 sps:$4 sm:$0xff]  }
 0x4c6   :  { %7329 = vmatprep.mubr.bf16.mxu0 %v15276_v6  ;;  %8411 = vmatprep.mubr.bf16.mxu1 %v15276_v6 }
 0x4c7   :  { %7451 = vmatpush1.bf16.msra.mxu0 %v12169_v22 }
 0x4c8   :  { %v9748_v39 = vpop.f32.mrb[236].mxu1  ;;  %7452 = vmatprep.subr.bf16.mxu0 %v12174_v16  ;;  %v12187_v16 = vld [vmem:[#allocation8 + $0x5d4] ss:$12 sps:$4 sm:$0xff]  }
 0x4c9   :  { %v9749_v54 = vpop.f32.mrb[237].mxu1 }
 0x4ca   :  { %v14063_v48 = vadd.f32 %v9749_v54, %v9748_v39  ;;  %v9751_v40 = vpop.f32.mrb[238].mxu1 }
 0x4cb   :  { %v9752_v10 = vpop.f32.mrb[239].mxu1  ;;  %7453 = vmatpush1.bf16.msra.mxu0 %v12172_v51 }
 0x4cc   :  { %v14065_v8 = vadd.f32 %v9752_v10, %v9751_v40  ;;  %7454 = vmatprep.subr.bf16.mxu0 %v12179_v62  ;;  %v12185_v62 = vld [vmem:[#allocation8 + $0x5d0] ss:$12 sps:$4 sm:$0xff]   ;;  %v12190_v10 = vld [vmem:[#allocation8 + $0x5ec] ss:$12 sps:$4 sm:$0xff]  }
 0x4cd   :  { %7330 = vmatmul.mubr.bf16.gmra.mrb[216].mxu0 %v15277_v59  ;;  %8412 = vmatmul.mubr.bf16.gmra.mrb[88].mxu1 %v15277_v59  ;;  %v15278_v59 = vld [vmem:[#allocation91_spill] sm:$0xff] }
 0x4ce   :  { %7339 = vmatprep.mubr.bf16.mxu0 %v13414_v57  ;;  %8419 = vmatprep.mubr.bf16.mxu1 %v13414_v57  ;;  %v12188_v57 = vld [vmem:[#allocation8 + $0x5e8] ss:$12 sps:$4 sm:$0xff]  }
 0x4cf   :  { %7455 = vmatpush1.bf16.msra.mxu0 %v12177_v24 }
 0x4d0   :  { %v9754_v22 = vpop.f32.mrb[240].mxu1  ;;  %7456 = vmatprep.subr.bf16.mxu0 %v12182_v2  ;;  %v12195_v2 = vld [vmem:[#allocation8 + $0x604] ss:$12 sps:$4 sm:$0xff]  }
 0x4d1   :  { %v9755_v6 = vpop.f32.mrb[241].mxu1 }
 0x4d2   :  { %v14071_v51 = vadd.f32 %v9755_v6, %v9754_v22  ;;  %v9757_v39 = vpop.f32.mrb[242].mxu1 }
 0x4d3   :  { %v9758_v54 = vpop.f32.mrb[243].mxu1  ;;  %7457 = vmatpush1.bf16.msra.mxu0 %v12180_v46 }
 0x4d4   :  { %v14073_v40 = vadd.f32 %v9758_v54, %v9757_v39  ;;  %7458 = vmatprep.subr.bf16.mxu0 %v12187_v16 }
 0x4d5   :  { %7340 = vmatmul.mubr.bf16.gmra.mrb[220].mxu0 %v15278_v59  ;;  %8420 = vmatmul.mubr.bf16.gmra.mrb[92].mxu1 %v15278_v59 }
 0x4d6   :  { %7349 = vmatprep.mubr.bf16.mxu0 %v13434_v61  ;;  %8427 = vmatprep.mubr.bf16.mxu1 %v13434_v61 }
 0x4d7   :  { %7459 = vmatpush1.bf16.msra.mxu0 %v12185_v62 }
 0x4d8   :  { %v9760_v24 = vpop.f32.mrb[244].mxu1  ;;  %7460 = vmatprep.subr.bf16.mxu0 %v12190_v10 }
 0x4d9   :  { %v9761_v22 = vpop.f32.mrb[245].mxu1 }
 0x4da   :  { %v14079_v46 = vadd.f32 %v9761_v22, %v9760_v24  ;;  %v9763_v6 = vpop.f32.mrb[246].mxu1  ;;  %v5298_v22 = vld [vmem:[#allocation10] sm:$0x7] }
 0x4db   :  { %v9764_v39 = vpop.f32.mrb[247].mxu1  ;;  %7461 = vmatpush1.bf16.msra.mxu0 %v12188_v57 }
 0x4dc   :  { %v14081_v16 = vadd.f32 %v9764_v39, %v9763_v6  ;;  %7623 = vmatprep.subr.bf16.mxu0 %v12195_v2 }
 0x4dd   :  { %7350 = vmatmul.mubr.bf16.gmra.mrb[224].mxu0 %v13430_v44  ;;  %8428 = vmatmul.mubr.bf16.gmra.mrb[96].mxu1 %v13430_v44 }
 0x4de   :  { %7359 = vmatprep.mubr.bf16.mxu0 %v13454_v56  ;;  %8435 = vmatprep.mubr.bf16.mxu1 %v13454_v56 }
 0x4e0   :  { %v9766_v61 = vpop.f32.mrb[248].mxu1 }
 0x4e1   :  { %v9767_v54 = vpop.f32.mrb[249].mxu1 }
 0x4e2   :  { %v14087_v62 = vadd.f32 %v9767_v54, %v9766_v61  ;;  %v9769_v10 = vpop.f32.mrb[250].mxu1  ;;  %v15279_v61 = vld [vmem:[#allocation98_spill] sm:$0xff]  ;;  %v14102_v54 = vrot.slane %v5298_v22, %v15184_v52  ;;  %v15280_v52 = vld [vmem:[#allocation101_spill] sm:$0xff] }
 0x4e3   :  { %v9770_v59 = vpop.f32.mrb[251].mxu1 }
 0x4e4   :  { %v14089_v24 = vadd.f32 %v9770_v59, %v9769_v10  ;;  %v8044_v10 = vadd.f32 %v13975_v41, %v14102_v54 }
 0x4e5   :  { %7360 = vmatmul.mubr.bf16.gmra.mrb[228].mxu0 %v13450_v53  ;;  %8436 = vmatmul.mubr.bf16.gmra.mrb[100].mxu1 %v13450_v53 }
 0x4e6   :  { %7369 = vmatprep.mubr.bf16.mxu0 %v13474_v0  ;;  %8443 = vmatprep.mubr.bf16.mxu1 %v13474_v0 }
 0x4e8   :  { %v9772_v44 = vpop.f32.mrb[252].mxu1 }
 0x4e9   :  { %v9773_v57 = vpop.f32.mrb[253].mxu1 }
 0x4ea   :  { %v14095_v2 = vadd.f32 %v9773_v57, %v9772_v44  ;;  %v9775_v56 = vpop.f32.mrb[254].mxu1 }
 0x4eb   :  { %v9776_v6 = vpop.f32.mrb[255].mxu1 }
 0x4ec   :  { %v14097_v39 = vadd.f32 %v9776_v6, %v9775_v56  ;;  %v8047_v56 = vadd.f32 %v13977_v33, %v14102_v54 }
 0x4ed   :  { %7370 = vmatmul.mubr.bf16.gmra.mrb[232].mxu0 %v15279_v61  ;;  %8444 = vmatmul.mubr.bf16.gmra.mrb[104].mxu1 %v15279_v61 }
 0x4ee   :  { %7379 = vmatprep.mubr.bf16.mxu0 %v13494_v3  ;;  %8451 = vmatprep.mubr.bf16.mxu1 %v13494_v3 }
 0x4f0   :  { %v9794_v53 = vpop.f32.mrb[0].mxu1 }
 0x4f1   :  { %v9795_v0 = vpop.f32.mrb[1].mxu1 }
 0x4f2   :  { %v9796_v59 = vadd.f32 %v9795_v0, %v9794_v53  ;;  %v9797_v44 = vpop.f32.mrb[2].mxu1  ;;  %v8052_v53 = vadd.f32 %v13983_v4, %v14102_v54 }
 0x4f3   :  { %v9798_v57 = vpop.f32.mrb[3].mxu1 }
 0x4f4   :  { %v9799_v6 = vadd.f32 %v9798_v57, %v9797_v44  ;;  %v14110_v61 = vadd.f32 %v9796_v59, %v8044_v10  ;;  %v8055_v10 = vadd.f32 %v13985_v19, %v14102_v54 }
 0x4f5   :  { %7380 = vmatmul.mubr.bf16.gmra.mrb[236].mxu0 %v15280_v52  ;;  %8452 = vmatmul.mubr.bf16.gmra.mrb[108].mxu1 %v15280_v52 }
 0x4f6   :  { %7389 = vmatprep.mubr.bf16.mxu0 %v13514_v21  ;;  %8459 = vmatprep.mubr.bf16.mxu1 %v13514_v21  ;;  %v14116_v3 = vadd.f32 %v9799_v6, %v8047_v56  ;;  %v8060_v6 = vadd.f32 %v13991_v36, %v14102_v54 }
 0x4f8   :  { %v9800_v41 = vpop.f32.mrb[4].mxu1 }
 0x4f9   :  { %v9801_v22 = vpop.f32.mrb[5].mxu1 }
 0x4fa   :  { %v9802_v0 = vadd.f32 %v9801_v22, %v9800_v41  ;;  %v9803_v33 = vpop.f32.mrb[6].mxu1  ;;  %v8063_v22 = vadd.f32 %v13993_v43, %v14102_v54 }
 0x4fb   :  { %v9804_v44 = vpop.f32.mrb[7].mxu1 }
 0x4fc   :  { %v9805_v59 = vadd.f32 %v9804_v44, %v9803_v33  ;;  %v14122_v57 = vadd.f32 %v9802_v0, %v8052_v53  ;;  %v8068_v33 = vadd.f32 %v13999_v32, %v14102_v54 }
 0x4fd   :  { %7390 = vmatmul.mubr.bf16.gmra.mrb[240].mxu0 %v13510_v15  ;;  %8460 = vmatmul.mubr.bf16.gmra.mrb[112].mxu1 %v13510_v15 }
 0x4fe   :  { %7399 = vmatprep.mubr.bf16.mxu0 %v13534_v5  ;;  %8467 = vmatprep.mubr.bf16.mxu1 %v13534_v5  ;;  %v14128_v21 = vadd.f32 %v9805_v59, %v8055_v10  ;;  %v8071_v59 = vadd.f32 %v14001_v7, %v14102_v54 }
 0x500   :  { %v9806_v4 = vpop.f32.mrb[8].mxu1 }
 0x501   :  { %v9807_v56 = vpop.f32.mrb[9].mxu1 }
 0x502   :  { %v9808_v52 = vadd.f32 %v9807_v56, %v9806_v4  ;;  %v9809_v19 = vpop.f32.mrb[10].mxu1 }
 0x503   :  { %v9810_v41 = vpop.f32.mrb[11].mxu1 }
 0x504   :  { %v9811_v53 = vadd.f32 %v9810_v41, %v9809_v19  ;;  %v14134_v0 = vadd.f32 %v9808_v52, %v8060_v6  ;;  %v8076_v6 = vadd.f32 %v14007_v11, %v14102_v54  ;;  %v8079_v41 = vadd.f32 %v14009_v63, %v14102_v54 }
 0x505   :  { %7400 = vmatmul.mubr.bf16.gmra.mrb[244].mxu0 %v13530_v42  ;;  %8468 = vmatmul.mubr.bf16.gmra.mrb[116].mxu1 %v13530_v42 }
 0x506   :  { %7409 = vmatprep.mubr.bf16.mxu0 %v13554_v35  ;;  %8475 = vmatprep.mubr.bf16.mxu1 %v13554_v35  ;;  %v14140_v15 = vadd.f32 %v9811_v53, %v8063_v22 }
 0x508   :  { %v9812_v5 = vpop.f32.mrb[12].mxu1 }
 0x509   :  { %v9813_v36 = vpop.f32.mrb[13].mxu1 }
 0x50a   :  { %v9814_v44 = vadd.f32 %v9813_v36, %v9812_v5  ;;  %v9815_v43 = vpop.f32.mrb[14].mxu1  ;;  %v8084_v36 = vadd.f32 %v14015_v30, %v14102_v54 }
 0x50b   :  { %v9816_v10 = vpop.f32.mrb[15].mxu1 }
 0x50c   :  { %v9817_v4 = vadd.f32 %v9816_v10, %v9815_v43  ;;  %v14146_v56 = vadd.f32 %v9814_v44, %v8068_v33  ;;  %v12192_v43 = vld [vmem:[#allocation8 + $0x608] ss:$12 sps:$4 sm:$0xff]   ;;  %v12193_v10 = vld [vmem:[#allocation8 + $0x600] ss:$12 sps:$4 sm:$0xff]  }
 0x50d   :  { %7410 = vmatmul.mubr.bf16.gmra.mrb[248].mxu0 %v13550_v60  ;;  %8476 = vmatmul.mubr.bf16.gmra.mrb[120].mxu1 %v13550_v60  ;;  %v15281_v60 = vld [vmem:[#allocation17_spill] sm:$0xff] }
 0x50e   :  { %7419 = vmatprep.mubr.bf16.mxu0 %v13574_v12  ;;  %8483 = vmatprep.mubr.bf16.mxu1 %v13574_v12  ;;  %v14152_v42 = vadd.f32 %v9817_v4, %v8071_v59  ;;  %v8087_v59 = vadd.f32 %v14017_v25, %v14102_v54  ;;  %v12198_v4 = vld [vmem:[#allocation8 + $0x61c] ss:$12 sps:$4 sm:$0xff]  }
 0x510   :  { %v9818_v35 = vpop.f32.mrb[16].mxu1 }
 0x511   :  { %v9819_v32 = vpop.f32.mrb[17].mxu1 }
 0x512   :  { %v9820_v52 = vadd.f32 %v9819_v32, %v9818_v35  ;;  %v9821_v7 = vpop.f32.mrb[18].mxu1  ;;  %v12199_v35 = vld [vmem:[#allocation8 + $0x6e0] ss:$12 sps:$4 sm:$0xff]  }
 0x513   :  { %v9822_v19 = vpop.f32.mrb[19].mxu1 }
 0x514   :  { %v9823_v22 = vadd.f32 %v9822_v19, %v9821_v7  ;;  %v14158_v53 = vadd.f32 %v9820_v52, %v8076_v6  ;;  %v15282_v6 = vld [vmem:[#allocation16_spill] sm:$0xff]  ;;  %v15283_v52 = vld [vmem:[#allocation19_spill] sm:$0xff] }
 0x515   :  { %7420 = vmatmul.mubr.bf16.gmra.mrb[252].mxu0 %v13570_v28  ;;  %8484 = vmatmul.mubr.bf16.gmra.mrb[124].mxu1 %v13570_v28  ;;  %v12196_v7 = vld [vmem:[#allocation8 + $0x618] ss:$12 sps:$4 sm:$0xff]   ;;  %v12200_v19 = vld [vmem:[#allocation8 + $0x620] ss:$12 sps:$4 sm:$0xff]  }
 0x516   :  { %7462 = vmatprep.mubr.bf16.mxu0 %v15281_v60  ;;  %8524 = vmatprep.mubr.bf16.mxu1 %v15281_v60  ;;  %v14164_v12 = vadd.f32 %v9823_v22, %v8079_v41  ;;  %v12203_v41 = vld [vmem:[#allocation8 + $0x634] ss:$12 sps:$4 sm:$0xff]   ;;  %v12207_v22 = vld [vmem:[#allocation8 + $0x6f8] ss:$12 sps:$4 sm:$0xff]  }
 0x518   :  { %v9824_v11 = vpop.f32.mrb[20].mxu1 }
 0x519   :  { %v9825_v5 = vpop.f32.mrb[21].mxu1 }
 0x51a   :  { %v9826_v33 = vadd.f32 %v9825_v5, %v9824_v11  ;;  %v9827_v63 = vpop.f32.mrb[22].mxu1  ;;  %v8092_v11 = vadd.f32 %v14023_v55, %v14102_v54  ;;  %v15285_v55 = vld [vmem:[#allocation29_spill] sm:$0xff] }
 0x51b   :  { %v9828_v44 = vpop.f32.mrb[23].mxu1 }
 0x51c   :  { %v9829_v28 = vadd.f32 %v9828_v44, %v9827_v63  ;;  %v14170_v32 = vadd.f32 %v9826_v33, %v8084_v36  ;;  %v12201_v63 = vld [vmem:[#allocation8 + $0x630] ss:$12 sps:$4 sm:$0xff]   ;;  %v12208_v44 = vld [vmem:[#allocation8 + $0x638] ss:$12 sps:$4 sm:$0xff]  }
 0x51d   :  { %7463 = vmatmul.mubr.bf16.vlgmr.msra.gmra.mrb[192].mxu0 %v15282_v6  ;;  %8525 = vmatmul.mubr.bf16.vlgmr.msra.gmra.mrb[128].mxu1 %v15282_v6 }
 0x51e   :  { %7472 = vmatprep.mubr.bf16.mxu0 %v15283_v52  ;;  %8532 = vmatprep.mubr.bf16.mxu1 %v15283_v52  ;;  %v14176_v30 = vadd.f32 %v9829_v28, %v8087_v59  ;;  %v12206_v59 = vld [vmem:[#allocation8 + $0x64c] ss:$12 sps:$4 sm:$0xff]   ;;  %v12215_v28 = vld [vmem:[#allocation8 + $0x710] ss:$12 sps:$4 sm:$0xff]   ;;  %v12204_v52 = vld [vmem:[#allocation8 + $0x648] ss:$12 sps:$4 sm:$0xff]  }
 0x51f   :  { %10115 = vmatpush3.bf16.msra.mxu1 %v12192_v43  ;;  %7624 = vmatpush1.bf16.msra.mxu0 %v12193_v10  ;;  %v8095_v43 = vadd.f32 %v14025_v58, %v14102_v54  ;;  %v12216_v58 = vld [vmem:[#allocation8 + $0x650] ss:$12 sps:$4 sm:$0xff]  }
 0x520   :  { %v9830_v25 = vpop.f32.mrb[24].mxu1  ;;  %7625 = vmatprep.subr.bf16.mxu0 %v12198_v4  ;;  %10116 = vmatprep.subr.bf16.mxu1 %v12199_v35  ;;  %v15284_v35 = vld [vmem:[#allocation18_spill] sm:$0xff] }
 0x521   :  { %v9831_v60 = vpop.f32.mrb[25].mxu1 }
 0x522   :  { %v9832_v5 = vadd.f32 %v9831_v60, %v9830_v25  ;;  %v9833_v36 = vpop.f32.mrb[26].mxu1  ;;  %v12223_v25 = vld [vmem:[#allocation8 + $0x728] ss:$12 sps:$4 sm:$0xff]  }
 0x523   :  { %v9834_v33 = vpop.f32.mrb[27].mxu1  ;;  %7626 = vmatpush1.bf16.msra.mxu0 %v12196_v7  ;;  %10117 = vmatpush3.bf16.msra.mxu1 %v12200_v19  ;;  %v12211_v19 = vld [vmem:[#allocation8 + $0x664] ss:$12 sps:$4 sm:$0xff]  }
 0x524   :  { %v9835_v10 = vadd.f32 %v9834_v33, %v9833_v36  ;;  %7627 = vmatprep.subr.bf16.mxu0 %v12203_v41  ;;  %10118 = vmatprep.subr.bf16.mxu1 %v12207_v22  ;;  %v14182_v4 = vadd.f32 %v9832_v5, %v8092_v11  ;;  %v8100_v22 = vadd.f32 %v14031_v13, %v14102_v54  ;;  %v12209_v36 = vld [vmem:[#allocation8 + $0x660] ss:$12 sps:$4 sm:$0xff]   ;;  %v12224_v33 = vld [vmem:[#allocation8 + $0x668] ss:$12 sps:$4 sm:$0xff]  }
 0x525   :  { %7473 = vmatmul.mubr.bf16.gmra.mrb[196].mxu0 %v15284_v35  ;;  %8533 = vmatmul.mubr.bf16.gmra.mrb[132].mxu1 %v15284_v35  ;;  %v15287_v13 = vld [vmem:[#allocation22_spill] sm:$0xff] }
 0x526   :  { %7482 = vmatprep.mubr.bf16.mxu0 %v15285_v55  ;;  %8540 = vmatprep.mubr.bf16.mxu1 %v15285_v55  ;;  %v14188_v6 = vadd.f32 %v9835_v10, %v8095_v43  ;;  %v12214_v43 = vld [vmem:[#allocation8 + $0x67c] ss:$12 sps:$4 sm:$0xff]   ;;  %v12231_v10 = vld [vmem:[#allocation8 + $0x740] ss:$12 sps:$4 sm:$0xff]   ;;  %v12212_v55 = vld [vmem:[#allocation8 + $0x678] ss:$12 sps:$4 sm:$0xff]  }
 0x527   :  { %7628 = vmatpush1.bf16.msra.mxu0 %v12201_v63  ;;  %10119 = vmatpush3.bf16.msra.mxu1 %v12208_v44  ;;  %v8103_v63 = vadd.f32 %v14033_v20, %v14102_v54  ;;  %v12232_v20 = vld [vmem:[#allocation8 + $0x680] ss:$12 sps:$4 sm:$0xff]  }
 0x528   :  { %v9836_v7 = vpop.f32.mrb[28].mxu1  ;;  %7629 = vmatprep.subr.bf16.mxu0 %v12206_v59  ;;  %10120 = vmatprep.subr.bf16.mxu1 %v12215_v28  ;;  %v15286_v28 = vld [vmem:[#allocation20_spill] sm:$0xff] }
 0x529   :  { %v9837_v41 = vpop.f32.mrb[29].mxu1 }
 0x52a   :  { %v9838_v60 = vadd.f32 %v9837_v41, %v9836_v7  ;;  %v9839_v11 = vpop.f32.mrb[30].mxu1  ;;  %v12239_v7 = vld [vmem:[#allocation8 + $0x758] ss:$12 sps:$4 sm:$0xff]  }
 0x52b   :  { %v9840_v5 = vpop.f32.mrb[31].mxu1  ;;  %7630 = vmatpush1.bf16.msra.mxu0 %v12204_v52  ;;  %10121 = vmatpush3.bf16.msra.mxu1 %v12216_v58  ;;  %v12219_v58 = vld [vmem:[#allocation8 + $0x694] ss:$12 sps:$4 sm:$0xff]  }
 0x52c   :  { %v9841_v44 = vadd.f32 %v9840_v5, %v9839_v11  ;;  %7631 = vmatprep.subr.bf16.mxu0 %v12211_v19  ;;  %10122 = vmatprep.subr.bf16.mxu1 %v12223_v25  ;;  %v14194_v59 = vadd.f32 %v9838_v60, %v8100_v22  ;;  %v8108_v25 = vadd.f32 %v14039_v31, %v14102_v54  ;;  %v12217_v11 = vld [vmem:[#allocation8 + $0x690] ss:$12 sps:$4 sm:$0xff]   ;;  %v12240_v5 = vld [vmem:[#allocation8 + $0x698] ss:$12 sps:$4 sm:$0xff]  }
 0x52d   :  { %7483 = vmatmul.mubr.bf16.gmra.mrb[200].mxu0 %v15286_v28  ;;  %8541 = vmatmul.mubr.bf16.gmra.mrb[136].mxu1 %v15286_v28  ;;  %v15289_v31 = vld [vmem:[#allocation25_spill] sm:$0xff] }
 0x52e   :  { %7492 = vmatprep.mubr.bf16.mxu0 %v15287_v13  ;;  %8548 = vmatprep.mubr.bf16.mxu1 %v15287_v13  ;;  %v14200_v35 = vadd.f32 %v9841_v44, %v8103_v63  ;;  %v12222_v63 = vld [vmem:[#allocation8 + $0x6ac] ss:$12 sps:$4 sm:$0xff]   ;;  %v12247_v44 = vld [vmem:[#allocation8 + $0x770] ss:$12 sps:$4 sm:$0xff]   ;;  %v12220_v13 = vld [vmem:[#allocation8 + $0x6a8] ss:$12 sps:$4 sm:$0xff]  }
 0x52f   :  { %7632 = vmatpush1.bf16.msra.mxu0 %v12209_v36  ;;  %10123 = vmatpush3.bf16.msra.mxu1 %v12224_v33  ;;  %v8111_v36 = vadd.f32 %v14041_v18, %v14102_v54  ;;  %v12248_v18 = vld [vmem:[#allocation8 + $0x6b0] ss:$12 sps:$4 sm:$0xff]  }
 0x530   :  { %v9842_v52 = vpop.f32.mrb[32].mxu1  ;;  %7633 = vmatprep.subr.bf16.mxu0 %v12214_v43  ;;  %10124 = vmatprep.subr.bf16.mxu1 %v12231_v10  ;;  %v15288_v10 = vld [vmem:[#allocation21_spill] sm:$0xff] }
 0x531   :  { %v9843_v19 = vpop.f32.mrb[33].mxu1 }
 0x532   :  { %v9844_v41 = vadd.f32 %v9843_v19, %v9842_v52  ;;  %v9845_v22 = vpop.f32.mrb[34].mxu1  ;;  %v12255_v52 = vld [vmem:[#allocation8 + $0x848] ss:$12 sps:$4 sm:$0xff]  }
 0x533   :  { %v9846_v60 = vpop.f32.mrb[35].mxu1  ;;  %7634 = vmatpush1.bf16.msra.mxu0 %v12212_v55  ;;  %10125 = vmatpush3.bf16.msra.mxu1 %v12232_v20  ;;  %v12227_v20 = vld [vmem:[#allocation8 + $0x6c4] ss:$12 sps:$4 sm:$0xff]  }
 0x534   :  { %v9847_v33 = vadd.f32 %v9846_v60, %v9845_v22  ;;  %7635 = vmatprep.subr.bf16.mxu0 %v12219_v58  ;;  %10126 = vmatprep.subr.bf16.mxu1 %v12239_v7  ;;  %v14206_v43 = vadd.f32 %v9844_v41, %v8108_v25  ;;  %v8116_v7 = vadd.f32 %v14047_v37, %v14102_v54  ;;  %v12225_v22 = vld [vmem:[#allocation8 + $0x6c0] ss:$12 sps:$4 sm:$0xff]  }
 0x535   :  { %7493 = vmatmul.mubr.bf16.gmra.mrb[204].mxu0 %v15288_v10  ;;  %8549 = vmatmul.mubr.bf16.gmra.mrb[140].mxu1 %v15288_v10  ;;  %v8119_v60 = vadd.f32 %v14049_v47, %v14102_v54  ;;  %v15291_v37 = vld [vmem:[#allocation27_spill] sm:$0xff] }
 0x536   :  { %7502 = vmatprep.mubr.bf16.mxu0 %v15289_v31  ;;  %8556 = vmatprep.mubr.bf16.mxu1 %v15289_v31  ;;  %v14212_v28 = vadd.f32 %v9847_v33, %v8111_v36  ;;  %v15290_v33 = vld [vmem:[#allocation24_spill] sm:$0xff]  ;;  %v12235_v47 = vld [vmem:[#allocation8 + $0x6f4] ss:$12 sps:$4 sm:$0xff]  }
 0x537   :  { %7636 = vmatpush1.bf16.msra.mxu0 %v12217_v11  ;;  %10127 = vmatpush3.bf16.msra.mxu1 %v12240_v5  ;;  %v12230_v5 = vld [vmem:[#allocation8 + $0x6dc] ss:$12 sps:$4 sm:$0xff]  }
 0x538   :  { %v9848_v55 = vpop.f32.mrb[36].mxu1  ;;  %7637 = vmatprep.subr.bf16.mxu0 %v12222_v63  ;;  %10128 = vmatprep.subr.bf16.mxu1 %v12247_v44  ;;  %v12228_v44 = vld [vmem:[#allocation8 + $0x6d8] ss:$12 sps:$4 sm:$0xff]  }
 0x539   :  { %v9849_v58 = vpop.f32.mrb[37].mxu1 }
 0x53a   :  { %v9850_v19 = vadd.f32 %v9849_v58, %v9848_v55  ;;  %v9851_v25 = vpop.f32.mrb[38].mxu1  ;;  %v8127_v58 = vadd.f32 %v14057_v17, %v14102_v54  ;;  %v12243_v17 = vld [vmem:[#allocation8 + $0x724] ss:$12 sps:$4 sm:$0xff]  }
 0x53b   :  { %v9852_v41 = vpop.f32.mrb[39].mxu1  ;;  %7638 = vmatpush1.bf16.msra.mxu0 %v12220_v13  ;;  %10129 = vmatpush3.bf16.msra.mxu1 %v12248_v18  ;;  %v8124_v13 = vadd.f32 %v14055_v34, %v14102_v54 }
 0x53c   :  { %v9853_v11 = vadd.f32 %v9852_v41, %v9851_v25  ;;  %7639 = vmatprep.subr.bf16.mxu0 %v12227_v20  ;;  %10226 = vmatprep.subr.bf16.mxu1 %v12255_v52  ;;  %v14218_v36 = vadd.f32 %v9850_v19, %v8116_v7  ;;  %v12233_v52 = vld [vmem:[#allocation8 + $0x6f0] ss:$12 sps:$4 sm:$0xff]   ;;  %v12238_v19 = vld [vmem:[#allocation8 + $0x70c] ss:$12 sps:$4 sm:$0xff]  }
 0x53d   :  { %7503 = vmatmul.mubr.bf16.gmra.mrb[208].mxu0 %v15290_v33  ;;  %8557 = vmatmul.mubr.bf16.gmra.mrb[144].mxu1 %v15290_v33  ;;  %v15292_v41 = vld [vmem:[#allocation26_spill] sm:$0xff]  ;;  %v8132_v33 = vadd.f32 %v14063_v48, %v14102_v54 }
 0x53e   :  { %7512 = vmatprep.mubr.bf16.mxu0 %v15291_v37  ;;  %8564 = vmatprep.mubr.bf16.mxu1 %v15291_v37  ;;  %v14224_v63 = vadd.f32 %v9853_v11, %v8119_v60  ;;  %v12236_v60 = vld [vmem:[#allocation8 + $0x708] ss:$12 sps:$4 sm:$0xff]  }
 0x53f   :  { %7640 = vmatpush1.bf16.msra.mxu0 %v12225_v22  ;;  %v15293_v22 = vld [vmem:[#allocation90_spill] sm:$0xff] }
 0x540   :  { %v9854_v10 = vpop.f32.mrb[40].mxu1  ;;  %7641 = vmatprep.subr.bf16.mxu0 %v12230_v5 }
 0x541   :  { %v9855_v31 = vpop.f32.mrb[41].mxu1 }
 0x542   :  { %v9856_v18 = vadd.f32 %v9855_v31, %v9854_v10  ;;  %v9857_v55 = vpop.f32.mrb[42].mxu1  ;;  %v8135_v31 = vadd.f32 %v14065_v8, %v14102_v54  ;;  %v12251_v8 = vld [vmem:[#allocation8 + $0x754] ss:$12 sps:$4 sm:$0xff]  }
 0x543   :  { %v9858_v20 = vpop.f32.mrb[43].mxu1  ;;  %7642 = vmatpush1.bf16.msra.mxu0 %v12228_v44 }
 0x544   :  { %v9859_v7 = vadd.f32 %v9858_v20, %v9857_v55  ;;  %7643 = vmatprep.subr.bf16.mxu0 %v12235_v47  ;;  %v14230_v25 = vadd.f32 %v9856_v18, %v8124_v13  ;;  %v12241_v47 = vld [vmem:[#allocation8 + $0x720] ss:$12 sps:$4 sm:$0xff]   ;;  %v12246_v18 = vld [vmem:[#allocation8 + $0x73c] ss:$12 sps:$4 sm:$0xff]  }
 0x545   :  { %7513 = vmatmul.mubr.bf16.gmra.mrb[212].mxu0 %v15292_v41  ;;  %8565 = vmatmul.mubr.bf16.gmra.mrb[148].mxu1 %v15292_v41  ;;  %v15294_v20 = vld [vmem:[#allocation88_spill] sm:$0xff]  ;;  %v8140_v41 = vadd.f32 %v14071_v51, %v14102_v54 }
 0x546   :  { %7522 = vmatprep.mubr.bf16.mxu0 %v15293_v22  ;;  %8572 = vmatprep.mubr.bf16.mxu1 %v15293_v22  ;;  %v14236_v34 = vadd.f32 %v9859_v7, %v8127_v58  ;;  %v12244_v58 = vld [vmem:[#allocation8 + $0x738] ss:$12 sps:$4 sm:$0xff]  }
 0x547   :  { %7644 = vmatpush1.bf16.msra.mxu0 %v12233_v52  ;;  %v15295_v52 = vld [vmem:[#allocation93_spill] sm:$0xff] }
 0x548   :  { %v9860_v11 = vpop.f32.mrb[44].mxu1  ;;  %7645 = vmatprep.subr.bf16.mxu0 %v12238_v19 }
 0x549   :  { %v9861_v5 = vpop.f32.mrb[45].mxu1 }
 0x54a   :  { %v9862_v37 = vadd.f32 %v9861_v5, %v9860_v11  ;;  %v9863_v44 = vpop.f32.mrb[46].mxu1  ;;  %v8143_v5 = vadd.f32 %v14073_v40, %v14102_v54  ;;  %v12259_v40 = vld [vmem:[#allocation8 + $0x784] ss:$12 sps:$4 sm:$0xff]  }
 0x54b   :  { %v9864_v10 = vpop.f32.mrb[47].mxu1  ;;  %7646 = vmatpush1.bf16.msra.mxu0 %v12236_v60 }
 0x54c   :  { %v9865_v13 = vadd.f32 %v9864_v10, %v9863_v44  ;;  %7647 = vmatprep.subr.bf16.mxu0 %v12243_v17  ;;  %v14242_v55 = vadd.f32 %v9862_v37, %v8132_v33  ;;  %v12249_v17 = vld [vmem:[#allocation8 + $0x750] ss:$12 sps:$4 sm:$0xff]   ;;  %v12254_v37 = vld [vmem:[#allocation8 + $0x76c] ss:$12 sps:$4 sm:$0xff]   ;;  %v15296_v10 = vld [vmem:[#allocation92_spill] sm:$0xff] }
 0x54d   :  { %7523 = vmatmul.mubr.bf16.gmra.mrb[216].mxu0 %v15294_v20  ;;  %8573 = vmatmul.mubr.bf16.gmra.mrb[152].mxu1 %v15294_v20  ;;  %v8148_v20 = vadd.f32 %v14079_v46, %v14102_v54 }
 0x54e   :  { %7532 = vmatprep.mubr.bf16.mxu0 %v15295_v52  ;;  %8580 = vmatprep.mubr.bf16.mxu1 %v15295_v52  ;;  %v14248_v48 = vadd.f32 %v9865_v13, %v8135_v31  ;;  %v12252_v31 = vld [vmem:[#allocation8 + $0x768] ss:$12 sps:$4 sm:$0xff]  }
 0x54f   :  { %7648 = vmatpush1.bf16.msra.mxu0 %v12241_v47  ;;  %v15297_v47 = vld [vmem:[#allocation95_spill] sm:$0xff] }
 0x550   :  { %v9866_v7 = vpop.f32.mrb[48].mxu1  ;;  %7649 = vmatprep.subr.bf16.mxu0 %v12246_v18 }
 0x551   :  { %v9867_v19 = vpop.f32.mrb[49].mxu1 }
 0x552   :  { %v9868_v22 = vadd.f32 %v9867_v19, %v9866_v7  ;;  %v9869_v60 = vpop.f32.mrb[50].mxu1 }
 0x553   :  { %v9870_v11 = vpop.f32.mrb[51].mxu1  ;;  %7650 = vmatpush1.bf16.msra.mxu0 %v12244_v58 }
 0x554   :  { %v9871_v33 = vadd.f32 %v9870_v11, %v9869_v60  ;;  %7651 = vmatprep.subr.bf16.mxu0 %v12251_v8  ;;  %v14254_v44 = vadd.f32 %v9868_v22, %v8140_v41  ;;  %v8151_v8 = vadd.f32 %v14081_v16, %v14102_v54  ;;  %v15298_v22 = vld [vmem:[#allocation94_spill] sm:$0xff]  ;;  %v15299_v60 = vld [vmem:[#allocation97_spill] sm:$0xff] }
 0x555   :  { %7533 = vmatmul.mubr.bf16.gmra.mrb[220].mxu0 %v15296_v10  ;;  %8581 = vmatmul.mubr.bf16.gmra.mrb[156].mxu1 %v15296_v10  ;;  %v8159_v10 = vadd.f32 %v14089_v24, %v14102_v54 }
 0x556   :  { %7542 = vmatprep.mubr.bf16.mxu0 %v15297_v47  ;;  %8588 = vmatprep.mubr.bf16.mxu1 %v15297_v47  ;;  %v14260_v51 = vadd.f32 %v9871_v33, %v8143_v5  ;;  %v8156_v5 = vadd.f32 %v14087_v62, %v14102_v54 }
 0x557   :  { %7652 = vmatpush1.bf16.msra.mxu0 %v12249_v17 }
 0x558   :  { %v9872_v13 = vpop.f32.mrb[52].mxu1  ;;  %7653 = vmatprep.subr.bf16.mxu0 %v12254_v37 }
 0x559   :  { %v9873_v18 = vpop.f32.mrb[53].mxu1 }
 0x55a   :  { %v9874_v52 = vadd.f32 %v9873_v18, %v9872_v13  ;;  %v9875_v58 = vpop.f32.mrb[54].mxu1  ;;  %v15300_v13 = vld [vmem:[#allocation96_spill] sm:$0xff] }
 0x55b   :  { %v9876_v7 = vpop.f32.mrb[55].mxu1  ;;  %7654 = vmatpush1.bf16.msra.mxu0 %v12252_v31 }
 0x55c   :  { %v9877_v19 = vadd.f32 %v9876_v7, %v9875_v58  ;;  %7816 = vmatprep.subr.bf16.mxu0 %v12259_v40  ;;  %v14266_v41 = vadd.f32 %v9874_v52, %v8148_v20  ;;  %v15301_v40 = vld [vmem:[#allocation100_spill] sm:$0xff]  ;;  %v8164_v52 = vadd.f32 %v14095_v2, %v14102_v54 }
 0x55d   :  { %7543 = vmatmul.mubr.bf16.gmra.mrb[224].mxu0 %v15298_v22  ;;  %8589 = vmatmul.mubr.bf16.gmra.mrb[160].mxu1 %v15298_v22 }
 0x55e   :  { %7552 = vmatprep.mubr.bf16.mxu0 %v15299_v60  ;;  %8596 = vmatprep.mubr.bf16.mxu1 %v15299_v60  ;;  %v14272_v46 = vadd.f32 %v9877_v19, %v8151_v8  ;;  %v8167_v8 = vadd.f32 %v14097_v39, %v14102_v54  ;;  %v15302_v60 = vld [vmem:[#allocation99_spill] sm:$0xff] }
 0x560   :  { %v9878_v11 = vpop.f32.mrb[56].mxu1 }
 0x561   :  { %v9879_v17 = vpop.f32.mrb[57].mxu1 }
 0x562   :  { %v9880_v16 = vadd.f32 %v9879_v17, %v9878_v11  ;;  %v9881_v33 = vpop.f32.mrb[58].mxu1  ;;  %v15303_v11 = vld [vmem:[#allocation103_spill] sm:$0xff] }
 0x563   :  { %v9882_v37 = vpop.f32.mrb[59].mxu1 }
 0x564   :  { %v9883_v47 = vadd.f32 %v9882_v37, %v9881_v33  ;;  %v14278_v31 = vadd.f32 %v9880_v16, %v8156_v5 }
 0x565   :  { %7553 = vmatmul.mubr.bf16.gmra.mrb[228].mxu0 %v15300_v13  ;;  %8597 = vmatmul.mubr.bf16.gmra.mrb[164].mxu1 %v15300_v13  ;;  %v15305_v13 = vld [vmem:[#allocation105_spill] sm:$0xff] }
 0x566   :  { %7562 = vmatprep.mubr.bf16.mxu0 %v15301_v40  ;;  %8604 = vmatprep.mubr.bf16.mxu1 %v15301_v40  ;;  %v14284_v18 = vadd.f32 %v9883_v47, %v8159_v10  ;;  %v15304_v10 = vld [vmem:[#allocation102_spill] sm:$0xff] }
 0x568   :  { %v9884_v62 = vpop.f32.mrb[60].mxu1 }
 0x569   :  { %v9885_v20 = vpop.f32.mrb[61].mxu1 }
 0x56a   :  { %v9886_v58 = vadd.f32 %v9885_v20, %v9884_v62  ;;  %v9887_v24 = vpop.f32.mrb[62].mxu1 }
 0x56b   :  { %v9888_v7 = vpop.f32.mrb[63].mxu1 }
 0x56c   :  { %v9889_v19 = vadd.f32 %v9888_v7, %v9887_v24  ;;  %v14290_v22 = vadd.f32 %v9886_v58, %v8164_v52  ;;  %v15306_v7 = vld [vmem:[#allocation104_spill] sm:$0xff] }
 0x56d   :  { %7563 = vmatmul.mubr.bf16.gmra.mrb[232].mxu0 %v15302_v60  ;;  %8605 = vmatmul.mubr.bf16.gmra.mrb[168].mxu1 %v15302_v60 }
 0x56e   :  { %7572 = vmatprep.mubr.bf16.mxu0 %v15303_v11  ;;  %8612 = vmatprep.mubr.bf16.mxu1 %v15303_v11  ;;  %v14296_v17 = vadd.f32 %v9889_v19, %v8167_v8  ;;  %v15307_v8 = vld [vmem:[#allocation107_spill] sm:$0xff] }
 0x570   :  { %v9906_v2 = vpop.f32.mrb[64].mxu1 }
 0x571   :  { %v9907_v5 = vpop.f32.mrb[65].mxu1 }
 0x572   :  { %v9908_v16 = vadd.f32 %v9907_v5, %v9906_v2  ;;  %v9909_v33 = vpop.f32.mrb[66].mxu1 }
 0x573   :  { %v9910_v37 = vpop.f32.mrb[67].mxu1 }
 0x574   :  { %v14299_v39 = vadd.f32 %v9908_v16, %v14110_v61  ;;  %v9911_v54 = vadd.f32 %v9910_v37, %v9909_v33  ;;  %v15308_v33 = vld [vmem:[#allocation106_spill] sm:$0xff]  ;;  %v15309_v37 = vld [vmem:[#allocation109_spill] sm:$0xff] }
 0x575   :  { %7573 = vmatmul.mubr.bf16.gmra.mrb[236].mxu0 %v15304_v10  ;;  %8613 = vmatmul.mubr.bf16.gmra.mrb[172].mxu1 %v15304_v10 }
 0x576   :  { %v14304_v47 = vadd.f32 %v9911_v54, %v14116_v3  ;;  %7582 = vmatprep.mubr.bf16.mxu0 %v15305_v13  ;;  %8620 = vmatprep.mubr.bf16.mxu1 %v15305_v13 }
 0x578   :  { %v9912_v40 = vpop.f32.mrb[68].mxu1 }
 0x579   :  { %v9913_v62 = vpop.f32.mrb[69].mxu1 }
 0x57a   :  { %v9914_v20 = vadd.f32 %v9913_v62, %v9912_v40  ;;  %v9915_v52 = vpop.f32.mrb[70].mxu1 }
 0x57b   :  { %v9916_v58 = vpop.f32.mrb[71].mxu1 }
 0x57c   :  { %v14309_v61 = vadd.f32 %v9914_v20, %v14122_v57  ;;  %v9917_v24 = vadd.f32 %v9916_v58, %v9915_v52  ;;  %v15310_v52 = vld [vmem:[#allocation108_spill] sm:$0xff] }
 0x57d   :  { %7583 = vmatmul.mubr.bf16.gmra.mrb[240].mxu0 %v15306_v7  ;;  %8621 = vmatmul.mubr.bf16.gmra.mrb[176].mxu1 %v15306_v7 }
 0x57e   :  { %v14314_v3 = vadd.f32 %v9917_v24, %v14128_v21  ;;  %7592 = vmatprep.mubr.bf16.mxu0 %v15307_v8  ;;  %8628 = vmatprep.mubr.bf16.mxu1 %v15307_v8 }
 0x580   :  { %v9918_v19 = vpop.f32.mrb[72].mxu1 }
 0x581   :  { %v9919_v60 = vpop.f32.mrb[73].mxu1 }
 0x582   :  { %v9920_v11 = vadd.f32 %v9919_v60, %v9918_v19  ;;  %v9921_v2 = vpop.f32.mrb[74].mxu1 }
 0x583   :  { %v9922_v5 = vpop.f32.mrb[75].mxu1 }
 0x584   :  { %v14319_v57 = vadd.f32 %v9920_v11, %v14134_v0  ;;  %v9923_v16 = vadd.f32 %v9922_v5, %v9921_v2 }
 0x585   :  { %7593 = vmatmul.mubr.bf16.gmra.mrb[244].mxu0 %v15308_v33  ;;  %8629 = vmatmul.mubr.bf16.gmra.mrb[180].mxu1 %v15308_v33  ;;  %v12256_v33 = vld [vmem:[#allocation8 + $0x788] ss:$12 sps:$4 sm:$0xff]  }
 0x586   :  { %v14324_v21 = vadd.f32 %v9923_v16, %v14140_v15  ;;  %7602 = vmatprep.mubr.bf16.mxu0 %v15309_v37  ;;  %8636 = vmatprep.mubr.bf16.mxu1 %v15309_v37 }
 0x588   :  { %v9924_v54 = vpop.f32.mrb[76].mxu1 }
 0x589   :  { %v9925_v10 = vpop.f32.mrb[77].mxu1 }
 0x58a   :  { %v9926_v13 = vadd.f32 %v9925_v10, %v9924_v54  ;;  %v9927_v40 = vpop.f32.mrb[78].mxu1  ;;  %v12262_v10 = vld [vmem:[#allocation8 + $0x79c] ss:$12 sps:$4 sm:$0xff]  }
 0x58b   :  { %v9928_v62 = vpop.f32.mrb[79].mxu1 }
 0x58c   :  { %v14329_v0 = vadd.f32 %v9926_v13, %v14146_v56  ;;  %v9929_v20 = vadd.f32 %v9928_v62, %v9927_v40  ;;  %v12264_v13 = vld [vmem:[#allocation8 + $0x7a0] ss:$12 sps:$4 sm:$0xff]   ;;  %v12271_v62 = vld [vmem:[#allocation8 + $0x878] ss:$12 sps:$4 sm:$0xff]  }
 0x58d   :  { %7603 = vmatmul.mubr.bf16.gmra.mrb[248].mxu0 %v15310_v52  ;;  %8637 = vmatmul.mubr.bf16.gmra.mrb[184].mxu1 %v15310_v52  ;;  %v12267_v40 = vld [vmem:[#allocation8 + $0x7b4] ss:$12 sps:$4 sm:$0xff]  }
 0x58e   :  { %v14334_v15 = vadd.f32 %v9929_v20, %v14152_v42  ;;  %7612 = vmatprep.mubr.bf16.mxu0 %v13576_v29  ;;  %8644 = vmatprep.mubr.bf16.mxu1 %v13576_v29 }
 0x590   :  { %v9930_v58 = vpop.f32.mrb[80].mxu1 }
 0x591   :  { %v9931_v24 = vpop.f32.mrb[81].mxu1 }
 0x592   :  { %v9932_v7 = vadd.f32 %v9931_v24, %v9930_v58  ;;  %v9933_v8 = vpop.f32.mrb[82].mxu1  ;;  %v12272_v24 = vld [vmem:[#allocation8 + $0x7b8] ss:$12 sps:$4 sm:$0xff]  }
 0x593   :  { %v9934_v19 = vpop.f32.mrb[83].mxu1 }
 0x594   :  { %v14339_v56 = vadd.f32 %v9932_v7, %v14158_v53  ;;  %v9935_v60 = vadd.f32 %v9934_v19, %v9933_v8  ;;  %v12257_v53 = vld [vmem:[#allocation8 + $0x780] ss:$12 sps:$4 sm:$0xff]   ;;  %v12279_v19 = vld [vmem:[#allocation8 + $0x890] ss:$12 sps:$4 sm:$0xff]  }
 0x595   :  { %7613 = vmatmul.mubr.bf16.gmra.mrb[252].mxu0 %v13572_v9  ;;  %8645 = vmatmul.mubr.bf16.gmra.mrb[188].mxu1 %v13572_v9  ;;  %v12263_v9 = vld [vmem:[#allocation8 + $0x860] ss:$12 sps:$4 sm:$0xff]  }
 0x596   :  { %v14344_v42 = vadd.f32 %v9935_v60, %v14164_v12  ;;  %7655 = vmatprep.mubr.bf16.mxu0 %v13671_v38  ;;  %8685 = vmatprep.mubr.bf16.mxu1 %v13671_v38  ;;  %v12260_v38 = vld [vmem:[#allocation8 + $0x798] ss:$12 sps:$4 sm:$0xff]   ;;  %v15311_v60 = vld [vmem:[#allocation39_spill] sm:$0xff] }
 0x597   :  { %v12270_v8 = vld [vmem:[#allocation8 + $0x7cc] ss:$12 sps:$4 sm:$0xff]  }
 0x598   :  { %v9936_v29 = vpop.f32.mrb[84].mxu1 }
 0x599   :  { %v9937_v11 = vpop.f32.mrb[85].mxu1 }
 0x59a   :  { %v9938_v2 = vadd.f32 %v9937_v11, %v9936_v29  ;;  %v9939_v5 = vpop.f32.mrb[86].mxu1  ;;  %v15312_v11 = vld [vmem:[#allocation45_spill] sm:$0xff] }
 0x59b   :  { %v9940_v16 = vpop.f32.mrb[87].mxu1 }
 0x59c   :  { %v14349_v37 = vadd.f32 %v9938_v2, %v14170_v32  ;;  %v9941_v54 = vadd.f32 %v9940_v16, %v9939_v5  ;;  %v12268_v2 = vld [vmem:[#allocation8 + $0x7c8] ss:$12 sps:$4 sm:$0xff]   ;;  %v12275_v16 = vld [vmem:[#allocation8 + $0x7e4] ss:$12 sps:$4 sm:$0xff]  }
 0x59d   :  { %7656 = vmatmul.mubr.bf16.vlgmr.msra.gmra.mrb[192].mxu0 %v13667_v23  ;;  %8686 = vmatmul.mubr.bf16.vlgmr.msra.gmra.mrb[192].mxu1 %v13667_v23 }
 0x59e   :  { %v14354_v12 = vadd.f32 %v9941_v54, %v14176_v30  ;;  %7665 = vmatprep.mubr.bf16.mxu0 %v13691_v27  ;;  %8693 = vmatprep.mubr.bf16.mxu1 %v13691_v27  ;;  %v12265_v30 = vld [vmem:[#allocation8 + $0x7b0] ss:$12 sps:$4 sm:$0xff]  }
 0x59f   :  { %10227 = vmatpush3.bf16.msra.mxu1 %v12256_v33  ;;  %7817 = vmatpush1.bf16.msra.mxu0 %v12257_v53  ;;  %v12287_v33 = vld [vmem:[#allocation8 + $0x8a8] ss:$12 sps:$4 sm:$0xff]  }
 0x5a0   :  { %v9942_v32 = vpop.f32.mrb[88].mxu1  ;;  %7818 = vmatprep.subr.bf16.mxu0 %v12262_v10  ;;  %10228 = vmatprep.subr.bf16.mxu1 %v12263_v9 }
 0x5a1   :  { %v9943_v20 = vpop.f32.mrb[89].mxu1 }
 0x5a2   :  { %v9944_v52 = vadd.f32 %v9943_v20, %v9942_v32  ;;  %v9945_v58 = vpop.f32.mrb[90].mxu1  ;;  %v15313_v20 = vld [vmem:[#allocation41_spill] sm:$0xff] }
 0x5a3   :  { %v9946_v23 = vpop.f32.mrb[91].mxu1  ;;  %7819 = vmatpush1.bf16.msra.mxu0 %v12260_v38  ;;  %10229 = vmatpush3.bf16.msra.mxu1 %v12264_v13  ;;  %v12288_v38 = vld [vmem:[#allocation8 + $0x7e8] ss:$12 sps:$4 sm:$0xff]  }
 0x5a4   :  { %v14359_v7 = vadd.f32 %v9944_v52, %v14182_v4  ;;  %v9947_v27 = vadd.f32 %v9946_v23, %v9945_v58  ;;  %7820 = vmatprep.subr.bf16.mxu0 %v12267_v40  ;;  %10230 = vmatprep.subr.bf16.mxu1 %v12271_v62  ;;  %v12280_v4 = vld [vmem:[#allocation8 + $0x7d0] ss:$12 sps:$4 sm:$0xff]   ;;  %v12295_v62 = vld [vmem:[#allocation8 + $0x8c0] ss:$12 sps:$4 sm:$0xff]   ;;  %v12276_v23 = vld [vmem:[#allocation8 + $0x7f8] ss:$12 sps:$4 sm:$0xff]  }
 0x5a5   :  { %7666 = vmatmul.mubr.bf16.gmra.mrb[196].mxu0 %v15311_v60  ;;  %8694 = vmatmul.mubr.bf16.gmra.mrb[196].mxu1 %v15311_v60  ;;  %v12278_v40 = vld [vmem:[#allocation8 + $0x7fc] ss:$12 sps:$4 sm:$0xff]   ;;  %v15314_v58 = vld [vmem:[#allocation53_spill] sm:$0xff] }
 0x5a6   :  { %v14364_v29 = vadd.f32 %v9947_v27, %v14188_v6  ;;  %7675 = vmatprep.mubr.bf16.mxu0 %v15312_v11  ;;  %8701 = vmatprep.mubr.bf16.mxu1 %v15312_v11  ;;  %v12273_v6 = vld [vmem:[#allocation8 + $0x7e0] ss:$12 sps:$4 sm:$0xff]   ;;  %v12303_v27 = vld [vmem:[#allocation8 + $0x8d8] ss:$12 sps:$4 sm:$0xff]  }
 0x5a7   :  { %7821 = vmatpush1.bf16.msra.mxu0 %v12265_v30  ;;  %10231 = vmatpush3.bf16.msra.mxu1 %v12272_v24  ;;  %v12283_v24 = vld [vmem:[#allocation8 + $0x814] ss:$12 sps:$4 sm:$0xff]  }
 0x5a8   :  { %v9948_v5 = vpop.f32.mrb[92].mxu1  ;;  %7822 = vmatprep.subr.bf16.mxu0 %v12270_v8  ;;  %10232 = vmatprep.subr.bf16.mxu1 %v12279_v19 }
 0x5a9   :  { %v9949_v53 = vpop.f32.mrb[93].mxu1 }
 0x5aa   :  { %v9950_v54 = vadd.f32 %v9949_v53, %v9948_v5  ;;  %v9951_v10 = vpop.f32.mrb[94].mxu1  ;;  %v15315_v53 = vld [vmem:[#allocation49_spill] sm:$0xff] }
 0x5ab   :  { %v9952_v9 = vpop.f32.mrb[95].mxu1  ;;  %7823 = vmatpush1.bf16.msra.mxu0 %v12268_v2  ;;  %10233 = vmatpush3.bf16.msra.mxu1 %v12280_v4  ;;  %v12304_v2 = vld [vmem:[#allocation8 + $0x818] ss:$12 sps:$4 sm:$0xff]  }
 0x5ac   :  { %v14369_v13 = vadd.f32 %v9950_v54, %v14194_v59  ;;  %v9953_v32 = vadd.f32 %v9952_v9, %v9951_v10  ;;  %7824 = vmatprep.subr.bf16.mxu0 %v12275_v16  ;;  %10234 = vmatprep.subr.bf16.mxu1 %v12287_v33  ;;  %v12296_v59 = vld [vmem:[#allocation8 + $0x800] ss:$12 sps:$4 sm:$0xff]   ;;  %v12311_v33 = vld [vmem:[#allocation8 + $0x8f0] ss:$12 sps:$4 sm:$0xff]   ;;  %v12284_v9 = vld [vmem:[#allocation8 + $0x828] ss:$12 sps:$4 sm:$0xff]  }
 0x5ad   :  { %7676 = vmatmul.mubr.bf16.gmra.mrb[200].mxu0 %v15313_v20  ;;  %8702 = vmatmul.mubr.bf16.gmra.mrb[200].mxu1 %v15313_v20  ;;  %v12286_v16 = vld [vmem:[#allocation8 + $0x82c] ss:$12 sps:$4 sm:$0xff]  }
 0x5ae   :  { %v14374_v52 = vadd.f32 %v9953_v32, %v14200_v35  ;;  %7685 = vmatprep.mubr.bf16.mxu0 %v15314_v58  ;;  %8709 = vmatprep.mubr.bf16.mxu1 %v15314_v58  ;;  %v12281_v35 = vld [vmem:[#allocation8 + $0x810] ss:$12 sps:$4 sm:$0xff]   ;;  %v12289_v58 = vld [vmem:[#allocation8 + $0x840] ss:$12 sps:$4 sm:$0xff]  }
 0x5af   :  { %7825 = vmatpush1.bf16.msra.mxu0 %v12273_v6  ;;  %10235 = vmatpush3.bf16.msra.mxu1 %v12288_v38  ;;  %v15316_v10 = vld [vmem:[#allocation61_spill] sm:$0xff] }
 0x5b0   :  { %v9954_v30 = vpop.f32.mrb[96].mxu1  ;;  %7826 = vmatprep.subr.bf16.mxu0 %v12278_v40  ;;  %10236 = vmatprep.subr.bf16.mxu1 %v12295_v62  ;;  %v12291_v38 = vld [vmem:[#allocation8 + $0x844] ss:$12 sps:$4 sm:$0xff]  }
 0x5b1   :  { %v9955_v8 = vpop.f32.mrb[97].mxu1 }
 0x5b2   :  { %v9956_v19 = vadd.f32 %v9955_v8, %v9954_v30  ;;  %v9957_v60 = vpop.f32.mrb[98].mxu1  ;;  %v15317_v30 = vld [vmem:[#allocation57_spill] sm:$0xff]  ;;  %v12292_v8 = vld [vmem:[#allocation8 + $0x858] ss:$12 sps:$4 sm:$0xff]  }
 0x5b3   :  { %v9958_v11 = vpop.f32.mrb[99].mxu1  ;;  %7827 = vmatpush1.bf16.msra.mxu0 %v12276_v23  ;;  %10237 = vmatpush3.bf16.msra.mxu1 %v12296_v59  ;;  %v12294_v59 = vld [vmem:[#allocation8 + $0x85c] ss:$12 sps:$4 sm:$0xff]  }
 0x5b4   :  { %v14379_v4 = vadd.f32 %v9956_v19, %v14206_v43  ;;  %v9959_v5 = vadd.f32 %v9958_v11, %v9957_v60  ;;  %7828 = vmatprep.subr.bf16.mxu0 %v12283_v24  ;;  %10238 = vmatprep.subr.bf16.mxu1 %v12303_v27  ;;  %v12312_v43 = vld [vmem:[#allocation8 + $0x830] ss:$12 sps:$4 sm:$0xff]  }
 0x5b5   :  { %7686 = vmatmul.mubr.bf16.gmra.mrb[204].mxu0 %v15315_v53  ;;  %8710 = vmatmul.mubr.bf16.gmra.mrb[204].mxu1 %v15315_v53  ;;  %v15318_v27 = vld [vmem:[#allocation69_spill] sm:$0xff] }
 0x5b6   :  { %v14384_v54 = vadd.f32 %v9959_v5, %v14212_v28  ;;  %7695 = vmatprep.mubr.bf16.mxu0 %v15316_v10  ;;  %8717 = vmatprep.mubr.bf16.mxu1 %v15316_v10  ;;  %v12297_v5 = vld [vmem:[#allocation8 + $0x870] ss:$12 sps:$4 sm:$0xff]  }
 0x5b7   :  { %7829 = vmatpush1.bf16.msra.mxu0 %v12281_v35  ;;  %10239 = vmatpush3.bf16.msra.mxu1 %v12304_v2  ;;  %v15319_v53 = vld [vmem:[#allocation65_spill] sm:$0xff] }
 0x5b8   :  { %v9960_v6 = vpop.f32.mrb[100].mxu1  ;;  %7830 = vmatprep.subr.bf16.mxu0 %v12286_v16  ;;  %10240 = vmatprep.subr.bf16.mxu1 %v12311_v33  ;;  %v12302_v33 = vld [vmem:[#allocation8 + $0x88c] ss:$12 sps:$4 sm:$0xff]  }
 0x5b9   :  { %v9961_v32 = vpop.f32.mrb[101].mxu1 }
 0x5ba   :  { %v9962_v40 = vadd.f32 %v9961_v32, %v9960_v6  ;;  %v9963_v62 = vpop.f32.mrb[102].mxu1 }
 0x5bb   :  { %v9964_v20 = vpop.f32.mrb[103].mxu1  ;;  %7831 = vmatpush1.bf16.msra.mxu0 %v12284_v9  ;;  %10241 = vmatpush3.bf16.msra.mxu1 %v12312_v43  ;;  %v15320_v9 = vld [vmem:[#allocation79_spill] sm:$0xff]  ;;  %v12300_v43 = vld [vmem:[#allocation8 + $0x888] ss:$12 sps:$4 sm:$0xff]  }
 0x5bc   :  { %v14389_v28 = vadd.f32 %v9962_v40, %v14218_v36  ;;  %v9965_v23 = vadd.f32 %v9964_v20, %v9963_v62  ;;  %7832 = vmatprep.subr.bf16.mxu0 %v12291_v38  ;;  %v12299_v36 = vld [vmem:[#allocation8 + $0x874] ss:$12 sps:$4 sm:$0xff]  }
 0x5bd   :  { %7696 = vmatmul.mubr.bf16.gmra.mrb[208].mxu0 %v15317_v30  ;;  %8718 = vmatmul.mubr.bf16.gmra.mrb[208].mxu1 %v15317_v30  ;;  %v12305_v20 = vld [vmem:[#allocation8 + $0x8a0] ss:$12 sps:$4 sm:$0xff]  }
 0x5be   :  { %v14394_v24 = vadd.f32 %v9965_v23, %v14224_v63  ;;  %7705 = vmatprep.mubr.bf16.mxu0 %v15318_v27  ;;  %8725 = vmatprep.mubr.bf16.mxu1 %v15318_v27  ;;  %v12310_v23 = vld [vmem:[#allocation8 + $0x8bc] ss:$12 sps:$4 sm:$0xff]   ;;  %v15322_v27 = vld [vmem:[#allocation34_spill] sm:$0xff] }
 0x5bf   :  { %7833 = vmatpush1.bf16.msra.mxu0 %v12289_v58 }
 0x5c0   :  { %v9966_v19 = vpop.f32.mrb[104].mxu1  ;;  %7834 = vmatprep.subr.bf16.mxu0 %v12294_v59  ;;  %v15321_v59 = vld [vmem:[#allocation73_spill] sm:$0xff] }
 0x5c1   :  { %v9967_v60 = vpop.f32.mrb[105].mxu1 }
 0x5c2   :  { %v9968_v11 = vadd.f32 %v9967_v60, %v9966_v19  ;;  %v9969_v35 = vpop.f32.mrb[106].mxu1 }
 0x5c3   :  { %v9970_v2 = vpop.f32.mrb[107].mxu1  ;;  %7835 = vmatpush1.bf16.msra.mxu0 %v12292_v8  ;;  %v12308_v8 = vld [vmem:[#allocation8 + $0x8b8] ss:$12 sps:$4 sm:$0xff]  }
 0x5c4   :  { %v14399_v16 = vadd.f32 %v9968_v11, %v14230_v25  ;;  %v9971_v63 = vadd.f32 %v9970_v2, %v9969_v35  ;;  %7836 = vmatprep.subr.bf16.mxu0 %v12299_v36  ;;  %v12307_v25 = vld [vmem:[#allocation8 + $0x8a4] ss:$12 sps:$4 sm:$0xff]  }
 0x5c5   :  { %7706 = vmatmul.mubr.bf16.gmra.mrb[212].mxu0 %v15319_v53  ;;  %8726 = vmatmul.mubr.bf16.gmra.mrb[212].mxu1 %v15319_v53  ;;  %v12313_v2 = vld [vmem:[#allocation8 + $0x8d0] ss:$12 sps:$4 sm:$0xff]  }
 0x5c6   :  { %v14404_v10 = vadd.f32 %v9971_v63, %v14236_v34  ;;  %7715 = vmatprep.mubr.bf16.mxu0 %v15320_v9  ;;  %8733 = vmatprep.mubr.bf16.mxu1 %v15320_v9  ;;  %v12318_v63 = vld [vmem:[#allocation8 + $0x8ec] ss:$12 sps:$4 sm:$0xff]   ;;  %v12316_v9 = vld [vmem:[#allocation8 + $0x8e8] ss:$12 sps:$4 sm:$0xff]  }
 0x5c7   :  { %7837 = vmatpush1.bf16.msra.mxu0 %v12297_v5 }
 0x5c8   :  { %v9972_v6 = vpop.f32.mrb[108].mxu1  ;;  %7838 = vmatprep.subr.bf16.mxu0 %v12302_v33  ;;  %v15323_v33 = vld [vmem:[#allocation85_spill] sm:$0xff] }
 0x5c9   :  { %v9973_v38 = vpop.f32.mrb[109].mxu1 }
 0x5ca   :  { %v9974_v32 = vadd.f32 %v9973_v38, %v9972_v6  ;;  %v9975_v40 = vpop.f32.mrb[110].mxu1 }
 0x5cb   :  { %v9976_v62 = vpop.f32.mrb[111].mxu1  ;;  %7839 = vmatpush1.bf16.msra.mxu0 %v12300_v43 }
 0x5cc   :  { %v14409_v58 = vadd.f32 %v9974_v32, %v14242_v55  ;;  %v9977_v34 = vadd.f32 %v9976_v62, %v9975_v40  ;;  %7840 = vmatprep.subr.bf16.mxu0 %v12307_v25  ;;  %v12315_v55 = vld [vmem:[#allocation8 + $0x8d4] ss:$12 sps:$4 sm:$0xff]  }
 0x5cd   :  { %7716 = vmatmul.mubr.bf16.gmra.mrb[216].mxu0 %v15321_v59  ;;  %8734 = vmatmul.mubr.bf16.gmra.mrb[216].mxu1 %v15321_v59 }
 0x5ce   :  { %v14414_v30 = vadd.f32 %v9977_v34, %v14248_v48  ;;  %7725 = vmatprep.mubr.bf16.mxu0 %v15322_v27  ;;  %8741 = vmatprep.mubr.bf16.mxu1 %v15322_v27  ;;  %v15324_v27 = vld [vmem:[#allocation42_spill] sm:$0xff] }
 0x5cf   :  { %7841 = vmatpush1.bf16.msra.mxu0 %v12305_v20 }
 0x5d0   :  { %v9978_v19 = vpop.f32.mrb[112].mxu1  ;;  %7842 = vmatprep.subr.bf16.mxu0 %v12310_v23 }
 0x5d1   :  { %v9979_v36 = vpop.f32.mrb[113].mxu1 }
 0x5d2   :  { %v9980_v60 = vadd.f32 %v9979_v36, %v9978_v19  ;;  %v9981_v11 = vpop.f32.mrb[114].mxu1 }
 0x5d3   :  { %v9982_v35 = vpop.f32.mrb[115].mxu1  ;;  %7843 = vmatpush1.bf16.msra.mxu0 %v12308_v8 }
 0x5d4   :  { %v14419_v5 = vadd.f32 %v9980_v60, %v14254_v44  ;;  %v9983_v48 = vadd.f32 %v9982_v35, %v9981_v11  ;;  %7844 = vmatprep.subr.bf16.mxu0 %v12315_v55  ;;  %v15326_v11 = vld [vmem:[#allocation52_spill] sm:$0xff] }
 0x5d5   :  { %7726 = vmatmul.mubr.bf16.gmra.mrb[220].mxu0 %v15323_v33  ;;  %8742 = vmatmul.mubr.bf16.gmra.mrb[220].mxu1 %v15323_v33  ;;  %v15327_v35 = vld [vmem:[#allocation64_spill] sm:$0xff] }
 0x5d6   :  { %v14424_v53 = vadd.f32 %v9983_v48, %v14260_v51  ;;  %7735 = vmatprep.mubr.bf16.mxu0 %v13831_v14  ;;  %8749 = vmatprep.mubr.bf16.mxu1 %v13831_v14 }
 0x5d7   :  { %7845 = vmatpush1.bf16.msra.mxu0 %v12313_v2 }
 0x5d8   :  { %v9984_v43 = vpop.f32.mrb[116].mxu1  ;;  %7846 = vmatprep.subr.bf16.mxu0 %v12318_v63 }
 0x5d9   :  { %v9985_v44 = vpop.f32.mrb[117].mxu1 }
 0x5da   :  { %v9986_v6 = vadd.f32 %v9985_v44, %v9984_v43  ;;  %v9987_v25 = vpop.f32.mrb[118].mxu1  ;;  %v15328_v44 = vld [vmem:[#allocation60_spill] sm:$0xff] }
 0x5db   :  { %v9988_v38 = vpop.f32.mrb[119].mxu1  ;;  %7847 = vmatpush1.bf16.msra.mxu0 %v12316_v9 }
 0x5dc   :  { %v14429_v32 = vadd.f32 %v9986_v6, %v14266_v41  ;;  %v9989_v40 = vadd.f32 %v9988_v38, %v9987_v25 }
 0x5dd   :  { %7736 = vmatmul.mubr.bf16.gmra.mrb[224].mxu0 %v13827_v1  ;;  %8750 = vmatmul.mubr.bf16.gmra.mrb[224].mxu1 %v13827_v1 }
 0x5de   :  { %v14434_v51 = vadd.f32 %v9989_v40, %v14272_v46  ;;  %7745 = vmatprep.mubr.bf16.mxu0 %v13851_v45  ;;  %8757 = vmatprep.mubr.bf16.mxu1 %v13851_v45  ;;  %v15325_v46 = vld [vmem:[#allocation56_spill] sm:$0xff] }
 0x5e0   :  { %v9990_v14 = vpop.f32.mrb[120].mxu1 }
 0x5e1   :  { %v9991_v62 = vpop.f32.mrb[121].mxu1 }
 0x5e2   :  { %v9992_v20 = vadd.f32 %v9991_v62, %v9990_v14  ;;  %v9993_v34 = vpop.f32.mrb[122].mxu1 }
 0x5e3   :  { %v9994_v23 = vpop.f32.mrb[123].mxu1 }
 0x5e4   :  { %v14439_v41 = vadd.f32 %v9992_v20, %v14278_v31  ;;  %v9995_v59 = vadd.f32 %v9994_v23, %v9993_v34  ;;  %v15329_v20 = vld [vmem:[#allocation62_spill] sm:$0xff] }
 0x5e5   :  { %7746 = vmatmul.mubr.bf16.gmra.mrb[228].mxu0 %v15324_v27  ;;  %8758 = vmatmul.mubr.bf16.gmra.mrb[228].mxu1 %v15324_v27 }
 0x5e6   :  { %v14444_v1 = vadd.f32 %v9995_v59, %v14284_v18  ;;  %7755 = vmatprep.mubr.bf16.mxu0 %v15325_v46  ;;  %8765 = vmatprep.mubr.bf16.mxu1 %v15325_v46 }
 0x5e8   :  { %v9996_v45 = vpop.f32.mrb[124].mxu1 }
 0x5e9   :  { %v9997_v8 = vpop.f32.mrb[125].mxu1 }
 0x5ea   :  { %v9998_v19 = vadd.f32 %v9997_v8, %v9996_v45  ;;  %v9999_v55 = vpop.f32.mrb[126].mxu1  ;;  %v15330_v45 = vld [vmem:[#allocation66_spill] sm:$0xff] }
 0x5eb   :  { %v10000_v36 = vpop.f32.mrb[127].mxu1 }
 0x5ec   :  { %v14449_v31 = vadd.f32 %v9998_v19, %v14290_v22  ;;  %v10001_v60 = vadd.f32 %v10000_v36, %v9999_v55 }
 0x5ed   :  { %7756 = vmatmul.mubr.bf16.gmra.mrb[232].mxu0 %v15326_v11  ;;  %8766 = vmatmul.mubr.bf16.gmra.mrb[232].mxu1 %v15326_v11  ;;  %v15331_v11 = vld [vmem:[#allocation70_spill] sm:$0xff] }
 0x5ee   :  { %v14454_v18 = vadd.f32 %v10001_v60, %v14296_v17  ;;  %7765 = vmatprep.mubr.bf16.mxu0 %v15327_v35  ;;  %8773 = vmatprep.mubr.bf16.mxu1 %v15327_v35  ;;  %v15332_v35 = vld [vmem:[#allocation114_spill] sm:$0xff] }
 0x5f0   :  { %v10018_v2 = vpop.f32.mrb[128].mxu1 }
 0x5f1   :  { %v10019_v48 = vpop.f32.mrb[129].mxu1 }
 0x5f2   :  { %v10020_v63 = vadd.f32 %v10019_v48, %v10018_v2  ;;  %v10021_v33 = vpop.f32.mrb[130].mxu1 }
 0x5f3   :  { %v10022_v9 = vpop.f32.mrb[131].mxu1 }
 0x5f4   :  { %v14459_v22 = vadd.f32 %v10020_v63, %v14299_v39  ;;  %v10023_v43 = vadd.f32 %v10022_v9, %v10021_v33 }
 0x5f5   :  { %7766 = vmatmul.mubr.bf16.gmra.mrb[236].mxu0 %v15328_v44  ;;  %8774 = vmatmul.mubr.bf16.gmra.mrb[236].mxu1 %v15328_v44  ;;  %v15334_v44 = vld [vmem:[#allocation33_spill] sm:$0xff] }
 0x5f6   :  { %v14464_v17 = vadd.f32 %v10023_v43, %v14304_v47  ;;  %7775 = vmatprep.mubr.bf16.mxu0 %v13911_v50  ;;  %8781 = vmatprep.mubr.bf16.mxu1 %v13911_v50  ;;  %v15333_v43 = vld [vmem:[#allocation74_spill] sm:$0xff] }
 0x5f8   :  { %v10024_v6 = vpop.f32.mrb[132].mxu1 }
 0x5f9   :  { %v10025_v25 = vpop.f32.mrb[133].mxu1 }
 0x5fa   :  { %v10026_v38 = vadd.f32 %v10025_v25, %v10024_v6  ;;  %v10027_v40 = vpop.f32.mrb[134].mxu1 }
 0x5fb   :  { %v10028_v14 = vpop.f32.mrb[135].mxu1 }
 0x5fc   :  { %v14469_v39 = vadd.f32 %v10026_v38, %v14309_v61  ;;  %v10029_v62 = vadd.f32 %v10028_v14, %v10027_v40 }
 0x5fd   :  { %7776 = vmatmul.mubr.bf16.gmra.mrb[240].mxu0 %v15329_v20  ;;  %8782 = vmatmul.mubr.bf16.gmra.mrb[240].mxu1 %v15329_v20  ;;  %v15335_v20 = vld [vmem:[#allocation35_spill] sm:$0xff] }
 0x5fe   :  { %v14474_v47 = vadd.f32 %v10029_v62, %v14314_v3  ;;  %7785 = vmatprep.mubr.bf16.mxu0 %v13931_v26  ;;  %8789 = vmatprep.mubr.bf16.mxu1 %v13931_v26 }
 0x600   :  { %v10030_v50 = vpop.f32.mrb[136].mxu1 }
 0x601   :  { %v10031_v34 = vpop.f32.mrb[137].mxu1 }
 0x602   :  { %v10032_v23 = vadd.f32 %v10031_v34, %v10030_v50  ;;  %v10033_v59 = vpop.f32.mrb[138].mxu1  ;;  %v15336_v50 = vld [vmem:[#allocation43_spill] sm:$0xff] }
 0x603   :  { %v10034_v27 = vpop.f32.mrb[139].mxu1 }
 0x604   :  { %v14479_v61 = vadd.f32 %v10032_v23, %v14319_v57  ;;  %v10035_v46 = vadd.f32 %v10034_v27, %v10033_v59 }
 0x605   :  { %7786 = vmatmul.mubr.bf16.gmra.mrb[244].mxu0 %v15330_v45  ;;  %8790 = vmatmul.mubr.bf16.gmra.mrb[244].mxu1 %v15330_v45 }
 0x606   :  { %v14484_v3 = vadd.f32 %v10035_v46, %v14324_v21  ;;  %7795 = vmatprep.mubr.bf16.mxu0 %v13951_v49  ;;  %8797 = vmatprep.mubr.bf16.mxu1 %v13951_v49 }
 0x608   :  { %v10036_v26 = vpop.f32.mrb[140].mxu1 }
 0x609   :  { %v10037_v8 = vpop.f32.mrb[141].mxu1 }
 0x60a   :  { %v10038_v19 = vadd.f32 %v10037_v8, %v10036_v26  ;;  %v10039_v55 = vpop.f32.mrb[142].mxu1  ;;  %v15337_v26 = vld [vmem:[#allocation37_spill] sm:$0xff]  ;;  %v15338_v8 = vld [vmem:[#allocation51_spill] sm:$0xff] }
 0x60b   :  { %v10040_v36 = vpop.f32.mrb[143].mxu1 }
 0x60c   :  { %v14489_v57 = vadd.f32 %v10038_v19, %v14329_v0  ;;  %v10041_v60 = vadd.f32 %v10040_v36, %v10039_v55 }
 0x60d   :  { %7796 = vmatmul.mubr.bf16.gmra.mrb[248].mxu0 %v15331_v11  ;;  %8798 = vmatmul.mubr.bf16.gmra.mrb[248].mxu1 %v15331_v11 }
 0x60e   :  { %v14494_v21 = vadd.f32 %v10041_v60, %v14334_v15  ;;  %7805 = vmatprep.mubr.bf16.mxu0 %v15332_v35  ;;  %8805 = vmatprep.mubr.bf16.mxu1 %v15332_v35 }
 0x610   :  { %v10042_v49 = vpop.f32.mrb[144].mxu1 }
 0x611   :  { %v10043_v2 = vpop.f32.mrb[145].mxu1 }
 0x612   :  { %v10044_v48 = vadd.f32 %v10043_v2, %v10042_v49  ;;  %v10045_v63 = vpop.f32.mrb[146].mxu1  ;;  %v15339_v49 = vld [vmem:[#allocation47_spill] sm:$0xff] }
 0x613   :  { %v10046_v33 = vpop.f32.mrb[147].mxu1  ;;  %v15340_v2 = vld [vmem:[#allocation59_spill] sm:$0xff] }
 0x614   :  { %v14499_v0 = vadd.f32 %v10044_v48, %v14339_v56  ;;  %v10047_v9 = vadd.f32 %v10046_v33, %v10045_v63 }
 0x615   :  { %7806 = vmatmul.mubr.bf16.gmra.mrb[252].mxu0 %v15333_v43  ;;  %8806 = vmatmul.mubr.bf16.gmra.mrb[252].mxu1 %v15333_v43 }
 0x616   :  { %v14504_v15 = vadd.f32 %v10047_v9, %v14344_v42  ;;  %7848 = vmatprep.mubr.bf16.mxu0 %v15334_v44  ;;  %8846 = vmatprep.mubr.bf16.mxu1 %v15334_v44 }
 0x618   :  { %v10048_v6 = vpop.f32.mrb[148].mxu1 }
 0x619   :  { %v10049_v25 = vpop.f32.mrb[149].mxu1 }
 0x61a   :  { %v10050_v38 = vadd.f32 %v10049_v25, %v10048_v6  ;;  %v10051_v40 = vpop.f32.mrb[150].mxu1  ;;  %v15341_v6 = vld [vmem:[#allocation55_spill] sm:$0xff] }
 0x61b   :  { %v10052_v14 = vpop.f32.mrb[151].mxu1  ;;  %v15342_v25 = vld [vmem:[#allocation67_spill] sm:$0xff] }
 0x61c   :  { %v14509_v56 = vadd.f32 %v10050_v38, %v14349_v37  ;;  %v10053_v62 = vadd.f32 %v10052_v14, %v10051_v40 }
 0x61d   :  { %7849 = vmatmul.mubr.bf16.vlgmr.msra.gmra.mrb[192].mxu0 %v15335_v20  ;;  %8847 = vmatmul.mubr.bf16.vlgmr.msra.gmra.mrb[0].mxu1 %v15335_v20 }
 0x61e   :  { %v14514_v42 = vadd.f32 %v10053_v62, %v14354_v12  ;;  %7858 = vmatprep.mubr.bf16.mxu0 %v15336_v50  ;;  %8854 = vmatprep.mubr.bf16.mxu1 %v15336_v50 }
 0x620   :  { %v10054_v34 = vpop.f32.mrb[152].mxu1 }
 0x621   :  { %v10055_v23 = vpop.f32.mrb[153].mxu1 }
 0x622   :  { %v10056_v59 = vadd.f32 %v10055_v23, %v10054_v34  ;;  %v10057_v27 = vpop.f32.mrb[154].mxu1  ;;  %v15343_v34 = vld [vmem:[#allocation63_spill] sm:$0xff] }
 0x623   :  { %v10058_v46 = vpop.f32.mrb[155].mxu1  ;;  %v15344_v23 = vld [vmem:[#allocation75_spill] sm:$0xff] }
 0x624   :  { %v14519_v37 = vadd.f32 %v10056_v59, %v14359_v7  ;;  %v10059_v45 = vadd.f32 %v10058_v46, %v10057_v27 }
 0x625   :  { %7859 = vmatmul.mubr.bf16.gmra.mrb[196].mxu0 %v15337_v26  ;;  %8855 = vmatmul.mubr.bf16.gmra.mrb[4].mxu1 %v15337_v26 }
 0x626   :  { %v14524_v12 = vadd.f32 %v10059_v45, %v14364_v29  ;;  %7868 = vmatprep.mubr.bf16.mxu0 %v15338_v8  ;;  %8862 = vmatprep.mubr.bf16.mxu1 %v15338_v8 }
 0x628   :  { %v10060_v19 = vpop.f32.mrb[156].mxu1 }
 0x629   :  { %v10061_v55 = vpop.f32.mrb[157].mxu1 }
 0x62a   :  { %v10062_v36 = vadd.f32 %v10061_v55, %v10060_v19  ;;  %v10063_v60 = vpop.f32.mrb[158].mxu1  ;;  %v15345_v19 = vld [vmem:[#allocation71_spill] sm:$0xff]  ;;  %v15346_v55 = vld [vmem:[#allocation77_spill] sm:$0xff] }
 0x62b   :  { %v10064_v11 = vpop.f32.mrb[159].mxu1 }
 0x62c   :  { %v14529_v7 = vadd.f32 %v10062_v36, %v14369_v13  ;;  %v10065_v35 = vadd.f32 %v10064_v11, %v10063_v60 }
 0x62d   :  { %7869 = vmatmul.mubr.bf16.gmra.mrb[200].mxu0 %v15339_v49  ;;  %8863 = vmatmul.mubr.bf16.gmra.mrb[8].mxu1 %v15339_v49 }
 0x62e   :  { %v14534_v29 = vadd.f32 %v10065_v35, %v14374_v52  ;;  %7878 = vmatprep.mubr.bf16.mxu0 %v15340_v2  ;;  %8870 = vmatprep.mubr.bf16.mxu1 %v15340_v2 }
 0x630   :  { %v10066_v48 = vpop.f32.mrb[160].mxu1 }
 0x631   :  { %v10067_v63 = vpop.f32.mrb[161].mxu1 }
 0x632   :  { %v10068_v33 = vadd.f32 %v10067_v63, %v10066_v48  ;;  %v10069_v9 = vpop.f32.mrb[162].mxu1  ;;  %v15347_v48 = vld [vmem:[#allocation31_spill] sm:$0xff]  ;;  %v15348_v63 = vld [vmem:[#allocation40_spill] sm:$0xff] }
 0x633   :  { %v10070_v43 = vpop.f32.mrb[163].mxu1 }
 0x634   :  { %v14539_v13 = vadd.f32 %v10068_v33, %v14379_v4  ;;  %v10071_v44 = vadd.f32 %v10070_v43, %v10069_v9 }
 0x635   :  { %7879 = vmatmul.mubr.bf16.gmra.mrb[204].mxu0 %v15341_v6  ;;  %8871 = vmatmul.mubr.bf16.gmra.mrb[12].mxu1 %v15341_v6 }
 0x636   :  { %v14544_v52 = vadd.f32 %v10071_v44, %v14384_v54  ;;  %7888 = vmatprep.mubr.bf16.mxu0 %v15342_v25  ;;  %8878 = vmatprep.mubr.bf16.mxu1 %v15342_v25 }
 0x638   :  { %v10072_v38 = vpop.f32.mrb[164].mxu1 }
 0x639   :  { %v10073_v40 = vpop.f32.mrb[165].mxu1 }
 0x63a   :  { %v10074_v14 = vadd.f32 %v10073_v40, %v10072_v38  ;;  %v10075_v62 = vpop.f32.mrb[166].mxu1  ;;  %v15349_v38 = vld [vmem:[#allocation36_spill] sm:$0xff] }
 0x63b   :  { %v10076_v20 = vpop.f32.mrb[167].mxu1  ;;  %v15350_v40 = vld [vmem:[#allocation44_spill] sm:$0xff] }
 0x63c   :  { %v14549_v4 = vadd.f32 %v10074_v14, %v14389_v28  ;;  %v10077_v50 = vadd.f32 %v10076_v20, %v10075_v62 }
 0x63d   :  { %7889 = vmatmul.mubr.bf16.gmra.mrb[208].mxu0 %v15343_v34  ;;  %8879 = vmatmul.mubr.bf16.gmra.mrb[16].mxu1 %v15343_v34 }
 0x63e   :  { %v14554_v54 = vadd.f32 %v10077_v50, %v14394_v24  ;;  %7898 = vmatprep.mubr.bf16.mxu0 %v15344_v23  ;;  %8886 = vmatprep.mubr.bf16.mxu1 %v15344_v23 }
 0x640   :  { %v10078_v59 = vpop.f32.mrb[168].mxu1 }
 0x641   :  { %v10079_v27 = vpop.f32.mrb[169].mxu1 }
 0x642   :  { %v10080_v46 = vadd.f32 %v10079_v27, %v10078_v59  ;;  %v10081_v45 = vpop.f32.mrb[170].mxu1  ;;  %v15351_v59 = vld [vmem:[#allocation38_spill] sm:$0xff] }
 0x643   :  { %v10082_v26 = vpop.f32.mrb[171].mxu1  ;;  %v15352_v27 = vld [vmem:[#allocation46_spill] sm:$0xff] }
 0x644   :  { %v14559_v28 = vadd.f32 %v10080_v46, %v14399_v16  ;;  %v10083_v8 = vadd.f32 %v10082_v26, %v10081_v45 }
 0x645   :  { %7899 = vmatmul.mubr.bf16.gmra.mrb[212].mxu0 %v15345_v19  ;;  %8887 = vmatmul.mubr.bf16.gmra.mrb[20].mxu1 %v15345_v19 }
 0x646   :  { %v14564_v24 = vadd.f32 %v10083_v8, %v14404_v10  ;;  %7908 = vmatprep.mubr.bf16.mxu0 %v15346_v55  ;;  %8894 = vmatprep.mubr.bf16.mxu1 %v15346_v55 }
 0x648   :  { %v10084_v36 = vpop.f32.mrb[172].mxu1 }
 0x649   :  { %v10085_v60 = vpop.f32.mrb[173].mxu1 }
 0x64a   :  { %v10086_v11 = vadd.f32 %v10085_v60, %v10084_v36  ;;  %v10087_v35 = vpop.f32.mrb[174].mxu1  ;;  %v15353_v36 = vld [vmem:[#allocation48_spill] sm:$0xff]  ;;  %v15354_v60 = vld [vmem:[#allocation54_spill] sm:$0xff] }
 0x64b   :  { %v10088_v49 = vpop.f32.mrb[175].mxu1 }
 0x64c   :  { %v14569_v16 = vadd.f32 %v10086_v11, %v14409_v58  ;;  %v10089_v2 = vadd.f32 %v10088_v49, %v10087_v35 }
 0x64d   :  { %7909 = vmatmul.mubr.bf16.gmra.mrb[216].mxu0 %v15347_v48  ;;  %8895 = vmatmul.mubr.bf16.gmra.mrb[24].mxu1 %v15347_v48 }
 0x64e   :  { %v14574_v10 = vadd.f32 %v10089_v2, %v14414_v30  ;;  %7918 = vmatprep.mubr.bf16.mxu0 %v15348_v63  ;;  %8902 = vmatprep.mubr.bf16.mxu1 %v15348_v63 }
 0x650   :  { %v10090_v33 = vpop.f32.mrb[176].mxu1 }
 0x651   :  { %v10091_v9 = vpop.f32.mrb[177].mxu1 }
 0x652   :  { %v10092_v43 = vadd.f32 %v10091_v9, %v10090_v33  ;;  %v10093_v44 = vpop.f32.mrb[178].mxu1  ;;  %v15355_v33 = vld [vmem:[#allocation50_spill] sm:$0xff] }
 0x653   :  { %v10094_v6 = vpop.f32.mrb[179].mxu1  ;;  %v15356_v9 = vld [vmem:[#allocation110_spill] sm:$0xff] }
 0x654   :  { %v14579_v58 = vadd.f32 %v10092_v43, %v14419_v5  ;;  %v10095_v25 = vadd.f32 %v10094_v6, %v10093_v44 }
 0x655   :  { %7919 = vmatmul.mubr.bf16.gmra.mrb[220].mxu0 %v15349_v38  ;;  %8903 = vmatmul.mubr.bf16.gmra.mrb[28].mxu1 %v15349_v38 }
 0x656   :  { %v14584_v30 = vadd.f32 %v10095_v25, %v14424_v53  ;;  %7928 = vmatprep.mubr.bf16.mxu0 %v15350_v40  ;;  %8910 = vmatprep.mubr.bf16.mxu1 %v15350_v40 }
 0x658   :  { %v10096_v14 = vpop.f32.mrb[180].mxu1 }
 0x659   :  { %v10097_v62 = vpop.f32.mrb[181].mxu1 }
 0x65a   :  { %v10098_v20 = vadd.f32 %v10097_v62, %v10096_v14  ;;  %v10099_v50 = vpop.f32.mrb[182].mxu1  ;;  %v15357_v14 = vld [vmem:[#allocation58_spill] sm:$0xff]  ;;  %v15358_v62 = vld [vmem:[#allocation111_spill] sm:$0xff] }
 0x65b   :  { %v10100_v34 = vpop.f32.mrb[183].mxu1 }
 0x65c   :  { %v14589_v5 = vadd.f32 %v10098_v20, %v14429_v32  ;;  %v10101_v23 = vadd.f32 %v10100_v34, %v10099_v50 }
 0x65d   :  { %7929 = vmatmul.mubr.bf16.gmra.mrb[224].mxu0 %v15351_v59  ;;  %8911 = vmatmul.mubr.bf16.gmra.mrb[32].mxu1 %v15351_v59 }
 0x65e   :  { %v14594_v53 = vadd.f32 %v10101_v23, %v14434_v51  ;;  %7938 = vmatprep.mubr.bf16.mxu0 %v15352_v27  ;;  %8918 = vmatprep.mubr.bf16.mxu1 %v15352_v27 }
 0x660   :  { %v10102_v46 = vpop.f32.mrb[184].mxu1 }
 0x661   :  { %v10103_v45 = vpop.f32.mrb[185].mxu1 }
 0x662   :  { %v10104_v26 = vadd.f32 %v10103_v45, %v10102_v46  ;;  %v10105_v8 = vpop.f32.mrb[186].mxu1  ;;  %v15359_v46 = vld [vmem:[#allocation68_spill] sm:$0xff] }
 0x663   :  { %v10106_v19 = vpop.f32.mrb[187].mxu1  ;;  %v15360_v45 = vld [vmem:[#allocation112_spill] sm:$0xff] }
 0x664   :  { %v14599_v32 = vadd.f32 %v10104_v26, %v14439_v41  ;;  %v10107_v55 = vadd.f32 %v10106_v19, %v10105_v8 }
 0x665   :  { %7939 = vmatmul.mubr.bf16.gmra.mrb[228].mxu0 %v15353_v36  ;;  %8919 = vmatmul.mubr.bf16.gmra.mrb[36].mxu1 %v15353_v36 }
 0x666   :  { %v14604_v51 = vadd.f32 %v10107_v55, %v14444_v1  ;;  %7948 = vmatprep.mubr.bf16.mxu0 %v15354_v60  ;;  %8926 = vmatprep.mubr.bf16.mxu1 %v15354_v60 }
 0x668   :  { %v10108_v11 = vpop.f32.mrb[188].mxu1 }
 0x669   :  { %v10109_v35 = vpop.f32.mrb[189].mxu1 }
 0x66a   :  { %v10110_v49 = vadd.f32 %v10109_v35, %v10108_v11  ;;  %v10111_v2 = vpop.f32.mrb[190].mxu1  ;;  %v15361_v11 = vld [vmem:[#allocation72_spill] sm:$0xff]  ;;  %v15362_v35 = vld [vmem:[#allocation113_spill] sm:$0xff] }
 0x66b   :  { %v10112_v48 = vpop.f32.mrb[191].mxu1 }
 0x66c   :  { %v14609_v41 = vadd.f32 %v10110_v49, %v14449_v31  ;;  %v10113_v63 = vadd.f32 %v10112_v48, %v10111_v2 }
 0x66d   :  { %7949 = vmatmul.mubr.bf16.gmra.mrb[232].mxu0 %v15355_v33  ;;  %8927 = vmatmul.mubr.bf16.gmra.mrb[40].mxu1 %v15355_v33 }
 0x66e   :  { %v14614_v1 = vadd.f32 %v10113_v63, %v14454_v18  ;;  %7958 = vmatprep.mubr.bf16.mxu0 %v15356_v9  ;;  %8934 = vmatprep.mubr.bf16.mxu1 %v15356_v9 }
 0x670   :  { %v10130_v43 = vpop.f32.mrb[192].mxu1 }
 0x671   :  { %v10131_v44 = vpop.f32.mrb[193].mxu1 }
 0x672   :  { %v10132_v6 = vadd.f32 %v10131_v44, %v10130_v43  ;;  %v10133_v25 = vpop.f32.mrb[194].mxu1  ;;  %v15363_v43 = vld [vmem:[#allocation76_spill] sm:$0xff]  ;;  %v15364_v44 = vld [vmem:[#allocation115_spill] sm:$0xff] }
 0x673   :  { %v10134_v38 = vpop.f32.mrb[195].mxu1 }
 0x674   :  { %v14619_v31 = vadd.f32 %v10132_v6, %v14459_v22  ;;  %v10135_v40 = vadd.f32 %v10134_v38, %v10133_v25 }
 0x675   :  { %7959 = vmatmul.mubr.bf16.gmra.mrb[236].mxu0 %v15357_v14  ;;  %8935 = vmatmul.mubr.bf16.gmra.mrb[44].mxu1 %v15357_v14 }
 0x676   :  { %v14624_v18 = vadd.f32 %v10135_v40, %v14464_v17  ;;  %7968 = vmatprep.mubr.bf16.mxu0 %v15358_v62  ;;  %8942 = vmatprep.mubr.bf16.mxu1 %v15358_v62 }
 0x678   :  { %v10136_v20 = vpop.f32.mrb[196].mxu1 }
 0x679   :  { %v10137_v50 = vpop.f32.mrb[197].mxu1 }
 0x67a   :  { %v10138_v34 = vadd.f32 %v10137_v50, %v10136_v20  ;;  %v10139_v23 = vpop.f32.mrb[198].mxu1  ;;  %v15365_v20 = vld [vmem:[#allocation80_spill] sm:$0xff] }
 0x67b   :  { %v10140_v59 = vpop.f32.mrb[199].mxu1 }
 0x67c   :  { %v14629_v22 = vadd.f32 %v10138_v34, %v14469_v39  ;;  %v10141_v27 = vadd.f32 %v10140_v59, %v10139_v23 }
 0x67d   :  { %7969 = vmatmul.mubr.bf16.gmra.mrb[240].mxu0 %v15359_v46  ;;  %8943 = vmatmul.mubr.bf16.gmra.mrb[48].mxu1 %v15359_v46 }
 0x67e   :  { %v14634_v17 = vadd.f32 %v10141_v27, %v14474_v47  ;;  %7978 = vmatprep.mubr.bf16.mxu0 %v15360_v45  ;;  %8950 = vmatprep.mubr.bf16.mxu1 %v15360_v45 }
 0x680   :  { %v10142_v26 = vpop.f32.mrb[200].mxu1 }
 0x681   :  { %v10143_v8 = vpop.f32.mrb[201].mxu1 }
 0x682   :  { %v10144_v19 = vadd.f32 %v10143_v8, %v10142_v26  ;;  %v10145_v55 = vpop.f32.mrb[202].mxu1 }
 0x683   :  { %v10146_v36 = vpop.f32.mrb[203].mxu1 }
 0x684   :  { %v14639_v39 = vadd.f32 %v10144_v19, %v14479_v61  ;;  %v10147_v60 = vadd.f32 %v10146_v36, %v10145_v55 }
 0x685   :  { %7979 = vmatmul.mubr.bf16.gmra.mrb[244].mxu0 %v15361_v11  ;;  %8951 = vmatmul.mubr.bf16.gmra.mrb[52].mxu1 %v15361_v11 }
 0x686   :  { %v14644_v47 = vadd.f32 %v10147_v60, %v14484_v3  ;;  %7988 = vmatprep.mubr.bf16.mxu0 %v15362_v35  ;;  %8958 = vmatprep.mubr.bf16.mxu1 %v15362_v35 }
 0x688   :  { %v10148_v49 = vpop.f32.mrb[204].mxu1 }
 0x689   :  { %v10149_v2 = vpop.f32.mrb[205].mxu1 }
 0x68a   :  { %v10150_v48 = vadd.f32 %v10149_v2, %v10148_v49  ;;  %v10151_v63 = vpop.f32.mrb[206].mxu1 }
 0x68b   :  { %v10152_v33 = vpop.f32.mrb[207].mxu1 }
 0x68c   :  { %v14649_v61 = vadd.f32 %v10150_v48, %v14489_v57  ;;  %v10153_v9 = vadd.f32 %v10152_v33, %v10151_v63 }
 0x68d   :  { %7989 = vmatmul.mubr.bf16.gmra.mrb[248].mxu0 %v15363_v43  ;;  %8959 = vmatmul.mubr.bf16.gmra.mrb[56].mxu1 %v15363_v43 }
 0x68e   :  { %v14654_v3 = vadd.f32 %v10153_v9, %v14494_v21  ;;  %7998 = vmatprep.mubr.bf16.mxu0 %v15364_v44  ;;  %8966 = vmatprep.mubr.bf16.mxu1 %v15364_v44 }
 0x690   :  { %v10154_v6 = vpop.f32.mrb[208].mxu1 }
 0x691   :  { %v10155_v25 = vpop.f32.mrb[209].mxu1 }
 0x692   :  { %v10156_v38 = vadd.f32 %v10155_v25, %v10154_v6  ;;  %v10157_v40 = vpop.f32.mrb[210].mxu1 }
 0x693   :  { %v10158_v14 = vpop.f32.mrb[211].mxu1 }
 0x694   :  { %v14659_v57 = vadd.f32 %v10156_v38, %v14499_v0  ;;  %v10159_v62 = vadd.f32 %v10158_v14, %v10157_v40 }
 0x695   :  { %7999 = vmatmul.mubr.bf16.gmra.mrb[252].mxu0 %v15365_v20  ;;  %8967 = vmatmul.mubr.bf16.gmra.mrb[60].mxu1 %v15365_v20 }
 0x696   :  { %v14664_v21 = vadd.f32 %v10159_v62, %v14504_v15 }
 0x698   :  { %v10160_v50 = vpop.f32.mrb[212].mxu1 }
 0x699   :  { %v10161_v34 = vpop.f32.mrb[213].mxu1 }
 0x69a   :  { %v10162_v23 = vadd.f32 %v10161_v34, %v10160_v50  ;;  %v10163_v59 = vpop.f32.mrb[214].mxu1 }
 0x69b   :  { %v10164_v27 = vpop.f32.mrb[215].mxu1 }
 0x69c   :  { %v14667_v46 = vadd.f32 %v10162_v23, %v14509_v56  ;;  %v10165_v45 = vadd.f32 %v10164_v27, %v10163_v59 }
 0x69e   :  { %v14670_v0 = vadd.f32 %v10165_v45, %v14514_v42 }
 0x6a0   :  { %v10166_v26 = vpop.f32.mrb[216].mxu1 }
 0x6a1   :  { %v10167_v8 = vpop.f32.mrb[217].mxu1 }
 0x6a2   :  { %v10168_v19 = vadd.f32 %v10167_v8, %v10166_v26  ;;  %v10169_v55 = vpop.f32.mrb[218].mxu1 }
 0x6a3   :  { %v10170_v36 = vpop.f32.mrb[219].mxu1 }
 0x6a4   :  { %v14673_v15 = vadd.f32 %v10168_v19, %v14519_v37  ;;  %v10171_v60 = vadd.f32 %v10170_v36, %v10169_v55 }
 0x6a6   :  { %v14676_v11 = vadd.f32 %v10171_v60, %v14524_v12 }
 0x6a8   :  { %v10172_v35 = vpop.f32.mrb[220].mxu1 }
 0x6a9   :  { %v10173_v49 = vpop.f32.mrb[221].mxu1 }
 0x6aa   :  { %v10174_v56 = vadd.f32 %v10173_v49, %v10172_v35  ;;  %v10175_v2 = vpop.f32.mrb[222].mxu1 }
 0x6ab   :  { %v10176_v48 = vpop.f32.mrb[223].mxu1 }
 0x6ac   :  { %v14679_v42 = vadd.f32 %v10174_v56, %v14529_v7  ;;  %v10177_v63 = vadd.f32 %v10176_v48, %v10175_v2 }
 0x6ae   :  { %v14682_v33 = vadd.f32 %v10177_v63, %v14534_v29 }
 0x6b0   :  { %v10178_v9 = vpop.f32.mrb[224].mxu1 }
 0x6b1   :  { %v10179_v43 = vpop.f32.mrb[225].mxu1 }
 0x6b2   :  { %v10180_v37 = vadd.f32 %v10179_v43, %v10178_v9  ;;  %v10181_v44 = vpop.f32.mrb[226].mxu1 }
 0x6b3   :  { %v10182_v6 = vpop.f32.mrb[227].mxu1 }
 0x6b4   :  { %v14685_v12 = vadd.f32 %v10180_v37, %v14539_v13  ;;  %v10183_v25 = vadd.f32 %v10182_v6, %v10181_v44 }
 0x6b6   :  { %v14688_v38 = vadd.f32 %v10183_v25, %v14544_v52 }
 0x6b8   :  { %v10184_v40 = vpop.f32.mrb[228].mxu1 }
 0x6b9   :  { %v10185_v14 = vpop.f32.mrb[229].mxu1 }
 0x6ba   :  { %v10186_v7 = vadd.f32 %v10185_v14, %v10184_v40  ;;  %v10187_v62 = vpop.f32.mrb[230].mxu1 }
 0x6bb   :  { %v10188_v20 = vpop.f32.mrb[231].mxu1 }
 0x6bc   :  { %v14691_v29 = vadd.f32 %v10186_v7, %v14549_v4  ;;  %v10189_v50 = vadd.f32 %v10188_v20, %v10187_v62 }
 0x6be   :  { %v14694_v34 = vadd.f32 %v10189_v50, %v14554_v54 }
 0x6c0   :  { %v10190_v23 = vpop.f32.mrb[232].mxu1 }
 0x6c1   :  { %v10191_v59 = vpop.f32.mrb[233].mxu1 }
 0x6c2   :  { %v10192_v13 = vadd.f32 %v10191_v59, %v10190_v23  ;;  %v10193_v27 = vpop.f32.mrb[234].mxu1 }
 0x6c3   :  { %v10194_v45 = vpop.f32.mrb[235].mxu1 }
 0x6c4   :  { %v14697_v52 = vadd.f32 %v10192_v13, %v14559_v28  ;;  %v10195_v26 = vadd.f32 %v10194_v45, %v10193_v27 }
 0x6c6   :  { %v14700_v8 = vadd.f32 %v10195_v26, %v14564_v24 }
 0x6c8   :  { %v10196_v19 = vpop.f32.mrb[236].mxu1 }
 0x6c9   :  { %v10197_v55 = vpop.f32.mrb[237].mxu1 }
 0x6ca   :  { %v10198_v4 = vadd.f32 %v10197_v55, %v10196_v19  ;;  %v10199_v36 = vpop.f32.mrb[238].mxu1  ;;  %v12320_v55 = vld [vmem:[#allocation10] sm:$0x7] }
 0x6cb   :  { %v10200_v60 = vpop.f32.mrb[239].mxu1 }
 0x6cc   :  { %v14703_v54 = vadd.f32 %v10198_v4, %v14569_v16  ;;  %v10201_v35 = vadd.f32 %v10200_v60, %v10199_v36  ;;  %v15366_v4 = vld [vmem:[#allocation30_spill] sm:$0xff]  ;;  %v15367_v60 = vld [vmem:[#allocation32_spill] sm:$0xff] }
 0x6cd   :  { %v14730_v36 = vrot.slane %v12320_v55, %v15366_v4 }
 0x6ce   :  { %v14706_v49 = vadd.f32 %v10201_v35, %v14574_v10  ;;  %v14736_v35 = vrot.slane %v12320_v55, %v15367_v60 }
 0x6d0   :  { %v10202_v56 = vpop.f32.mrb[240].mxu1 }
 0x6d1   :  { %v10203_v2 = vpop.f32.mrb[241].mxu1 }
 0x6d2   :  { %v10204_v28 = vadd.f32 %v10203_v2, %v10202_v56  ;;  %v10205_v48 = vpop.f32.mrb[242].mxu1 }
 0x6d3   :  { %v10206_v63 = vpop.f32.mrb[243].mxu1 }
 0x6d4   :  { %v14709_v24 = vadd.f32 %v10204_v28, %v14579_v58  ;;  %v10207_v9 = vadd.f32 %v10206_v63, %v10205_v48 }
 0x6d6   :  { %v14712_v43 = vadd.f32 %v10207_v9, %v14584_v30 }
 0x6d8   :  { %v10208_v37 = vpop.f32.mrb[244].mxu1 }
 0x6d9   :  { %v10209_v44 = vpop.f32.mrb[245].mxu1 }
 0x6da   :  { %v10210_v16 = vadd.f32 %v10209_v44, %v10208_v37  ;;  %v10211_v6 = vpop.f32.mrb[246].mxu1 }
 0x6db   :  { %v10212_v25 = vpop.f32.mrb[247].mxu1 }
 0x6dc   :  { %v14715_v10 = vadd.f32 %v10210_v16, %v14589_v5  ;;  %v10213_v40 = vadd.f32 %v10212_v25, %v10211_v6 }
 0x6de   :  { %v14718_v14 = vadd.f32 %v10213_v40, %v14594_v53 }
 0x6e0   :  { %v10214_v7 = vpop.f32.mrb[248].mxu1 }
 0x6e1   :  { %v10215_v62 = vpop.f32.mrb[249].mxu1 }
 0x6e2   :  { %v10216_v58 = vadd.f32 %v10215_v62, %v10214_v7  ;;  %v10217_v20 = vpop.f32.mrb[250].mxu1 }
 0x6e3   :  { %v10218_v50 = vpop.f32.mrb[251].mxu1 }
 0x6e4   :  { %v14721_v30 = vadd.f32 %v10216_v58, %v14599_v32  ;;  %v10219_v23 = vadd.f32 %v10218_v50, %v10217_v20 }
 0x6e6   :  { %v14724_v59 = vadd.f32 %v10219_v23, %v14604_v51 }
 0x6e8   :  { %v10220_v13 = vpop.f32.mrb[252].mxu1 }
 0x6e9   :  { %v10221_v27 = vpop.f32.mrb[253].mxu1 }
 0x6ea   :  { %v10222_v5 = vadd.f32 %v10221_v27, %v10220_v13  ;;  %v10223_v45 = vpop.f32.mrb[254].mxu1 }
 0x6eb   :  { %v10224_v26 = vpop.f32.mrb[255].mxu1 }
 0x6ec   :  { %v14727_v53 = vadd.f32 %v10222_v5, %v14609_v41  ;;  %v10225_v19 = vadd.f32 %v10224_v26, %v10223_v45 }
 0x6ee   :  { %v14733_v32 = vadd.f32 %v10225_v19, %v14614_v1 }
 0x6f0   :  { %v7850_v51 = vpop.f32.mrb[192].mxu0  ;;  %v10242_v56 = vpop.f32.mrb[0].mxu1 }
 0x6f1   :  { %v10722_v2 = vadd.f32 %v7850_v51, %v14730_v36  ;;  %v7852_v28 = vpop.f32.mrb[193].mxu0  ;;  %v10243_v48 = vpop.f32.mrb[1].mxu1 }
 0x6f2   :  { %v10723_v41 = vadd.f32 %v7852_v28, %v14736_v35  ;;  %v10244_v63 = vadd.f32 %v10243_v48, %v10242_v56  ;;  %v7854_v9 = vpop.f32.mrb[194].mxu0  ;;  %v10245_v37 = vpop.f32.mrb[2].mxu1 }
 0x6f3   :  { %8975 = vst [vmem:[#allocation11] sm:$0xff] %v10722_v2  ;;  %v10724_v44 = vadd.f32 %v7854_v9, %v14730_v36  ;;  %v7856_v16 = vpop.f32.mrb[195].mxu0  ;;  %v10246_v1 = vpop.f32.mrb[3].mxu1 }
 0x6f4   :  { %8976 = vst [vmem:[#allocation11 + $0x8] sm:$0xff] %v10723_v41  ;;  %v8849_v6 = vadd.f32 %v10244_v63, %v14619_v31  ;;  %v10725_v25 = vadd.f32 %v7856_v16, %v14736_v35  ;;  %v10247_v40 = vadd.f32 %v10246_v1, %v10245_v37 }
 0x6f5   :  { %8978 = vst [vmem:[#allocation11 + $0x18] sm:$0xff] %v10724_v44 }
 0x6f6   :  { %8977 = vst [vmem:[#allocation11 + $0x10] sm:$0xff] %v8849_v6  ;;  %8979 = vst [vmem:[#allocation11 + $0x20] sm:$0xff] %v10725_v25  ;;  %v8852_v7 = vadd.f32 %v10247_v40, %v14624_v18 }
 0x6f8   :  { %8980 = vst [vmem:[#allocation11 + $0x28] sm:$0xff] %v8852_v7  ;;  %v7860_v62 = vpop.f32.mrb[196].mxu0  ;;  %v10248_v58 = vpop.f32.mrb[4].mxu1 }
 0x6f9   :  { %v10726_v20 = vadd.f32 %v7860_v62, %v14730_v36  ;;  %v7862_v50 = vpop.f32.mrb[197].mxu0  ;;  %v10249_v23 = vpop.f32.mrb[5].mxu1 }
 0x6fa   :  { %v10727_v13 = vadd.f32 %v7862_v50, %v14736_v35  ;;  %v10250_v27 = vadd.f32 %v10249_v23, %v10248_v58  ;;  %v7864_v5 = vpop.f32.mrb[198].mxu0  ;;  %v10251_v31 = vpop.f32.mrb[6].mxu1 }
 0x6fb   :  { %8981 = vst [vmem:[#allocation11 + $0x30] sm:$0xff] %v10726_v20  ;;  %v10728_v45 = vadd.f32 %v7864_v5, %v14730_v36  ;;  %v7866_v26 = vpop.f32.mrb[199].mxu0  ;;  %v10252_v19 = vpop.f32.mrb[7].mxu1 }
 0x6fc   :  { %8982 = vst [vmem:[#allocation11 + $0x38] sm:$0xff] %v10727_v13  ;;  %v8857_v18 = vadd.f32 %v10250_v27, %v14629_v22  ;;  %v10729_v55 = vadd.f32 %v7866_v26, %v14736_v35  ;;  %v10253_v4 = vadd.f32 %v10252_v19, %v10251_v31 }
 0x6fd   :  { %8984 = vst [vmem:[#allocation11 + $0x48] sm:$0xff] %v10728_v45 }
 0x6fe   :  { %8983 = vst [vmem:[#allocation11 + $0x40] sm:$0xff] %v8857_v18  ;;  %8985 = vst [vmem:[#allocation11 + $0x50] sm:$0xff] %v10729_v55  ;;  %v8860_v60 = vadd.f32 %v10253_v4, %v14634_v17 }
 0x700   :  { %8986 = vst [vmem:[#allocation11 + $0x58] sm:$0xff] %v8860_v60  ;;  %v7870_v51 = vpop.f32.mrb[200].mxu0  ;;  %v10254_v56 = vpop.f32.mrb[8].mxu1 }
 0x701   :  { %v10730_v2 = vadd.f32 %v7870_v51, %v14730_v36  ;;  %v7872_v28 = vpop.f32.mrb[201].mxu0  ;;  %v10255_v48 = vpop.f32.mrb[9].mxu1 }
 0x702   :  { %v10731_v41 = vadd.f32 %v7872_v28, %v14736_v35  ;;  %v10256_v63 = vadd.f32 %v10255_v48, %v10254_v56  ;;  %v7874_v9 = vpop.f32.mrb[202].mxu0  ;;  %v10257_v22 = vpop.f32.mrb[10].mxu1 }
 0x703   :  { %8987 = vst [vmem:[#allocation11 + $0x60] sm:$0xff] %v10730_v2  ;;  %v10732_v37 = vadd.f32 %v7874_v9, %v14730_v36  ;;  %v7876_v44 = vpop.f32.mrb[203].mxu0  ;;  %v10258_v16 = vpop.f32.mrb[11].mxu1 }
 0x704   :  { %8988 = vst [vmem:[#allocation11 + $0x68] sm:$0xff] %v10731_v41  ;;  %v8865_v17 = vadd.f32 %v10256_v63, %v14639_v39  ;;  %v10733_v1 = vadd.f32 %v7876_v44, %v14736_v35  ;;  %v10259_v6 = vadd.f32 %v10258_v16, %v10257_v22 }
 0x705   :  { %8990 = vst [vmem:[#allocation11 + $0x78] sm:$0xff] %v10732_v37 }
 0x706   :  { %8989 = vst [vmem:[#allocation11 + $0x70] sm:$0xff] %v8865_v17  ;;  %8991 = vst [vmem:[#allocation11 + $0x80] sm:$0xff] %v10733_v1  ;;  %v8868_v25 = vadd.f32 %v10259_v6, %v14644_v47 }
 0x708   :  { %8992 = vst [vmem:[#allocation11 + $0x88] sm:$0xff] %v8868_v25  ;;  %v7880_v40 = vpop.f32.mrb[204].mxu0  ;;  %v10260_v7 = vpop.f32.mrb[12].mxu1 }
 0x709   :  { %v10734_v62 = vadd.f32 %v7880_v40, %v14730_v36  ;;  %v7882_v58 = vpop.f32.mrb[205].mxu0  ;;  %v10261_v20 = vpop.f32.mrb[13].mxu1 }
 0x70a   :  { %v10735_v50 = vadd.f32 %v7882_v58, %v14736_v35  ;;  %v10262_v23 = vadd.f32 %v10261_v20, %v10260_v7  ;;  %v7884_v13 = vpop.f32.mrb[206].mxu0  ;;  %v10263_v39 = vpop.f32.mrb[14].mxu1 }
 0x70b   :  { %8993 = vst [vmem:[#allocation11 + $0x90] sm:$0xff] %v10734_v62  ;;  %v10736_v27 = vadd.f32 %v7884_v13, %v14730_v36  ;;  %v7886_v5 = vpop.f32.mrb[207].mxu0  ;;  %v10264_v31 = vpop.f32.mrb[15].mxu1 }
 0x70c   :  { %8994 = vst [vmem:[#allocation11 + $0x98] sm:$0xff] %v10735_v50  ;;  %v8873_v47 = vadd.f32 %v10262_v23, %v14649_v61  ;;  %v10737_v45 = vadd.f32 %v7886_v5, %v14736_v35  ;;  %v10265_v26 = vadd.f32 %v10264_v31, %v10263_v39 }
 0x70d   :  { %8996 = vst [vmem:[#allocation11 + $0xa8] sm:$0xff] %v10736_v27 }
 0x70e   :  { %8995 = vst [vmem:[#allocation11 + $0xa0] sm:$0xff] %v8873_v47  ;;  %8997 = vst [vmem:[#allocation11 + $0xb0] sm:$0xff] %v10737_v45  ;;  %v8876_v19 = vadd.f32 %v10265_v26, %v14654_v3 }
 0x710   :  { %8998 = vst [vmem:[#allocation11 + $0xb8] sm:$0xff] %v8876_v19  ;;  %v7890_v18 = vpop.f32.mrb[208].mxu0  ;;  %v10266_v55 = vpop.f32.mrb[16].mxu1 }
 0x711   :  { %v10738_v4 = vadd.f32 %v7890_v18, %v14730_v36  ;;  %v7892_v60 = vpop.f32.mrb[209].mxu0  ;;  %v10267_v51 = vpop.f32.mrb[17].mxu1 }
 0x712   :  { %v10739_v56 = vadd.f32 %v7892_v60, %v14736_v35  ;;  %v10268_v2 = vadd.f32 %v10267_v51, %v10266_v55  ;;  %v7894_v28 = vpop.f32.mrb[210].mxu0  ;;  %v10269_v61 = vpop.f32.mrb[18].mxu1 }
 0x713   :  { %8999 = vst [vmem:[#allocation11 + $0xc0] sm:$0xff] %v10738_v4  ;;  %v10740_v48 = vadd.f32 %v7894_v28, %v14730_v36  ;;  %v7896_v41 = vpop.f32.mrb[211].mxu0  ;;  %v10270_v63 = vpop.f32.mrb[19].mxu1 }
 0x714   :  { %9000 = vst [vmem:[#allocation11 + $0xc8] sm:$0xff] %v10739_v56  ;;  %v8881_v3 = vadd.f32 %v10268_v2, %v14659_v57  ;;  %v10741_v9 = vadd.f32 %v7896_v41, %v14736_v35  ;;  %v10271_v22 = vadd.f32 %v10270_v63, %v10269_v61 }
 0x715   :  { %9002 = vst [vmem:[#allocation11 + $0xd8] sm:$0xff] %v10740_v48 }
 0x716   :  { %9001 = vst [vmem:[#allocation11 + $0xd0] sm:$0xff] %v8881_v3  ;;  %9003 = vst [vmem:[#allocation11 + $0xe0] sm:$0xff] %v10741_v9  ;;  %v8884_v37 = vadd.f32 %v10271_v22, %v14664_v21 }
 0x718   :  { %9004 = vst [vmem:[#allocation11 + $0xe8] sm:$0xff] %v8884_v37  ;;  %v7900_v44 = vpop.f32.mrb[212].mxu0  ;;  %v10272_v16 = vpop.f32.mrb[20].mxu1 }
 0x719   :  { %v10742_v17 = vadd.f32 %v7900_v44, %v14730_v36  ;;  %v7902_v1 = vpop.f32.mrb[213].mxu0  ;;  %v10273_v6 = vpop.f32.mrb[21].mxu1 }
 0x71a   :  { %v10743_v25 = vadd.f32 %v7902_v1, %v14736_v35  ;;  %v10274_v40 = vadd.f32 %v10273_v6, %v10272_v16  ;;  %v7904_v7 = vpop.f32.mrb[214].mxu0  ;;  %v10275_v57 = vpop.f32.mrb[22].mxu1 }
 0x71b   :  { %9005 = vst [vmem:[#allocation11 + $0xf0] sm:$0xff] %v10742_v17  ;;  %v10744_v62 = vadd.f32 %v7904_v7, %v14730_v36  ;;  %v7906_v58 = vpop.f32.mrb[215].mxu0  ;;  %v10276_v20 = vpop.f32.mrb[23].mxu1 }
 0x71c   :  { %9006 = vst [vmem:[#allocation11 + $0xf8] sm:$0xff] %v10743_v25  ;;  %v8889_v21 = vadd.f32 %v10274_v40, %v14667_v46  ;;  %v10745_v50 = vadd.f32 %v7906_v58, %v14736_v35  ;;  %v10277_v23 = vadd.f32 %v10276_v20, %v10275_v57 }
 0x71d   :  { %9008 = vst [vmem:[#allocation11 + $0x108] sm:$0xff] %v10744_v62 }
 0x71e   :  { %9007 = vst [vmem:[#allocation11 + $0x100] sm:$0xff] %v8889_v21  ;;  %9009 = vst [vmem:[#allocation11 + $0x110] sm:$0xff] %v10745_v50  ;;  %v8892_v13 = vadd.f32 %v10277_v23, %v14670_v0 }
 0x720   :  { %9010 = vst [vmem:[#allocation11 + $0x118] sm:$0xff] %v8892_v13  ;;  %v7910_v39 = vpop.f32.mrb[216].mxu0  ;;  %v10278_v27 = vpop.f32.mrb[24].mxu1 }
 0x721   :  { %v10746_v5 = vadd.f32 %v7910_v39, %v14730_v36  ;;  %v7912_v31 = vpop.f32.mrb[217].mxu0  ;;  %v10279_v47 = vpop.f32.mrb[25].mxu1 }
 0x722   :  { %v10747_v45 = vadd.f32 %v7912_v31, %v14736_v35  ;;  %v10280_v26 = vadd.f32 %v10279_v47, %v10278_v27  ;;  %v7914_v19 = vpop.f32.mrb[218].mxu0  ;;  %v10281_v46 = vpop.f32.mrb[26].mxu1 }
 0x723   :  { %9011 = vst [vmem:[#allocation11 + $0x120] sm:$0xff] %v10746_v5  ;;  %v10748_v18 = vadd.f32 %v7914_v19, %v14730_v36  ;;  %v7916_v55 = vpop.f32.mrb[219].mxu0  ;;  %v10282_v4 = vpop.f32.mrb[27].mxu1 }
 0x724   :  { %9012 = vst [vmem:[#allocation11 + $0x128] sm:$0xff] %v10747_v45  ;;  %v8897_v0 = vadd.f32 %v10280_v26, %v14673_v15  ;;  %v10749_v60 = vadd.f32 %v7916_v55, %v14736_v35  ;;  %v10283_v51 = vadd.f32 %v10282_v4, %v10281_v46 }
 0x725   :  { %9014 = vst [vmem:[#allocation11 + $0x138] sm:$0xff] %v10748_v18 }
 0x726   :  { %9013 = vst [vmem:[#allocation11 + $0x130] sm:$0xff] %v8897_v0  ;;  %9015 = vst [vmem:[#allocation11 + $0x140] sm:$0xff] %v10749_v60  ;;  %v8900_v56 = vadd.f32 %v10283_v51, %v14676_v11 }
 0x728   :  { %9016 = vst [vmem:[#allocation11 + $0x148] sm:$0xff] %v8900_v56  ;;  %v7920_v2 = vpop.f32.mrb[220].mxu0  ;;  %v10284_v28 = vpop.f32.mrb[28].mxu1 }
 0x729   :  { %v10750_v61 = vadd.f32 %v7920_v2, %v14730_v36  ;;  %v7922_v48 = vpop.f32.mrb[221].mxu0  ;;  %v10285_v41 = vpop.f32.mrb[29].mxu1 }
 0x72a   :  { %v10751_v63 = vadd.f32 %v7922_v48, %v14736_v35  ;;  %v10286_v3 = vadd.f32 %v10285_v41, %v10284_v28  ;;  %v7924_v9 = vpop.f32.mrb[222].mxu0  ;;  %v10287_v15 = vpop.f32.mrb[30].mxu1 }
 0x72b   :  { %9017 = vst [vmem:[#allocation11 + $0x150] sm:$0xff] %v10750_v61  ;;  %v10752_v22 = vadd.f32 %v7924_v9, %v14730_v36  ;;  %v7926_v37 = vpop.f32.mrb[223].mxu0  ;;  %v10288_v44 = vpop.f32.mrb[31].mxu1 }
 0x72c   :  { %9018 = vst [vmem:[#allocation11 + $0x158] sm:$0xff] %v10751_v63  ;;  %v8905_v11 = vadd.f32 %v10286_v3, %v14679_v42  ;;  %v10753_v16 = vadd.f32 %v7926_v37, %v14736_v35  ;;  %v10289_v17 = vadd.f32 %v10288_v44, %v10287_v15 }
 0x72d   :  { %9020 = vst [vmem:[#allocation11 + $0x168] sm:$0xff] %v10752_v22 }
 0x72e   :  { %9019 = vst [vmem:[#allocation11 + $0x160] sm:$0xff] %v8905_v11  ;;  %9021 = vst [vmem:[#allocation11 + $0x170] sm:$0xff] %v10753_v16  ;;  %v8908_v1 = vadd.f32 %v10289_v17, %v14682_v33 }
 0x730   :  { %9022 = vst [vmem:[#allocation11 + $0x178] sm:$0xff] %v8908_v1  ;;  %v7930_v6 = vpop.f32.mrb[224].mxu0  ;;  %v10290_v25 = vpop.f32.mrb[32].mxu1 }
 0x731   :  { %v10754_v40 = vadd.f32 %v7930_v6, %v14730_v36  ;;  %v7932_v7 = vpop.f32.mrb[225].mxu0  ;;  %v10291_v57 = vpop.f32.mrb[33].mxu1 }
 0x732   :  { %v10755_v62 = vadd.f32 %v7932_v7, %v14736_v35  ;;  %v10292_v58 = vadd.f32 %v10291_v57, %v10290_v25  ;;  %v7934_v20 = vpop.f32.mrb[226].mxu0  ;;  %v10293_v42 = vpop.f32.mrb[34].mxu1 }
 0x733   :  { %9023 = vst [vmem:[#allocation11 + $0x180] sm:$0xff] %v10754_v40  ;;  %v10756_v21 = vadd.f32 %v7934_v20, %v14730_v36  ;;  %v7936_v50 = vpop.f32.mrb[227].mxu0  ;;  %v10294_v23 = vpop.f32.mrb[35].mxu1 }
 0x734   :  { %9024 = vst [vmem:[#allocation11 + $0x188] sm:$0xff] %v10755_v62  ;;  %v8913_v33 = vadd.f32 %v10292_v58, %v14685_v12  ;;  %v10757_v13 = vadd.f32 %v7936_v50, %v14736_v35  ;;  %v10295_v39 = vadd.f32 %v10294_v23, %v10293_v42 }
 0x735   :  { %9026 = vst [vmem:[#allocation11 + $0x198] sm:$0xff] %v10756_v21 }
 0x736   :  { %9025 = vst [vmem:[#allocation11 + $0x190] sm:$0xff] %v8913_v33  ;;  %9027 = vst [vmem:[#allocation11 + $0x1a0] sm:$0xff] %v10757_v13  ;;  %v8916_v27 = vadd.f32 %v10295_v39, %v14688_v38 }
 0x738   :  { %9028 = vst [vmem:[#allocation11 + $0x1a8] sm:$0xff] %v8916_v27  ;;  %v7940_v5 = vpop.f32.mrb[228].mxu0  ;;  %v10296_v31 = vpop.f32.mrb[36].mxu1 }
 0x739   :  { %v10758_v47 = vadd.f32 %v7940_v5, %v14730_v36  ;;  %v7942_v45 = vpop.f32.mrb[229].mxu0  ;;  %v10297_v26 = vpop.f32.mrb[37].mxu1 }
 0x73a   :  { %v10759_v19 = vadd.f32 %v7942_v45, %v14736_v35  ;;  %v10298_v46 = vadd.f32 %v10297_v26, %v10296_v31  ;;  %v7944_v18 = vpop.f32.mrb[230].mxu0  ;;  %v10299_v12 = vpop.f32.mrb[38].mxu1 }
 0x73b   :  { %9029 = vst [vmem:[#allocation11 + $0x1b0] sm:$0xff] %v10758_v47  ;;  %v10760_v55 = vadd.f32 %v7944_v18, %v14730_v36  ;;  %v7946_v4 = vpop.f32.mrb[231].mxu0  ;;  %v10300_v0 = vpop.f32.mrb[39].mxu1 }
 0x73c   :  { %9030 = vst [vmem:[#allocation11 + $0x1b8] sm:$0xff] %v10759_v19  ;;  %v8921_v38 = vadd.f32 %v10298_v46, %v14691_v29  ;;  %v10761_v60 = vadd.f32 %v7946_v4, %v14736_v35  ;;  %v10301_v51 = vadd.f32 %v10300_v0, %v10299_v12 }
 0x73d   :  { %9032 = vst [vmem:[#allocation11 + $0x1c8] sm:$0xff] %v10760_v55 }
 0x73e   :  { %9031 = vst [vmem:[#allocation11 + $0x1c0] sm:$0xff] %v8921_v38  ;;  %9033 = vst [vmem:[#allocation11 + $0x1d0] sm:$0xff] %v10761_v60  ;;  %v8924_v56 = vadd.f32 %v10301_v51, %v14694_v34 }
 0x740   :  { %9034 = vst [vmem:[#allocation11 + $0x1d8] sm:$0xff] %v8924_v56  ;;  %v7950_v2 = vpop.f32.mrb[232].mxu0  ;;  %v10302_v28 = vpop.f32.mrb[40].mxu1 }
 0x741   :  { %v10762_v61 = vadd.f32 %v7950_v2, %v14730_v36  ;;  %v7952_v48 = vpop.f32.mrb[233].mxu0  ;;  %v10303_v41 = vpop.f32.mrb[41].mxu1 }
 0x742   :  { %v10763_v63 = vadd.f32 %v7952_v48, %v14736_v35  ;;  %v10304_v3 = vadd.f32 %v10303_v41, %v10302_v28  ;;  %v7954_v9 = vpop.f32.mrb[234].mxu0  ;;  %v10305_v29 = vpop.f32.mrb[42].mxu1 }
 0x743   :  { %9035 = vst [vmem:[#allocation11 + $0x1e0] sm:$0xff] %v10762_v61  ;;  %v10764_v15 = vadd.f32 %v7954_v9, %v14730_v36  ;;  %v7956_v22 = vpop.f32.mrb[235].mxu0  ;;  %v10306_v37 = vpop.f32.mrb[43].mxu1 }
 0x744   :  { %9036 = vst [vmem:[#allocation11 + $0x1e8] sm:$0xff] %v10763_v63  ;;  %v8929_v34 = vadd.f32 %v10304_v3, %v14697_v52  ;;  %v10765_v44 = vadd.f32 %v7956_v22, %v14736_v35  ;;  %v10307_v11 = vadd.f32 %v10306_v37, %v10305_v29 }
 0x745   :  { %9038 = vst [vmem:[#allocation11 + $0x1f8] sm:$0xff] %v10764_v15 }
 0x746   :  { %9037 = vst [vmem:[#allocation11 + $0x1f0] sm:$0xff] %v8929_v34  ;;  %9039 = vst [vmem:[#allocation11 + $0x200] sm:$0xff] %v10765_v44  ;;  %v8932_v16 = vadd.f32 %v10307_v11, %v14700_v8 }
 0x748   :  { %9040 = vst [vmem:[#allocation11 + $0x208] sm:$0xff] %v8932_v16  ;;  %v7960_v17 = vpop.f32.mrb[236].mxu0  ;;  %v10308_v1 = vpop.f32.mrb[44].mxu1 }
 0x749   :  { %v10766_v6 = vadd.f32 %v7960_v17, %v14730_v36  ;;  %v7962_v25 = vpop.f32.mrb[237].mxu0  ;;  %v10309_v40 = vpop.f32.mrb[45].mxu1 }
 0x74a   :  { %v10767_v7 = vadd.f32 %v7962_v25, %v14736_v35  ;;  %v10310_v57 = vadd.f32 %v10309_v40, %v10308_v1  ;;  %v7964_v62 = vpop.f32.mrb[238].mxu0  ;;  %v10311_v52 = vpop.f32.mrb[46].mxu1 }
 0x74b   :  { %9041 = vst [vmem:[#allocation11 + $0x210] sm:$0xff] %v10766_v6  ;;  %v10768_v58 = vadd.f32 %v7964_v62, %v14730_v36  ;;  %v7966_v20 = vpop.f32.mrb[239].mxu0  ;;  %v10312_v42 = vpop.f32.mrb[47].mxu1 }
 0x74c   :  { %9042 = vst [vmem:[#allocation11 + $0x218] sm:$0xff] %v10767_v7  ;;  %v8937_v8 = vadd.f32 %v10310_v57, %v14703_v54  ;;  %v10769_v21 = vadd.f32 %v7966_v20, %v14736_v35  ;;  %v10313_v50 = vadd.f32 %v10312_v42, %v10311_v52 }
 0x74d   :  { %9044 = vst [vmem:[#allocation11 + $0x228] sm:$0xff] %v10768_v58 }
 0x74e   :  { %9043 = vst [vmem:[#allocation11 + $0x220] sm:$0xff] %v8937_v8  ;;  %9045 = vst [vmem:[#allocation11 + $0x230] sm:$0xff] %v10769_v21  ;;  %v8940_v23 = vadd.f32 %v10313_v50, %v14706_v49 }
 0x750   :  { %9046 = vst [vmem:[#allocation11 + $0x238] sm:$0xff] %v8940_v23  ;;  %v7970_v33 = vpop.f32.mrb[240].mxu0  ;;  %v10314_v13 = vpop.f32.mrb[48].mxu1 }
 0x751   :  { %v10770_v39 = vadd.f32 %v7970_v33, %v14730_v36  ;;  %v7972_v27 = vpop.f32.mrb[241].mxu0  ;;  %v10315_v5 = vpop.f32.mrb[49].mxu1 }
 0x752   :  { %v10771_v31 = vadd.f32 %v7972_v27, %v14736_v35  ;;  %v10316_v47 = vadd.f32 %v10315_v5, %v10314_v13  ;;  %v7974_v45 = vpop.f32.mrb[242].mxu0  ;;  %v10317_v54 = vpop.f32.mrb[50].mxu1 }
 0x753   :  { %9047 = vst [vmem:[#allocation11 + $0x240] sm:$0xff] %v10770_v39  ;;  %v10772_v26 = vadd.f32 %v7974_v45, %v14730_v36  ;;  %v7976_v19 = vpop.f32.mrb[243].mxu0  ;;  %v10318_v46 = vpop.f32.mrb[51].mxu1 }
 0x754   :  { %9048 = vst [vmem:[#allocation11 + $0x248] sm:$0xff] %v10771_v31  ;;  %v8945_v49 = vadd.f32 %v10316_v47, %v14709_v24  ;;  %v10773_v18 = vadd.f32 %v7976_v19, %v14736_v35  ;;  %v10319_v12 = vadd.f32 %v10318_v46, %v10317_v54 }
 0x755   :  { %9050 = vst [vmem:[#allocation11 + $0x258] sm:$0xff] %v10772_v26 }
 0x756   :  { %9049 = vst [vmem:[#allocation11 + $0x250] sm:$0xff] %v8945_v49  ;;  %9051 = vst [vmem:[#allocation11 + $0x260] sm:$0xff] %v10773_v18  ;;  %v8948_v55 = vadd.f32 %v10319_v12, %v14712_v43 }
 0x758   :  { %9052 = vst [vmem:[#allocation11 + $0x268] sm:$0xff] %v8948_v55  ;;  %v7980_v4 = vpop.f32.mrb[244].mxu0  ;;  %v10320_v0 = vpop.f32.mrb[52].mxu1 }
 0x759   :  { %v10774_v38 = vadd.f32 %v7980_v4, %v14730_v36  ;;  %v7982_v60 = vpop.f32.mrb[245].mxu0  ;;  %v10321_v51 = vpop.f32.mrb[53].mxu1 }
 0x75a   :  { %v10775_v56 = vadd.f32 %v7982_v60, %v14736_v35  ;;  %v10322_v2 = vadd.f32 %v10321_v51, %v10320_v0  ;;  %v7984_v28 = vpop.f32.mrb[246].mxu0  ;;  %v10323_v24 = vpop.f32.mrb[54].mxu1 }
 0x75b   :  { %9053 = vst [vmem:[#allocation11 + $0x270] sm:$0xff] %v10774_v38  ;;  %v10776_v61 = vadd.f32 %v7984_v28, %v14730_v36  ;;  %v7986_v48 = vpop.f32.mrb[247].mxu0  ;;  %v10324_v41 = vpop.f32.mrb[55].mxu1 }
 0x75c   :  { %9054 = vst [vmem:[#allocation11 + $0x278] sm:$0xff] %v10775_v56  ;;  %v8953_v43 = vadd.f32 %v10322_v2, %v14715_v10  ;;  %v10777_v63 = vadd.f32 %v7986_v48, %v14736_v35  ;;  %v10325_v3 = vadd.f32 %v10324_v41, %v10323_v24 }
 0x75d   :  { %9056 = vst [vmem:[#allocation11 + $0x288] sm:$0xff] %v10776_v61 }
 0x75e   :  { %9055 = vst [vmem:[#allocation11 + $0x280] sm:$0xff] %v8953_v43  ;;  %9057 = vst [vmem:[#allocation11 + $0x290] sm:$0xff] %v10777_v63  ;;  %v8956_v9 = vadd.f32 %v10325_v3, %v14718_v14 }
 0x760   :  { %9058 = vst [vmem:[#allocation11 + $0x298] sm:$0xff] %v8956_v9  ;;  %v7990_v29 = vpop.f32.mrb[248].mxu0  ;;  %v10326_v15 = vpop.f32.mrb[56].mxu1 }
 0x761   :  { %v10778_v22 = vadd.f32 %v7990_v29, %v14730_v36  ;;  %v7992_v37 = vpop.f32.mrb[249].mxu0  ;;  %v10327_v34 = vpop.f32.mrb[57].mxu1 }
 0x762   :  { %v10779_v44 = vadd.f32 %v7992_v37, %v14736_v35  ;;  %v10328_v11 = vadd.f32 %v10327_v34, %v10326_v15  ;;  %v7994_v16 = vpop.f32.mrb[250].mxu0  ;;  %v10329_v10 = vpop.f32.mrb[58].mxu1 }
 0x763   :  { %9059 = vst [vmem:[#allocation11 + $0x2a0] sm:$0xff] %v10778_v22  ;;  %v10780_v17 = vadd.f32 %v7994_v16, %v14730_v36  ;;  %v7996_v1 = vpop.f32.mrb[251].mxu0  ;;  %v10330_v6 = vpop.f32.mrb[59].mxu1 }
 0x764   :  { %9060 = vst [vmem:[#allocation11 + $0x2a8] sm:$0xff] %v10779_v44  ;;  %v8961_v14 = vadd.f32 %v10328_v11, %v14721_v30  ;;  %v10781_v25 = vadd.f32 %v7996_v1, %v14736_v35  ;;  %v10331_v40 = vadd.f32 %v10330_v6, %v10329_v10 }
 0x765   :  { %9062 = vst [vmem:[#allocation11 + $0x2b8] sm:$0xff] %v10780_v17 }
 0x766   :  { %9061 = vst [vmem:[#allocation11 + $0x2b0] sm:$0xff] %v8961_v14  ;;  %9063 = vst [vmem:[#allocation11 + $0x2c0] sm:$0xff] %v10781_v25  ;;  %v8964_v7 = vadd.f32 %v10331_v40, %v14724_v59 }
 0x768   :  { %9064 = vst [vmem:[#allocation11 + $0x2c8] sm:$0xff] %v8964_v7  ;;  %v8000_v57 = vpop.f32.mrb[252].mxu0  ;;  %v10332_v62 = vpop.f32.mrb[60].mxu1 }
 0x769   :  { %v10782_v52 = vadd.f32 %v8000_v57, %v14730_v36  ;;  %v8002_v58 = vpop.f32.mrb[253].mxu0  ;;  %v10333_v20 = vpop.f32.mrb[61].mxu1 }
 0x76a   :  { %v10783_v42 = vadd.f32 %v8002_v58, %v14736_v35  ;;  %v10334_v8 = vadd.f32 %v10333_v20, %v10332_v62  ;;  %v8004_v21 = vpop.f32.mrb[254].mxu0  ;;  %v10335_v30 = vpop.f32.mrb[62].mxu1 }
 0x76b   :  { %9065 = vst [vmem:[#allocation11 + $0x2d0] sm:$0xff] %v10782_v52  ;;  %v10784_v50 = vadd.f32 %v8004_v21, %v14730_v36  ;;  %v8006_v23 = vpop.f32.mrb[255].mxu0  ;;  %v10336_v33 = vpop.f32.mrb[63].mxu1 }
 0x76c   :  { %9066 = vst [vmem:[#allocation11 + $0x2d8] sm:$0xff] %v10783_v42  ;;  %v8969_v59 = vadd.f32 %v10334_v8, %v14727_v53  ;;  %v10785_v13 = vadd.f32 %v8006_v23, %v14736_v35  ;;  %v10337_v39 = vadd.f32 %v10336_v33, %v10335_v30 }
 0x76d   :  { %9068 = vst [vmem:[#allocation11 + $0x2e8] sm:$0xff] %v10784_v50 }
 0x76e   :  { %9067 = vst [vmem:[#allocation11 + $0x2e0] sm:$0xff] %v8969_v59  ;;  %9069 = vst [vmem:[#allocation11 + $0x2f0] sm:$0xff] %v10785_v13  ;;  %v8972_v27 = vadd.f32 %v10337_v39, %v14733_v32 }
 0x770   :  { %9070 = vst [vmem:[#allocation11 + $0x2f8] sm:$0xff] %v8972_v27 }
 0x771   :  { %12442 = shalt.err (!%p12439_p2)
}
 0x772   :  { %s12443_s10 = scalar_lea.hbm %s14854_s5, 12288 }
 0x773   :  { %p12444_p3 = scmp.ne.s32.totalorder %s14854_s5, %s12443_s10  ;;  %p12447_p4 = scmp.lt.u32.totalorder %s12443_s10, %s14854_s5 }
 0x775   :  { %p12449_p5 = pnand %p12447_p4, %p12444_p3 }
 0x777   :  { %12452 = shalt.err (!%p12449_p5)
}
 0x778   :  { %9082 = dma.vmem_to_hbm [thread:$0]  %s9077_s6, 12288, %s14854_s5, [#allocation4], %s12468_s3, %s12468_s3, %s12469_s30  }
 0x779   :  { %12459 = dma.done.wait [#allocation4], 12288  }
 0x77a   :  { %12460 = vsyncadd [#allocation4], 4294955008 }
 0x77b   :  { %9086 = vsyncpa [#allocation3], 1 }
 0x77c   :  { %9087 = vsyncpa [#allocation6], 1 }
 0x77d   :  { %9088 = vsyncpa [#allocation9], 1 }
 0x77e   :  { %9089 = vsyncpa [#allocation4], 1 }

</bundles_post_ra>
